<compile_context>
chip_gen: v7x
topology: tpu7x:2x2x1
jax: 0.10.0
libtpu: 0.0.40
codegen_flags: <defaults>
</compile_context>

<pallas_src>
import jax
import jax.numpy as jnp
from jax.experimental import pallas as pl
from jax.experimental.pallas import tpu as pltpu

N_TEXT_FEATURES = 768
N_AUDIO_FEATURES = 65


# ------------------------------ Fused kernel --------------------------------

def fused_forward_kernel(
    emb_ref, mask_ref, pooler_w_ref, pooler_b_ref,          # text branch
    x_img_ref, conv_w_ref, conv_b_ref,                      # image backbone (1x1 conv)
    gru_wih_ref, gru_whh_ref, gru_bih_ref, gru_bhh_ref,     # GRU, gates stacked (r, z, n)
    audio_ref,                                              # audio features (Bp, 65)
    hw_gru_ref, hw_aud_ref, hw_text_ref, hid_b_ref,         # hidden layer, row-sliced
    fc_w_ref, fc_b_ref,                                     # fc layer
    out_ref):
    B = out_ref.shape[0]                   # padded batch (multiple of 8)
    TB, Cin, HW = x_img_ref.shape          # time-major rows, HW on the lane dim
    T = TB // B
    Cout = conv_w_ref.shape[1]
    H = gru_whh_ref.shape[0]

    # ---------------- text branch ----------------
    # TODO(synk): the pretrained BERT encoder has no clean Pallas equivalent;
    # approximated by an attention-masked mean of token embeddings followed by
    # the BERT pooler (dense + tanh).
    emb = emb_ref[...]                                                   # (B, S, 768)
    mask = mask_ref[...]                                                 # (B, S)
    summed = jnp.sum(emb * mask[:, :, None], axis=1)                     # (B, 768)
    denom = jnp.maximum(jnp.sum(mask, axis=1, keepdims=True), 1.0)       # zero-mask guard
    pooled = summed * pl.reciprocal(denom, approx=True)                  # EUP divide
    text_feat = jnp.tanh(
        jnp.dot(pooled.astype(jnp.bfloat16), pooler_w_ref[...],
                preferred_element_type=jnp.float32) + pooler_b_ref[...])  # (B, 768) f32

    # ---------------- image backbone + spatial mean ----------------
    # TODO(synk): EfficientNet backbone approximated by a single 1x1 conv + ReLU.
    # HW is the lane dim, so the conv is Cin dense VPU multiply-adds; bias is
    # added once instead of materializing a (TB, Cout, HW) broadcast.
    x = x_img_ref[...]                                                   # (TB, Cin, HW)
    w = conv_w_ref[...].astype(jnp.float32)                              # (Cin, Cout)
    acc = x[:, 0:1, :] * w[0:1, :][:, :, None]                           # (TB, Cout, HW)
    for c in range(1, Cin):                                              # static unroll
        acc = acc + x[:, c:c + 1, :] * w[c:c + 1, :][:, :, None]
    acc = jnp.maximum(acc + conv_b_ref[...][:, :, None], 0.0)            # +bias, ReLU
    feats = jnp.mean(acc, axis=-1)                                       # (TB, Cout)

    # ---------------- GRU over T frames (rows time-major: n = t*B + b) -------
    # All input-side gate projections in ONE matmul, input biases folded in.
    gates_x = (jnp.dot(feats.astype(jnp.bfloat16), gru_wih_ref[...],
                       preferred_element_type=jnp.float32)
               + gru_bih_ref[...])                                       # (TB, 3H)
    whh = gru_whh_ref[...]                                               # (H, 3H) bf16
    bhh = jnp.broadcast_to(gru_bhh_ref[...], (B, 3 * H))                 # hoisted once
    h = jnp.zeros((B, H), jnp.float32)
    for t in range(T):                                                   # unrolled recurrence
        gx = gates_x[t * B:(t + 1) * B, :]                               # (B, 3H) static slice
        gh = jnp.dot(h.astype(jnp.bfloat16), whh,
                     preferred_element_type=jnp.float32) + bhh           # fused 3-gate matmul
        r = jax.nn.sigmoid(gx[:, 0:H] + gh[:, 0:H])
        z = jax.nn.sigmoid(gx[:, H:2 * H] + gh[:, H:2 * H])
        n = jnp.tanh(gx[:, 2 * H:3 * H] + r * gh[:, 2 * H:3 * H])        # PyTorch GRU n-gate
        h = (1.0 - z) * n + z * h                                        # (B, H)

    # ------- head: hidden(concat) as three aligned partial matmuls, fc, softmax
    hidden = (jnp.dot(h.astype(jnp.bfloat16), hw_gru_ref[...],
                      preferred_element_type=jnp.float32)
              + jnp.dot(audio_ref[...].astype(jnp.bfloat16), hw_aud_ref[...],
                        preferred_element_type=jnp.float32)
              + jnp.dot(text_feat.astype(jnp.bfloat16), hw_text_ref[...],
                        preferred_element_type=jnp.float32)
              + hid_b_ref[...])                                          # (B, CH)
    logits = (jnp.dot(hidden.astype(jnp.bfloat16), fc_w_ref[...],
                      preferred_element_type=jnp.float32) + fc_b_ref[...])  # (B, NCLS)
    m = jnp.max(logits, axis=1, keepdims=True)
    e = jnp.exp(logits - m)
    out_ref[...] = e / jnp.sum(e, axis=1, keepdims=True)                 # softmax(dim=1)


# ------------------------------ Forward wrapper ------------------------------

def forward(params, audios_features, input_ids, attention_mask, frames):
    B, T, Cin, Hf, Wf = frames.shape
    HW = Hf * Wf
    NCLS = params["fc_w"].shape[1]
    Cout = params["conv_w"].shape[1]
    H = params["gru_whh"].shape[0]
    CH = params["hidden_b"].shape[1]

    # Pad the batch to a multiple of 8 (f32 sublane / MXU M-dim hygiene);
    # padded rows are zeros and are sliced off after the kernel.
    Bp = ((B + 7) // 8) * 8
    pad = Bp - B

    # Host-side glue.
    # TODO(synk): embedding-row gather stays host-side (jnp.take); an in-kernel
    # SMEM-ids + manual DMA gather from an HBM-resident table only pays off for
    # a realistic 30k-row BERT table.
    emb = jnp.take(params["emb_table"], input_ids, axis=0)               # (B, S, 768)
    mask = attention_mask.astype(jnp.float32)
    audio = audios_features.astype(jnp.float32)
    if pad:
        emb = jnp.pad(emb, ((0, pad), (0, 0), (0, 0)))
        mask = jnp.pad(mask, ((0, pad), (0, 0)))
        audio = jnp.pad(audio, ((0, pad), (0, 0)))
        frames = jnp.pad(frames, ((0, pad),) + ((0, 0),) * 4)
    # Time-major rows (n = t*Bp + b) with HW on the lane dim: only the two
    # leading (B, T) axes are permuted; the minor dims are a pure reshape.
    x_img = jnp.transpose(frames, (1, 0, 2, 3, 4)).reshape(T * Bp, Cin, HW)

    inputs = (
        emb, mask, params["pooler_w"], params["pooler_b"],
        x_img, params["conv_w"], params["conv_b"],
        params["gru_wih"], params["gru_whh"], params["gru_bih"], params["gru_bhh"],
        audio,
        params["hidden_w_gru"], params["hidden_w_aud"], params["hidden_w_text"],
        params["hidden_b"], params["fc_w"], params["fc_b"],
    )

    # Grid-less call: everything (weights + activations, ~1.5 MiB) is whole-array
    # VMEM-resident, single-buffered — no pipeline overhead, no double buffering.
    vmem = pl.BlockSpec(memory_space=pltpu.MemorySpace.VMEM)

    flops = int(
        2 * Bp * N_TEXT_FEATURES * N_TEXT_FEATURES                       # pooler
        + 2 * T * Bp * HW * Cin * Cout                                   # 1x1 conv
        + 2 * T * Bp * Cout * 3 * H                                      # GRU input proj
        + 2 * T * Bp * H * 3 * H                                         # GRU hidden proj
        + 2 * Bp * (H + N_AUDIO_FEATURES + N_TEXT_FEATURES) * CH         # hidden layer
        + 2 * Bp * CH * NCLS)                                            # fc
    transcendentals = int(Bp * (N_TEXT_FEATURES + T * 3 * H + NCLS))
    bytes_accessed = int(sum(a.size * a.dtype.itemsize for a in inputs)
                         + Bp * NCLS * 4)

    out = pl.pallas_call(
        fused_forward_kernel,
        out_shape=jax.ShapeDtypeStruct((Bp, NCLS), jnp.float32),
        in_specs=[vmem] * len(inputs),
        out_specs=vmem,
        compiler_params=pltpu.CompilerParams(vmem_limit_bytes=32 * 1024 * 1024),
        cost_estimate=pl.CostEstimate(flops=flops,
                                      transcendentals=transcendentals,
                                      bytes_accessed=bytes_accessed),
    )(*inputs)
    return out[:B]


# ----------------------------------- Main ------------------------------------

if __name__ == "__main__":
    B, T = 2, 4                 # batch, frames per video
    Cin, Hf, Wf = 3, 8, 8       # frame channels / spatial
    COUT = 32                   # image_model.features[-1].out_channels
    HID = 32                    # Config.gru_hidden_size
    CH = 64                     # Config.combined_hidden_size
    NCLS = 4                    # n_classes
    S = 8                       # text sequence length
    VOCAB = 100

    key = jax.random.PRNGKey(0)
    k_in, k_par = jax.random.split(key)
    ki = jax.random.split(k_in, 3)

    audios_features = jax.random.normal(ki[0], (B, N_AUDIO_FEATURES), jnp.float32)
    input_ids = jax.random.randint(ki[1], (B, S), 0, VOCAB)
    attention_mask = jnp.ones((B, S), jnp.float32).at[1, -2:].set(0.0)
    frames = jax.random.normal(ki[2], (B, T, Cin, Hf, Wf), jnp.float32)  # NCHW per frame

    kp = jax.random.split(k_par, 11)
    # bf16 matmul weights with f32 in-kernel accumulation; biases stay f32.
    # GRU weights are PyTorch weight_ih/hh_l0 transposed to (in, 3H) with gates
    # stacked in (r, z, n) order; hidden.weight.T is row-sliced to match the
    # concat order [gru_hidden | audio(65) | text(768)] so no 865-wide concat.
    params = {
        "emb_table": 0.02 * jax.random.normal(kp[0], (VOCAB, N_TEXT_FEATURES), jnp.float32),
        "pooler_w": (0.02 * jax.random.normal(
            kp[1], (N_TEXT_FEATURES, N_TEXT_FEATURES), jnp.float32)).astype(jnp.bfloat16),
        "pooler_b": jnp.zeros((1, N_TEXT_FEATURES), jnp.float32),
        "conv_w": (0.1 * jax.random.normal(kp[2], (Cin, COUT), jnp.float32)).astype(jnp.bfloat16),
        "conv_b": jnp.zeros((1, COUT), jnp.float32),
        "gru_wih": (0.1 * jax.random.normal(kp[3], (COUT, 3 * HID), jnp.float32)).astype(jnp.bfloat16),
        "gru_whh": (0.1 * jax.random.normal(kp[4], (HID, 3 * HID), jnp.float32)).astype(jnp.bfloat16),
        "gru_bih": 0.01 * jax.random.normal(kp[5], (1, 3 * HID), jnp.float32),
        "gru_bhh": 0.01 * jax.random.normal(kp[6], (1, 3 * HID), jnp.float32),
        "hidden_w_gru": (0.05 * jax.random.normal(kp[7], (HID, CH), jnp.float32)).astype(jnp.bfloat16),
        "hidden_w_aud": (0.05 * jax.random.normal(
            kp[8], (N_AUDIO_FEATURES, CH), jnp.float32)).astype(jnp.bfloat16),
        "hidden_w_text": (0.05 * jax.random.normal(
            kp[9], (N_TEXT_FEATURES, CH), jnp.float32)).astype(jnp.bfloat16),
        "hidden_b": jnp.zeros((1, CH), jnp.float32),
        "fc_w": (0.05 * jax.random.normal(kp[10], (CH, NCLS), jnp.float32)).astype(jnp.bfloat16),
        "fc_b": jnp.zeros((1, NCLS), jnp.float32),
    }

    probs = forward(params, audios_features, input_ids, attention_mask, frames)
    probs = jax.block_until_ready(probs)

    assert probs.shape == (B, NCLS)
    assert bool(jnp.all(jnp.isfinite(probs)))
    assert bool(jnp.allclose(jnp.sum(probs, axis=1), 1.0, atol=1e-4))
    print("KERNEL_OK")
</pallas_src>

<mosaic_0001>
module attributes {stable_mosaic.version = 11 : i64} {
  func.func @fused_forward_kernel(%arg0: memref<8x8x768xf32, #tpu.memory_space<vmem>>, %arg1: memref<8x8xf32, #tpu.memory_space<vmem>>, %arg2: memref<768x768xbf16, #tpu.memory_space<vmem>>, %arg3: memref<1x768xf32, #tpu.memory_space<vmem>>, %arg4: memref<32x3x64xf32, #tpu.memory_space<vmem>>, %arg5: memref<3x32xbf16, #tpu.memory_space<vmem>>, %arg6: memref<1x32xf32, #tpu.memory_space<vmem>>, %arg7: memref<32x96xbf16, #tpu.memory_space<vmem>>, %arg8: memref<32x96xbf16, #tpu.memory_space<vmem>>, %arg9: memref<1x96xf32, #tpu.memory_space<vmem>>, %arg10: memref<1x96xf32, #tpu.memory_space<vmem>>, %arg11: memref<8x65xf32, #tpu.memory_space<vmem>>, %arg12: memref<32x64xbf16, #tpu.memory_space<vmem>>, %arg13: memref<65x64xbf16, #tpu.memory_space<vmem>>, %arg14: memref<768x64xbf16, #tpu.memory_space<vmem>>, %arg15: memref<1x64xf32, #tpu.memory_space<vmem>>, %arg16: memref<64x4xbf16, #tpu.memory_space<vmem>>, %arg17: memref<1x4xf32, #tpu.memory_space<vmem>>, %arg18: memref<8x4xf32, #tpu.memory_space<vmem>>) attributes {dimension_semantics = [], scalar_prefetch = 0 : i64, scratch_operands = 0 : i64, tpu.core_type = #tpu.core_type<tc>} {
    %c0 = arith.constant 0 : index
    %c0_0 = arith.constant 0 : index
    %c0_1 = arith.constant 0 : index
    %0 = vector.load %arg0[%c0, %c0_0, %c0_1] : memref<8x8x768xf32, #tpu.memory_space<vmem>>, vector<8x8x768xf32>
    %c0_2 = arith.constant 0 : index
    %c0_3 = arith.constant 0 : index
    %1 = vector.load %arg1[%c0_2, %c0_3] : memref<8x8xf32, #tpu.memory_space<vmem>>, vector<8x8xf32>
    %2 = vector.shape_cast %1 : vector<8x8xf32> to vector<8x8x1xf32>
    %3 = vector.broadcast %2 : vector<8x8x1xf32> to vector<8x8x768xf32>
    %4 = arith.mulf %0, %3 : vector<8x8x768xf32>
    %cst = arith.constant dense<0.000000e+00> : vector<8x768xf32>
    %5 = vector.multi_reduction <add>, %4, %cst [1] : vector<8x8x768xf32> to vector<8x768xf32>
    %cst_4 = arith.constant dense<0.000000e+00> : vector<8xf32>
    %6 = vector.multi_reduction <add>, %1, %cst_4 [1] : vector<8x8xf32> to vector<8xf32>
    %7 = vector.shape_cast %6 : vector<8xf32> to vector<8x1xf32>
    %cst_5 = arith.constant 1.000000e+00 : f32
    %8 = vector.broadcast %cst_5 : f32 to vector<8x1xf32>
    %9 = arith.maximumf %7, %8 : vector<8x1xf32>
    %10 = tpu.reciprocal %9 {approx = true} : vector<8x1xf32> -> vector<8x1xf32>
    %11 = vector.broadcast %10 : vector<8x1xf32> to vector<8x768xf32>
    %12 = arith.mulf %5, %11 : vector<8x768xf32>
    %13 = arith.truncf %12 : vector<8x768xf32> to vector<8x768xbf16>
    %c0_6 = arith.constant 0 : index
    %c0_7 = arith.constant 0 : index
    %14 = vector.load %arg2[%c0_6, %c0_7] : memref<768x768xbf16, #tpu.memory_space<vmem>>, vector<768x768xbf16>
    %cst_8 = arith.constant dense<0.000000e+00> : vector<8x768xf32>
    %15 = tpu.matmul %13, %14, %cst_8 {dimension_numbers = #tpu.dot_dimension_numbers<[1], [0], [0], [1], [0, 0, 1, 1], [], []>} : vector<8x768xbf16>, vector<768x768xbf16>, vector<8x768xf32> -> vector<8x768xf32>
    %c0_9 = arith.constant 0 : index
    %c0_10 = arith.constant 0 : index
    %16 = vector.load %arg3[%c0_9, %c0_10] : memref<1x768xf32, #tpu.memory_space<vmem>>, vector<1x768xf32>
    %17 = vector.broadcast %16 : vector<1x768xf32> to vector<8x768xf32>
    %18 = arith.addf %15, %17 : vector<8x768xf32>
    %19 = math.tanh %18 : vector<8x768xf32>
    %c0_11 = arith.constant 0 : index
    %c0_12 = arith.constant 0 : index
    %c0_13 = arith.constant 0 : index
    %20 = vector.load %arg4[%c0_11, %c0_12, %c0_13] : memref<32x3x64xf32, #tpu.memory_space<vmem>>, vector<32x3x64xf32>
    %c0_14 = arith.constant 0 : index
    %c0_15 = arith.constant 0 : index
    %21 = vector.load %arg5[%c0_14, %c0_15] : memref<3x32xbf16, #tpu.memory_space<vmem>>, vector<3x32xbf16>
    %22 = arith.extf %21 : vector<3x32xbf16> to vector<3x32xf32>
    %23 = vector.extract_strided_slice %20 {offsets = [0, 0, 0], sizes = [32, 1, 64], strides = [1, 1, 1]} : vector<32x3x64xf32> to vector<32x1x64xf32>
    %24 = vector.extract_strided_slice %22 {offsets = [0, 0], sizes = [1, 32], strides = [1, 1]} : vector<3x32xf32> to vector<1x32xf32>
    %25 = vector.shape_cast %24 : vector<1x32xf32> to vector<1x32x1xf32>
    %26 = vector.broadcast %23 : vector<32x1x64xf32> to vector<32x32x64xf32>
    %27 = vector.broadcast %25 : vector<1x32x1xf32> to vector<32x32x64xf32>
    %28 = arith.mulf %26, %27 : vector<32x32x64xf32>
    %29 = vector.extract_strided_slice %20 {offsets = [0, 1, 0], sizes = [32, 1, 64], strides = [1, 1, 1]} : vector<32x3x64xf32> to vector<32x1x64xf32>
    %30 = vector.extract_strided_slice %22 {offsets = [1, 0], sizes = [1, 32], strides = [1, 1]} : vector<3x32xf32> to vector<1x32xf32>
    %31 = vector.shape_cast %30 : vector<1x32xf32> to vector<1x32x1xf32>
    %32 = vector.broadcast %29 : vector<32x1x64xf32> to vector<32x32x64xf32>
    %33 = vector.broadcast %31 : vector<1x32x1xf32> to vector<32x32x64xf32>
    %34 = arith.mulf %32, %33 : vector<32x32x64xf32>
    %35 = arith.addf %28, %34 : vector<32x32x64xf32>
    %36 = vector.extract_strided_slice %20 {offsets = [0, 2, 0], sizes = [32, 1, 64], strides = [1, 1, 1]} : vector<32x3x64xf32> to vector<32x1x64xf32>
    %37 = vector.extract_strided_slice %22 {offsets = [2, 0], sizes = [1, 32], strides = [1, 1]} : vector<3x32xf32> to vector<1x32xf32>
    %38 = vector.shape_cast %37 : vector<1x32xf32> to vector<1x32x1xf32>
    %39 = vector.broadcast %36 : vector<32x1x64xf32> to vector<32x32x64xf32>
    %40 = vector.broadcast %38 : vector<1x32x1xf32> to vector<32x32x64xf32>
    %41 = arith.mulf %39, %40 : vector<32x32x64xf32>
    %42 = arith.addf %35, %41 : vector<32x32x64xf32>
    %c0_16 = arith.constant 0 : index
    %c0_17 = arith.constant 0 : index
    %43 = vector.load %arg6[%c0_16, %c0_17] : memref<1x32xf32, #tpu.memory_space<vmem>>, vector<1x32xf32>
    %44 = vector.shape_cast %43 : vector<1x32xf32> to vector<1x32x1xf32>
    %45 = vector.broadcast %44 : vector<1x32x1xf32> to vector<32x32x64xf32>
    %46 = arith.addf %42, %45 : vector<32x32x64xf32>
    %cst_18 = arith.constant 0.000000e+00 : f32
    %47 = vector.broadcast %cst_18 : f32 to vector<32x32x64xf32>
    %48 = arith.maximumf %46, %47 : vector<32x32x64xf32>
    %cst_19 = arith.constant dense<0.000000e+00> : vector<32x32xf32>
    %49 = vector.multi_reduction <add>, %48, %cst_19 [2] : vector<32x32x64xf32> to vector<32x32xf32>
    %cst_20 = arith.constant 6.400000e+01 : f32
    %50 = vector.broadcast %cst_20 : f32 to vector<32x32xf32>
    %51 = arith.divf %49, %50 : vector<32x32xf32>
    %52 = arith.truncf %51 : vector<32x32xf32> to vector<32x32xbf16>
    %c0_21 = arith.constant 0 : index
    %c0_22 = arith.constant 0 : index
    %53 = vector.load %arg7[%c0_21, %c0_22] : memref<32x96xbf16, #tpu.memory_space<vmem>>, vector<32x96xbf16>
    %cst_23 = arith.constant dense<0.000000e+00> : vector<32x96xf32>
    %54 = tpu.matmul %52, %53, %cst_23 {dimension_numbers = #tpu.dot_dimension_numbers<[1], [0], [0], [1], [0, 0, 1, 1], [], []>} : vector<32x32xbf16>, vector<32x96xbf16>, vector<32x96xf32> -> vector<32x96xf32>
    %c0_24 = arith.constant 0 : index
    %c0_25 = arith.constant 0 : index
    %55 = vector.load %arg9[%c0_24, %c0_25] : memref<1x96xf32, #tpu.memory_space<vmem>>, vector<1x96xf32>
    %56 = vector.broadcast %55 : vector<1x96xf32> to vector<32x96xf32>
    %57 = arith.addf %54, %56 : vector<32x96xf32>
    %c0_26 = arith.constant 0 : index
    %c0_27 = arith.constant 0 : index
    %58 = vector.load %arg8[%c0_26, %c0_27] : memref<32x96xbf16, #tpu.memory_space<vmem>>, vector<32x96xbf16>
    %c0_28 = arith.constant 0 : index
    %c0_29 = arith.constant 0 : index
    %59 = vector.load %arg10[%c0_28, %c0_29] : memref<1x96xf32, #tpu.memory_space<vmem>>, vector<1x96xf32>
    %60 = vector.shape_cast %59 : vector<1x96xf32> to vector<1x96xf32>
    %61 = vector.broadcast %60 : vector<1x96xf32> to vector<8x96xf32>
    %cst_30 = arith.constant 0.000000e+00 : f32
    %62 = vector.broadcast %cst_30 : f32 to vector<8x32xf32>
    %63 = vector.extract_strided_slice %57 {offsets = [0, 0], sizes = [8, 96], strides = [1, 1]} : vector<32x96xf32> to vector<8x96xf32>
    %64 = arith.truncf %62 : vector<8x32xf32> to vector<8x32xbf16>
    %cst_31 = arith.constant dense<0.000000e+00> : vector<8x96xf32>
    %65 = tpu.matmul %64, %58, %cst_31 {dimension_numbers = #tpu.dot_dimension_numbers<[1], [0], [0], [1], [0, 0, 1, 1], [], []>} : vector<8x32xbf16>, vector<32x96xbf16>, vector<8x96xf32> -> vector<8x96xf32>
    %66 = arith.addf %65, %61 : vector<8x96xf32>
    %67 = vector.extract_strided_slice %63 {offsets = [0, 0], sizes = [8, 32], strides = [1, 1]} : vector<8x96xf32> to vector<8x32xf32>
    %68 = vector.extract_strided_slice %66 {offsets = [0, 0], sizes = [8, 32], strides = [1, 1]} : vector<8x96xf32> to vector<8x32xf32>
    %69 = arith.addf %67, %68 : vector<8x32xf32>
    %70 = arith.negf %69 : vector<8x32xf32>
    %71 = math.exp %70 : vector<8x32xf32>
    %cst_32 = arith.constant 1.000000e+00 : f32
    %72 = vector.broadcast %cst_32 : f32 to vector<8x32xf32>
    %73 = arith.addf %72, %71 : vector<8x32xf32>
    %74 = arith.divf %72, %73 : vector<8x32xf32>
    %75 = vector.extract_strided_slice %63 {offsets = [0, 32], sizes = [8, 32], strides = [1, 1]} : vector<8x96xf32> to vector<8x32xf32>
    %76 = vector.extract_strided_slice %66 {offsets = [0, 32], sizes = [8, 32], strides = [1, 1]} : vector<8x96xf32> to vector<8x32xf32>
    %77 = arith.addf %75, %76 : vector<8x32xf32>
    %78 = arith.negf %77 : vector<8x32xf32>
    %79 = math.exp %78 : vector<8x32xf32>
    %cst_33 = arith.constant 1.000000e+00 : f32
    %80 = vector.broadcast %cst_33 : f32 to vector<8x32xf32>
    %81 = arith.addf %80, %79 : vector<8x32xf32>
    %82 = arith.divf %80, %81 : vector<8x32xf32>
    %83 = vector.extract_strided_slice %63 {offsets = [0, 64], sizes = [8, 32], strides = [1, 1]} : vector<8x96xf32> to vector<8x32xf32>
    %84 = vector.extract_strided_slice %66 {offsets = [0, 64], sizes = [8, 32], strides = [1, 1]} : vector<8x96xf32> to vector<8x32xf32>
    %85 = arith.mulf %74, %84 : vector<8x32xf32>
    %86 = arith.addf %83, %85 : vector<8x32xf32>
    %87 = math.tanh %86 : vector<8x32xf32>
    %cst_34 = arith.constant 1.000000e+00 : f32
    %88 = vector.broadcast %cst_34 : f32 to vector<8x32xf32>
    %89 = arith.subf %88, %82 : vector<8x32xf32>
    %90 = arith.mulf %89, %87 : vector<8x32xf32>
    %91 = arith.mulf %82, %62 : vector<8x32xf32>
    %92 = arith.addf %90, %91 : vector<8x32xf32>
    %93 = vector.extract_strided_slice %57 {offsets = [8, 0], sizes = [8, 96], strides = [1, 1]} : vector<32x96xf32> to vector<8x96xf32>
    %94 = arith.truncf %92 : vector<8x32xf32> to vector<8x32xbf16>
    %cst_35 = arith.constant dense<0.000000e+00> : vector<8x96xf32>
    %95 = tpu.matmul %94, %58, %cst_35 {dimension_numbers = #tpu.dot_dimension_numbers<[1], [0], [0], [1], [0, 0, 1, 1], [], []>} : vector<8x32xbf16>, vector<32x96xbf16>, vector<8x96xf32> -> vector<8x96xf32>
    %96 = arith.addf %95, %61 : vector<8x96xf32>
    %97 = vector.extract_strided_slice %93 {offsets = [0, 0], sizes = [8, 32], strides = [1, 1]} : vector<8x96xf32> to vector<8x32xf32>
    %98 = vector.extract_strided_slice %96 {offsets = [0, 0], sizes = [8, 32], strides = [1, 1]} : vector<8x96xf32> to vector<8x32xf32>
    %99 = arith.addf %97, %98 : vector<8x32xf32>
    %100 = arith.negf %99 : vector<8x32xf32>
    %101 = math.exp %100 : vector<8x32xf32>
    %cst_36 = arith.constant 1.000000e+00 : f32
    %102 = vector.broadcast %cst_36 : f32 to vector<8x32xf32>
    %103 = arith.addf %102, %101 : vector<8x32xf32>
    %104 = arith.divf %102, %103 : vector<8x32xf32>
    %105 = vector.extract_strided_slice %93 {offsets = [0, 32], sizes = [8, 32], strides = [1, 1]} : vector<8x96xf32> to vector<8x32xf32>
    %106 = vector.extract_strided_slice %96 {offsets = [0, 32], sizes = [8, 32], strides = [1, 1]} : vector<8x96xf32> to vector<8x32xf32>
    %107 = arith.addf %105, %106 : vector<8x32xf32>
    %108 = arith.negf %107 : vector<8x32xf32>
    %109 = math.exp %108 : vector<8x32xf32>
    %cst_37 = arith.constant 1.000000e+00 : f32
    %110 = vector.broadcast %cst_37 : f32 to vector<8x32xf32>
    %111 = arith.addf %110, %109 : vector<8x32xf32>
    %112 = arith.divf %110, %111 : vector<8x32xf32>
    %113 = vector.extract_strided_slice %93 {offsets = [0, 64], sizes = [8, 32], strides = [1, 1]} : vector<8x96xf32> to vector<8x32xf32>
    %114 = vector.extract_strided_slice %96 {offsets = [0, 64], sizes = [8, 32], strides = [1, 1]} : vector<8x96xf32> to vector<8x32xf32>
    %115 = arith.mulf %104, %114 : vector<8x32xf32>
    %116 = arith.addf %113, %115 : vector<8x32xf32>
    %117 = math.tanh %116 : vector<8x32xf32>
    %cst_38 = arith.constant 1.000000e+00 : f32
    %118 = vector.broadcast %cst_38 : f32 to vector<8x32xf32>
    %119 = arith.subf %118, %112 : vector<8x32xf32>
    %120 = arith.mulf %119, %117 : vector<8x32xf32>
    %121 = arith.mulf %112, %92 : vector<8x32xf32>
    %122 = arith.addf %120, %121 : vector<8x32xf32>
    %123 = vector.extract_strided_slice %57 {offsets = [16, 0], sizes = [8, 96], strides = [1, 1]} : vector<32x96xf32> to vector<8x96xf32>
    %124 = arith.truncf %122 : vector<8x32xf32> to vector<8x32xbf16>
    %cst_39 = arith.constant dense<0.000000e+00> : vector<8x96xf32>
    %125 = tpu.matmul %124, %58, %cst_39 {dimension_numbers = #tpu.dot_dimension_numbers<[1], [0], [0], [1], [0, 0, 1, 1], [], []>} : vector<8x32xbf16>, vector<32x96xbf16>, vector<8x96xf32> -> vector<8x96xf32>
    %126 = arith.addf %125, %61 : vector<8x96xf32>
    %127 = vector.extract_strided_slice %123 {offsets = [0, 0], sizes = [8, 32], strides = [1, 1]} : vector<8x96xf32> to vector<8x32xf32>
    %128 = vector.extract_strided_slice %126 {offsets = [0, 0], sizes = [8, 32], strides = [1, 1]} : vector<8x96xf32> to vector<8x32xf32>
    %129 = arith.addf %127, %128 : vector<8x32xf32>
    %130 = arith.negf %129 : vector<8x32xf32>
    %131 = math.exp %130 : vector<8x32xf32>
    %cst_40 = arith.constant 1.000000e+00 : f32
    %132 = vector.broadcast %cst_40 : f32 to vector<8x32xf32>
    %133 = arith.addf %132, %131 : vector<8x32xf32>
    %134 = arith.divf %132, %133 : vector<8x32xf32>
    %135 = vector.extract_strided_slice %123 {offsets = [0, 32], sizes = [8, 32], strides = [1, 1]} : vector<8x96xf32> to vector<8x32xf32>
    %136 = vector.extract_strided_slice %126 {offsets = [0, 32], sizes = [8, 32], strides = [1, 1]} : vector<8x96xf32> to vector<8x32xf32>
    %137 = arith.addf %135, %136 : vector<8x32xf32>
    %138 = arith.negf %137 : vector<8x32xf32>
    %139 = math.exp %138 : vector<8x32xf32>
    %cst_41 = arith.constant 1.000000e+00 : f32
    %140 = vector.broadcast %cst_41 : f32 to vector<8x32xf32>
    %141 = arith.addf %140, %139 : vector<8x32xf32>
    %142 = arith.divf %140, %141 : vector<8x32xf32>
    %143 = vector.extract_strided_slice %123 {offsets = [0, 64], sizes = [8, 32], strides = [1, 1]} : vector<8x96xf32> to vector<8x32xf32>
    %144 = vector.extract_strided_slice %126 {offsets = [0, 64], sizes = [8, 32], strides = [1, 1]} : vector<8x96xf32> to vector<8x32xf32>
    %145 = arith.mulf %134, %144 : vector<8x32xf32>
    %146 = arith.addf %143, %145 : vector<8x32xf32>
    %147 = math.tanh %146 : vector<8x32xf32>
    %cst_42 = arith.constant 1.000000e+00 : f32
    %148 = vector.broadcast %cst_42 : f32 to vector<8x32xf32>
    %149 = arith.subf %148, %142 : vector<8x32xf32>
    %150 = arith.mulf %149, %147 : vector<8x32xf32>
    %151 = arith.mulf %142, %122 : vector<8x32xf32>
    %152 = arith.addf %150, %151 : vector<8x32xf32>
    %153 = vector.extract_strided_slice %57 {offsets = [24, 0], sizes = [8, 96], strides = [1, 1]} : vector<32x96xf32> to vector<8x96xf32>
    %154 = arith.truncf %152 : vector<8x32xf32> to vector<8x32xbf16>
    %cst_43 = arith.constant dense<0.000000e+00> : vector<8x96xf32>
    %155 = tpu.matmul %154, %58, %cst_43 {dimension_numbers = #tpu.dot_dimension_numbers<[1], [0], [0], [1], [0, 0, 1, 1], [], []>} : vector<8x32xbf16>, vector<32x96xbf16>, vector<8x96xf32> -> vector<8x96xf32>
    %156 = arith.addf %155, %61 : vector<8x96xf32>
    %157 = vector.extract_strided_slice %153 {offsets = [0, 0], sizes = [8, 32], strides = [1, 1]} : vector<8x96xf32> to vector<8x32xf32>
    %158 = vector.extract_strided_slice %156 {offsets = [0, 0], sizes = [8, 32], strides = [1, 1]} : vector<8x96xf32> to vector<8x32xf32>
    %159 = arith.addf %157, %158 : vector<8x32xf32>
    %160 = arith.negf %159 : vector<8x32xf32>
    %161 = math.exp %160 : vector<8x32xf32>
    %cst_44 = arith.constant 1.000000e+00 : f32
    %162 = vector.broadcast %cst_44 : f32 to vector<8x32xf32>
    %163 = arith.addf %162, %161 : vector<8x32xf32>
    %164 = arith.divf %162, %163 : vector<8x32xf32>
    %165 = vector.extract_strided_slice %153 {offsets = [0, 32], sizes = [8, 32], strides = [1, 1]} : vector<8x96xf32> to vector<8x32xf32>
    %166 = vector.extract_strided_slice %156 {offsets = [0, 32], sizes = [8, 32], strides = [1, 1]} : vector<8x96xf32> to vector<8x32xf32>
    %167 = arith.addf %165, %166 : vector<8x32xf32>
    %168 = arith.negf %167 : vector<8x32xf32>
    %169 = math.exp %168 : vector<8x32xf32>
    %cst_45 = arith.constant 1.000000e+00 : f32
    %170 = vector.broadcast %cst_45 : f32 to vector<8x32xf32>
    %171 = arith.addf %170, %169 : vector<8x32xf32>
    %172 = arith.divf %170, %171 : vector<8x32xf32>
    %173 = vector.extract_strided_slice %153 {offsets = [0, 64], sizes = [8, 32], strides = [1, 1]} : vector<8x96xf32> to vector<8x32xf32>
    %174 = vector.extract_strided_slice %156 {offsets = [0, 64], sizes = [8, 32], strides = [1, 1]} : vector<8x96xf32> to vector<8x32xf32>
    %175 = arith.mulf %164, %174 : vector<8x32xf32>
    %176 = arith.addf %173, %175 : vector<8x32xf32>
    %177 = math.tanh %176 : vector<8x32xf32>
    %cst_46 = arith.constant 1.000000e+00 : f32
    %178 = vector.broadcast %cst_46 : f32 to vector<8x32xf32>
    %179 = arith.subf %178, %172 : vector<8x32xf32>
    %180 = arith.mulf %179, %177 : vector<8x32xf32>
    %181 = arith.mulf %172, %152 : vector<8x32xf32>
    %182 = arith.addf %180, %181 : vector<8x32xf32>
    %183 = arith.truncf %182 : vector<8x32xf32> to vector<8x32xbf16>
    %c0_47 = arith.constant 0 : index
    %c0_48 = arith.constant 0 : index
    %184 = vector.load %arg12[%c0_47, %c0_48] : memref<32x64xbf16, #tpu.memory_space<vmem>>, vector<32x64xbf16>
    %cst_49 = arith.constant dense<0.000000e+00> : vector<8x64xf32>
    %185 = tpu.matmul %183, %184, %cst_49 {dimension_numbers = #tpu.dot_dimension_numbers<[1], [0], [0], [1], [0, 0, 1, 1], [], []>} : vector<8x32xbf16>, vector<32x64xbf16>, vector<8x64xf32> -> vector<8x64xf32>
    %c0_50 = arith.constant 0 : index
    %c0_51 = arith.constant 0 : index
    %186 = vector.load %arg11[%c0_50, %c0_51] : memref<8x65xf32, #tpu.memory_space<vmem>>, vector<8x65xf32>
    %187 = arith.truncf %186 : vector<8x65xf32> to vector<8x65xbf16>
    %c0_52 = arith.constant 0 : index
    %c0_53 = arith.constant 0 : index
    %188 = vector.load %arg13[%c0_52, %c0_53] : memref<65x64xbf16, #tpu.memory_space<vmem>>, vector<65x64xbf16>
    %cst_54 = arith.constant dense<0.000000e+00> : vector<8x64xf32>
    %189 = tpu.matmul %187, %188, %cst_54 {dimension_numbers = #tpu.dot_dimension_numbers<[1], [0], [0], [1], [0, 0, 1, 1], [], []>} : vector<8x65xbf16>, vector<65x64xbf16>, vector<8x64xf32> -> vector<8x64xf32>
    %190 = arith.addf %185, %189 : vector<8x64xf32>
    %191 = arith.truncf %19 : vector<8x768xf32> to vector<8x768xbf16>
    %c0_55 = arith.constant 0 : index
    %c0_56 = arith.constant 0 : index
    %192 = vector.load %arg14[%c0_55, %c0_56] : memref<768x64xbf16, #tpu.memory_space<vmem>>, vector<768x64xbf16>
    %cst_57 = arith.constant dense<0.000000e+00> : vector<8x64xf32>
    %193 = tpu.matmul %191, %192, %cst_57 {dimension_numbers = #tpu.dot_dimension_numbers<[1], [0], [0], [1], [0, 0, 1, 1], [], []>} : vector<8x768xbf16>, vector<768x64xbf16>, vector<8x64xf32> -> vector<8x64xf32>
    %194 = arith.addf %190, %193 : vector<8x64xf32>
    %c0_58 = arith.constant 0 : index
    %c0_59 = arith.constant 0 : index
    %195 = vector.load %arg15[%c0_58, %c0_59] : memref<1x64xf32, #tpu.memory_space<vmem>>, vector<1x64xf32>
    %196 = vector.broadcast %195 : vector<1x64xf32> to vector<8x64xf32>
    %197 = arith.addf %194, %196 : vector<8x64xf32>
    %198 = arith.truncf %197 : vector<8x64xf32> to vector<8x64xbf16>
    %c0_60 = arith.constant 0 : index
    %c0_61 = arith.constant 0 : index
    %199 = vector.load %arg16[%c0_60, %c0_61] : memref<64x4xbf16, #tpu.memory_space<vmem>>, vector<64x4xbf16>
    %cst_62 = arith.constant dense<0.000000e+00> : vector<8x4xf32>
    %200 = tpu.matmul %198, %199, %cst_62 {dimension_numbers = #tpu.dot_dimension_numbers<[1], [0], [0], [1], [0, 0, 1, 1], [], []>} : vector<8x64xbf16>, vector<64x4xbf16>, vector<8x4xf32> -> vector<8x4xf32>
    %c0_63 = arith.constant 0 : index
    %c0_64 = arith.constant 0 : index
    %201 = vector.load %arg17[%c0_63, %c0_64] : memref<1x4xf32, #tpu.memory_space<vmem>>, vector<1x4xf32>
    %202 = vector.broadcast %201 : vector<1x4xf32> to vector<8x4xf32>
    %203 = arith.addf %200, %202 : vector<8x4xf32>
    %cst_65 = arith.constant dense<0xFF800000> : vector<8xf32>
    %204 = vector.multi_reduction <maximumf>, %203, %cst_65 [1] : vector<8x4xf32> to vector<8xf32>
    %205 = vector.shape_cast %204 : vector<8xf32> to vector<8x1xf32>
    %206 = vector.broadcast %205 : vector<8x1xf32> to vector<8x4xf32>
    %207 = arith.subf %203, %206 : vector<8x4xf32>
    %208 = math.exp %207 : vector<8x4xf32>
    %cst_66 = arith.constant dense<0.000000e+00> : vector<8xf32>
    %209 = vector.multi_reduction <add>, %208, %cst_66 [1] : vector<8x4xf32> to vector<8xf32>
    %210 = vector.shape_cast %209 : vector<8xf32> to vector<8x1xf32>
    %211 = vector.broadcast %210 : vector<8x1xf32> to vector<8x4xf32>
    %212 = arith.divf %208, %211 : vector<8x4xf32>
    %c0_67 = arith.constant 0 : index
    %c0_68 = arith.constant 0 : index
    %213 = vector.load %arg18[%c0_67, %c0_68] : memref<8x4xf32, #tpu.memory_space<vmem>>, vector<8x4xf32>
    tpu.vector_store %arg18[%c0_67, %c0_68], %212 {strides = array<i32>} : memref<8x4xf32, #tpu.memory_space<vmem>>, vector<8x4xf32>,
    return
  }
}

</mosaic_0001>

<bundles_post_ra>
// kernel: tpu_custom_call.1
= control target key start
LH: loop header
LB: loop body
LE: loop exit
PB: predicated region body
PF: predicated region fallthrough
CT: control target
= control target key end

     0   :  { %s11755_s0 = inlined_call_operand.hbm [shape: f32[8,8,768], index: 0, kind: input, shape index: {}]   ;;  %s11756_s1 = inlined_call_operand.hbm [shape: f32[8,8], index: 1, kind: input, shape index: {}]   ;;  %s11757_s2 = inlined_call_operand.hbm [shape: bf16[768,768], index: 2, kind: input, shape index: {}]   ;;  %s11758_s3 = inlined_call_operand.hbm [shape: f32[1,768], index: 3, kind: input, shape index: {}]   ;;  %s11759_s4 = inlined_call_operand.vmem [shape: f32[32,3,64], index: 4, kind: input, shape index: {}]   ;;  %s11760_s5 = inlined_call_operand.hbm [shape: bf16[3,32], index: 5, kind: input, shape index: {}]   ;;  %s11761_s6 = inlined_call_operand.hbm [shape: f32[1,32], index: 6, kind: input, shape index: {}]   ;;  %s11762_s7 = inlined_call_operand.hbm [shape: bf16[32,96], index: 7, kind: input, shape index: {}]   ;;  %s11763_s8 = inlined_call_operand.hbm [shape: bf16[32,96], index: 8, kind: input, shape index: {}]   ;;  %s11764_s9 = inlined_call_operand.hbm [shape: f32[1,96], index: 9, kind: input, shape index: {}]   ;;  %s11765_s10 = inlined_call_operand.hbm [shape: f32[1,96], index: 10, kind: input, shape index: {}]   ;;  %s11766_s11 = inlined_call_operand.hbm [shape: f32[8,65], index: 11, kind: input, shape index: {}]   ;;  %s11767_s12 = inlined_call_operand.hbm [shape: bf16[32,64], index: 12, kind: input, shape index: {}]   ;;  %s11768_s13 = inlined_call_operand.vmem [shape: bf16[65,64], index: 13, kind: input, shape index: {}]   ;;  %s11769_s14 = inlined_call_operand.vmem [shape: bf16[768,64], index: 14, kind: input, shape index: {}]   ;;  %s11770_s15 = inlined_call_operand.hbm [shape: f32[1,64], index: 15, kind: input, shape index: {}]   ;;  %s11771_s16 = inlined_call_operand.vmem [shape: bf16[64,4], index: 16, kind: input, shape index: {}]   ;;  %s11772_s17 = inlined_call_operand.hbm [shape: f32[1,4], index: 17, kind: input, shape index: {}]   ;;  %s11773_s18 = inlined_call_operand.vmem [shape: f32[8,4], index: 18, kind: output, shape index: {}]  }
   0x1   :  { %11900 = sst [smem:[#allocation81_spill]] %s11755_s0 }
   0x2   :  { %11901 = sst [smem:[#allocation82_spill]] %s11756_s1 }
   0x3   :  { %11902 = sst [smem:[#allocation83_spill]] %s11757_s2 }
   0x4   :  { %23 = vsyncpa [#allocation3], 0 }
   0x5   :  { %24 = vsyncpa [#allocation5], 0 }
   0x6   :  { %25 = vsyncpa [#allocation8], 0 }
   0x7   :  { %26 = vsyncpa [#allocation11], 0 }
   0x8   :  { %27 = vsyncpa [#allocation14], 0 }
   0x9   :  { %28 = vsyncpa [#allocation17], 0 }
   0xa   :  { %29 = vsyncpa [#allocation20], 0 }
   0xb   :  { %30 = vsyncpa [#allocation23], 0  ;;  %s8555_s27 = smov [#allocation4]   ;;  %s8556_s29 = smov [#allocation7]  }
   0xc   :  { %s49_s28 = sshll.u32 %s8555_s27, 4  ;;  %s71_s30 = sshll.u32 %s8556_s29, 4  ;;  %s50_s28 = int_to_ptr.vmem [resolvable:$true] %s49_s28  ;;  %s72_s30 = int_to_ptr.vmem [resolvable:$true] %s71_s30 }
   0xd   :  { %s11903_s1 = sld [smem:[#allocation82_spill]] }
  0x13   :  { %s8231_s20 = scalar_lea.hbm %s11903_s1, 128 }
  0x14   :  { %p8232_p0 = scmp.ne.s32.totalorder %s11903_s1, %s8231_s20  ;;  %p8235_p1 = scmp.lt.u32.totalorder %s8231_s20, %s11903_s1 }
  0x16   :  { %p8237_p2 = pnand %p8235_p1, %p8232_p0 }
  0x18   :  { %8240 = shalt.err (!%p8237_p2)
}
  0x19   :  { %s8241_s24 = scalar_lea.vmem %s50_s28, 128  ;;  %p8246_p4 = scmp.lt.s32.totalorder %s50_s28, %s50_s28 }
  0x1a   :  { %p8242_p3 = scmp.ne.s32.totalorder %s50_s28, %s8241_s24  ;;  %p8247_p5 = scmp.lt.s32.totalorder %s8241_s24, %s8241_s24 }
  0x1c   :  { %p8248_p6 = por %p8247_p5, %p8246_p4 }
  0x1e   :  { %p8249_p7 = pnand %p8248_p6, %p8242_p3 }
  0x20   :  { %8252 = shalt.err (!%p8249_p7)
}
  0x21   :  { %52 = dma.hbm_to_vmem [thread:$0]  %s11903_s1, 128, %s50_s28, [#allocation5]  }
  0x22   :  { %s8253_s0 = scalar_lea.hbm %s11758_s3, 96 }
  0x23   :  { %p8254_p8 = scmp.ne.s32.totalorder %s11758_s3, %s8253_s0  ;;  %p8257_p9 = scmp.lt.u32.totalorder %s8253_s0, %s11758_s3 }
  0x25   :  { %p8259_p10 = pnand %p8257_p9, %p8254_p8 }
  0x27   :  { %8262 = shalt.err (!%p8259_p10)
}
  0x28   :  { %s8263_s2 = scalar_lea.vmem %s72_s30, 96  ;;  %p8268_p12 = scmp.lt.s32.totalorder %s72_s30, %s72_s30 }
  0x29   :  { %p8264_p11 = scmp.ne.s32.totalorder %s72_s30, %s8263_s2  ;;  %p8269_p13 = scmp.lt.s32.totalorder %s8263_s2, %s8263_s2 }
  0x2b   :  { %p8270_p0 = por %p8269_p13, %p8268_p12 }
  0x2d   :  { %p8271_p1 = pnand %p8270_p0, %p8264_p11 }
  0x2f   :  { %8274 = shalt.err (!%p8271_p1)
}
  0x30   :  { %74 = dma.hbm_to_vmem [thread:$0]  %s11758_s3, 96, %s72_s30, [#allocation8]  }
  0x31   :  { %s8557_s23 = smov [#allocation10]   ;;  %s8275_s27 = scalar_lea.hbm %s11761_s6, 16 }
  0x32   :  { %s93_s24 = sshll.u32 %s8557_s23, 4  ;;  %p8276_p2 = scmp.ne.s32.totalorder %s11761_s6, %s8275_s27  ;;  %s94_s24 = int_to_ptr.vmem [resolvable:$true] %s93_s24 }
  0x33   :  { %p8279_p3 = scmp.lt.u32.totalorder %s8275_s27, %s11761_s6 }
  0x35   :  { %p8281_p4 = pnand %p8279_p3, %p8276_p2 }
  0x37   :  { %8284 = shalt.err (!%p8281_p4)
}
  0x38   :  { %s8285_s20 = scalar_lea.vmem %s94_s24, 16  ;;  %s8289_s3 = scalar_lea.vmem %s94_s24, 32 }
  0x39   :  { %p8286_p5 = scmp.ne.s32.totalorder %s94_s24, %s8285_s20  ;;  %p8290_p6 = scmp.lt.s32.totalorder %s94_s24, %s94_s24 }
  0x3a   :  { %p8291_p7 = scmp.lt.s32.totalorder %s8289_s3, %s8285_s20 }
  0x3c   :  { %p8292_p8 = por %p8291_p7, %p8290_p6 }
  0x3e   :  { %p8293_p9 = pnand %p8292_p8, %p8286_p5 }
  0x40   :  { %8296 = shalt.err (!%p8293_p9)
}
  0x41   :  { %96 = dma.hbm_to_vmem [thread:$0]  %s11761_s6, 16, %s94_s24, [#allocation11]  }
  0x42   :  { %s8558_s2 = smov [#allocation13]   ;;  %s8559_s1 = smov [#allocation16]  }
  0x43   :  { %s114_s28 = sshll.u32 %s8558_s2, 4  ;;  %s137_s23 = sshll.u32 %s8559_s1, 4  ;;  %s115_s28 = int_to_ptr.vmem [resolvable:$true] %s114_s28  ;;  %s138_s23 = int_to_ptr.vmem [resolvable:$true] %s137_s23 }
  0x44   :  { %s8297_s27 = scalar_lea.hbm %s11763_s8, 256 }
  0x45   :  { %p8298_p10 = scmp.ne.s32.totalorder %s11763_s8, %s8297_s27  ;;  %p8301_p11 = scmp.lt.u32.totalorder %s8297_s27, %s11763_s8 }
  0x47   :  { %p8303_p12 = pnand %p8301_p11, %p8298_p10 }
  0x49   :  { %8306 = shalt.err (!%p8303_p12)
}
  0x4a   :  { %s8307_s6 = scalar_lea.vmem %s115_s28, 256  ;;  %p8312_p0 = scmp.lt.s32.totalorder %s115_s28, %s115_s28 }
  0x4b   :  { %p8308_p13 = scmp.ne.s32.totalorder %s115_s28, %s8307_s6  ;;  %p8313_p1 = scmp.lt.s32.totalorder %s8307_s6, %s8307_s6 }
  0x4d   :  { %p8314_p2 = por %p8313_p1, %p8312_p0 }
  0x4f   :  { %p8315_p3 = pnand %p8314_p2, %p8308_p13 }
  0x51   :  { %8318 = shalt.err (!%p8315_p3)
}
  0x52   :  { %s8560_s24 = smov 64   ;;  %s8561_s20 = smov 4  }
  0x53   :  { %120 = dma.hbm_to_vmem [thread:$0]  %s11763_s8, 256, %s115_s28, [#allocation14], %s8560_s24, %s8560_s24, %s8561_s20  }
  0x54   :  { %s8319_s1 = scalar_lea.hbm %s11765_s10, 16 }
  0x55   :  { %p8320_p4 = scmp.ne.s32.totalorder %s11765_s10, %s8319_s1  ;;  %p8323_p5 = scmp.lt.u32.totalorder %s8319_s1, %s11765_s10 }
  0x57   :  { %p8325_p6 = pnand %p8323_p5, %p8320_p4 }
  0x59   :  { %8328 = shalt.err (!%p8325_p6)
}
  0x5a   :  { %s8329_s0 = scalar_lea.vmem %s138_s23, 16  ;;  %s8333_s19 = scalar_lea.vmem %s138_s23, 32 }
  0x5b   :  { %p8330_p7 = scmp.ne.s32.totalorder %s138_s23, %s8329_s0  ;;  %p8334_p8 = scmp.lt.s32.totalorder %s138_s23, %s138_s23 }
  0x5c   :  { %p8335_p9 = scmp.lt.s32.totalorder %s8333_s19, %s8329_s0 }
  0x5e   :  { %p8336_p10 = por %p8335_p9, %p8334_p8 }
  0x60   :  { %p8337_p11 = pnand %p8336_p10, %p8330_p7 }
  0x62   :  { %8340 = shalt.err (!%p8337_p11)
}
  0x63   :  { %140 = dma.hbm_to_vmem [thread:$0]  %s11765_s10, 16, %s138_s23, [#allocation17]  }
  0x64   :  { %s8562_s21 = smov [#allocation19]   ;;  %s8563_s3 = smov [#allocation2]  }
  0x65   :  { %s156_s6 = sshll.u32 %s8562_s21, 4  ;;  %s36_s30 = sshll.u32 %s8563_s3, 4  ;;  %s157_s6 = int_to_ptr.vmem [resolvable:$true] %s156_s6  ;;  %s37_s30 = int_to_ptr.vmem [resolvable:$true] %s36_s30 }
  0x66   :  { %s8341_s1 = scalar_lea.hbm %s11767_s12, 256 }
  0x67   :  { %p8342_p12 = scmp.ne.s32.totalorder %s11767_s12, %s8341_s1  ;;  %p8345_p13 = scmp.lt.u32.totalorder %s8341_s1, %s11767_s12 }
  0x69   :  { %p8347_p0 = pnand %p8345_p13, %p8342_p12 }
  0x6b   :  { %8350 = shalt.err (!%p8347_p0)
}
  0x6c   :  { %s8351_s10 = scalar_lea.vmem %s157_s6, 256  ;;  %p8356_p2 = scmp.lt.s32.totalorder %s157_s6, %s157_s6 }
  0x6d   :  { %p8352_p1 = scmp.ne.s32.totalorder %s157_s6, %s8351_s10  ;;  %p8357_p3 = scmp.lt.s32.totalorder %s8351_s10, %s8351_s10 }
  0x6f   :  { %p8358_p4 = por %p8357_p3, %p8356_p2 }
  0x71   :  { %p8359_p5 = pnand %p8358_p4, %p8352_p1 }
  0x73   :  { %8362 = shalt.err (!%p8359_p5)
}
  0x74   :  { %162 = dma.hbm_to_vmem [thread:$0]  %s11767_s12, 256, %s157_s6, [#allocation20], %s8560_s24, %s8560_s24, %s8561_s20  }
  0x75   :  { %s11904_s28 = sld [smem:[#allocation81_spill]] }
  0x7b   :  { %s8363_s21 = scalar_lea.hbm %s11904_s28, 6144 }
  0x7c   :  { %p8364_p6 = scmp.ne.s32.totalorder %s11904_s28, %s8363_s21  ;;  %p8367_p7 = scmp.lt.u32.totalorder %s8363_s21, %s11904_s28 }
  0x7e   :  { %p8369_p8 = pnand %p8367_p7, %p8364_p6 }
  0x80   :  { %8372 = shalt.err (!%p8369_p8)
}
  0x81   :  { %s8373_s25 = scalar_lea.vmem %s37_s30, 6144  ;;  %p8378_p10 = scmp.lt.s32.totalorder %s37_s30, %s37_s30 }
  0x82   :  { %p8374_p9 = scmp.ne.s32.totalorder %s37_s30, %s8373_s25  ;;  %p8379_p11 = scmp.lt.s32.totalorder %s8373_s25, %s8373_s25 }
  0x84   :  { %p8380_p12 = por %p8379_p11, %p8378_p10 }
  0x86   :  { %p8381_p13 = pnand %p8380_p12, %p8374_p9 }
  0x88   :  { %8384 = shalt.err (!%p8381_p13)
}
  0x89   :  { %s8564_s12 = smov 768   ;;  %s8565_s6 = smov 48  }
  0x8a   :  { %42 = dma.hbm_to_vmem [thread:$0]  %s11904_s28, 6144, %s37_s30, [#allocation3], %s8564_s12, %s8564_s12, %s8565_s6  }
  0x8b   :  { %s8566_s29 = smov [#allocation6]   ;;  %s11905_s19 = sld [smem:[#allocation83_spill]] }
  0x8c   :  { %s58_s10 = sshll.u32 %s8566_s29, 4  ;;  %s59_s10 = int_to_ptr.vmem [resolvable:$true] %s58_s10 }
  0x91   :  { %s8385_s8 = scalar_lea.hbm %s11905_s19, 36864 }
  0x92   :  { %p8386_p0 = scmp.ne.s32.totalorder %s11905_s19, %s8385_s8  ;;  %p8389_p1 = scmp.lt.u32.totalorder %s8385_s8, %s11905_s19 }
  0x94   :  { %p8391_p2 = pnand %p8389_p1, %p8386_p0 }
  0x96   :  { %8394 = shalt.err (!%p8391_p2)
}
  0x97   :  { %s8395_s1 = scalar_lea.vmem %s59_s10, 36864  ;;  %p8400_p4 = scmp.lt.s32.totalorder %s59_s10, %s59_s10 }
  0x98   :  { %p8396_p3 = scmp.ne.s32.totalorder %s59_s10, %s8395_s1  ;;  %p8401_p5 = scmp.lt.s32.totalorder %s8395_s1, %s8395_s1 }
  0x9a   :  { %p8402_p6 = por %p8401_p5, %p8400_p4 }
  0x9c   :  { %p8403_p7 = pnand %p8402_p6, %p8396_p3 }
  0x9e   :  { %8406 = shalt.err (!%p8403_p7)
}
  0x9f   :  { %s8567_s30 = smov 384   ;;  %s8568_s28 = smov 24  }
  0xa0   :  { %64 = dma.hbm_to_vmem [thread:$0]  %s11905_s19, 36864, %s59_s10, [#allocation5], %s8567_s30, %s8567_s30, %s8568_s28  }
  0xa1   :  { %s8569_s6 = smov [#allocation9]   ;;  %s8570_s27 = smov [#allocation12]  }
  0xa2   :  { %s83_s26 = sshll.u32 %s8569_s6, 4  ;;  %s102_s29 = sshll.u32 %s8570_s27, 4  ;;  %s84_s26 = int_to_ptr.vmem [resolvable:$true] %s83_s26  ;;  %s8776_s29 = int_to_ptr.vmem [resolvable:$true] %s102_s29 }
  0xa3   :  { %s8407_s8 = scalar_lea.hbm %s11760_s5, 32 }
  0xa4   :  { %p8408_p8 = scmp.ne.s32.totalorder %s11760_s5, %s8407_s8  ;;  %p8411_p9 = scmp.lt.u32.totalorder %s8407_s8, %s11760_s5 }
  0xa6   :  { %p8413_p10 = pnand %p8411_p9, %p8408_p8 }
  0xa8   :  { %8416 = shalt.err (!%p8413_p10)
}
  0xa9   :  { %s8417_s10 = scalar_lea.vmem %s84_s26, 32  ;;  %p8422_p12 = scmp.lt.s32.totalorder %s84_s26, %s84_s26 }
  0xaa   :  { %p8418_p11 = scmp.ne.s32.totalorder %s84_s26, %s8417_s10  ;;  %p8423_p13 = scmp.lt.s32.totalorder %s8417_s10, %s8417_s10 }
  0xac   :  { %p8424_p0 = por %p8423_p13, %p8422_p12 }
  0xae   :  { %p8425_p1 = pnand %p8424_p0, %p8418_p11 }
  0xb0   :  { %8428 = shalt.err (!%p8425_p1)
}
  0xb1   :  { %86 = dma.hbm_to_vmem [thread:$0]  %s11760_s5, 32, %s84_s26, [#allocation8]  }
  0xb2   :  { %s8429_s25 = scalar_lea.hbm %s11762_s7, 256 }
  0xb3   :  { %p8430_p2 = scmp.ne.s32.totalorder %s11762_s7, %s8429_s25  ;;  %p8433_p3 = scmp.lt.u32.totalorder %s8429_s25, %s11762_s7 }
  0xb5   :  { %p8435_p4 = pnand %p8433_p3, %p8430_p2 }
  0xb7   :  { %8438 = shalt.err (!%p8435_p4)
}
  0xb8   :  { %s8439_s0 = scalar_lea.vmem %s8776_s29, 256  ;;  %p8444_p6 = scmp.lt.s32.totalorder %s8776_s29, %s8776_s29 }
  0xb9   :  { %p8440_p5 = scmp.ne.s32.totalorder %s8776_s29, %s8439_s0  ;;  %p8445_p7 = scmp.lt.s32.totalorder %s8439_s0, %s8439_s0 }
  0xbb   :  { %p8446_p8 = por %p8445_p7, %p8444_p6 }
  0xbd   :  { %p8447_p9 = pnand %p8446_p8, %p8440_p5 }
  0xbf   :  { %8450 = shalt.err (!%p8447_p9)
}
  0xc0   :  { %108 = dma.hbm_to_vmem [thread:$0]  %s11762_s7, 256, %s8776_s29, [#allocation11], %s8560_s24, %s8560_s24, %s8561_s20  }
  0xc1   :  { %s8571_s8 = smov [#allocation15]   ;;  %s8572_s3 = smov [#allocation18]  }
  0xc2   :  { %s127_s21 = sshll.u32 %s8571_s8, 4  ;;  %s147_s22 = sshll.u32 %s8572_s3, 4  ;;  %s128_s21 = int_to_ptr.vmem [resolvable:$true] %s127_s21  ;;  %s148_s22 = int_to_ptr.vmem [resolvable:$true] %s147_s22 }
  0xc3   :  { %s8451_s19 = scalar_lea.hbm %s11764_s9, 16 }
  0xc4   :  { %p8452_p10 = scmp.ne.s32.totalorder %s11764_s9, %s8451_s19  ;;  %p8455_p11 = scmp.lt.u32.totalorder %s8451_s19, %s11764_s9 }
  0xc6   :  { %p8457_p12 = pnand %p8455_p11, %p8452_p10 }
  0xc8   :  { %8460 = shalt.err (!%p8457_p12)
}
  0xc9   :  { %s8461_s7 = scalar_lea.vmem %s128_s21, 16  ;;  %s8465_s20 = scalar_lea.vmem %s128_s21, 32 }
  0xca   :  { %p8462_p13 = scmp.ne.s32.totalorder %s128_s21, %s8461_s7  ;;  %p8466_p0 = scmp.lt.s32.totalorder %s128_s21, %s128_s21 }
  0xcb   :  { %p8467_p1 = scmp.lt.s32.totalorder %s8465_s20, %s8461_s7 }
  0xcd   :  { %p8468_p2 = por %p8467_p1, %p8466_p0 }
  0xcf   :  { %p8469_p3 = pnand %p8468_p2, %p8462_p13 }
  0xd1   :  { %8472 = shalt.err (!%p8469_p3)
}
  0xd2   :  { %130 = dma.hbm_to_vmem [thread:$0]  %s11764_s9, 16, %s128_s21, [#allocation14]  }
  0xd3   :  { %s8473_s23 = scalar_lea.hbm %s11766_s11, 128 }
  0xd4   :  { %p8474_p4 = scmp.ne.s32.totalorder %s11766_s11, %s8473_s23  ;;  %p8477_p5 = scmp.lt.u32.totalorder %s8473_s23, %s11766_s11 }
  0xd6   :  { %p8479_p6 = pnand %p8477_p5, %p8474_p4 }
  0xd8   :  { %8482 = shalt.err (!%p8479_p6)
}
  0xd9   :  { %s8483_s3 = scalar_lea.vmem %s148_s22, 128  ;;  %p8488_p8 = scmp.lt.s32.totalorder %s148_s22, %s148_s22 }
  0xda   :  { %p8484_p7 = scmp.ne.s32.totalorder %s148_s22, %s8483_s3  ;;  %p8489_p9 = scmp.lt.s32.totalorder %s8483_s3, %s8483_s3 }
  0xdc   :  { %p8490_p10 = por %p8489_p9, %p8488_p8 }
  0xde   :  { %p8491_p11 = pnand %p8490_p10, %p8484_p7 }
  0xe0   :  { %8494 = shalt.err (!%p8491_p11)
}
  0xe1   :  { %150 = dma.hbm_to_vmem [thread:$0]  %s11766_s11, 128, %s148_s22, [#allocation17]  }
  0xe2   :  { %s8573_s2 = smov [#allocation21]   ;;  %s8574_s19 = smov [#allocation22]  }
  0xe3   :  { %s173_s10 = sshll.u32 %s8573_s2, 4  ;;  %s185_s1 = sshll.u32 %s8574_s19, 4  ;;  %s174_s10 = int_to_ptr.vmem [resolvable:$true] %s173_s10  ;;  %s186_s1 = int_to_ptr.vmem [resolvable:$true] %s185_s1 }
  0xe4   :  { %s8495_s25 = scalar_lea.hbm %s11770_s15, 16 }
  0xe5   :  { %p8496_p12 = scmp.ne.s32.totalorder %s11770_s15, %s8495_s25  ;;  %p8499_p13 = scmp.lt.u32.totalorder %s8495_s25, %s11770_s15 }
  0xe7   :  { %p8501_p0 = pnand %p8499_p13, %p8496_p12 }
  0xe9   :  { %8504 = shalt.err (!%p8501_p0)
}
  0xea   :  { %s8505_s11 = scalar_lea.vmem %s174_s10, 16  ;;  %s8509_s22 = scalar_lea.vmem %s174_s10, 32 }
  0xeb   :  { %p8506_p1 = scmp.ne.s32.totalorder %s174_s10, %s8505_s11  ;;  %p8510_p2 = scmp.lt.s32.totalorder %s174_s10, %s174_s10 }
  0xec   :  { %p8511_p3 = scmp.lt.s32.totalorder %s8509_s22, %s8505_s11 }
  0xee   :  { %p8512_p4 = por %p8511_p3, %p8510_p2 }
  0xf0   :  { %p8513_p5 = pnand %p8512_p4, %p8506_p1 }
  0xf2   :  { %8516 = shalt.err (!%p8513_p5)
}
  0xf3   :  { %176 = dma.hbm_to_vmem [thread:$0]  %s11770_s15, 16, %s174_s10, [#allocation20]  }
  0xf4   :  { %s8517_s5 = scalar_lea.hbm %s11772_s17, 16 }
  0xf5   :  { %p8518_p6 = scmp.ne.s32.totalorder %s11772_s17, %s8517_s5  ;;  %p8521_p7 = scmp.lt.u32.totalorder %s8517_s5, %s11772_s17 }
  0xf7   :  { %p8523_p8 = pnand %p8521_p7, %p8518_p6 }
  0xf9   :  { %8526 = shalt.err (!%p8523_p8)
}
  0xfa   :  { %s8527_s21 = scalar_lea.vmem %s186_s1, 16  ;;  %s8531_s2 = scalar_lea.vmem %s186_s1, 32 }
  0xfb   :  { %p8528_p9 = scmp.ne.s32.totalorder %s186_s1, %s8527_s21  ;;  %p8532_p10 = scmp.lt.s32.totalorder %s186_s1, %s186_s1 }
  0xfc   :  { %p8533_p11 = scmp.lt.s32.totalorder %s8531_s2, %s8527_s21 }
  0xfe   :  { %p8534_p12 = por %p8533_p11, %p8532_p10 }
 0x100   :  { %p8535_p13 = pnand %p8534_p12, %p8528_p9 }
 0x102   :  { %8538 = shalt.err (!%p8535_p13)
}
 0x103   :  { %188 = dma.hbm_to_vmem [thread:$0]  %s11772_s17, 16, %s186_s1, [#allocation23]  }
 0x104   :  { %8539 = dma.done.wait [#allocation3], 6144  }
 0x105   :  { %8540 = vsyncadd [#allocation3], 4294961152 }
 0x106   :  { %8541 = dma.done.wait [#allocation5], 36992  }
 0x107   :  { %8542 = vsyncadd [#allocation5], 4294930304 }
 0x108   :  { %8543 = dma.done.wait [#allocation8], 128  }
 0x109   :  { %8544 = vsyncadd [#allocation8], 4294967168 }
 0x10a   :  { %8545 = dma.done.wait [#allocation11], 272  }
 0x10b   :  { %8546 = vsyncadd [#allocation11], 4294967024 }
 0x10c   :  { %8547 = dma.done.wait [#allocation14], 272  }
 0x10d   :  { %8548 = vsyncadd [#allocation14], 4294967024 }
 0x10e   :  { %8549 = dma.done.wait [#allocation17], 144  }
 0x10f   :  { %8550 = vsyncadd [#allocation17], 4294967152 }
 0x110   :  { %8551 = dma.done.wait [#allocation20], 272  }
 0x111   :  { %8552 = vsyncadd [#allocation20], 4294967024 }
 0x112   :  { %8553 = dma.done.wait [#allocation23], 16  }
 0x113   :  { %8554 = vsyncadd [#allocation23], 4294967280  ;;  %v11780_v0 = vlaneseq  ;;  %vm673_vm0 = vcmask 64512   ;;  %v8867_v4 = vld [vmem:[#allocation4] sm:$0xff]  ;;  %v7694_v8 = vld [vmem:[#allocation6 + $0xc] ss:$24 sps:$4 sm:$0xff]  }
 0x114   :  { %v674_v5 = vsel %vm673_vm0, %v8867_v4, 0.0  ;;  %v7692_v7 = vld [vmem:[#allocation6 + $0x4] ss:$24 sps:$4 sm:$0xff]   ;;  %v7696_v11 = vld [vmem:[#allocation6] ss:$24 sps:$4 sm:$0xff]   ;;  %2873 = vmatprep.subr.bf16.mxu1 %v7694_v8  ;;  %vm4516_vm1 = vcmask 523264  }
 0x115   :  { %v8859_v1 = vshrl.u32 %v11780_v0, 7  ;;  %675 = vadd.xlane.f32.xlu0 %v674_v5  ;;  %2750 = vmatprep.subr.bf16.mxu0 %v7692_v7  ;;  %v7697_v12 = vld [vmem:[#allocation6 + $0x8] ss:$24 sps:$4 sm:$0xff]   ;;  %v7698_v14 = vld [vmem:[#allocation6 + $0x34] ss:$24 sps:$4 sm:$0xff]   ;;  %vm1208_vm2 = vcmask 1041409  }
 0x116   :  { %2751 = vmatpush1.bf16.msra.mxu0 %v7696_v11  ;;  %2874 = vmatpush1.bf16.msra.mxu1 %v7697_v12  ;;  %v7700_v16 = vld [vmem:[#allocation6 + $0x3c] ss:$24 sps:$4 sm:$0xff]   ;;  %v7702_v17 = vld [vmem:[#allocation6 + $0x30] ss:$24 sps:$4 sm:$0xff]   ;;  %v7706_v22 = vld [vmem:[#allocation6 + $0x6c] ss:$24 sps:$4 sm:$0xff]  }
 0x117   :  { %11906 = vst [vmem:[#allocation32_spill] sm:$0xff] %v8859_v1  ;;  %v8862_v2 = vsub.s32 2, %v8859_v1  ;;  %v8865_v3 = vsub.s32 0, %v8859_v1  ;;  %v11779_v10 = vsub.s32 3, %v8859_v1  ;;  %v11777_v13 = vsub.s32 4, %v8859_v1  ;;  %2752 = vmatprep.subr.bf16.mxu0 %v7698_v14  ;;  %2875 = vmatprep.subr.bf16.mxu1 %v7700_v16 }
 0x118   :  { %v7703_v18 = vld [vmem:[#allocation6 + $0x38] ss:$24 sps:$4 sm:$0xff]   ;;  %v11778_v20 = vsub.s32 5, %v8859_v1  ;;  %v7704_v21 = vld [vmem:[#allocation6 + $0x64] ss:$24 sps:$4 sm:$0xff]   ;;  %v325_v26 = vsub.s32 6, %v8859_v1 }
 0x119   :  { %11907 = vst [vmem:[#allocation33_spill] sm:$0xff] %v8862_v2  ;;  %11908 = vst [vmem:[#allocation34_spill] sm:$0xff] %v8865_v3  ;;  %v298_v6 = vrot.slane %v8867_v4, %v8862_v2  ;;  %v284_v9 = vrot.slane %v8867_v4, %v8865_v3  ;;  %v305_v15 = vrot.slane %v8867_v4, %v11779_v10  ;;  %v7708_v23 = vld [vmem:[#allocation6 + $0x60] ss:$24 sps:$4 sm:$0xff]   ;;  %v7710_v27 = vld [vmem:[#allocation6 + $0x94] ss:$24 sps:$4 sm:$0xff]  }
 0x11a   :  { %2753 = vmatpush1.bf16.msra.mxu0 %v7702_v17  ;;  %2876 = vmatpush1.bf16.msra.mxu1 %v7703_v18  ;;  %v312_v19 = vrot.slane %v8867_v4, %v11777_v13  ;;  %v7709_v24 = vld [vmem:[#allocation6 + $0x68] ss:$24 sps:$4 sm:$0xff]   ;;  %v319_v25 = vrot.slane %v8867_v4, %v11778_v20  ;;  %v8888_v28 = vsub.s32 1, %v8859_v1  ;;  %v7712_v29 = vld [vmem:[#allocation6 + $0x9c] ss:$24 sps:$4 sm:$0xff]   ;;  %v326_v32 = vrot.slane %v8867_v4, %v325_v26 }
 0x11b   :  { %300 = vbcast.lane.b32.xlu1 %v298_v6, 256  ;;  %2754 = vmatprep.subr.bf16.mxu0 %v7704_v21  ;;  %v7714_v30 = vld [vmem:[#allocation6 + $0x90] ss:$24 sps:$4 sm:$0xff]   ;;  %v332_v33 = vsub.s32 7, %v8859_v1  ;;  %v3157_v34 = vld [vmem:[#allocation9] sm:$0x3] }
 0x11c   :  { %2877 = vmatprep.subr.bf16.mxu1 %v7706_v22  ;;  %11909 = vst [vmem:[#allocation35_spill] sm:$0xff] %v8888_v28  ;;  %v7715_v31 = vld [vmem:[#allocation6 + $0x98] ss:$24 sps:$4 sm:$0xff]   ;;  %v291_v35 = vrot.slane %v8867_v4, %v8888_v28  ;;  %v7716_v36 = vld [vmem:[#allocation6 + $0xc4] ss:$24 sps:$4 sm:$0xff]   ;;  %v3158_v39 = vunpack.c.l.bf16 %v3157_v34  ;;  %vm1211_vm3 = vcmask 1042434  }
 0x11d   :  { %v7718_v37 = vld [vmem:[#allocation6 + $0xcc] ss:$24 sps:$4 sm:$0xff]   ;;  %v7720_v38 = vld [vmem:[#allocation6 + $0xc0] ss:$24 sps:$4 sm:$0xff]   ;;  %v333_v41 = vrot.slane %v8867_v4, %v332_v33  ;;  %v7724_v43 = vld [vmem:[#allocation6 + $0xfc] ss:$24 sps:$4 sm:$0xff]  }
 0x11e   :  { %2755 = vmatpush1.bf16.msra.mxu0 %v7708_v23  ;;  %2878 = vmatpush1.bf16.msra.mxu1 %v7709_v24  ;;  %v7721_v40 = vld [vmem:[#allocation6 + $0xc8] ss:$24 sps:$4 sm:$0xff]   ;;  %v7722_v42 = vld [vmem:[#allocation6 + $0xf4] ss:$24 sps:$4 sm:$0xff]   ;;  %v7727_v45 = vld [vmem:[#allocation6 + $0xf8] ss:$24 sps:$4 sm:$0xff]   ;;  %v3162_v46 = vrot.slane %v3158_v39, %v8865_v3  ;;  %v3437_v49 = vrot.slane %v3158_v39, %v8888_v28  ;;  %v3840_v54 = vrot.slane %v3158_v39, %v8862_v2 }
 0x11f   :  { %286 = vbcast.lane.b32.xlu1 %v284_v9, 256  ;;  %2756 = vmatprep.subr.bf16.mxu0 %v7710_v27  ;;  %v7726_v44 = vld [vmem:[#allocation6 + $0xf0] ss:$24 sps:$4 sm:$0xff]   ;;  %v7728_v47 = vld [vmem:[#allocation6 + $0x124] ss:$24 sps:$4 sm:$0xff]   ;;  %vm1214_vm4 = vcmask 1043459  }
 0x120   :  { %2879 = vmatprep.subr.bf16.mxu1 %v7712_v29  ;;  %v7730_v48 = vld [vmem:[#allocation6 + $0x12c] ss:$24 sps:$4 sm:$0xff]   ;;  %v7732_v50 = vld [vmem:[#allocation6 + $0x120] ss:$24 sps:$4 sm:$0xff]   ;;  %v7736_v53 = vld [vmem:[#allocation6 + $0x15c] ss:$24 sps:$4 sm:$0xff]  }
 0x121   :  { %v7733_v51 = vld [vmem:[#allocation6 + $0x128] ss:$24 sps:$4 sm:$0xff]   ;;  %v7734_v52 = vld [vmem:[#allocation6 + $0x154] ss:$24 sps:$4 sm:$0xff]   ;;  %v7739_v56 = vld [vmem:[#allocation6 + $0x158] ss:$24 sps:$4 sm:$0xff]  }
 0x122   :  { %2757 = vmatpush1.bf16.msra.mxu0 %v7714_v30  ;;  %2880 = vmatpush1.bf16.msra.mxu1 %v7715_v31  ;;  %v7738_v55 = vld [vmem:[#allocation6 + $0x150] ss:$24 sps:$4 sm:$0xff]   ;;  %v7740_v57 = vld [vmem:[#allocation6 + $0x184] ss:$24 sps:$4 sm:$0xff]   ;;  %v7744_v59 = vld [vmem:[#allocation6 + $0x180] ss:$24 sps:$4 sm:$0xff]  }
 0x123   :  { %307 = vbcast.lane.b32.xlu1 %v305_v15, 256  ;;  %2758 = vmatprep.subr.bf16.mxu0 %v7716_v36  ;;  %v7742_v58 = vld [vmem:[#allocation6 + $0x18c] ss:$24 sps:$4 sm:$0xff]   ;;  %v7745_v60 = vld [vmem:[#allocation6 + $0x188] ss:$24 sps:$4 sm:$0xff]   ;;  %vm1217_vm5 = vcmask 1044484  }
 0x124   :  { %2881 = vmatprep.subr.bf16.mxu1 %v7718_v37  ;;  %v7388_v61 = vld [vmem:[#allocation10] ss:$0 sm:$0xff]  ;;  %v7746_v62 = vld [vmem:[#allocation6 + $0x1b4] ss:$24 sps:$4 sm:$0xff]   ;;  %v7751_v5 = vld [vmem:[#allocation6 + $0x1b8] ss:$24 sps:$4 sm:$0xff]  }
 0x125   :  { %v7748_v63 = vld [vmem:[#allocation6 + $0x1bc] ss:$24 sps:$4 sm:$0xff]   ;;  %v7750_v4 = vld [vmem:[#allocation6 + $0x1b0] ss:$24 sps:$4 sm:$0xff]   ;;  %v7754_v7 = vld [vmem:[#allocation6 + $0x1ec] ss:$24 sps:$4 sm:$0xff]  }
 0x126   :  { %2759 = vmatpush1.bf16.msra.mxu0 %v7720_v38  ;;  %2882 = vmatpush1.bf16.msra.mxu1 %v7721_v40  ;;  %v7752_v6 = vld [vmem:[#allocation6 + $0x1e4] ss:$24 sps:$4 sm:$0xff]   ;;  %v7756_v8 = vld [vmem:[#allocation6 + $0x1e0] ss:$24 sps:$4 sm:$0xff]   ;;  %v7758_v11 = vld [vmem:[#allocation6 + $0x214] ss:$24 sps:$4 sm:$0xff]  }
 0x127   :  { %314 = vbcast.lane.b32.xlu1 %v312_v19, 256  ;;  %2760 = vmatprep.subr.bf16.mxu0 %v7722_v42  ;;  %v7757_v9 = vld [vmem:[#allocation6 + $0x1e8] ss:$24 sps:$4 sm:$0xff]   ;;  %v7760_v12 = vld [vmem:[#allocation6 + $0x21c] ss:$24 sps:$4 sm:$0xff]   ;;  %vm1220_vm6 = vcmask 1045509  }
 0x128   :  { %2883 = vmatprep.subr.bf16.mxu1 %v7724_v43  ;;  %v7762_v14 = vld [vmem:[#allocation6 + $0x210] ss:$24 sps:$4 sm:$0xff]   ;;  %v7764_v16 = vld [vmem:[#allocation6 + $0x244] ss:$24 sps:$4 sm:$0xff]   ;;  %v7768_v18 = vld [vmem:[#allocation6 + $0x240] ss:$24 sps:$4 sm:$0xff]  }
 0x129   :  { %v7763_v15 = vld [vmem:[#allocation6 + $0x218] ss:$24 sps:$4 sm:$0xff]   ;;  %v7766_v17 = vld [vmem:[#allocation6 + $0x24c] ss:$24 sps:$4 sm:$0xff]   ;;  %v7769_v19 = vld [vmem:[#allocation6 + $0x248] ss:$24 sps:$4 sm:$0xff]  }
 0x12a   :  { %2761 = vmatpush1.bf16.msra.mxu0 %v7726_v44  ;;  %2884 = vmatpush1.bf16.msra.mxu1 %v7727_v45  ;;  %v7770_v21 = vld [vmem:[#allocation6 + $0x274] ss:$24 sps:$4 sm:$0xff]   ;;  %v7774_v23 = vld [vmem:[#allocation6 + $0x270] ss:$24 sps:$4 sm:$0xff]   ;;  %v7780_v27 = vld [vmem:[#allocation6 + $0x2a0] ss:$24 sps:$4 sm:$0xff]  }
 0x12b   :  { %321 = vbcast.lane.b32.xlu1 %v319_v25, 256  ;;  %293 = vbcast.lane.b32.xlu0 %v291_v35, 256  ;;  %v7772_v22 = vld [vmem:[#allocation6 + $0x27c] ss:$24 sps:$4 sm:$0xff]   ;;  %v7775_v24 = vld [vmem:[#allocation6 + $0x278] ss:$24 sps:$4 sm:$0xff]  }
 0x12c   :  { %2762 = vmatprep.subr.bf16.mxu0 %v7728_v47  ;;  %2885 = vmatprep.subr.bf16.mxu1 %v7730_v48  ;;  %v7776_v25 = vld [vmem:[#allocation6 + $0x2a4] ss:$24 sps:$4 sm:$0xff]   ;;  %v7781_v29 = vld [vmem:[#allocation6 + $0x2a8] ss:$24 sps:$4 sm:$0xff]   ;;  %v7782_v30 = vld [vmem:[#allocation6 + $0x2d4] ss:$24 sps:$4 sm:$0xff]  }
 0x12d   :  { %v7778_v26 = vld [vmem:[#allocation6 + $0x2ac] ss:$24 sps:$4 sm:$0xff]   ;;  %v7784_v31 = vld [vmem:[#allocation6 + $0x2dc] ss:$24 sps:$4 sm:$0xff]   ;;  %v7787_v33 = vld [vmem:[#allocation6 + $0x2d8] ss:$24 sps:$4 sm:$0xff]  }
 0x12e   :  { %2763 = vmatpush1.bf16.msra.mxu0 %v7732_v50  ;;  %2886 = vmatpush1.bf16.msra.mxu1 %v7733_v51  ;;  %v7790_v34 = vld [vmem:[#allocation6 + $0x304] ss:$24 sps:$4 sm:$0xff]   ;;  %v3125_v36 = vld [vmem:[%s11759_s4] sm:$0x7]  ;;  %v3127_v40 = vld [vmem:[%s11759_s4 + $0x8] sm:$0x7] }
 0x12f   :  { %328 = vbcast.lane.b32.xlu1 %v326_v32, 256  ;;  %3164 = vbcast.lane.b32.xlu0 %v3162_v46, 256  ;;  %v7786_v32 = vld [vmem:[#allocation6 + $0x2d0] ss:$24 sps:$4 sm:$0xff]   ;;  %v7793_v35 = vld [vmem:[#allocation6 + $0x30c] ss:$24 sps:$4 sm:$0xff]   ;;  %v8914_v45 = vrot.slane %v3125_v36, %v8865_v3  ;;  %v8920_v47 = vrot.slane %v3125_v36, %v8862_v2 }
 0x130   :  { %2764 = vmatprep.subr.bf16.mxu0 %v7734_v52  ;;  %2887 = vmatprep.subr.bf16.mxu1 %v7736_v53  ;;  %v3133_v37 = vld [vmem:[%s11759_s4 + $0x20] sm:$0x7]  ;;  %v3126_v38 = vld [vmem:[%s11759_s4 + $0x4] sm:$0x7]  ;;  %v245_v42 = vld [vmem:[#allocation2 + $0x68] sm:$0xff]  ;;  %vm1223_vm7 = vcmask 1046534  }
 0x131   :  { %v3134_v39 = vld [vmem:[%s11759_s4 + $0x24] sm:$0x7]  ;;  %v246_v43 = vld [vmem:[#allocation2 + $0x70] sm:$0xff]  ;;  %v247_v44 = vld [vmem:[#allocation2 + $0x78] sm:$0xff]  ;;  %v8923_v50 = vrot.slane %v3133_v37, %v8865_v3  ;;  %v8926_v51 = vrot.slane %v3133_v37, %v8888_v28  ;;  %v8929_v52 = vrot.slane %v3133_v37, %v8862_v2  ;;  %v8932_v53 = vrot.slane %v3126_v38, %v8865_v3 }
 0x132   :  { %2765 = vmatpush1.bf16.msra.mxu0 %v7738_v55  ;;  %2888 = vmatpush1.bf16.msra.mxu1 %v7739_v56  ;;  %v248_v48 = vld [vmem:[#allocation2 + $0x80] sm:$0xff]  ;;  %v8935_v55 = vrot.slane %v3126_v38, %v8888_v28  ;;  %v8938_v56 = vrot.slane %v3134_v39, %v8865_v3  ;;  %vm1226_vm8 = vcmask 1047559   ;;  %vm5308_vm9 = vcmask 130112  }
 0x133   :  { %335 = vbcast.lane.b32.xlu1 %v333_v41, 256  ;;  %3439 = vbcast.lane.b32.xlu0 %v3437_v49, 256  ;;  %v244_v41 = vld [vmem:[#allocation2 + $0x60] sm:$0xff]  ;;  %vm5315_vm10 = vcmask 195712   ;;  %vm5322_vm11 = vcmask 261312   ;;  %vm5955_vm12 = vcmask 261120  }
 0x134   :  { %2766 = vmatprep.subr.bf16.mxu0 %v7740_v57  ;;  %2889 = vmatprep.subr.bf16.mxu1 %v7742_v58  ;;  %v8941_v57 = vrot.slane %v3134_v39, %v8888_v28  ;;  %v8944_v58 = vrot.slane %v3127_v40, %v8865_v3  ;;  %vm8576_vm13 = vmmov 0   ;;  %vm6369_vm14 = vcmask 1040384  }
 0x135   :  { %vm6365_vm15 = vcmask 531456   ;;  %vm7075_vm0 = vcmask 31744  }
 0x136   :  { %2767 = vmatpush1.bf16.msra.mxu0 %v7744_v59  ;;  %2890 = vmatpush1.bf16.msra.mxu1 %v7745_v60  ;;  %11910 = vst [vmem:[#allocation36_spill] sm:$0xff] %v8944_v58 }
 0x137   :  { %3168 = vbcast.lane.b32.xlu1 %v3162_v46, 264  ;;  %3172 = vbcast.lane.b32.xlu0 %v3162_v46, 272 }
 0x138   :  { %2768 = vmatprep.subr.bf16.mxu0 %v7746_v62  ;;  %2891 = vmatprep.subr.bf16.mxu1 %v7748_v63  ;;  %v232_v63 = vld [vmem:[#allocation2] sm:$0xff] }
 0x13a   :  { %2769 = vmatpush1.bf16.msra.mxu0 %v7750_v4  ;;  %2892 = vmatpush1.bf16.msra.mxu1 %v7751_v5  ;;  %v233_v4 = vld [vmem:[#allocation2 + $0x8] sm:$0xff] }
 0x13b   :  { %3443 = vbcast.lane.b32.xlu1 %v3437_v49, 264  ;;  %3447 = vbcast.lane.b32.xlu0 %v3437_v49, 272  ;;  %v3135_v5 = vld [vmem:[%s11759_s4 + $0x28] sm:$0x7] }
 0x13c   :  { %2770 = vmatprep.subr.bf16.mxu0 %v7752_v6  ;;  %2893 = vmatprep.subr.bf16.mxu1 %v7754_v7 }
 0x13e   :  { %2771 = vmatpush1.bf16.msra.mxu0 %v7756_v8  ;;  %2894 = vmatpush1.bf16.msra.mxu1 %v7757_v9  ;;  %v8950_v8 = vrot.slane %v3126_v38, %v8862_v2  ;;  %v8953_v9 = vrot.slane %v3134_v39, %v8862_v2 }
 0x13f   :  { %3176 = vbcast.lane.b32.xlu1 %v3162_v46, 280  ;;  %3842 = vbcast.lane.b32.xlu0 %v3840_v54, 256  ;;  %v8917_v46 = vrot.slane %v3125_v36, %v8888_v28 }
 0x140   :  { %2772 = vmatprep.subr.bf16.mxu0 %v7758_v11  ;;  %2895 = vmatprep.subr.bf16.mxu1 %v7760_v12  ;;  %11911 = vst [vmem:[#allocation37_spill] sm:$0xff] %v8953_v9 }
 0x142   :  { %2773 = vmatpush1.bf16.msra.mxu0 %v7762_v14  ;;  %2896 = vmatpush1.bf16.msra.mxu1 %v7763_v15 }
 0x143   :  { %3451 = vbcast.lane.b32.xlu1 %v3437_v49, 280  ;;  %3850 = vbcast.lane.b32.xlu0 %v3840_v54, 272  ;;  %v249_v49 = vld [vmem:[#allocation2 + $0x88] sm:$0xff] }
 0x144   :  { %2774 = vmatprep.subr.bf16.mxu0 %v7764_v16  ;;  %2897 = vmatprep.subr.bf16.mxu1 %v7766_v17 }
 0x146   :  { %2775 = vmatpush1.bf16.msra.mxu0 %v7768_v18  ;;  %2898 = vmatpush1.bf16.msra.mxu1 %v7769_v19  ;;  %v8956_v19 = vrot.slane %v3127_v40, %v8888_v28  ;;  %v278_v28 = vld [vmem:[#allocation2 + $0x170] sm:$0xff] }
 0x147   :  { %3846 = vbcast.lane.b32.xlu1 %v3840_v54, 264  ;;  %4246 = vbcast.lane.b32.xlu0 %v7388_v61, 256 }
 0x148   :  { %2776 = vmatprep.subr.bf16.mxu0 %v7770_v21  ;;  %2899 = vmatprep.subr.bf16.mxu1 %v7772_v22  ;;  %11912 = vst [vmem:[#allocation38_spill] sm:$0xff] %v8956_v19  ;;  %v8959_v21 = vrot.slane %v3135_v5, %v8865_v3 }
 0x14a   :  { %2777 = vmatpush1.bf16.msra.mxu0 %v7774_v23  ;;  %2900 = vmatpush1.bf16.msra.mxu1 %v7775_v24  ;;  %11913 = vst [vmem:[#allocation39_spill] sm:$0xff] %v8959_v21 }
 0x14b   :  { %3854 = vbcast.lane.b32.xlu1 %v3840_v54, 280  ;;  %4254 = vbcast.lane.b32.xlu0 %v7388_v61, 272 }
 0x14c   :  { %2778 = vmatprep.subr.bf16.mxu0 %v7776_v25  ;;  %2901 = vmatprep.subr.bf16.mxu1 %v7778_v26  ;;  %v234_v26 = vld [vmem:[#allocation2 + $0x10] sm:$0xff] }
 0x14e   :  { %2779 = vmatpush1.bf16.msra.mxu0 %v7780_v27  ;;  %2902 = vmatpush1.bf16.msra.mxu1 %v7781_v29  ;;  %v235_v27 = vld [vmem:[#allocation2 + $0x18] sm:$0xff]  ;;  %v236_v29 = vld [vmem:[#allocation2 + $0x20] sm:$0xff] }
 0x14f   :  { %4250 = vbcast.lane.b32.xlu1 %v7388_v61, 264  ;;  %2780 = vmatprep.subr.bf16.mxu0 %v7782_v30 }
 0x150   :  { %2903 = vmatprep.subr.bf16.mxu1 %v7784_v31 }
 0x152   :  { %2781 = vmatpush1.bf16.msra.mxu0 %v7786_v32  ;;  %2904 = vmatpush1.bf16.msra.mxu1 %v7787_v33  ;;  %v237_v32 = vld [vmem:[#allocation2 + $0x28] sm:$0xff] }
 0x153   :  { %4258 = vbcast.lane.b32.xlu1 %v7388_v61, 280  ;;  %2791 = vmatprep.subr.bf16.mxu0 %v7790_v34 }
 0x154   :  { %2914 = vmatprep.subr.bf16.mxu1 %v7793_v35 }
 0x18d   :  { %v301_v54 = vpop.permute.xlu1 %300 }
 0x18e   :  { %v349_v59 = vmul.f32 %v301_v54, %v244_v41  ;;  %v350_v60 = vmul.f32 %v301_v54, %v245_v42  ;;  %v351_v61 = vmul.f32 %v301_v54, %v246_v43  ;;  %v352_v62 = vmul.f32 %v301_v54, %v247_v44 }
 0x18f   :  { %v353_v6 = vmul.f32 %v301_v54, %v248_v48  ;;  %v354_v7 = vmul.f32 %v301_v54, %v249_v49 }
 0x190   :  { %v457_v11 = vrot.slane %v349_v59, 4  ;;  %v463_v12 = vrot.slane %v350_v60, 4  ;;  %v469_v14 = vrot.slane %v351_v61, 4  ;;  %v475_v15 = vrot.slane %v352_v62, 4 }
 0x191   :  { %v481_v16 = vrot.slane %v353_v6, 4  ;;  %v487_v17 = vrot.slane %v354_v7, 4  ;;  %v287_v18 = vpop.permute.xlu1 %286 }
 0x192   :  { %v458_v22 = vadd.f32 %v457_v11, %v349_v59  ;;  %v464_v23 = vadd.f32 %v463_v12, %v350_v60  ;;  %v470_v24 = vadd.f32 %v469_v14, %v351_v61  ;;  %v476_v25 = vadd.f32 %v475_v15, %v352_v62  ;;  %v251_v11 = vld [vmem:[#allocation2 + $0x98] sm:$0xff] }
 0x193   :  { %v482_v30 = vadd.f32 %v481_v16, %v353_v6  ;;  %v488_v31 = vadd.f32 %v487_v17, %v354_v7  ;;  %v337_v33 = vmul.f32 %v287_v18, %v232_v63  ;;  %v338_v34 = vmul.f32 %v287_v18, %v233_v4  ;;  %v250_v7 = vld [vmem:[#allocation2 + $0x90] sm:$0xff] }
 0x194   :  { %v459_v35 = vrot.slane %v458_v22, 2  ;;  %v465_v36 = vrot.slane %v464_v23, 2  ;;  %v471_v37 = vrot.slane %v470_v24, 2  ;;  %v477_v38 = vrot.slane %v476_v25, 2 }
 0x195   :  { %v483_v39 = vrot.slane %v482_v30, 2  ;;  %v489_v40 = vrot.slane %v488_v31, 2  ;;  %v339_v41 = vmul.f32 %v287_v18, %v234_v26  ;;  %v340_v42 = vmul.f32 %v287_v18, %v235_v27  ;;  %v308_v43 = vpop.permute.xlu1 %307 }
 0x196   :  { %v460_v44 = vadd.f32 %v459_v35, %v458_v22  ;;  %v466_v48 = vadd.f32 %v465_v36, %v464_v23  ;;  %v472_v49 = vadd.f32 %v471_v37, %v470_v24  ;;  %v478_v54 = vadd.f32 %v477_v38, %v476_v25  ;;  %v253_v37 = vld [vmem:[#allocation2 + $0xa8] sm:$0xff]  ;;  %v254_v38 = vld [vmem:[#allocation2 + $0xb0] sm:$0xff] }
 0x197   :  { %v484_v59 = vadd.f32 %v483_v39, %v482_v30  ;;  %v490_v60 = vadd.f32 %v489_v40, %v488_v31  ;;  %v341_v61 = vmul.f32 %v287_v18, %v236_v29  ;;  %v342_v62 = vmul.f32 %v287_v18, %v237_v32  ;;  %v252_v30 = vld [vmem:[#allocation2 + $0xa0] sm:$0xff] }
 0x198   :  { %v461_v5 = vrot.slane %v460_v44, 1  ;;  %v467_v63 = vrot.slane %v466_v48, 1  ;;  %v473_v4 = vrot.slane %v472_v49, 1  ;;  %v479_v6 = vrot.slane %v478_v54, 1 }
 0x199   :  { %v485_v12 = vrot.slane %v484_v59, 1  ;;  %v491_v14 = vrot.slane %v490_v60, 1  ;;  %v385_v15 = vrot.slane %v337_v33, 4  ;;  %v391_v16 = vrot.slane %v338_v34, 4  ;;  %v8961_v17 = vpop.permute.xlu1 %314 }
 0x19a   :  { %v8963_v22 = vadd.f32 %v461_v5, %v460_v44  ;;  %v8965_v23 = vadd.f32 %v467_v63, %v466_v48  ;;  %v8967_v24 = vadd.f32 %v473_v4, %v472_v49  ;;  %v8969_v25 = vadd.f32 %v479_v6, %v478_v54  ;;  %v255_v44 = vld [vmem:[#allocation2 + $0xb8] sm:$0xff] }
 0x19b   :  { %v8971_v18 = vadd.f32 %v485_v12, %v484_v59  ;;  %v8973_v26 = vadd.f32 %v491_v14, %v490_v60  ;;  %v386_v27 = vadd.f32 %v385_v15, %v337_v33  ;;  %v392_v29 = vadd.f32 %v391_v16, %v338_v34 }
 0x19c   :  { %11914 = vst [vmem:[#allocation40_spill] sm:$0xff] %v8967_v24  ;;  %v397_v31 = vrot.slane %v339_v41, 4  ;;  %v403_v32 = vrot.slane %v340_v42, 4  ;;  %v409_v35 = vrot.slane %v341_v61, 4  ;;  %v415_v36 = vrot.slane %v342_v62, 4 }
 0x19d   :  { %11915 = vst [vmem:[#allocation41_spill] sm:$0xff] %v8971_v18  ;;  %11916 = vst [vmem:[#allocation42_spill] sm:$0xff] %v8973_v26  ;;  %v387_v39 = vrot.slane %v386_v27, 2  ;;  %v393_v40 = vrot.slane %v392_v29, 2  ;;  %v355_v48 = vmul.f32 %v308_v43, %v250_v7  ;;  %v356_v49 = vmul.f32 %v308_v43, %v251_v11  ;;  %v8975_v54 = vpop.permute.xlu1 %321 }
 0x19e   :  { %v398_v59 = vadd.f32 %v397_v31, %v339_v41  ;;  %v404_v5 = vadd.f32 %v403_v32, %v340_v42  ;;  %v410_v60 = vadd.f32 %v409_v35, %v341_v61  ;;  %v416_v63 = vadd.f32 %v415_v36, %v342_v62  ;;  %v256_v36 = vld [vmem:[#allocation2 + $0xc0] sm:$0xff] }
 0x19f   :  { %v388_v33 = vadd.f32 %v387_v39, %v386_v27  ;;  %v394_v34 = vadd.f32 %v393_v40, %v392_v29  ;;  %v357_v4 = vmul.f32 %v308_v43, %v252_v30  ;;  %v358_v6 = vmul.f32 %v308_v43, %v253_v37  ;;  %v257_v40 = vld [vmem:[#allocation2 + $0xc8] sm:$0xff] }
 0x1a0   :  { %v399_v12 = vrot.slane %v398_v59, 2  ;;  %v405_v14 = vrot.slane %v404_v5, 2  ;;  %v411_v15 = vrot.slane %v410_v60, 2  ;;  %v417_v16 = vrot.slane %v416_v63, 2 }
 0x1a1   :  { %v389_v13 = vrot.slane %v388_v33, 1  ;;  %v395_v20 = vrot.slane %v394_v34, 1  ;;  %v359_v10 = vmul.f32 %v308_v43, %v254_v38  ;;  %v360_v0 = vmul.f32 %v308_v43, %v255_v44  ;;  %v8977_v7 = vpop.permute.xlu1 %328 }
 0x1a2   :  { %v400_v11 = vadd.f32 %v399_v12, %v398_v59  ;;  %v406_v1 = vadd.f32 %v405_v14, %v404_v5  ;;  %v412_v41 = vadd.f32 %v411_v15, %v410_v60  ;;  %v418_v42 = vadd.f32 %v417_v16, %v416_v63  ;;  %v258_v12 = vld [vmem:[#allocation2 + $0xd0] sm:$0xff]  ;;  %v260_v15 = vld [vmem:[#allocation2 + $0xe0] sm:$0xff]  ;;  %v261_v16 = vld [vmem:[#allocation2 + $0xe8] sm:$0xff] }
 0x1a3   :  { %v8979_v61 = vadd.f32 %v389_v13, %v388_v33  ;;  %v8981_v62 = vadd.f32 %v395_v20, %v394_v34  ;;  %v493_v27 = vrot.slane %v355_v48, 4  ;;  %v499_v29 = vrot.slane %v356_v49, 4 }
 0x1a4   :  { %v401_v30 = vrot.slane %v400_v11, 1  ;;  %v407_v31 = vrot.slane %v406_v1, 1  ;;  %v413_v32 = vrot.slane %v412_v41, 1  ;;  %v419_v35 = vrot.slane %v418_v42, 1 }
 0x1a5   :  { %v494_v37 = vadd.f32 %v493_v27, %v355_v48  ;;  %v500_v38 = vadd.f32 %v499_v29, %v356_v49  ;;  %v505_v43 = vrot.slane %v357_v4, 4  ;;  %v511_v39 = vrot.slane %v358_v6, 4  ;;  %v8983_v44 = vpop.permute.xlu1 %335  ;;  %v259_v48 = vld [vmem:[#allocation2 + $0xd8] sm:$0xff] }
 0x1a6   :  { %v8985_v59 = vadd.f32 %v401_v30, %v400_v11  ;;  %v8987_v13 = vadd.f32 %v407_v31, %v406_v1  ;;  %v8989_v20 = vadd.f32 %v413_v32, %v412_v41  ;;  %v8991_v5 = vadd.f32 %v419_v35, %v418_v42 }
 0x1a7   :  { %v495_v60 = vrot.slane %v494_v37, 2  ;;  %v501_v63 = vrot.slane %v500_v38, 2  ;;  %v506_v33 = vadd.f32 %v505_v43, %v357_v4  ;;  %v512_v34 = vadd.f32 %v511_v39, %v358_v6 }
 0x1a8   :  { %11917 = vst [vmem:[#allocation43_spill] sm:$0xff] %v8985_v59  ;;  %11918 = vst [vmem:[#allocation44_spill] sm:$0xff] %v8989_v20  ;;  %v517_v49 = vrot.slane %v359_v10, 4  ;;  %v523_v14 = vrot.slane %v360_v0, 4  ;;  %v361_v27 = vmul.f32 %v8961_v17, %v256_v36  ;;  %v362_v11 = vmul.f32 %v8961_v17, %v257_v40  ;;  %v262_v36 = vld [vmem:[#allocation2 + $0xf0] sm:$0xff]  ;;  %v263_v20 = vld [vmem:[#allocation2 + $0xf8] sm:$0xff] }
 0x1a9   :  { %11919 = vst [vmem:[#allocation45_spill] sm:$0xff] %v8991_v5  ;;  %v8995_v1 = vadd.f32 %v495_v60, %v494_v37  ;;  %v8997_v41 = vadd.f32 %v501_v63, %v500_v38  ;;  %v507_v42 = vrot.slane %v506_v33, 2  ;;  %v513_v29 = vrot.slane %v512_v34, 2  ;;  %v8999_v30 = vpop.permute.xlu1 %3168  ;;  %v265_v5 = vld [vmem:[#allocation2 + $0x108] sm:$0xff] }
 0x1aa   :  { %11920 = vst [vmem:[#allocation46_spill] sm:$0xff] %v8999_v30  ;;  %v518_v4 = vadd.f32 %v517_v49, %v359_v10  ;;  %v524_v6 = vadd.f32 %v523_v14, %v360_v0  ;;  %v363_v31 = vmul.f32 %v8961_v17, %v258_v12  ;;  %v364_v32 = vmul.f32 %v8961_v17, %v259_v48 }
 0x1ab   :  { %v508_v43 = vadd.f32 %v507_v42, %v506_v33  ;;  %v9005_v39 = vadd.f32 %v513_v29, %v512_v34  ;;  %v365_v40 = vmul.f32 %v8961_v17, %v260_v15  ;;  %v366_v60 = vmul.f32 %v8961_v17, %v261_v16 }
 0x1ac   :  { %v519_v37 = vrot.slane %v518_v4, 2  ;;  %v525_v38 = vrot.slane %v524_v6, 2  ;;  %v529_v10 = vrot.slane %v361_v27, 4  ;;  %v535_v12 = vrot.slane %v362_v11, 4 }
 0x1ad   :  { %v509_v63 = vrot.slane %v508_v43, 1  ;;  %v541_v14 = vrot.slane %v363_v31, 4  ;;  %v547_v35 = vrot.slane %v364_v32, 4  ;;  %v553_v29 = vrot.slane %v365_v40, 4  ;;  %v9014_v18 = vpop.permute.xlu1 %3443 }
 0x1ae   :  { %v520_v49 = vadd.f32 %v519_v37, %v518_v4  ;;  %v9010_v48 = vadd.f32 %v525_v38, %v524_v6  ;;  %v530_v34 = vadd.f32 %v529_v10, %v361_v27  ;;  %v536_v42 = vadd.f32 %v535_v12, %v362_v11  ;;  %11923 = vst [vmem:[#allocation49_spill] sm:$0xff] %v9014_v18  ;;  %v264_v38 = vld [vmem:[#allocation2 + $0x100] sm:$0xff]  ;;  %v266_v11 = vld [vmem:[#allocation2 + $0x110] sm:$0xff] }
 0x1af   :  { %v9012_v33 = vadd.f32 %v509_v63, %v508_v43  ;;  %v542_v16 = vadd.f32 %v541_v14, %v363_v31  ;;  %v548_v0 = vadd.f32 %v547_v35, %v364_v32  ;;  %v554_v6 = vadd.f32 %v553_v29, %v365_v40  ;;  %v267_v35 = vld [vmem:[#allocation2 + $0x118] sm:$0xff] }
 0x1b0   :  { %11921 = vst [vmem:[#allocation47_spill] sm:$0xff] %v9010_v48  ;;  %v521_v15 = vrot.slane %v520_v49, 1  ;;  %v531_v26 = vrot.slane %v530_v34, 2  ;;  %v537_v4 = vrot.slane %v536_v42, 2  ;;  %v559_v37 = vrot.slane %v366_v60, 4  ;;  %v271_v48 = vld [vmem:[#allocation2 + $0x138] sm:$0xff] }
 0x1b1   :  { %11922 = vst [vmem:[#allocation48_spill] sm:$0xff] %v9012_v33  ;;  %v543_v43 = vrot.slane %v542_v16, 2  ;;  %v549_v27 = vrot.slane %v548_v0, 2  ;;  %v367_v63 = vmul.f32 %v8975_v54, %v262_v36  ;;  %v555_v31 = vrot.slane %v554_v6, 2  ;;  %v272_v33 = vld [vmem:[#allocation2 + $0x140] sm:$0xff] }
 0x1b2   :  { %v9017_v24 = vadd.f32 %v521_v15, %v520_v49  ;;  %v9020_v10 = vadd.f32 %v531_v26, %v530_v34  ;;  %v9022_v12 = vadd.f32 %v537_v4, %v536_v42  ;;  %v560_v32 = vadd.f32 %v559_v37, %v366_v60  ;;  %v9030_v26 = vpop.permute.xlu1 %3176 }
 0x1b3   :  { %v544_v14 = vadd.f32 %v543_v43, %v542_v16  ;;  %v9024_v17 = vadd.f32 %v549_v27, %v548_v0  ;;  %v368_v40 = vmul.f32 %v8975_v54, %v263_v20  ;;  %v369_v49 = vmul.f32 %v8975_v54, %v264_v38  ;;  %11925 = vst [vmem:[#allocation51_spill] sm:$0xff] %v9030_v26  ;;  %v268_v16 = vld [vmem:[#allocation2 + $0x120] sm:$0xff]  ;;  %v269_v38 = vld [vmem:[#allocation2 + $0x128] sm:$0xff] }
 0x1b4   :  { %11924 = vst [vmem:[#allocation50_spill] sm:$0xff] %v9017_v24  ;;  %v556_v29 = vadd.f32 %v555_v31, %v554_v6  ;;  %v561_v15 = vrot.slane %v560_v32, 2  ;;  %v370_v24 = vmul.f32 %v8975_v54, %v265_v5  ;;  %v371_v36 = vmul.f32 %v8975_v54, %v266_v11  ;;  %v270_v6 = vld [vmem:[#allocation2 + $0x130] sm:$0xff] }
 0x1b5   :  { %v545_v34 = vrot.slane %v544_v14, 1  ;;  %v372_v42 = vmul.f32 %v8975_v54, %v267_v35  ;;  %v565_v60 = vrot.slane %v367_v63, 4  ;;  %v571_v4 = vrot.slane %v368_v40, 4 }
 0x1b6   :  { %v557_v0 = vrot.slane %v556_v29, 1  ;;  %v9033_v37 = vadd.f32 %v561_v15, %v560_v32  ;;  %v577_v20 = vrot.slane %v369_v49, 4  ;;  %v583_v43 = vrot.slane %v370_v24, 4 }
 0x1b7   :  { %v9035_v27 = vadd.f32 %v545_v34, %v544_v14  ;;  %v9037_v5 = vadd.f32 %v565_v60, %v367_v63  ;;  %v9039_v11 = vadd.f32 %v571_v4, %v368_v40  ;;  %v589_v31 = vrot.slane %v371_v36, 4  ;;  %v273_v14 = vld [vmem:[#allocation2 + $0x148] sm:$0xff]  ;;  %v9052_v4 = vpop.permute.xlu1 %3451 }
 0x1b8   :  { %11926 = vst [vmem:[#allocation52_spill] sm:$0xff] %v9033_v37  ;;  %v9041_v54 = vadd.f32 %v557_v0, %v556_v29  ;;  %v578_v35 = vadd.f32 %v577_v20, %v369_v49  ;;  %v9043_v59 = vadd.f32 %v583_v43, %v370_v24  ;;  %v595_v32 = vrot.slane %v372_v42, 4  ;;  %11930 = vst [vmem:[#allocation56_spill] sm:$0xff] %v9052_v4  ;;  %v274_v37 = vld [vmem:[#allocation2 + $0x150] sm:$0xff] }
 0x1b9   :  { %11927 = vst [vmem:[#allocation53_spill] sm:$0xff] %v9035_v27  ;;  %v590_v3 = vadd.f32 %v589_v31, %v371_v36  ;;  %v373_v63 = vmul.f32 %v8977_v7, %v268_v16  ;;  %v374_v29 = vmul.f32 %v8977_v7, %v269_v38  ;;  %v375_v49 = vmul.f32 %v8977_v7, %v270_v6  ;;  %v676_v36 = vpop.xlane.xlu0 %675 }
 0x1ba   :  { %11928 = vst [vmem:[#allocation54_spill] sm:$0xff] %v9041_v54  ;;  %v579_v34 = vrot.slane %v578_v35, 2  ;;  %v9049_v60 = vadd.f32 %v595_v32, %v372_v42  ;;  %v376_v0 = vmul.f32 %v8977_v7, %v271_v48  ;;  %v377_v20 = vmul.f32 %v8977_v7, %v272_v33  ;;  %v275_v54 = vld [vmem:[#allocation2 + $0x158] sm:$0xff] }
 0x1bb   :  { %v591_v24 = vrot.slane %v590_v3, 2  ;;  %v378_v31 = vmul.f32 %v8977_v7, %v273_v14  ;;  %v601_v42 = vrot.slane %v373_v63, 4  ;;  %v607_v38 = vrot.slane %v374_v29, 4 }
 0x1bc   :  { %11929 = vst [vmem:[#allocation55_spill] sm:$0xff] %v9049_v60  ;;  %v9057_v43 = vadd.f32 %v579_v34, %v578_v35  ;;  %v613_v40 = vrot.slane %v375_v49, 4  ;;  %v619_v15 = vrot.slane %v376_v0, 4  ;;  %v625_v33 = vrot.slane %v377_v20, 4  ;;  %v276_v35 = vld [vmem:[#allocation2 + $0x160] sm:$0xff]  ;;  %v277_v34 = vld [vmem:[#allocation2 + $0x168] sm:$0xff] }
 0x1bd   :  { %v9061_v32 = vadd.f32 %v591_v24, %v590_v3  ;;  %v9064_v48 = vadd.f32 %v601_v42, %v373_v63  ;;  %v631_v27 = vrot.slane %v378_v31, 4  ;;  %v9067_v7 = vadd.f32 %v607_v38, %v374_v29  ;;  %v279_v24 = vld [vmem:[#allocation2 + $0x178] sm:$0xff]  ;;  %v9079_v42 = vpop.permute.xlu1 %3846 }
 0x1be   :  { %11931 = vst [vmem:[#allocation57_spill] sm:$0xff] %v9057_v43  ;;  %v614_v3 = vadd.f32 %v613_v40, %v375_v49  ;;  %v9069_v14 = vadd.f32 %v619_v15, %v376_v0  ;;  %v626_v60 = vadd.f32 %v625_v33, %v377_v20  ;;  %v9074_v6 = vmul.f32 %v8983_v44, %v274_v37  ;;  %v294_v40 = vpop.permute.xlu0 %293  ;;  %v238_v49 = vld [vmem:[#allocation2 + $0x30] sm:$0xff]  ;;  %v239_v20 = vld [vmem:[#allocation2 + $0x38] sm:$0xff] }
 0x1bf   :  { %11932 = vst [vmem:[#allocation58_spill] sm:$0xff] %v9061_v32  ;;  %v9071_v21 = vadd.f32 %v631_v27, %v378_v31  ;;  %v9077_v63 = vmul.f32 %v8983_v44, %v275_v54  ;;  %11934 = vst [vmem:[#allocation60_spill] sm:$0xff] %v9079_v42  ;;  %v381_v16 = vmul.f32 %v8983_v44, %v276_v35  ;;  %v240_v31 = vld [vmem:[#allocation2 + $0x40] sm:$0xff]  ;;  %v241_v32 = vld [vmem:[#allocation2 + $0x48] sm:$0xff] }
 0x1c0   :  { %v615_v43 = vrot.slane %v614_v3, 2  ;;  %v9083_v29 = vmul.f32 %v8983_v44, %v277_v34  ;;  %v383_v15 = vmul.f32 %v8983_v44, %v278_v28  ;;  %v627_v27 = vrot.slane %v626_v60, 2  ;;  %v242_v28 = vld [vmem:[#allocation2 + $0x50] sm:$0xff] }
 0x1c1   :  { %11933 = vst [vmem:[#allocation59_spill] sm:$0xff] %v9071_v21  ;;  %v9087_v0 = vmul.f32 %v8983_v44, %v279_v24  ;;  %v649_v33 = vrot.slane %v381_v16, 4  ;;  %v243_v21 = vld [vmem:[#allocation2 + $0x58] sm:$0xff]  ;;  %v677_v24 = vmax.f32 %v676_v36, 1.0  ;;  %v343_v26 = vmul.f32 %v294_v40, %v238_v49  ;;  %v9101_v19 = vpop.permute.xlu1 %3854 }
 0x1c2   :  { %v9091_v38 = vadd.f32 %v615_v43, %v614_v3  ;;  %v661_v34 = vrot.slane %v383_v15, 4  ;;  %v9094_v4 = vadd.f32 %v627_v27, %v626_v60  ;;  %v344_v2 = vmul.f32 %v294_v40, %v239_v20  ;;  %11940 = vst [vmem:[#allocation66_spill] sm:$0xff] %v9101_v19 }
 0x1c3   :  { %11935 = vst [vmem:[#allocation61_spill] sm:$0xff] %v9087_v0  ;;  %v9097_v37 = vadd.f32 %v649_v33, %v381_v16  ;;  %v345_v43 = vmul.f32 %v294_v40, %v240_v31  ;;  %8187 = vrcp.f32 %v677_v24  ;;  %v346_v3 = vmul.f32 %v294_v40, %v241_v32 }
 0x1c4   :  { %11936 = vst [vmem:[#allocation62_spill] sm:$0xff] %v9091_v38  ;;  %11937 = vst [vmem:[#allocation63_spill] sm:$0xff] %v9094_v4  ;;  %v9099_v54 = vadd.f32 %v661_v34, %v383_v15  ;;  %v347_v38 = vmul.f32 %v294_v40, %v242_v28  ;;  %v348_v35 = vmul.f32 %v294_v40, %v243_v21  ;;  %v421_v27 = vrot.slane %v343_v26, 4 }
 0x1c5   :  { %11938 = vst [vmem:[#allocation64_spill] sm:$0xff] %v9097_v37  ;;  %v427_v44 = vrot.slane %v344_v2, 4  ;;  %v433_v36 = vrot.slane %v345_v43, 4  ;;  %v439_v49 = vrot.slane %v346_v3, 4  ;;  %v3307_v32 = vmul.f32 %v8914_v45, %v8999_v30 }
 0x1c6   :  { %11939 = vst [vmem:[#allocation65_spill] sm:$0xff] %v9099_v54  ;;  %v445_v16 = vrot.slane %v347_v38, 4  ;;  %v451_v33 = vrot.slane %v348_v35, 4  ;;  %v422_v15 = vadd.f32 %v421_v27, %v343_v26  ;;  %v3582_v21 = vmul.f32 %v8917_v46, %v9014_v18 }
 0x1c7   :  { %v428_v20 = vadd.f32 %v427_v44, %v344_v2  ;;  %v434_v40 = vadd.f32 %v433_v36, %v345_v43  ;;  %v440_v31 = vadd.f32 %v439_v49, %v346_v3  ;;  %v3985_v54 = vmul.f32 %v8920_v47, %v9079_v42  ;;  %v9111_v44 = vpop.permute.xlu1 %4250 }
 0x1c8   :  { %v446_v34 = vadd.f32 %v445_v16, %v347_v38  ;;  %v452_v28 = vadd.f32 %v451_v33, %v348_v35  ;;  %v423_v24 = vrot.slane %v422_v15, 2  ;;  %v3710_v58 = vadd.f32 %v3582_v21, %v3307_v32  ;;  %11941 = vst [vmem:[#allocation67_spill] sm:$0xff] %v9111_v44  ;;  %v9116_v16 = vpop.permute.xlu0 %3164 }
 0x1c9   :  { %v429_v60 = vrot.slane %v428_v20, 2  ;;  %v435_v4 = vrot.slane %v434_v40, 2  ;;  %v441_v0 = vrot.slane %v440_v31, 2  ;;  %v11942_v43 = vrot.slane %v8997_v41, 1  ;;  %11943 = vst [vmem:[#allocation68_spill] sm:$0xff] %v9116_v16 }
 0x1ca   :  { %v447_v26 = vrot.slane %v446_v34, 2  ;;  %v453_v2 = vrot.slane %v452_v28, 2  ;;  %v424_v27 = vadd.f32 %v423_v24, %v422_v15  ;;  %v4113_v19 = vadd.f32 %v3985_v54, %v3710_v58 }
 0x1cb   :  { %v430_v37 = vadd.f32 %v429_v60, %v428_v20  ;;  %v504_v38 = vadd.f32 %v11942_v43, %v8997_v41  ;;  %v436_v35 = vadd.f32 %v435_v4, %v434_v40  ;;  %v442_v3 = vadd.f32 %v441_v0, %v440_v31 }
 0x1cc   :  { %v448_v36 = vadd.f32 %v447_v26, %v446_v34  ;;  %v454_v49 = vadd.f32 %v453_v2, %v452_v28  ;;  %v425_v33 = vrot.slane %v424_v27, 1  ;;  %v4261_v21 = vadd.f32 %v9111_v44, %v4113_v19 }
 0x1cd   :  { %v431_v32 = vrot.slane %v430_v37, 1  ;;  %v539_v42 = vrot.slane %v9022_v12, 1  ;;  %v9120_v18 = vpop.eup %8187  ;;  %v437_v60 = vrot.slane %v436_v35, 1  ;;  %v443_v58 = vrot.slane %v442_v3, 1 }
 0x1ce   :  { %v449_v54 = vrot.slane %v448_v36, 1  ;;  %v455_v15 = vrot.slane %v454_v49, 1  ;;  %v680_v41 = vrot.slane %v9120_v18, 1  ;;  %v426_v4 = vadd.f32 %v425_v33, %v424_v27  ;;  %v9131_v27 = vpop.permute.xlu0 %3439 }
 0x1cf   :  { %v432_v0 = vadd.f32 %v431_v32, %v430_v37  ;;  %v4389_v20 = vmax.f32 %v4261_v21, 0.0  ;;  %v438_v40 = vadd.f32 %v437_v60, %v436_v35  ;;  %v444_v31 = vadd.f32 %v443_v58, %v442_v3  ;;  %11945 = vst [vmem:[#allocation70_spill] sm:$0xff] %v9131_v27 }
 0x1d0   :  { %v450_v34 = vadd.f32 %v449_v54, %v448_v36  ;;  %v456_v28 = vadd.f32 %v455_v15, %v454_v49  ;;  %v9123_v24 = vmul.f32 %v680_v41, %v426_v4  ;;  %v540_v2 = vadd.f32 %v539_v42, %v9022_v12 }
 0x1d1   :  { %v702_v19 = vmul.f32 %v680_v41, %v432_v0  ;;  %v4520_v26 = vsel %vm4516_vm1, %v4389_v20, 0.0  ;;  %v703_v43 = vmul.f32 %v680_v41, %v438_v40  ;;  %v9127_v44 = vmul.f32 %v680_v41, %v444_v31 }
 0x1d2   :  { %v705_v30 = vmul.f32 %v680_v41, %v450_v34  ;;  %v9129_v9 = vmul.f32 %v680_v41, %v456_v28  ;;  %4521 = vadd.xlane.f32.xlu1 %v4520_v26  ;;  %v11946_v37 = vrot.slane %v9039_v11, 2  ;;  %v609_v3 = vrot.slane %v9067_v7, 2  ;;  %v9167_v34 = vpop.permute.xlu0 %3172 }
 0x1d3   :  { %v11947_v36 = vrot.slane %v9077_v63, 4  ;;  %v9141_v12 = vrot.slane %v9120_v18, 2  ;;  %v751_v42 = vpack.c.bf16 %v703_v43, %v703_v43  ;;  %v9144_v32 = vrot.slane %v9120_v18, 3 }
 0x1d4   :  { %11944 = vst [vmem:[#allocation69_spill] sm:$0xff] %v9129_v9  ;;  %v574_v35 = vadd.f32 %v11946_v37, %v9039_v11  ;;  %v753_v33 = vpack.c.bf16 %v705_v30, %v705_v30  ;;  %v9147_v21 = vrot.slane %v9120_v18, 4  ;;  %v610_v11 = vadd.f32 %v609_v3, %v9067_v7 }
 0x1d5   :  { %v644_v49 = vadd.f32 %v11947_v36, %v9077_v63  ;;  %11948 = vst [vmem:[#allocation71_spill] sm:$0xff] %v9141_v12  ;;  %v9151_v54 = vrot.slane %v9120_v18, 5  ;;  %v9153_v63 = vunpack.c.l.b16 %v751_v42  ;;  %v9158_v30 = vrot.slane %v9120_v18, 6 }
 0x1d6   :  { %11949 = vst [vmem:[#allocation72_spill] sm:$0xff] %v9147_v21  ;;  %v575_v60 = vrot.slane %v574_v35, 1  ;;  %v9155_v15 = vunpack.c.l.b16 %v753_v33  ;;  %v9161_v41 = vrot.slane %v9120_v18, 7  ;;  %v611_v0 = vrot.slane %v610_v11, 1 }
 0x1d7   :  { %v645_v58 = vrot.slane %v644_v49, 2  ;;  %11950 = vst [vmem:[#allocation73_spill] sm:$0xff] %v9153_v63  ;;  %11952 = vst [vmem:[#allocation75_spill] sm:$0xff] %v9158_v30  ;;  %v696_v7 = vmul.f32 %v9120_v18, %v8981_v62  ;;  %v708_v28 = vmul.f32 %v9141_v12, %v8965_v23  ;;  %v714_v26 = vmul.f32 %v9144_v32, %v504_v38 }
 0x1d8   :  { %11951 = vst [vmem:[#allocation74_spill] sm:$0xff] %v9155_v15  ;;  %11953 = vst [vmem:[#allocation76_spill] sm:$0xff] %v9161_v41  ;;  %v576_v4 = vadd.f32 %v575_v60, %v574_v35  ;;  %v612_v43 = vadd.f32 %v611_v0, %v610_v11  ;;  %v720_v35 = vmul.f32 %v9147_v21, %v540_v2 }
 0x1d9   :  { %v646_v20 = vadd.f32 %v645_v58, %v644_v49  ;;  %v744_v62 = vpack.c.bf16 %v696_v7, %v696_v7  ;;  %v750_v36 = vpack.c.bf16 %v702_v19, %v702_v19  ;;  %v756_v49 = vpack.c.bf16 %v708_v28, %v708_v28  ;;  %v9176_v7 = vpop.permute.xlu0 %3447 }
 0x1da   :  { %v726_v3 = vmul.f32 %v9151_v54, %v576_v4  ;;  %v762_v42 = vpack.c.bf16 %v714_v26, %v714_v26  ;;  %v732_v60 = vmul.f32 %v9158_v30, %v612_v43  ;;  %v768_v58 = vpack.c.bf16 %v720_v35, %v720_v35 }
 0x1db   :  { %v647_v37 = vrot.slane %v646_v20, 1  ;;  %v1160_v38 = vunpack.c.l.b16 %v744_v62  ;;  %v1166_v31 = vunpack.c.l.b16 %v750_v36  ;;  %v1172_v11 = vunpack.c.l.b16 %v756_v49 }
 0x1dc   :  { %v774_v23 = vpack.c.bf16 %v726_v3, %v726_v3  ;;  %v1178_v0 = vunpack.c.l.b16 %v762_v42  ;;  %v780_v40 = vpack.c.bf16 %v732_v60, %v732_v60  ;;  %v1184_v4 = vunpack.c.l.b16 %v768_v58 }
 0x1dd   :  { %v648_v33 = vadd.f32 %v647_v37, %v646_v20  ;;  %v1228_v19 = vrot.slane %v1166_v31, 7  ;;  %v1230_v28 = vrot.slane %v1172_v11, 6  ;;  %v11954_v20 = vrot.slane %v8995_v1, 1 }
 0x1de   :  { %v1190_v15 = vunpack.c.l.b16 %v774_v23  ;;  %v1232_v26 = vrot.slane %v1178_v0, 5  ;;  %v1196_v35 = vunpack.c.l.b16 %v780_v40  ;;  %v1234_v3 = vrot.slane %v1184_v4, 4 }
 0x1df   :  { %v738_v2 = vmul.f32 %v9161_v41, %v648_v33  ;;  %v498_v43 = vadd.f32 %v11954_v20, %v8995_v1  ;;  %v1229_v36 = vsel %vm1208_vm2, %v1228_v19, %v1160_v38  ;;  %v533_v49 = vrot.slane %v9020_v10, 1 }
 0x1e0   :  { %v1236_v62 = vrot.slane %v1190_v15, 3  ;;  %v11955_v42 = vrot.slane %v9037_v5, 2  ;;  %v603_v31 = vrot.slane %v9064_v48, 2  ;;  %v1231_v58 = vsel %vm1211_vm3, %v1230_v28, %v1229_v36  ;;  %v9197_v28 = vpop.permute.xlu0 %3842 }
 0x1e1   :  { %v786_v37 = vpack.c.bf16 %v738_v2, %v738_v2  ;;  %v1238_v23 = vrot.slane %v1196_v35, 2  ;;  %v11956_v1 = vrot.slane %v9074_v6, 4  ;;  %v1233_v15 = vsel %vm1214_vm4, %v1232_v26, %v1231_v58  ;;  %11957 = vst [vmem:[#allocation77_spill] sm:$0xff] %v9197_v28 }
 0x1e2   :  { %v568_v33 = vadd.f32 %v11955_v42, %v9037_v5  ;;  %v534_v38 = vadd.f32 %v533_v49, %v9020_v10  ;;  %v604_v0 = vadd.f32 %v603_v31, %v9064_v48  ;;  %v1235_v2 = vsel %vm1217_vm5, %v1234_v3, %v1233_v15 }
 0x1e3   :  { %v1202_v60 = vunpack.c.l.b16 %v786_v37  ;;  %v638_v40 = vadd.f32 %v11956_v1, %v9074_v6  ;;  %v695_v19 = vmul.f32 %v9120_v18, %v8979_v61  ;;  %v1237_v20 = vsel %vm1220_vm6, %v1236_v62, %v1235_v2 }
 0x1e4   :  { %v569_v11 = vrot.slane %v568_v33, 1  ;;  %v605_v6 = vrot.slane %v604_v0, 1  ;;  %v707_v26 = vmul.f32 %v9141_v12, %v8963_v22  ;;  %v1239_v10 = vsel %vm1223_vm7, %v1238_v23, %v1237_v20 }
 0x1e5   :  { %v1240_v5 = vrot.slane %v1202_v60, 1  ;;  %v639_v4 = vrot.slane %v638_v40, 2  ;;  %v713_v48 = vmul.f32 %v9144_v32, %v498_v43  ;;  %v719_v3 = vmul.f32 %v9147_v21, %v534_v38 }
 0x1e6   :  { %v570_v37 = vadd.f32 %v569_v11, %v568_v33  ;;  %v606_v49 = vadd.f32 %v605_v6, %v604_v0  ;;  %v743_v42 = vpack.c.bf16 %v695_v19, %v695_v19  ;;  %v749_v33 = vpack.c.bf16 %v9123_v24, %v9123_v24  ;;  %v9214_v11 = vpop.permute.xlu0 %3850 }
 0x1e7   :  { %v640_v35 = vadd.f32 %v639_v4, %v638_v40  ;;  %v1241_v36 = vsel %vm1226_vm8, %v1240_v5, %v1239_v10  ;;  %v755_v22 = vpack.c.bf16 %v707_v26, %v707_v26  ;;  %v761_v58 = vpack.c.bf16 %v713_v48, %v713_v48 }
 0x1e8   :  { %v725_v61 = vmul.f32 %v9151_v54, %v570_v37  ;;  %v9207_v31 = vpack.c.b16 %v1241_v36, %v1241_v36  ;;  %v731_v60 = vmul.f32 %v9158_v30, %v606_v49  ;;  %v767_v23 = vpack.c.bf16 %v719_v3, %v719_v3 }
 0x1e9   :  { %v641_v62 = vrot.slane %v640_v35, 1  ;;  %v1159_v40 = vunpack.c.l.b16 %v743_v42  ;;  %v1165_v15 = vunpack.c.l.b16 %v749_v33  ;;  %v1171_v38 = vunpack.c.l.b16 %v755_v22 }
 0x1ea   :  { %11958 = vst [vmem:[#allocation78_spill] sm:$0xff] %v9207_v31  ;;  %v773_v43 = vpack.c.bf16 %v725_v61, %v725_v61  ;;  %2782 = vmatprep.mubr.bf16.mxu0 %v9207_v31  ;;  %2905 = vmatprep.mubr.bf16.mxu1 %v9207_v31  ;;  %v779_v0 = vpack.c.bf16 %v731_v60, %v731_v60  ;;  %v1177_v2 = vunpack.c.l.b16 %v761_v58  ;;  %v1183_v5 = vunpack.c.l.b16 %v767_v23 }
 0x1eb   :  { %v642_v1 = vadd.f32 %v641_v62, %v640_v35  ;;  %v1207_v19 = vrot.slane %v1165_v15, 7  ;;  %v1210_v20 = vrot.slane %v1171_v38, 6  ;;  %v3306_v37 = vmul.f32 %v8914_v45, %v9116_v16 }
 0x1ec   :  { %v1189_v24 = vunpack.c.l.b16 %v773_v43  ;;  %v1195_v6 = vunpack.c.l.b16 %v779_v0  ;;  %v1213_v26 = vrot.slane %v1177_v2, 5  ;;  %v1216_v10 = vrot.slane %v1183_v5, 4  ;;  %v9232_v43 = vpop.permute.xlu0 %4246  ;;  %v7788_v2 = vld [vmem:[#allocation6 + $0x300] ss:$24 sps:$4 sm:$0xff]  }
 0x1ed   :  { %v737_v4 = vmul.f32 %v9161_v41, %v642_v1  ;;  %v1209_v3 = vsel %vm1208_vm2, %v1207_v19, %v1159_v40  ;;  %v3581_v36 = vmul.f32 %v8917_v46, %v9131_v27  ;;  %v3984_v49 = vmul.f32 %v8920_v47, %v9197_v28  ;;  %11959 = vst [vmem:[#allocation79_spill] sm:$0xff] %v9232_v43 }
 0x1ee   :  { %v1219_v35 = vrot.slane %v1189_v24, 3  ;;  %v1212_v61 = vsel %vm1211_vm3, %v1210_v20, %v1209_v3  ;;  %v1222_v42 = vrot.slane %v1195_v6, 2  ;;  %v3338_v62 = vmul.f32 %v8923_v50, %v9116_v16 }
 0x1ef   :  { %v785_v48 = vpack.c.bf16 %v737_v4, %v737_v4  ;;  %v3613_v33 = vmul.f32 %v8926_v51, %v9131_v27  ;;  %v1215_v60 = vsel %vm1214_vm4, %v1213_v26, %v1212_v61  ;;  %v3709_v58 = vadd.f32 %v3581_v36, %v3306_v37  ;;  %v7791_v37 = vld [vmem:[#allocation6 + $0x308] ss:$24 sps:$4 sm:$0xff]  }
 0x1f0   :  { %v4016_v23 = vmul.f32 %v8929_v52, %v9197_v28  ;;  %v1218_v1 = vsel %vm1217_vm5, %v1216_v10, %v1215_v60  ;;  %v11960_v15 = vrot.slane %v9005_v39, 1  ;;  %v551_v0 = vrot.slane %v9024_v17, 1 }
 0x1f1   :  { %v1201_v22 = vunpack.c.l.b16 %v785_v48  ;;  %v3741_v40 = vadd.f32 %v3613_v33, %v3338_v62  ;;  %v1221_v5 = vsel %vm1220_vm6, %v1219_v35, %v1218_v1  ;;  %v4112_v4 = vadd.f32 %v3984_v49, %v3709_v58  ;;  %v7796_v62 = vld [vmem:[#allocation6 + $0x334] ss:$24 sps:$4 sm:$0xff]   ;;  %v7797_v1 = vld [vmem:[#allocation6 + $0x338] ss:$24 sps:$4 sm:$0xff]  }
 0x1f2   :  { %v516_v38 = vadd.f32 %v11960_v15, %v9005_v39  ;;  %v11961_v19 = vrot.slane %v9043_v59, 2  ;;  %v1224_v6 = vsel %vm1223_vm7, %v1222_v42, %v1221_v5  ;;  %v552_v10 = vadd.f32 %v551_v0, %v9024_v17  ;;  %v7802_v0 = vld [vmem:[#allocation6 + $0x364] ss:$24 sps:$4 sm:$0xff]  }
 0x1f3   :  { %v1225_v24 = vrot.slane %v1201_v22, 1  ;;  %v4144_v26 = vadd.f32 %v4016_v23, %v3741_v40  ;;  %v621_v48 = vrot.slane %v9069_v14, 2  ;;  %v4260_v3 = vadd.f32 %v9232_v43, %v4112_v4  ;;  %v7794_v23 = vld [vmem:[#allocation6 + $0x330] ss:$24 sps:$4 sm:$0xff]   ;;  %v7799_v40 = vld [vmem:[#allocation6 + $0x33c] ss:$24 sps:$4 sm:$0xff]  }
 0x1f4   :  { %v586_v20 = vadd.f32 %v11961_v19, %v9043_v59  ;;  %v11962_v35 = vrot.slane %v9083_v29, 4  ;;  %v698_v17 = vmul.f32 %v9120_v18, %v8987_v13  ;;  %v710_v58 = vmul.f32 %v9141_v12, %v8969_v25  ;;  %v7805_v5 = vld [vmem:[#allocation6 + $0x36c] ss:$24 sps:$4 sm:$0xff]  }
 0x1f5   :  { %v1227_v39 = vsel %vm1226_vm8, %v1225_v24, %v1224_v6  ;;  %v4292_v59 = vadd.f32 %v9232_v43, %v4144_v26  ;;  %v622_v42 = vadd.f32 %v621_v48, %v9069_v14  ;;  %v4388_v33 = vmax.f32 %v4260_v3, 0.0 }
 0x1f6   :  { %v587_v36 = vrot.slane %v586_v20, 1  ;;  %v656_v49 = vadd.f32 %v11962_v35, %v9083_v29  ;;  %v9251_v61 = vpack.c.b16 %v1227_v39, %v1227_v39  ;;  %v716_v14 = vmul.f32 %v9144_v32, %v516_v38 }
 0x1f7   :  { %v4420_v29 = vmax.f32 %v4292_v59, 0.0  ;;  %v623_v15 = vrot.slane %v622_v42, 1  ;;  %v722_v13 = vmul.f32 %v9147_v21, %v552_v10  ;;  %v4517_v24 = vsel %vm4516_vm1, %v4388_v33, 0.0  ;;  %v7803_v59 = vld [vmem:[#allocation6 + $0x368] ss:$24 sps:$4 sm:$0xff]  }
 0x1f8   :  { %11963 = vst [vmem:[#allocation80_spill] sm:$0xff] %v9251_v61  ;;  %v588_v22 = vadd.f32 %v587_v36, %v586_v20  ;;  %v657_v60 = vrot.slane %v656_v49, 2  ;;  %2783 = vmatmul.mubr.bf16.vlgmr.msra.gmra.mrb[0].mxu0 %v9251_v61  ;;  %2906 = vmatmul.mubr.bf16.vlgmr.msra.gmra.mrb[0].mxu1 %v9251_v61  ;;  %v746_v19 = vpack.c.bf16 %v698_v17, %v698_v17 }
 0x1f9   :  { %2792 = vmatpush1.bf16.msra.mxu0 %v7788_v2  ;;  %2915 = vmatpush1.bf16.msra.mxu1 %v7791_v37  ;;  %v4613_v20 = vsel %vm4516_vm1, %v4420_v29, 0.0  ;;  %v624_v6 = vadd.f32 %v623_v15, %v622_v42  ;;  %v752_v26 = vpack.c.bf16 %v9127_v44, %v9127_v44  ;;  %v758_v38 = vpack.c.bf16 %v710_v58, %v710_v58  ;;  %v7808_v44 = vld [vmem:[#allocation6 + $0x394] ss:$24 sps:$4 sm:$0xff]  }
 0x1fa   :  { %v658_v25 = vadd.f32 %v657_v60, %v656_v49  ;;  %v728_v4 = vmul.f32 %v9151_v54, %v588_v22  ;;  %4518 = vadd.xlane.f32.xlu0 %v4517_v24  ;;  %2793 = vmatprep.subr.bf16.mxu0 %v7796_v62  ;;  %v764_v48 = vpack.c.bf16 %v716_v14, %v716_v14  ;;  %v1162_v3 = vunpack.c.l.b16 %v746_v19  ;;  %v7800_v49 = vld [vmem:[#allocation6 + $0x360] ss:$24 sps:$4 sm:$0xff]   ;;  %v7811_v24 = vld [vmem:[#allocation6 + $0x39c] ss:$24 sps:$4 sm:$0xff]   ;;  %v7806_v19 = vld [vmem:[#allocation6 + $0x390] ss:$24 sps:$4 sm:$0xff]  }
 0x1fb   :  { %4614 = vadd.xlane.f32.xlu1 %v4613_v20  ;;  %v770_v2 = vpack.c.bf16 %v722_v13, %v722_v13  ;;  %2916 = vmatprep.subr.bf16.mxu1 %v7799_v40  ;;  %v734_v39 = vmul.f32 %v9158_v30, %v624_v6  ;;  %v1168_v36 = vunpack.c.l.b16 %v752_v26  ;;  %v1174_v35 = vunpack.c.l.b16 %v758_v38  ;;  %v7809_v20 = vld [vmem:[#allocation6 + $0x398] ss:$24 sps:$4 sm:$0xff]   ;;  %v7814_v38 = vld [vmem:[#allocation6 + $0x3c4] ss:$24 sps:$4 sm:$0xff]  }
 0x1fc   :  { %v659_v10 = vrot.slane %v658_v25, 1  ;;  %v776_v37 = vpack.c.bf16 %v728_v4, %v728_v4  ;;  %v1180_v42 = vunpack.c.l.b16 %v764_v48  ;;  %v3310_v40 = vmul.f32 %v8932_v53, %v9116_v16  ;;  %v7883_v30 = vld [vmem:[#allocation6 + $0x5dc] ss:$24 sps:$4 sm:$0xff]  }
 0x1fd   :  { %v1186_v33 = vunpack.c.l.b16 %v770_v2  ;;  %2794 = vmatpush1.bf16.msra.mxu0 %v7794_v23  ;;  %2917 = vmatpush1.bf16.msra.mxu1 %v7797_v1  ;;  %v782_v62 = vpack.c.bf16 %v734_v39, %v734_v39  ;;  %v1256_v60 = vrot.slane %v1168_v36, 7  ;;  %v1258_v58 = vrot.slane %v1174_v35, 6 }
 0x1fe   :  { %v660_v17 = vadd.f32 %v659_v10, %v658_v25  ;;  %v1192_v22 = vunpack.c.l.b16 %v776_v37  ;;  %2795 = vmatprep.subr.bf16.mxu0 %v7802_v0  ;;  %2918 = vmatprep.subr.bf16.mxu1 %v7805_v5  ;;  %v1260_v15 = vrot.slane %v1180_v42, 5  ;;  %v3585_v23 = vmul.f32 %v8935_v55, %v9131_v27  ;;  %v11964_v37 = vld [vmem:[#allocation37_spill] sm:$0xff] }
 0x1ff   :  { %v1262_v14 = vrot.slane %v1186_v33, 4  ;;  %v1198_v25 = vunpack.c.l.b16 %v782_v62  ;;  %v1257_v4 = vsel %vm1208_vm2, %v1256_v60, %v1162_v3  ;;  %v3988_v1 = vmul.f32 %v8950_v8, %v9197_v28  ;;  %v11967_v60 = vld [vmem:[#allocation60_spill] sm:$0xff] }
 0x200   :  { %v740_v29 = vmul.f32 %v9161_v41, %v660_v17  ;;  %v1264_v13 = vrot.slane %v1192_v22, 3  ;;  %v1259_v0 = vsel %vm1211_vm3, %v1258_v58, %v1257_v4  ;;  %v3342_v5 = vmul.f32 %v8938_v56, %v9116_v16  ;;  %v11965_v17 = vld [vmem:[#allocation46_spill] sm:$0xff]  ;;  %v11966_v22 = vld [vmem:[#allocation49_spill] sm:$0xff] }
 0x201   :  { %v3617_v26 = vmul.f32 %v8941_v57, %v9131_v27  ;;  %2796 = vmatpush1.bf16.msra.mxu0 %v7800_v49  ;;  %v1261_v10 = vsel %vm1214_vm4, %v1260_v15, %v1259_v0  ;;  %v1266_v48 = vrot.slane %v1198_v25, 2  ;;  %v3713_v2 = vadd.f32 %v3585_v23, %v3310_v40  ;;  %2919 = vmatpush1.bf16.msra.mxu1 %v7803_v59  ;;  %v7817_v40 = vld [vmem:[#allocation6 + $0x3cc] ss:$24 sps:$4 sm:$0xff]   ;;  %v7815_v23 = vld [vmem:[#allocation6 + $0x3c8] ss:$24 sps:$4 sm:$0xff]  }
 0x202   :  { %v788_v6 = vpack.c.bf16 %v740_v29, %v740_v29  ;;  %v4020_v39 = vmul.f32 %v11964_v37, %v9197_v28  ;;  %2797 = vmatprep.subr.bf16.mxu0 %v7808_v44  ;;  %v1263_v36 = vsel %vm1217_vm5, %v1262_v14, %v1261_v10  ;;  %v3311_v42 = vmul.f32 %v8932_v53, %v11965_v17  ;;  %v7812_v14 = vld [vmem:[#allocation6 + $0x3c0] ss:$24 sps:$4 sm:$0xff]  }
 0x203   :  { %v3745_v35 = vadd.f32 %v3617_v26, %v3342_v5  ;;  %2920 = vmatprep.subr.bf16.mxu1 %v7811_v24  ;;  %v1265_v49 = vsel %vm1220_vm6, %v1264_v13, %v1263_v36  ;;  %v4116_v33 = vadd.f32 %v3988_v1, %v3713_v2  ;;  %v3586_v62 = vmul.f32 %v8935_v55, %v11966_v22  ;;  %v7818_v2 = vld [vmem:[#allocation6 + $0x3f0] ss:$24 sps:$4 sm:$0xff]  }
 0x204   :  { %v1204_v3 = vunpack.c.l.b16 %v788_v6  ;;  %v3989_v58 = vmul.f32 %v8950_v8, %v11967_v60  ;;  %v1267_v59 = vsel %vm1223_vm7, %v1266_v48, %v1265_v49  ;;  %v3308_v15 = vmul.f32 %v8914_v45, %v9167_v34  ;;  %v7823_v49 = vld [vmem:[#allocation6 + $0x3fc] ss:$24 sps:$4 sm:$0xff]  }
 0x205   :  { %v4148_v29 = vadd.f32 %v4020_v39, %v3745_v35  ;;  %2798 = vmatpush1.bf16.msra.mxu0 %v7806_v19  ;;  %v4264_v24 = vadd.f32 %v9232_v43, %v4116_v33  ;;  %v3714_v13 = vadd.f32 %v3586_v62, %v3311_v42  ;;  %v3583_v25 = vmul.f32 %v8917_v46, %v9176_v7  ;;  %v9309_v39 = vpop.permute.xlu0 %4254  ;;  %v11969_v62 = vld [vmem:[#allocation67_spill] sm:$0xff] }
 0x206   :  { %v1268_v44 = vrot.slane %v1204_v3, 1  ;;  %v3986_v4 = vmul.f32 %v8920_v47, %v9214_v11  ;;  %2921 = vmatpush1.bf16.msra.mxu1 %v7809_v20  ;;  %v3339_v0 = vmul.f32 %v8923_v50, %v11965_v17  ;;  %v3614_v19 = vmul.f32 %v8926_v51, %v11966_v22  ;;  %2799 = vmatprep.subr.bf16.mxu0 %v7814_v38  ;;  %v7820_v20 = vld [vmem:[#allocation6 + $0x3f4] ss:$24 sps:$4 sm:$0xff]   ;;  %v7821_v38 = vld [vmem:[#allocation6 + $0x3f8] ss:$24 sps:$4 sm:$0xff]  }
 0x207   :  { %v4296_v6 = vadd.f32 %v9232_v43, %v4148_v29  ;;  %v4392_v26 = vmax.f32 %v4264_v24, 0.0  ;;  %v4117_v10 = vadd.f32 %v3989_v58, %v3714_v13  ;;  %v3711_v48 = vadd.f32 %v3583_v25, %v3308_v15  ;;  %2922 = vmatprep.subr.bf16.mxu1 %v7817_v40  ;;  %v7829_v29 = vld [vmem:[#allocation6 + $0x42c] ss:$24 sps:$4 sm:$0xff]  }
 0x208   :  { %v1269_v1 = vsel %vm1226_vm8, %v1268_v44, %v1267_v59  ;;  %v3742_v36 = vadd.f32 %v3614_v19, %v3339_v0  ;;  %v4017_v35 = vmul.f32 %v8929_v52, %v11967_v60  ;;  %v3312_v42 = vmul.f32 %v8932_v53, %v9167_v34  ;;  %v7826_v44 = vld [vmem:[#allocation6 + $0x424] ss:$24 sps:$4 sm:$0xff]  }
 0x209   :  { %v9307_v5 = vpack.c.b16 %v1269_v1, %v1269_v1  ;;  %v4424_v3 = vmax.f32 %v4296_v6, 0.0  ;;  %2800 = vmatpush1.bf16.msra.mxu0 %v7812_v14  ;;  %v4529_v33 = vsel %vm4516_vm1, %v4392_v26, 0.0  ;;  %v4265_v58 = vadd.f32 %v11969_v62, %v4117_v10  ;;  %v11970_v26 = vld [vmem:[#allocation36_spill] sm:$0xff]  ;;  %v11971_v10 = vld [vmem:[#allocation38_spill] sm:$0xff] }
 0x20a   :  { %v4114_v40 = vadd.f32 %v3986_v4, %v3711_v48  ;;  %v3587_v59 = vmul.f32 %v8935_v55, %v9176_v7  ;;  %4530 = vadd.xlane.f32.xlu0 %v4529_v33  ;;  %v4145_v14 = vadd.f32 %v4017_v35, %v3742_v36  ;;  %v3990_v24 = vmul.f32 %v8950_v8, %v9214_v11  ;;  %v7824_v33 = vld [vmem:[#allocation6 + $0x420] ss:$24 sps:$4 sm:$0xff]  }
 0x20b   :  { %11968 = vst [vmem:[#allocation37_spill] sm:$0xff] %v9307_v5  ;;  %2823 = vmatprep.mubr.bf16.mxu0 %v9307_v5  ;;  %2946 = vmatprep.mubr.bf16.mxu1 %v9307_v5  ;;  %v4625_v15 = vsel %vm4516_vm1, %v4424_v3, 0.0  ;;  %v3343_v13 = vmul.f32 %v8938_v56, %v11965_v17  ;;  %v4393_v25 = vmax.f32 %v4265_v58, 0.0  ;;  %v3618_v6 = vmul.f32 %v8941_v57, %v11966_v22  ;;  %v7833_v5 = vld [vmem:[#allocation6 + $0x458] ss:$24 sps:$4 sm:$0xff]  }
 0x20c   :  { %2923 = vmatpush1.bf16.msra.mxu1 %v7815_v23  ;;  %4626 = vadd.xlane.f32.xlu1 %v4625_v15  ;;  %v4262_v4 = vadd.f32 %v9309_v39, %v4114_v40  ;;  %v3715_v1 = vadd.f32 %v3587_v59, %v3312_v42  ;;  %v4293_v0 = vadd.f32 %v11969_v62, %v4145_v14  ;;  %v8229_v40 = vld [vmem:[%s11759_s4 + $0x8] sm:$0x7]  ;;  %v11972_v59 = vld [vmem:[#allocation33_spill] sm:$0xff] }
 0x20d   :  { %2801 = vmatprep.subr.bf16.mxu0 %v7820_v20  ;;  %v4021_v19 = vmul.f32 %v11964_v37, %v11967_v60  ;;  %v3314_v23 = vmul.f32 %v11970_v26, %v9116_v16  ;;  %v3589_v48 = vmul.f32 %v11971_v10, %v9131_v27  ;;  %2924 = vmatprep.subr.bf16.mxu1 %v7823_v49  ;;  %v4532_v3 = vsel %vm4516_vm1, %v4393_v25, 0.0  ;;  %v7827_v14 = vld [vmem:[#allocation6 + $0x428] ss:$24 sps:$4 sm:$0xff]  }
 0x20e   :  { %v4390_v36 = vmax.f32 %v4262_v4, 0.0  ;;  %v4118_v35 = vadd.f32 %v3990_v24, %v3715_v1  ;;  %v3746_v42 = vadd.f32 %v3618_v6, %v3343_v13  ;;  %2802 = vmatpush1.bf16.msra.mxu0 %v7818_v2  ;;  %4533 = vadd.xlane.f32.xlu0 %v4532_v3  ;;  %v4421_v20 = vmax.f32 %v4293_v0, 0.0  ;;  %v7832_v4 = vld [vmem:[#allocation6 + $0x454] ss:$24 sps:$4 sm:$0xff]  }
 0x20f   :  { %v3717_v58 = vadd.f32 %v3589_v48, %v3314_v23  ;;  %v9341_v15 = vrot.slane %v8229_v40, %v11972_v59  ;;  %v3340_v49 = vmul.f32 %v8923_v50, %v9167_v34  ;;  %v3615_v25 = vmul.f32 %v8926_v51, %v9176_v7  ;;  %2803 = vmatprep.subr.bf16.mxu0 %v7826_v44  ;;  %v7835_v1 = vld [vmem:[#allocation6 + $0x45c] ss:$24 sps:$4 sm:$0xff]   ;;  %v11973_v23 = vld [vmem:[#allocation51_spill] sm:$0xff]  ;;  %v11974_v44 = vld [vmem:[#allocation56_spill] sm:$0xff] }
 0x210   :  { %2925 = vmatpush1.bf16.msra.mxu1 %v7821_v38  ;;  %v4523_v24 = vsel %vm4516_vm1, %v4390_v36, 0.0  ;;  %v4266_v2 = vadd.f32 %v9309_v39, %v4118_v35  ;;  %v4149_v13 = vadd.f32 %v4021_v19, %v3746_v42  ;;  %v4616_v6 = vsel %vm4516_vm1, %v4421_v20, 0.0  ;;  %v7830_v35 = vld [vmem:[#allocation6 + $0x450] ss:$24 sps:$4 sm:$0xff]   ;;  %v11975_v20 = vld [vmem:[#allocation66_spill] sm:$0xff] }
 0x211   :  { %2926 = vmatprep.subr.bf16.mxu1 %v7829_v29  ;;  %4524 = vadd.xlane.f32.xlu1 %v4523_v24  ;;  %v3992_v38 = vmul.f32 %v9341_v15, %v9197_v28  ;;  %v4018_v0 = vmul.f32 %v8929_v52, %v9214_v11  ;;  %v3309_v48 = vmul.f32 %v8914_v45, %v11973_v23  ;;  %v11976_v45 = vld [vmem:[#allocation62_spill] sm:$0xff] }
 0x212   :  { %v4394_v19 = vmax.f32 %v4266_v2, 0.0  ;;  %v4297_v3 = vadd.f32 %v11969_v62, %v4149_v13  ;;  %v3743_v36 = vadd.f32 %v3615_v25, %v3340_v49  ;;  %v3584_v29 = vmul.f32 %v8917_v46, %v11974_v44  ;;  %2804 = vmatpush1.bf16.msra.mxu0 %v7824_v33  ;;  %4617 = vadd.xlane.f32.xlu0 %v4616_v6  ;;  %v7838_v46 = vld [vmem:[#allocation6 + $0x484] ss:$24 sps:$4 sm:$0xff]  }
 0x213   :  { %v4120_v42 = vadd.f32 %v3992_v38, %v3717_v58  ;;  %v3987_v40 = vmul.f32 %v8920_v47, %v11975_v20  ;;  %v3344_v24 = vmul.f32 %v8938_v56, %v9167_v34  ;;  %2805 = vmatprep.subr.bf16.mxu0 %v7832_v4  ;;  %v7841_v33 = vld [vmem:[#allocation6 + $0x48c] ss:$24 sps:$4 sm:$0xff]   ;;  %v9365_v58 = vpop.permute.xlu1 %4258  ;;  %v4022_v6 = vmul.f32 %v11964_v37, %v9214_v11 }
 0x214   :  { %2927 = vmatpush1.bf16.msra.mxu1 %v7827_v14  ;;  %v4535_v13 = vsel %vm4516_vm1, %v4394_v19, 0.0  ;;  %v4425_v49 = vmax.f32 %v4297_v3, 0.0  ;;  %v4146_v25 = vadd.f32 %v4018_v0, %v3743_v36  ;;  %v3712_v61 = vadd.f32 %v3584_v29, %v3309_v48  ;;  %11977 = vst [vmem:[#allocation46_spill] sm:$0xff] %v9365_v58  ;;  %v7836_v19 = vld [vmem:[#allocation6 + $0x480] ss:$24 sps:$4 sm:$0xff]  }
 0x215   :  { %2928 = vmatprep.subr.bf16.mxu1 %v7835_v1  ;;  %4536 = vadd.xlane.f32.xlu1 %v4535_v13  ;;  %v4268_v47 = vadd.f32 %v9232_v43, %v4120_v42  ;;  %v3619_v14 = vmul.f32 %v8941_v57, %v9176_v7  ;;  %v3313_v38 = vmul.f32 %v8932_v53, %v11973_v23  ;;  %v11978_v42 = vld [vmem:[#allocation39_spill] sm:$0xff] }
 0x216   :  { %v4628_v0 = vsel %vm4516_vm1, %v4425_v49, 0.0  ;;  %v4294_v4 = vadd.f32 %v9309_v39, %v4146_v25  ;;  %v4115_v1 = vadd.f32 %v3987_v40, %v3712_v61  ;;  %v3588_v48 = vmul.f32 %v8935_v55, %v11974_v44  ;;  %2806 = vmatpush1.bf16.msra.mxu0 %v7830_v35  ;;  %v7839_v13 = vld [vmem:[#allocation6 + $0x488] ss:$24 sps:$4 sm:$0xff]  }
 0x217   :  { %4629 = vadd.xlane.f32.xlu0 %v4628_v0  ;;  %v4396_v3 = vmax.f32 %v4268_v47, 0.0  ;;  %v3747_v36 = vadd.f32 %v3619_v14, %v3344_v24  ;;  %v3991_v29 = vmul.f32 %v8950_v8, %v11975_v20  ;;  %v3346_v53 = vmul.f32 %v11978_v42, %v9116_v16  ;;  %v8230_v55 = vld [vmem:[%s11759_s4 + $0x28] sm:$0x7]  ;;  %2807 = vmatprep.subr.bf16.mxu0 %v7838_v46  ;;  %v7844_v24 = vld [vmem:[#allocation6 + $0x4b4] ss:$24 sps:$4 sm:$0xff]  }
 0x218   :  { %2929 = vmatpush1.bf16.msra.mxu1 %v7833_v5  ;;  %v4422_v49 = vmax.f32 %v4294_v4, 0.0  ;;  %v4263_v25 = vadd.f32 %v9365_v58, %v4115_v1  ;;  %v3716_v61 = vadd.f32 %v3588_v48, %v3313_v38  ;;  %v11979_v35 = vld [vmem:[#allocation35_spill] sm:$0xff]  ;;  %v7847_v8 = vld [vmem:[#allocation6 + $0x4bc] ss:$24 sps:$4 sm:$0xff]   ;;  %v9391_v14 = vrot.slane %v8230_v55, %v11972_v59  ;;  %v3141_v0 = vld [vmem:[%s11759_s4 + $0x40] sm:$0x7] }
 0x219   :  { %v9387_v40 = vrot.slane %v8230_v55, %v11979_v35  ;;  %2930 = vmatprep.subr.bf16.mxu1 %v7841_v33  ;;  %v4541_v5 = vsel %vm4516_vm1, %v4396_v3, 0.0  ;;  %v4150_v47 = vadd.f32 %v4022_v6, %v3747_v36  ;;  %v3315_v38 = vmul.f32 %v11970_v26, %v11965_v17  ;;  %v7842_v6 = vld [vmem:[#allocation6 + $0x4b0] ss:$24 sps:$4 sm:$0xff]  }
 0x21a   :  { %4542 = vadd.xlane.f32.xlu1 %v4541_v5  ;;  %v4619_v4 = vsel %vm4516_vm1, %v4422_v49, 0.0  ;;  %v4391_v46 = vmax.f32 %v4263_v25, 0.0  ;;  %v4119_v33 = vadd.f32 %v3991_v29, %v3716_v61  ;;  %2808 = vmatpush1.bf16.msra.mxu0 %v7836_v19  ;;  %v4024_v3 = vmul.f32 %v9391_v14, %v9197_v28  ;;  %v7845_v49 = vld [vmem:[#allocation6 + $0x4b8] ss:$24 sps:$4 sm:$0xff]   ;;  %v7850_v25 = vld [vmem:[#allocation6 + $0x4e4] ss:$24 sps:$4 sm:$0xff]  }
 0x21b   :  { %v3621_v1 = vmul.f32 %v9387_v40, %v9131_v27  ;;  %v4298_v48 = vadd.f32 %v9309_v39, %v4150_v47  ;;  %v3590_v36 = vmul.f32 %v11971_v10, %v11966_v22  ;;  %v3993_v55 = vmul.f32 %v9341_v15, %v11967_v60  ;;  %v11980_v5 = vld [vmem:[#allocation34_spill] sm:$0xff]  ;;  %2809 = vmatprep.subr.bf16.mxu0 %v7844_v24  ;;  %v7853_v47 = vld [vmem:[#allocation6 + $0x4ec] ss:$24 sps:$4 sm:$0xff]  }
 0x21c   :  { %2931 = vmatpush1.bf16.msra.mxu1 %v7839_v13  ;;  %v4526_v29 = vsel %vm4516_vm1, %v4391_v46, 0.0  ;;  %v4267_v61 = vadd.f32 %v9365_v58, %v4119_v33  ;;  %v9411_v2 = vrot.slane %v3141_v0, %v11980_v5  ;;  %v9414_v63 = vrot.slane %v3141_v0, %v11979_v35 }
 0x21d   :  { %v3749_v19 = vadd.f32 %v3621_v1, %v3346_v53  ;;  %2932 = vmatprep.subr.bf16.mxu1 %v7847_v8  ;;  %4527 = vadd.xlane.f32.xlu0 %v4526_v29  ;;  %v4426_v31 = vmax.f32 %v4298_v48, 0.0  ;;  %v3718_v9 = vadd.f32 %v3590_v36, %v3315_v38  ;;  %v9417_v13 = vrot.slane %v3141_v0, %v11972_v59  ;;  %v3142_v8 = vld [vmem:[%s11759_s4 + $0x44] sm:$0x7]  ;;  %v7848_v38 = vld [vmem:[#allocation6 + $0x4e0] ss:$24 sps:$4 sm:$0xff]  }
 0x21e   :  { %11981 = vst [vmem:[#allocation49_spill] sm:$0xff] %v9411_v2  ;;  %11982 = vst [vmem:[#allocation60_spill] sm:$0xff] %v9414_v63  ;;  %4620 = vadd.xlane.f32.xlu1 %v4619_v4  ;;  %v4395_v46 = vmax.f32 %v4267_v61, 0.0  ;;  %v3370_v53 = vmul.f32 %v9411_v2, %v9116_v16  ;;  %v3341_v24 = vmul.f32 %v8923_v50, %v11973_v23  ;;  %2810 = vmatpush1.bf16.msra.mxu0 %v7842_v6  ;;  %v7851_v48 = vld [vmem:[#allocation6 + $0x4e8] ss:$24 sps:$4 sm:$0xff]  }
 0x21f   :  { %11983 = vst [vmem:[#allocation67_spill] sm:$0xff] %v9417_v13  ;;  %v4152_v41 = vadd.f32 %v4024_v3, %v3749_v19  ;;  %v4631_v33 = vsel %vm4516_vm1, %v4426_v31, 0.0  ;;  %v4121_v1 = vadd.f32 %v3993_v55, %v3718_v9  ;;  %v3645_v0 = vmul.f32 %v9414_v63, %v9131_v27  ;;  %2811 = vmatprep.subr.bf16.mxu0 %v7850_v25  ;;  %v7856_v3 = vld [vmem:[#allocation6 + $0x514] ss:$24 sps:$4 sm:$0xff]   ;;  %v3149_v19 = vld [vmem:[%s11759_s4 + $0x60] sm:$0x7] }
 0x220   :  { %v4048_v4 = vmul.f32 %v9417_v13, %v9197_v28  ;;  %2933 = vmatpush1.bf16.msra.mxu1 %v7845_v49  ;;  %v4538_v50 = vsel %vm4516_vm1, %v4395_v46, 0.0  ;;  %v3616_v36 = vmul.f32 %v8926_v51, %v11974_v44  ;;  %v4019_v9 = vmul.f32 %v8929_v52, %v11975_v20  ;;  %v7859_v31 = vld [vmem:[#allocation6 + $0x51c] ss:$24 sps:$4 sm:$0xff]  }
 0x221   :  { %v4300_v6 = vadd.f32 %v9232_v43, %v4152_v41  ;;  %2934 = vmatprep.subr.bf16.mxu1 %v7853_v47  ;;  %4539 = vadd.xlane.f32.xlu0 %v4538_v50  ;;  %v4269_v55 = vadd.f32 %v11969_v62, %v4121_v1  ;;  %v3773_v29 = vadd.f32 %v3645_v0, %v3370_v53  ;;  %v7865_v50 = vld [vmem:[#allocation6 + $0x54c] ss:$24 sps:$4 sm:$0xff]  }
 0x222   :  { %v9439_v49 = vrot.slane %v3142_v8, %v11980_v5  ;;  %v9442_v25 = vrot.slane %v3142_v8, %v11979_v35  ;;  %4632 = vadd.xlane.f32.xlu1 %v4631_v33  ;;  %v3744_v61 = vadd.f32 %v3616_v36, %v3341_v24  ;;  %v9445_v51 = vrot.slane %v3142_v8, %v11972_v59  ;;  %v7854_v24 = vld [vmem:[#allocation6 + $0x510] ss:$24 sps:$4 sm:$0xff]  }
 0x223   :  { %v4428_v41 = vmax.f32 %v4300_v6, 0.0  ;;  %v3345_v52 = vmul.f32 %v8938_v56, %v11973_v23  ;;  %2812 = vmatpush1.bf16.msra.mxu0 %v7848_v38  ;;  %v4397_v47 = vmax.f32 %v4269_v55, 0.0  ;;  %v4176_v46 = vadd.f32 %v4048_v4, %v3773_v29  ;;  %v7857_v8 = vld [vmem:[#allocation6 + $0x518] ss:$24 sps:$4 sm:$0xff]   ;;  %v7862_v4 = vld [vmem:[#allocation6 + $0x544] ss:$24 sps:$4 sm:$0xff]  }
 0x224   :  { %11984 = vst [vmem:[#allocation36_spill] sm:$0xff] %v9439_v49  ;;  %v3374_v53 = vmul.f32 %v9439_v49, %v9116_v16  ;;  %v3649_v33 = vmul.f32 %v9442_v25, %v9131_v27  ;;  %2935 = vmatpush1.bf16.msra.mxu1 %v7851_v48  ;;  %2813 = vmatprep.subr.bf16.mxu0 %v7856_v3 }
 0x225   :  { %v4637_v1 = vsel %vm4516_vm1, %v4428_v41, 0.0  ;;  %v4147_v56 = vadd.f32 %v4019_v9, %v3744_v61  ;;  %v4052_v38 = vmul.f32 %v9445_v51, %v9197_v28  ;;  %v3620_v0 = vmul.f32 %v8941_v57, %v11974_v44  ;;  %2936 = vmatprep.subr.bf16.mxu1 %v7859_v31  ;;  %v7866_v57 = vld [vmem:[#allocation6 + $0x570] ss:$24 sps:$4 sm:$0xff]  }
 0x226   :  { %v4544_v6 = vsel %vm4516_vm1, %v4397_v47, 0.0  ;;  %v4324_v36 = vadd.f32 %v9232_v43, %v4176_v46  ;;  %v3777_v48 = vadd.f32 %v3649_v33, %v3374_v53  ;;  %v4023_v3 = vmul.f32 %v11964_v37, %v11975_v20  ;;  %4638 = vadd.xlane.f32.xlu1 %v4637_v1  ;;  %v3150_v37 = vld [vmem:[%s11759_s4 + $0x64] sm:$0x7] }
 0x227   :  { %4545 = vadd.xlane.f32.xlu0 %v4544_v6  ;;  %v4295_v9 = vadd.f32 %v9365_v58, %v4147_v56  ;;  %v3748_v55 = vadd.f32 %v3620_v0, %v3345_v52  ;;  %v9467_v29 = vrot.slane %v3149_v19, %v11980_v5  ;;  %v9471_v47 = vrot.slane %v3149_v19, %v11979_v35  ;;  %v7860_v52 = vld [vmem:[#allocation6 + $0x540] ss:$24 sps:$4 sm:$0xff]  }
 0x228   :  { %v4452_v41 = vmax.f32 %v4324_v36, 0.0  ;;  %v4180_v61 = vadd.f32 %v4052_v38, %v3777_v48  ;;  %v9474_v46 = vrot.slane %v3149_v19, %v11972_v59  ;;  %2814 = vmatpush1.bf16.msra.mxu0 %v7854_v24  ;;  %2937 = vmatpush1.bf16.msra.mxu1 %v7857_v8  ;;  %v3347_v56 = vmul.f32 %v11978_v42, %v11965_v17  ;;  %v7863_v38 = vld [vmem:[#allocation6 + $0x548] ss:$24 sps:$4 sm:$0xff]   ;;  %v7868_v19 = vld [vmem:[#allocation6 + $0x574] ss:$24 sps:$4 sm:$0xff]  }
 0x229   :  { %v4423_v53 = vmax.f32 %v4295_v9, 0.0  ;;  %v4151_v33 = vadd.f32 %v4023_v3, %v3748_v55  ;;  %v3402_v1 = vmul.f32 %v9467_v29, %v9116_v16  ;;  %2815 = vmatprep.subr.bf16.mxu0 %v7862_v4  ;;  %2938 = vmatprep.subr.bf16.mxu1 %v7865_v50  ;;  %v3677_v0 = vmul.f32 %v9471_v47, %v9131_v27  ;;  %v7871_v36 = vld [vmem:[#allocation6 + $0x57c] ss:$24 sps:$4 sm:$0xff]  }
 0x22a   :  { %11986 = vst [vmem:[#allocation38_spill] sm:$0xff] %v9474_v46  ;;  %v4709_v24 = vsel %vm4516_vm1, %v4452_v41, 0.0  ;;  %v4328_v8 = vadd.f32 %v9232_v43, %v4180_v61  ;;  %v4080_v6 = vmul.f32 %v9474_v46, %v9197_v28  ;;  %v3622_v4 = vmul.f32 %v9387_v40, %v11966_v22 }
 0x22b   :  { %4710 = vadd.xlane.f32.xlu1 %v4709_v24  ;;  %v4622_v48 = vsel %vm4516_vm1, %v4423_v53, 0.0  ;;  %v4299_v3 = vadd.f32 %v9365_v58, %v4151_v33  ;;  %v4025_v50 = vmul.f32 %v9391_v14, %v11967_v60  ;;  %v3805_v55 = vadd.f32 %v3677_v0, %v3402_v1  ;;  %v7880_v58 = vld [vmem:[#allocation6 + $0x5d4] ss:$24 sps:$4 sm:$0xff]  }
 0x22c   :  { %4623 = vadd.xlane.f32.xlu0 %v4622_v48  ;;  %v4456_v9 = vmax.f32 %v4328_v8, 0.0  ;;  %v9496_v41 = vrot.slane %v3150_v37, %v11980_v5  ;;  %v9499_v61 = vrot.slane %v3150_v37, %v11979_v35  ;;  %2816 = vmatpush1.bf16.msra.mxu0 %v7860_v52  ;;  %v3750_v53 = vadd.f32 %v3622_v4, %v3347_v56  ;;  %v7869_v48 = vld [vmem:[#allocation6 + $0x578] ss:$24 sps:$4 sm:$0xff]   ;;  %v7874_v56 = vld [vmem:[#allocation6 + $0x5a4] ss:$24 sps:$4 sm:$0xff]  }
 0x22d   :  { %v4427_v24 = vmax.f32 %v4299_v3, 0.0  ;;  %v9502_v33 = vrot.slane %v3150_v37, %v11972_v59  ;;  %v3371_v31 = vmul.f32 %v9411_v2, %v11965_v17  ;;  %2939 = vmatpush1.bf16.msra.mxu1 %v7863_v38  ;;  %2817 = vmatprep.subr.bf16.mxu0 %v7868_v19  ;;  %v4208_v8 = vadd.f32 %v4080_v6, %v3805_v55  ;;  %v7877_v6 = vld [vmem:[#allocation6 + $0x5ac] ss:$24 sps:$4 sm:$0xff]  }
 0x22e   :  { %11987 = vst [vmem:[#allocation51_spill] sm:$0xff] %v9496_v41  ;;  %11988 = vst [vmem:[#allocation56_spill] sm:$0xff] %v9499_v61  ;;  %v4721_v1 = vsel %vm4516_vm1, %v4456_v9, 0.0  ;;  %v3406_v0 = vmul.f32 %v9496_v41, %v9116_v16  ;;  %v3681_v52 = vmul.f32 %v9499_v61, %v9131_v27  ;;  %2940 = vmatprep.subr.bf16.mxu1 %v7871_v36 }
 0x22f   :  { %11989 = vst [vmem:[#allocation66_spill] sm:$0xff] %v9502_v33  ;;  %4722 = vadd.xlane.f32.xlu1 %v4721_v1  ;;  %v4634_v37 = vsel %vm4516_vm1, %v4427_v24, 0.0  ;;  %v4153_v3 = vadd.f32 %v4025_v50, %v3750_v53  ;;  %v4084_v38 = vmul.f32 %v9502_v33, %v9197_v28  ;;  %v3646_v19 = vmul.f32 %v9414_v63, %v11966_v22 }
 0x230   :  { %4635 = vadd.xlane.f32.xlu0 %v4634_v37  ;;  %v4356_v4 = vadd.f32 %v9232_v43, %v4208_v8  ;;  %v3809_v9 = vadd.f32 %v3681_v52, %v3406_v0  ;;  %v4049_v55 = vmul.f32 %v9417_v13, %v11967_v60  ;;  %v3316_v36 = vmul.f32 %v11970_v26, %v9167_v34  ;;  %v3128_v8 = vld [vmem:[%s11759_s4 + $0xc] sm:$0x7]  ;;  %v7872_v0 = vld [vmem:[#allocation6 + $0x5a0] ss:$24 sps:$4 sm:$0xff]  }
 0x231   :  { %v4301_v24 = vadd.f32 %v11969_v62, %v4153_v3  ;;  %v3774_v50 = vadd.f32 %v3646_v19, %v3371_v31  ;;  %v3591_v53 = vmul.f32 %v11971_v10, %v9176_v7  ;;  %v3994_v1 = vmul.f32 %v9341_v15, %v9214_v11  ;;  %2818 = vmatpush1.bf16.msra.mxu0 %v7866_v57  ;;  %v7875_v3 = vld [vmem:[#allocation6 + $0x5a8] ss:$24 sps:$4 sm:$0xff]  }
 0x232   :  { %v4484_v52 = vmax.f32 %v4356_v4, 0.0  ;;  %v4212_v37 = vadd.f32 %v4084_v38, %v3809_v9  ;;  %v3375_v13 = vmul.f32 %v9439_v49, %v11965_v17  ;;  %v3650_v31 = vmul.f32 %v9442_v25, %v11966_v22  ;;  %2941 = vmatpush1.bf16.msra.mxu1 %v7869_v48  ;;  %2819 = vmatprep.subr.bf16.mxu0 %v7874_v56 }
 0x233   :  { %v4429_v19 = vmax.f32 %v4301_v24, 0.0  ;;  %v4177_v63 = vadd.f32 %v4049_v55, %v3774_v50  ;;  %v3719_v2 = vadd.f32 %v3591_v53, %v3316_v36  ;;  %v4053_v57 = vmul.f32 %v9445_v51, %v11967_v60  ;;  %2942 = vmatprep.subr.bf16.mxu1 %v7877_v6  ;;  %v7878_v6 = vld [vmem:[#allocation6 + $0x5d0] ss:$24 sps:$4 sm:$0xff]  }
 0x234   :  { %v4805_v38 = vsel %vm4516_vm1, %v4484_v52, 0.0  ;;  %v4360_v4 = vadd.f32 %v9232_v43, %v4212_v37  ;;  %v3778_v9 = vadd.f32 %v3650_v31, %v3375_v13  ;;  %v9538_v49 = vrot.slane %v3128_v8, %v11980_v5  ;;  %v7881_v52 = vld [vmem:[#allocation6 + $0x5d8] ss:$24 sps:$4 sm:$0xff]   ;;  %v7889_v31 = vld [vmem:[#allocation6 + $0x60c] ss:$24 sps:$4 sm:$0xff]  }
 0x235   :  { %4806 = vadd.xlane.f32.xlu1 %v4805_v38  ;;  %v4640_v48 = vsel %vm4516_vm1, %v4429_v19, 0.0  ;;  %v4325_v56 = vadd.f32 %v11969_v62, %v4177_v63  ;;  %v4122_v55 = vadd.f32 %v3994_v1, %v3719_v2  ;;  %v9543_v36 = vrot.slane %v3128_v8, %v11979_v35  ;;  %2820 = vmatpush1.bf16.msra.mxu0 %v7872_v0  ;;  %v7886_v0 = vld [vmem:[#allocation6 + $0x604] ss:$24 sps:$4 sm:$0xff]  }
 0x236   :  { %4641 = vadd.xlane.f32.xlu0 %v4640_v48  ;;  %v4488_v24 = vmax.f32 %v4360_v4, 0.0  ;;  %v4181_v50 = vadd.f32 %v4053_v57, %v3778_v9  ;;  %v3318_v13 = vmul.f32 %v9538_v49, %v9116_v16  ;;  %v9548_v53 = vrot.slane %v3128_v8, %v11972_v59  ;;  %2943 = vmatpush1.bf16.msra.mxu1 %v7875_v3 }
 0x237   :  { %v4453_v37 = vmax.f32 %v4325_v56, 0.0  ;;  %v4270_v63 = vadd.f32 %v9309_v39, %v4122_v55  ;;  %v3593_v2 = vmul.f32 %v9543_v36, %v9131_v27  ;;  %v3403_v1 = vmul.f32 %v9467_v29, %v11965_v17  ;;  %2821 = vmatprep.subr.bf16.mxu0 %v7880_v58  ;;  %2944 = vmatprep.subr.bf16.mxu1 %v7883_v30 }
 0x238   :  { %v4817_v19 = vsel %vm4516_vm1, %v4488_v24, 0.0  ;;  %v4329_v8 = vadd.f32 %v11969_v62, %v4181_v50  ;;  %v3996_v3 = vmul.f32 %v9548_v53, %v9197_v28  ;;  %v3678_v57 = vmul.f32 %v9471_v47, %v11966_v22  ;;  %v3136_v24 = vld [vmem:[%s11759_s4 + $0x2c] sm:$0x7] }
 0x239   :  { %4818 = vadd.xlane.f32.xlu1 %v4817_v19  ;;  %v4712_v38 = vsel %vm4516_vm1, %v4453_v37, 0.0  ;;  %v4398_v4 = vmax.f32 %v4270_v63, 0.0  ;;  %v3721_v9 = vadd.f32 %v3593_v2, %v3318_v13  ;;  %v4081_v30 = vmul.f32 %v9474_v46, %v11967_v60  ;;  %2822 = vmatpush1.bf16.msra.mxu0 %v7878_v6 }
 0x23a   :  { %4713 = vadd.xlane.f32.xlu0 %v4712_v38  ;;  %v4457_v58 = vmax.f32 %v4329_v8, 0.0  ;;  %v3806_v48 = vadd.f32 %v3678_v57, %v3403_v1  ;;  %v3348_v56 = vmul.f32 %v11978_v42, %v9167_v34  ;;  %v3623_v55 = vmul.f32 %v9387_v40, %v9176_v7  ;;  %2945 = vmatpush1.bf16.msra.mxu1 %v7881_v52 }
 0x23b   :  { %v4547_v50 = vsel %vm4516_vm1, %v4398_v4, 0.0  ;;  %v4124_v13 = vadd.f32 %v3996_v3, %v3721_v9  ;;  %v4026_v6 = vmul.f32 %v9391_v14, %v9214_v11  ;;  %v3407_v37 = vmul.f32 %v9496_v41, %v11965_v17  ;;  %2832 = vmatprep.subr.bf16.mxu0 %v7886_v0  ;;  %2955 = vmatprep.subr.bf16.mxu1 %v7889_v31  ;;  %v12001_v41 = vld [vmem:[#allocation76_spill] sm:$0xff] }
 0x23c   :  { %v4724_v63 = vsel %vm4516_vm1, %v4457_v58, 0.0  ;;  %v4209_v2 = vadd.f32 %v4081_v30, %v3806_v48  ;;  %v3751_v1 = vadd.f32 %v3623_v55, %v3348_v56  ;;  %v3682_v52 = vmul.f32 %v9499_v61, %v11966_v22 }
 0x23d   :  { %4548 = vadd.xlane.f32.xlu1 %v4547_v50  ;;  %v4272_v19 = vadd.f32 %v9232_v43, %v4124_v13  ;;  %v4085_v8 = vmul.f32 %v9502_v33, %v11967_v60  ;;  %v9583_v3 = vrot.slane %v3136_v24, %v11980_v5  ;;  %v9586_v57 = vrot.slane %v3136_v24, %v11979_v35 }
 0x23e   :  { %4725 = vadd.xlane.f32.xlu0 %v4724_v63  ;;  %v4357_v0 = vadd.f32 %v11969_v62, %v4209_v2  ;;  %v4154_v31 = vadd.f32 %v4026_v6, %v3751_v1  ;;  %v3810_v38 = vadd.f32 %v3682_v52, %v3407_v37  ;;  %v9590_v4 = vrot.slane %v3136_v24, %v11972_v59  ;;  %v11990_v52 = vld [vmem:[#allocation57_spill] sm:$0xff] }
 0x23f   :  { %v4400_v9 = vmax.f32 %v4272_v19, 0.0  ;;  %v3350_v30 = vmul.f32 %v9583_v3, %v9116_v16  ;;  %v3625_v58 = vmul.f32 %v9586_v57, %v9131_v27  ;;  %v3317_v48 = vmul.f32 %v11970_v26, %v11973_v23 }
 0x240   :  { %v4485_v56 = vmax.f32 %v4357_v0, 0.0  ;;  %v4302_v55 = vadd.f32 %v9309_v39, %v4154_v31  ;;  %v4213_v50 = vadd.f32 %v4085_v8, %v3810_v38  ;;  %v4028_v13 = vmul.f32 %v9590_v4, %v9197_v28 }
 0x241   :  { %v4553_v24 = vsel %vm4516_vm1, %v4400_v9, 0.0  ;;  %v3753_v6 = vadd.f32 %v3625_v58, %v3350_v30  ;;  %v3592_v37 = vmul.f32 %v11971_v10, %v11974_v44  ;;  %v3995_v63 = vmul.f32 %v9341_v15, %v11975_v20  ;;  %v11993_v9 = vld [vmem:[#allocation64_spill] sm:$0xff] }
 0x242   :  { %4554 = vadd.xlane.f32.xlu1 %v4553_v24  ;;  %v4808_v2 = vsel %vm4516_vm1, %v4485_v56, 0.0  ;;  %v4430_v26 = vmax.f32 %v4302_v55, 0.0  ;;  %v4361_v1 = vadd.f32 %v11969_v62, %v4213_v50  ;;  %v11991_v19 = vrot.slane %v11990_v52, 1  ;;  %v11995_v55 = vld [vmem:[#allocation43_spill] sm:$0xff]  ;;  %v11996_v24 = vld [vmem:[#allocation40_spill] sm:$0xff] }
 0x243   :  { %4809 = vadd.xlane.f32.xlu0 %v4808_v2  ;;  %v4156_v0 = vadd.f32 %v4028_v13, %v3753_v6  ;;  %v3720_v31 = vadd.f32 %v3592_v37, %v3317_v48  ;;  %v11992_v38 = vrot.slane %v11976_v45, 1  ;;  %v11994_v15 = vrot.slane %v11993_v9, 2  ;;  %v11997_v37 = vld [vmem:[#allocation48_spill] sm:$0xff] }
 0x244   :  { %v582_v8 = vadd.f32 %v11991_v19, %v11990_v52  ;;  %v4643_v58 = vsel %vm4516_vm1, %v4430_v26, 0.0  ;;  %v4489_v56 = vmax.f32 %v4361_v1, 0.0  ;;  %v697_v50 = vmul.f32 %v9120_v18, %v11995_v55  ;;  %v11998_v19 = vld [vmem:[#allocation53_spill] sm:$0xff]  ;;  %v12000_v55 = vld [vmem:[#allocation46_spill] sm:$0xff] }
 0x245   :  { %v618_v10 = vadd.f32 %v11992_v38, %v11976_v45  ;;  %v652_v30 = vadd.f32 %v11994_v15, %v11993_v9  ;;  %v709_v52 = vmul.f32 %v9141_v12, %v11996_v24  ;;  %v4304_v13 = vadd.f32 %v9232_v43, %v4156_v0  ;;  %v11999_v38 = vld [vmem:[#allocation75_spill] sm:$0xff] }
 0x246   :  { %v4123_v48 = vadd.f32 %v3995_v63, %v3720_v31  ;;  %v715_v45 = vmul.f32 %v9144_v32, %v11997_v37  ;;  %4644 = vadd.xlane.f32.xlu1 %v4643_v58  ;;  %v4820_v2 = vsel %vm4516_vm1, %v4489_v56, 0.0  ;;  %v721_v26 = vmul.f32 %v9147_v21, %v11998_v19 }
 0x247   :  { %v653_v6 = vrot.slane %v652_v30, 1  ;;  %v727_v1 = vmul.f32 %v9151_v54, %v582_v8  ;;  %v733_v9 = vmul.f32 %v11999_v38, %v618_v10  ;;  %4821 = vadd.xlane.f32.xlu0 %v4820_v2  ;;  %v4432_v15 = vmax.f32 %v4304_v13, 0.0 }
 0x248   :  { %v4271_v24 = vadd.f32 %v12000_v55, %v4123_v48  ;;  %v745_v63 = vpack.c.bf16 %v697_v50, %v697_v50  ;;  %v757_v31 = vpack.c.bf16 %v709_v52, %v709_v52  ;;  %v763_v33 = vpack.c.bf16 %v715_v45, %v715_v45  ;;  %v12002_v52 = vld [vmem:[#allocation73_spill] sm:$0xff] }
 0x249   :  { %v654_v0 = vadd.f32 %v653_v6, %v652_v30  ;;  %v769_v61 = vpack.c.bf16 %v721_v26, %v721_v26  ;;  %v775_v37 = vpack.c.bf16 %v727_v1, %v727_v1  ;;  %v4649_v58 = vsel %vm4516_vm1, %v4432_v15, 0.0 }
 0x24a   :  { %v4399_v56 = vmax.f32 %v4271_v24, 0.0  ;;  %v781_v19 = vpack.c.bf16 %v733_v9, %v733_v9  ;;  %4650 = vadd.xlane.f32.xlu1 %v4649_v58  ;;  %v1161_v8 = vunpack.c.l.b16 %v745_v63  ;;  %v1173_v46 = vunpack.c.l.b16 %v757_v31  ;;  %v12004_v63 = vld [vmem:[#allocation47_spill] sm:$0xff] }
 0x24b   :  { %v739_v43 = vmul.f32 %v12001_v41, %v654_v0  ;;  %v1179_v10 = vunpack.c.l.b16 %v763_v33  ;;  %v1185_v2 = vunpack.c.l.b16 %v769_v61  ;;  %v1191_v30 = vunpack.c.l.b16 %v775_v37 }
 0x24c   :  { %v4550_v13 = vsel %vm4516_vm1, %v4399_v56, 0.0  ;;  %v1197_v50 = vunpack.c.l.b16 %v781_v19  ;;  %v12003_v6 = vrot.slane %v12002_v52, 7  ;;  %v1244_v26 = vrot.slane %v1173_v46, 6  ;;  %v12008_v56 = vld [vmem:[#allocation55_spill] sm:$0xff]  ;;  %v12013_v52 = vld [vmem:[#allocation45_spill] sm:$0xff] }
 0x24d   :  { %v787_v48 = vpack.c.bf16 %v739_v43, %v739_v43  ;;  %4551 = vadd.xlane.f32.xlu0 %v4550_v13  ;;  %v1246_v1 = vrot.slane %v1179_v10, 5  ;;  %v1248_v15 = vrot.slane %v1185_v2, 4  ;;  %v1250_v9 = vrot.slane %v1191_v30, 3  ;;  %v12006_v43 = vld [vmem:[#allocation52_spill] sm:$0xff]  ;;  %v12010_v46 = vld [vmem:[#allocation59_spill] sm:$0xff] }
 0x24e   :  { %v1243_v45 = vsel %vm1208_vm2, %v12003_v6, %v1161_v8  ;;  %v1252_v0 = vrot.slane %v1197_v50, 2  ;;  %v12005_v33 = vrot.slane %v12004_v63, 1  ;;  %v12007_v37 = vrot.slane %v12006_v43, 1 }
 0x24f   :  { %v1203_v24 = vunpack.c.l.b16 %v787_v48  ;;  %v1245_v31 = vsel %vm1211_vm3, %v1244_v26, %v1243_v45  ;;  %v12009_v19 = vrot.slane %v12008_v56, 2  ;;  %v633_v10 = vrot.slane %v12010_v46, 2  ;;  %v12011_v48 = vld [vmem:[#allocation61_spill] sm:$0xff] }
 0x250   :  { %v528_v61 = vadd.f32 %v12005_v33, %v12004_v63  ;;  %v564_v58 = vadd.f32 %v12007_v37, %v12006_v43  ;;  %v1247_v2 = vsel %vm1214_vm4, %v1246_v1, %v1245_v31  ;;  %v12012_v30 = vrot.slane %v12011_v48, 4  ;;  %v12014_v33 = vld [vmem:[#allocation42_spill] sm:$0xff] }
 0x251   :  { %v598_v8 = vadd.f32 %v12009_v19, %v12008_v56  ;;  %v1254_v13 = vrot.slane %v1203_v24, 1  ;;  %v700_v6 = vmul.f32 %v9120_v18, %v12013_v52  ;;  %v1249_v45 = vsel %vm1217_vm5, %v1248_v15, %v1247_v2  ;;  %v7884_v2 = vld [vmem:[#allocation6 + $0x600] ss:$24 sps:$4 sm:$0xff]  }
 0x252   :  { %v668_v50 = vadd.f32 %v12012_v30, %v12011_v48  ;;  %v634_v63 = vadd.f32 %v633_v10, %v12010_v46  ;;  %v712_v43 = vmul.f32 %v9141_v12, %v12014_v33  ;;  %v1251_v37 = vsel %vm1220_vm6, %v1250_v9, %v1249_v45  ;;  %v7887_v52 = vld [vmem:[#allocation6 + $0x608] ss:$24 sps:$4 sm:$0xff]   ;;  %v12015_v10 = vld [vmem:[#allocation69_spill] sm:$0xff] }
 0x253   :  { %v599_v26 = vrot.slane %v598_v8, 1  ;;  %v718_v1 = vmul.f32 %v9144_v32, %v528_v61  ;;  %v724_v24 = vmul.f32 %v9147_v21, %v564_v58  ;;  %v1253_v31 = vsel %vm1223_vm7, %v1252_v0, %v1251_v37  ;;  %v7892_v21 = vld [vmem:[#allocation6 + $0x634] ss:$24 sps:$4 sm:$0xff]  }
 0x254   :  { %v669_v56 = vrot.slane %v668_v50, 2  ;;  %v635_v48 = vrot.slane %v634_v63, 1  ;;  %v748_v30 = vpack.c.bf16 %v700_v6, %v700_v6  ;;  %v1255_v15 = vsel %vm1226_vm8, %v1254_v13, %v1253_v31  ;;  %v7895_v0 = vld [vmem:[#allocation6 + $0x63c] ss:$24 sps:$4 sm:$0xff]  }
 0x255   :  { %v600_v19 = vadd.f32 %v599_v26, %v598_v8  ;;  %v754_v33 = vpack.c.bf16 %v12015_v10, %v12015_v10  ;;  %v760_v12 = vpack.c.bf16 %v712_v43, %v712_v43  ;;  %v9665_v9 = vpack.c.b16 %v1255_v15, %v1255_v15 }
 0x256   :  { %v670_v46 = vadd.f32 %v669_v56, %v668_v50  ;;  %v636_v45 = vadd.f32 %v635_v48, %v634_v63  ;;  %v766_v58 = vpack.c.bf16 %v718_v1, %v718_v1  ;;  %v772_v26 = vpack.c.bf16 %v724_v24, %v724_v24  ;;  %v12017_v1 = vld [vmem:[#allocation49_spill] sm:$0xff] }
 0x257   :  { %12016 = vst [vmem:[#allocation62_spill] sm:$0xff] %v9665_v9  ;;  %v730_v61 = vmul.f32 %v9151_v54, %v600_v19  ;;  %v1164_v6 = vunpack.c.l.b16 %v748_v30  ;;  %v1170_v37 = vunpack.c.l.b16 %v754_v33  ;;  %2824 = vmatmul.mubr.bf16.vlgmr.msra.gmra.mrb[0].mxu0 %v9665_v9  ;;  %2947 = vmatmul.mubr.bf16.vlgmr.msra.gmra.mrb[0].mxu1 %v9665_v9  ;;  %v1176_v43 = vunpack.c.l.b16 %v760_v12  ;;  %v7890_v24 = vld [vmem:[#allocation6 + $0x630] ss:$24 sps:$4 sm:$0xff]  }
 0x258   :  { %v671_v8 = vrot.slane %v670_v46, 1  ;;  %v736_v13 = vmul.f32 %v11999_v38, %v636_v45  ;;  %v1182_v56 = vunpack.c.l.b16 %v766_v58  ;;  %2833 = vmatpush1.bf16.msra.mxu0 %v7884_v2  ;;  %v1188_v31 = vunpack.c.l.b16 %v772_v26  ;;  %2956 = vmatpush1.bf16.msra.mxu1 %v7887_v52  ;;  %v7893_v9 = vld [vmem:[#allocation6 + $0x638] ss:$24 sps:$4 sm:$0xff]   ;;  %v7898_v45 = vld [vmem:[#allocation6 + $0x664] ss:$24 sps:$4 sm:$0xff]  }
 0x259   :  { %v778_v50 = vpack.c.bf16 %v730_v61, %v730_v61  ;;  %v1284_v19 = vrot.slane %v1170_v37, 7  ;;  %v3372_v48 = vmul.f32 %v12017_v1, %v9167_v34  ;;  %v1286_v10 = vrot.slane %v1176_v43, 6  ;;  %2834 = vmatprep.subr.bf16.mxu0 %v7892_v21  ;;  %2957 = vmatprep.subr.bf16.mxu1 %v7895_v0  ;;  %v12018_v61 = vld [vmem:[#allocation60_spill] sm:$0xff]  ;;  %v7920_v38 = vld [vmem:[#allocation6 + $0x720] ss:$24 sps:$4 sm:$0xff]  }
 0x25a   :  { %v672_v63 = vadd.f32 %v671_v8, %v670_v46  ;;  %v784_v30 = vpack.c.bf16 %v736_v13, %v736_v13  ;;  %v1288_v33 = vrot.slane %v1182_v56, 5  ;;  %v1290_v46 = vrot.slane %v1188_v31, 4  ;;  %v7901_v58 = vld [vmem:[#allocation6 + $0x66c] ss:$24 sps:$4 sm:$0xff]  }
 0x25b   :  { %v1194_v15 = vunpack.c.l.b16 %v778_v50  ;;  %v1285_v2 = vsel %vm1208_vm2, %v1284_v19, %v1164_v6  ;;  %v3647_v52 = vmul.f32 %v12018_v61, %v9176_v7  ;;  %v12019_v13 = vld [vmem:[#allocation67_spill] sm:$0xff]  ;;  %v3319_v56 = vmul.f32 %v9538_v49, %v11965_v17 }
 0x25c   :  { %v742_v12 = vmul.f32 %v12001_v41, %v672_v63  ;;  %v1200_v8 = vunpack.c.l.b16 %v784_v30  ;;  %v1287_v26 = vsel %vm1211_vm3, %v1286_v10, %v1285_v2  ;;  %v4050_v50 = vmul.f32 %v12019_v13, %v9214_v11  ;;  %2835 = vmatpush1.bf16.msra.mxu0 %v7890_v24  ;;  %v7896_v6 = vld [vmem:[#allocation6 + $0x660] ss:$24 sps:$4 sm:$0xff]   ;;  %2958 = vmatpush1.bf16.msra.mxu1 %v7893_v9 }
 0x25d   :  { %v1292_v37 = vrot.slane %v1194_v15, 3  ;;  %v1289_v0 = vsel %vm1214_vm4, %v1288_v33, %v1287_v26  ;;  %v3775_v43 = vadd.f32 %v3647_v52, %v3372_v48  ;;  %v3594_v19 = vmul.f32 %v9543_v36, %v11966_v22  ;;  %2836 = vmatprep.subr.bf16.mxu0 %v7898_v45  ;;  %v7899_v15 = vld [vmem:[#allocation6 + $0x668] ss:$24 sps:$4 sm:$0xff]   ;;  %2959 = vmatprep.subr.bf16.mxu1 %v7901_v58  ;;  %v7907_v52 = vld [vmem:[#allocation6 + $0x69c] ss:$24 sps:$4 sm:$0xff]  }
 0x25e   :  { %v790_v21 = vpack.c.bf16 %v742_v12, %v742_v12  ;;  %v1291_v63 = vsel %vm1217_vm5, %v1290_v46, %v1289_v0  ;;  %v1294_v31 = vrot.slane %v1200_v8, 2  ;;  %v3997_v30 = vmul.f32 %v9548_v53, %v11967_v60  ;;  %v12020_v12 = vld [vmem:[#allocation36_spill] sm:$0xff]  ;;  %v3143_v2 = vld [vmem:[%s11759_s4 + $0x48] sm:$0x7] }
 0x25f   :  { %v1293_v48 = vsel %vm1220_vm6, %v1292_v37, %v1291_v63  ;;  %v4178_v33 = vadd.f32 %v4050_v50, %v3775_v43  ;;  %v3376_v24 = vmul.f32 %v12020_v12, %v9167_v34  ;;  %v7904_v46 = vld [vmem:[#allocation6 + $0x694] ss:$24 sps:$4 sm:$0xff]   ;;  %v3722_v26 = vadd.f32 %v3594_v19, %v3319_v56  ;;  %v7902_v0 = vld [vmem:[#allocation6 + $0x690] ss:$24 sps:$4 sm:$0xff]  }
 0x260   :  { %v1206_v10 = vunpack.c.l.b16 %v790_v21  ;;  %v1295_v8 = vsel %vm1223_vm7, %v1294_v31, %v1293_v48  ;;  %v3651_v9 = vmul.f32 %v9442_v25, %v9176_v7  ;;  %v4054_v45 = vmul.f32 %v9445_v51, %v9214_v11  ;;  %2837 = vmatpush1.bf16.msra.mxu0 %v7896_v6  ;;  %2960 = vmatpush1.bf16.msra.mxu1 %v7899_v15  ;;  %v7905_v15 = vld [vmem:[#allocation6 + $0x698] ss:$24 sps:$4 sm:$0xff]  }
 0x261   :  { %v4326_v50 = vadd.f32 %v9309_v39, %v4178_v33  ;;  %v3349_v58 = vmul.f32 %v11978_v42, %v11973_v23  ;;  %v3624_v21 = vmul.f32 %v9387_v40, %v11974_v44  ;;  %v4125_v43 = vadd.f32 %v3997_v30, %v3722_v26  ;;  %2838 = vmatprep.subr.bf16.mxu0 %v7904_v46  ;;  %v7910_v33 = vld [vmem:[#allocation6 + $0x6c4] ss:$24 sps:$4 sm:$0xff]  }
 0x262   :  { %v1296_v37 = vrot.slane %v1206_v10, 1  ;;  %v3779_v63 = vadd.f32 %v3651_v9, %v3376_v24  ;;  %v4027_v56 = vmul.f32 %v9391_v14, %v11975_v20  ;;  %v9707_v31 = vrot.slane %v3143_v2, %v11980_v5  ;;  %2961 = vmatprep.subr.bf16.mxu1 %v7907_v52  ;;  %v7913_v46 = vld [vmem:[#allocation6 + $0x6cc] ss:$24 sps:$4 sm:$0xff]  }
 0x263   :  { %v4454_v10 = vmax.f32 %v4326_v50, 0.0  ;;  %v3752_v48 = vadd.f32 %v3624_v21, %v3349_v58  ;;  %v9711_v42 = vrot.slane %v3143_v2, %v11979_v35  ;;  %v4273_v6 = vadd.f32 %v11969_v62, %v4125_v43  ;;  %v7908_v58 = vld [vmem:[#allocation6 + $0x6c0] ss:$24 sps:$4 sm:$0xff]  }
 0x264   :  { %v1297_v19 = vsel %vm1226_vm8, %v1296_v37, %v1295_v8  ;;  %v4182_v30 = vadd.f32 %v4054_v45, %v3779_v63  ;;  %v3378_v14 = vmul.f32 %v9707_v31, %v9116_v16  ;;  %v9722_v9 = vrot.slane %v3143_v2, %v11972_v59  ;;  %2839 = vmatpush1.bf16.msra.mxu0 %v7902_v0  ;;  %v7916_v63 = vld [vmem:[#allocation6 + $0x6f4] ss:$24 sps:$4 sm:$0xff]  }
 0x265   :  { %v9713_v40 = vpack.c.b16 %v1297_v19, %v1297_v19  ;;  %v4715_v24 = vsel %vm4516_vm1, %v4454_v10, 0.0  ;;  %v4155_v8 = vadd.f32 %v4027_v56, %v3752_v48  ;;  %v3653_v26 = vmul.f32 %v9711_v42, %v9131_v27  ;;  %2962 = vmatpush1.bf16.msra.mxu1 %v7905_v15  ;;  %2840 = vmatprep.subr.bf16.mxu0 %v7910_v33 }
 0x266   :  { %v4401_v52 = vmax.f32 %v4273_v6, 0.0  ;;  %v4330_v45 = vadd.f32 %v9309_v39, %v4182_v30  ;;  %v3351_v37 = vmul.f32 %v9583_v3, %v11965_v17  ;;  %v3626_v50 = vmul.f32 %v9586_v57, %v11966_v22  ;;  %4716 = vadd.xlane.f32.xlu1 %v4715_v24  ;;  %v7911_v6 = vld [vmem:[#allocation6 + $0x6c8] ss:$24 sps:$4 sm:$0xff]   ;;  %2963 = vmatprep.subr.bf16.mxu1 %v7913_v46 }
 0x267   :  { %12021 = vst [vmem:[#allocation39_spill] sm:$0xff] %v9713_v40  ;;  %2864 = vmatprep.mubr.bf16.mxu0 %v9713_v40  ;;  %2987 = vmatprep.mubr.bf16.mxu1 %v9713_v40  ;;  %v4303_v2 = vadd.f32 %v12000_v55, %v4155_v8  ;;  %v3781_v21 = vadd.f32 %v3653_v26, %v3378_v14  ;;  %v12022_v8 = vld [vmem:[#allocation38_spill] sm:$0xff] }
 0x268   :  { %v4056_v0 = vmul.f32 %v9722_v9, %v9197_v28  ;;  %v4029_v43 = vmul.f32 %v9590_v4, %v11967_v60  ;;  %v4556_v56 = vsel %vm4516_vm1, %v4401_v52, 0.0  ;;  %v4458_v19 = vmax.f32 %v4330_v45, 0.0  ;;  %v7919_v40 = vld [vmem:[#allocation6 + $0x6fc] ss:$24 sps:$4 sm:$0xff]   ;;  %2841 = vmatpush1.bf16.msra.mxu0 %v7908_v58  ;;  %v12025_v58 = vld [vmem:[#allocation56_spill] sm:$0xff] }
 0x269   :  { %v3754_v10 = vadd.f32 %v3626_v50, %v3351_v37  ;;  %v3404_v48 = vmul.f32 %v9467_v29, %v9167_v34  ;;  %4557 = vadd.xlane.f32.xlu0 %v4556_v56  ;;  %v4431_v30 = vmax.f32 %v4303_v2, 0.0  ;;  %v3679_v24 = vmul.f32 %v9471_v47, %v9176_v7  ;;  %v7914_v37 = vld [vmem:[#allocation6 + $0x6f0] ss:$24 sps:$4 sm:$0xff]   ;;  %2842 = vmatprep.subr.bf16.mxu0 %v7916_v63  ;;  %v7922_v56 = vld [vmem:[#allocation6 + $0x724] ss:$24 sps:$4 sm:$0xff]  }
 0x26a   :  { %v4184_v14 = vadd.f32 %v4056_v0, %v3781_v21  ;;  %v4082_v26 = vmul.f32 %v12022_v8, %v9214_v11  ;;  %v4727_v52 = vsel %vm4516_vm1, %v4458_v19, 0.0  ;;  %v3373_v15 = vmul.f32 %v12017_v1, %v11973_v23  ;;  %v12023_v2 = vld [vmem:[#allocation79_spill] sm:$0xff]  ;;  %2964 = vmatpush1.bf16.msra.mxu1 %v7911_v6  ;;  %v12026_v63 = vld [vmem:[#allocation66_spill] sm:$0xff] }
 0x26b   :  { %v4157_v45 = vadd.f32 %v4029_v43, %v3754_v10  ;;  %v3648_v33 = vmul.f32 %v12018_v61, %v11974_v44  ;;  %4728 = vadd.xlane.f32.xlu1 %v4727_v52  ;;  %v4646_v50 = vsel %vm4516_vm1, %v4431_v30, 0.0  ;;  %v3807_v0 = vadd.f32 %v3679_v24, %v3404_v48  ;;  %v12024_v1 = vld [vmem:[#allocation51_spill] sm:$0xff]  ;;  %v7917_v52 = vld [vmem:[#allocation6 + $0x6f8] ss:$24 sps:$4 sm:$0xff]   ;;  %2965 = vmatprep.subr.bf16.mxu1 %v7919_v40 }
 0x26c   :  { %v4332_v21 = vadd.f32 %v12023_v2, %v4184_v14  ;;  %v4051_v46 = vmul.f32 %v12019_v13, %v11975_v20  ;;  %v3408_v61 = vmul.f32 %v12024_v1, %v9167_v34  ;;  %v3683_v10 = vmul.f32 %v12025_v58, %v9176_v7  ;;  %v3151_v48 = vld [vmem:[%s11759_s4 + $0x68] sm:$0x7]  ;;  %v7925_v24 = vld [vmem:[#allocation6 + $0x72c] ss:$24 sps:$4 sm:$0xff]   ;;  %2843 = vmatpush1.bf16.msra.mxu0 %v7914_v37 }
 0x26d   :  { %v4305_v43 = vadd.f32 %v11969_v62, %v4157_v45  ;;  %v3776_v19 = vadd.f32 %v3648_v33, %v3373_v15  ;;  %4647 = vadd.xlane.f32.xlu0 %v4646_v50  ;;  %v4210_v13 = vadd.f32 %v4082_v26, %v3807_v0  ;;  %v4086_v14 = vmul.f32 %v12026_v63, %v9214_v11 }
 0x26e   :  { %v4460_v30 = vmax.f32 %v4332_v21, 0.0  ;;  %v3377_v6 = vmul.f32 %v12020_v12, %v11973_v23  ;;  %v3811_v33 = vadd.f32 %v3683_v10, %v3408_v61  ;;  %v3652_v41 = vmul.f32 %v9442_v25, %v11974_v44  ;;  %2844 = vmatprep.subr.bf16.mxu0 %v7922_v56  ;;  %v7928_v12 = vld [vmem:[#allocation6 + $0x754] ss:$24 sps:$4 sm:$0xff]   ;;  %2966 = vmatpush1.bf16.msra.mxu1 %v7917_v52  ;;  %v7926_v52 = vld [vmem:[#allocation6 + $0x750] ss:$24 sps:$4 sm:$0xff]  }
 0x26f   :  { %v4433_v45 = vmax.f32 %v4305_v43, 0.0  ;;  %v4179_v15 = vadd.f32 %v4051_v46, %v3776_v19  ;;  %v4358_v26 = vadd.f32 %v9309_v39, %v4210_v13  ;;  %v4055_v21 = vmul.f32 %v9445_v51, %v11975_v20  ;;  %v7923_v43 = vld [vmem:[#allocation6 + $0x728] ss:$24 sps:$4 sm:$0xff]   ;;  %2967 = vmatprep.subr.bf16.mxu1 %v7925_v24 }
 0x270   :  { %v4733_v50 = vsel %vm4516_vm1, %v4460_v30, 0.0  ;;  %v9771_v0 = vrot.slane %v3151_v48, %v11980_v5  ;;  %v4214_v25 = vadd.f32 %v4086_v14, %v3811_v33  ;;  %v3780_v37 = vadd.f32 %v3652_v41, %v3377_v6  ;;  %2845 = vmatpush1.bf16.msra.mxu0 %v7920_v38  ;;  %v7931_v14 = vld [vmem:[#allocation6 + $0x75c] ss:$24 sps:$4 sm:$0xff]  }
 0x271   :  { %4734 = vadd.xlane.f32.xlu1 %v4733_v50  ;;  %v4652_v40 = vsel %vm4516_vm1, %v4433_v45, 0.0  ;;  %v4327_v46 = vadd.f32 %v12000_v55, %v4179_v15  ;;  %v4486_v19 = vmax.f32 %v4358_v26, 0.0  ;;  %v9778_v51 = vrot.slane %v3151_v48, %v11979_v35  ;;  %2846 = vmatprep.subr.bf16.mxu0 %v7928_v12  ;;  %v7934_v15 = vld [vmem:[#allocation6 + $0x784] ss:$24 sps:$4 sm:$0xff]  }
 0x272   :  { %4653 = vadd.xlane.f32.xlu0 %v4652_v40  ;;  %v3410_v61 = vmul.f32 %v9771_v0, %v9116_v16  ;;  %v9781_v56 = vrot.slane %v3151_v48, %v11972_v59  ;;  %v4362_v30 = vadd.f32 %v9309_v39, %v4214_v25  ;;  %v4183_v13 = vadd.f32 %v4055_v21, %v3780_v37  ;;  %v7929_v21 = vld [vmem:[#allocation6 + $0x758] ss:$24 sps:$4 sm:$0xff]   ;;  %v3129_v37 = vld [vmem:[%s11759_s4 + $0x10] sm:$0x7] }
 0x273   :  { %v4455_v10 = vmax.f32 %v4327_v46, 0.0  ;;  %v3379_v41 = vmul.f32 %v9707_v31, %v11965_v17  ;;  %v4811_v6 = vsel %vm4516_vm1, %v4486_v19, 0.0  ;;  %v3685_v45 = vmul.f32 %v9778_v51, %v9131_v27  ;;  %2968 = vmatpush1.bf16.msra.mxu1 %v7923_v43 }
 0x274   :  { %v4088_v48 = vmul.f32 %v9781_v56, %v9197_v28  ;;  %v3654_v24 = vmul.f32 %v9711_v42, %v11966_v22  ;;  %v4490_v50 = vmax.f32 %v4362_v30, 0.0  ;;  %v4331_v38 = vadd.f32 %v12000_v55, %v4183_v13  ;;  %2969 = vmatprep.subr.bf16.mxu1 %v7931_v14  ;;  %2847 = vmatpush1.bf16.msra.mxu0 %v7926_v52  ;;  %v7937_v30 = vld [vmem:[#allocation6 + $0x78c] ss:$24 sps:$4 sm:$0xff]   ;;  %v7935_v14 = vld [vmem:[#allocation6 + $0x788] ss:$24 sps:$4 sm:$0xff]  }
 0x275   :  { %4812 = vadd.xlane.f32.xlu1 %v4811_v6  ;;  %v4718_v33 = vsel %vm4516_vm1, %v4455_v10, 0.0  ;;  %v4057_v26 = vmul.f32 %v9722_v9, %v11967_v60  ;;  %v3813_v40 = vadd.f32 %v3685_v45, %v3410_v61  ;;  %v3320_v25 = vmul.f32 %v9538_v49, %v9167_v34  ;;  %2848 = vmatprep.subr.bf16.mxu0 %v7934_v15 }
 0x276   :  { %4719 = vadd.xlane.f32.xlu0 %v4718_v33  ;;  %v3782_v46 = vadd.f32 %v3654_v24, %v3379_v41  ;;  %v3595_v12 = vmul.f32 %v9543_v36, %v9176_v7  ;;  %v4823_v19 = vsel %vm4516_vm1, %v4490_v50, 0.0  ;;  %v4459_v10 = vmax.f32 %v4331_v38, 0.0  ;;  %v7932_v24 = vld [vmem:[#allocation6 + $0x780] ss:$24 sps:$4 sm:$0xff]  }
 0x277   :  { %v3998_v43 = vmul.f32 %v9548_v53, %v9214_v11  ;;  %v3405_v61 = vmul.f32 %v9467_v29, %v11973_v23  ;;  %v4216_v13 = vadd.f32 %v4088_v48, %v3813_v40  ;;  %v3680_v45 = vmul.f32 %v9471_v47, %v11974_v44  ;;  %2970 = vmatpush1.bf16.msra.mxu1 %v7929_v21  ;;  %v7943_v40 = vld [vmem:[#allocation6 + $0x7bc] ss:$24 sps:$4 sm:$0xff]  }
 0x278   :  { %v4185_v41 = vadd.f32 %v4057_v26, %v3782_v46  ;;  %v3723_v6 = vadd.f32 %v3595_v12, %v3320_v25  ;;  %v4730_v33 = vsel %vm4516_vm1, %v4459_v10, 0.0  ;;  %v4083_v50 = vmul.f32 %v12022_v8, %v11975_v20  ;;  %v7940_v26 = vld [vmem:[#allocation6 + $0x7b4] ss:$24 sps:$4 sm:$0xff]   ;;  %2971 = vmatprep.subr.bf16.mxu1 %v7937_v30  ;;  %2849 = vmatpush1.bf16.msra.mxu0 %v7932_v24  ;;  %v7946_v30 = vld [vmem:[#allocation6 + $0x7e4] ss:$24 sps:$4 sm:$0xff]  }
 0x279   :  { %4824 = vadd.xlane.f32.xlu1 %v4823_v19  ;;  %v9815_v29 = vrot.slane %v3129_v37, %v11980_v5  ;;  %v9818_v52 = vrot.slane %v3129_v37, %v11979_v35  ;;  %v4364_v48 = vadd.f32 %v12023_v2, %v4216_v13  ;;  %v3808_v38 = vadd.f32 %v3680_v45, %v3405_v61  ;;  %v7938_v61 = vld [vmem:[#allocation6 + $0x7b0] ss:$24 sps:$4 sm:$0xff]  }
 0x27a   :  { %4731 = vadd.xlane.f32.xlu0 %v4730_v33  ;;  %v4333_v47 = vadd.f32 %v11969_v62, %v4185_v41  ;;  %v4126_v15 = vadd.f32 %v3998_v43, %v3723_v6  ;;  %v9827_v46 = vrot.slane %v3129_v37, %v11972_v59  ;;  %v3409_v25 = vmul.f32 %v12024_v1, %v11973_v23  ;;  %v7941_v1 = vld [vmem:[#allocation6 + $0x7b8] ss:$24 sps:$4 sm:$0xff]  }
 0x27b   :  { %v3322_v8 = vmul.f32 %v9815_v29, %v9116_v16  ;;  %v3597_v21 = vmul.f32 %v9818_v52, %v9131_v27  ;;  %v4492_v12 = vmax.f32 %v4364_v48, 0.0  ;;  %v4211_v43 = vadd.f32 %v4083_v50, %v3808_v38  ;;  %2972 = vmatpush1.bf16.msra.mxu1 %v7935_v14  ;;  %2850 = vmatprep.subr.bf16.mxu0 %v7940_v26  ;;  %v7949_v48 = vld [vmem:[#allocation6 + $0x7ec] ss:$24 sps:$4 sm:$0xff]   ;;  %v3137_v14 = vld [vmem:[%s11759_s4 + $0x30] sm:$0x7] }
 0x27c   :  { %v4461_v19 = vmax.f32 %v4333_v47, 0.0  ;;  %v4274_v10 = vadd.f32 %v9309_v39, %v4126_v15  ;;  %v4000_v41 = vmul.f32 %v9827_v46, %v9197_v28  ;;  %v3684_v6 = vmul.f32 %v12025_v58, %v11974_v44  ;;  %2973 = vmatprep.subr.bf16.mxu1 %v7943_v40  ;;  %v12027_v15 = vld [vmem:[#allocation63_spill] sm:$0xff]  ;;  %2851 = vmatpush1.bf16.msra.mxu0 %v7938_v61 }
 0x27d   :  { %v3725_v13 = vadd.f32 %v3597_v21, %v3322_v8  ;;  %v4087_v37 = vmul.f32 %v12026_v63, %v11975_v20  ;;  %v4829_v45 = vsel %vm4516_vm1, %v4492_v12, 0.0  ;;  %v4359_v24 = vadd.f32 %v12000_v55, %v4211_v43  ;;  %2852 = vmatprep.subr.bf16.mxu0 %v7946_v30 }
 0x27e   :  { %v4736_v33 = vsel %vm4516_vm1, %v4461_v19, 0.0  ;;  %v4402_v50 = vmax.f32 %v4274_v10, 0.0  ;;  %4830 = vadd.xlane.f32.xlu1 %v4829_v45  ;;  %v3812_v58 = vadd.f32 %v3684_v6, %v3409_v25  ;;  %v3352_v63 = vmul.f32 %v9583_v3, %v9167_v34  ;;  %v7944_v25 = vld [vmem:[#allocation6 + $0x7e0] ss:$24 sps:$4 sm:$0xff]  }
 0x27f   :  { %4737 = vadd.xlane.f32.xlu0 %v4736_v33  ;;  %v4128_v47 = vadd.f32 %v4000_v41, %v3725_v13  ;;  %v4487_v21 = vmax.f32 %v4359_v24, 0.0  ;;  %v3627_v26 = vmul.f32 %v9586_v57, %v9176_v7  ;;  %v4030_v40 = vmul.f32 %v9590_v4, %v9214_v11  ;;  %2974 = vmatpush1.bf16.msra.mxu1 %v7941_v1  ;;  %v7947_v13 = vld [vmem:[#allocation6 + $0x7e8] ss:$24 sps:$4 sm:$0xff]   ;;  %v7952_v41 = vld [vmem:[#allocation6 + $0x814] ss:$24 sps:$4 sm:$0xff]  }
 0x280   :  { %v4559_v8 = vsel %vm4516_vm1, %v4402_v50, 0.0  ;;  %v4215_v19 = vadd.f32 %v4087_v37, %v3812_v58  ;;  %v3411_v10 = vmul.f32 %v9771_v0, %v11965_v17  ;;  %v3686_v43 = vmul.f32 %v9778_v51, %v11966_v22  ;;  %2975 = vmatprep.subr.bf16.mxu1 %v7949_v48  ;;  %v7955_v37 = vld [vmem:[#allocation6 + $0x81c] ss:$24 sps:$4 sm:$0xff]   ;;  %2853 = vmatpush1.bf16.msra.mxu0 %v7944_v25  ;;  %v7950_v48 = vld [vmem:[#allocation6 + $0x810] ss:$24 sps:$4 sm:$0xff]  }
 0x281   :  { %v4276_v12 = vadd.f32 %v12023_v2, %v4128_v47  ;;  %v4814_v6 = vsel %vm4516_vm1, %v4487_v21, 0.0  ;;  %v3755_v45 = vadd.f32 %v3627_v26, %v3352_v63  ;;  %v4089_v33 = vmul.f32 %v9781_v56, %v11967_v60  ;;  %2854 = vmatprep.subr.bf16.mxu0 %v7952_v41 }
 0x282   :  { %v9861_v61 = vrot.slane %v3137_v14, %v11980_v5  ;;  %4560 = vadd.xlane.f32.xlu1 %v4559_v8  ;;  %v4363_v24 = vadd.f32 %v12000_v55, %v4215_v19  ;;  %v3814_v1 = vadd.f32 %v3686_v43, %v3411_v10  ;;  %v9865_v47 = vrot.slane %v3137_v14, %v11979_v35  ;;  %v7958_v10 = vld [vmem:[#allocation6 + $0x844] ss:$24 sps:$4 sm:$0xff]  }
 0x283   :  { %4815 = vadd.xlane.f32.xlu0 %v4814_v6  ;;  %v4404_v50 = vmax.f32 %v4276_v12, 0.0  ;;  %v4158_v58 = vadd.f32 %v4030_v40, %v3755_v45  ;;  %v9870_v21 = vrot.slane %v3137_v14, %v11972_v59  ;;  %v3321_v30 = vmul.f32 %v9538_v49, %v11973_v23  ;;  %2976 = vmatpush1.bf16.msra.mxu1 %v7947_v13  ;;  %v7953_v40 = vld [vmem:[#allocation6 + $0x818] ss:$24 sps:$4 sm:$0xff]   ;;  %v7961_v6 = vld [vmem:[#allocation6 + $0x84c] ss:$24 sps:$4 sm:$0xff]  }
 0x284   :  { %v3354_v63 = vmul.f32 %v9861_v61, %v9116_v16  ;;  %v4491_v26 = vmax.f32 %v4363_v24, 0.0  ;;  %v4217_v12 = vadd.f32 %v4089_v33, %v3814_v1  ;;  %v3629_v19 = vmul.f32 %v9865_v47, %v9131_v27  ;;  %2977 = vmatprep.subr.bf16.mxu1 %v7955_v37  ;;  %2855 = vmatpush1.bf16.msra.mxu0 %v7950_v48  ;;  %v3144_v37 = vld [vmem:[%s11759_s4 + $0x4c] sm:$0x7] }
 0x285   :  { %v4565_v8 = vsel %vm4516_vm1, %v4404_v50, 0.0  ;;  %v4306_v43 = vadd.f32 %v9309_v39, %v4158_v58  ;;  %v4032_v14 = vmul.f32 %v9870_v21, %v9197_v28  ;;  %v3596_v49 = vmul.f32 %v9543_v36, %v11974_v44  ;;  %2856 = vmatprep.subr.bf16.mxu0 %v7958_v10 }
 0x286   :  { %v3999_v25 = vmul.f32 %v9548_v53, %v11975_v20  ;;  %4566 = vadd.xlane.f32.xlu1 %v4565_v8  ;;  %v4826_v45 = vsel %vm4516_vm1, %v4491_v26, 0.0  ;;  %v4365_v13 = vadd.f32 %v11969_v62, %v4217_v12  ;;  %v3757_v41 = vadd.f32 %v3629_v19, %v3354_v63  ;;  %v7959_v26 = vld [vmem:[#allocation6 + $0x848] ss:$24 sps:$4 sm:$0xff]  }
 0x287   :  { %v3380_v33 = vmul.f32 %v9707_v31, %v9167_v34  ;;  %4827 = vadd.xlane.f32.xlu0 %v4826_v45  ;;  %v4434_v50 = vmax.f32 %v4306_v43, 0.0  ;;  %v3724_v24 = vadd.f32 %v3596_v49, %v3321_v30  ;;  %v3655_v36 = vmul.f32 %v9711_v42, %v9176_v7  ;;  %2978 = vmatpush1.bf16.msra.mxu1 %v7953_v40  ;;  %v7956_v30 = vld [vmem:[#allocation6 + $0x840] ss:$24 sps:$4 sm:$0xff]   ;;  %v7964_v49 = vld [vmem:[#allocation6 + $0x874] ss:$24 sps:$4 sm:$0xff]  }
 0x288   :  { %v4058_v53 = vmul.f32 %v9722_v9, %v9214_v11  ;;  %v4493_v1 = vmax.f32 %v4365_v13, 0.0  ;;  %v4160_v58 = vadd.f32 %v4032_v14, %v3757_v41  ;;  %v3323_v63 = vmul.f32 %v9815_v29, %v11965_v17  ;;  %2979 = vmatprep.subr.bf16.mxu1 %v7961_v6  ;;  %v7967_v14 = vld [vmem:[#allocation6 + $0x87c] ss:$24 sps:$4 sm:$0xff]   ;;  %2857 = vmatpush1.bf16.msra.mxu0 %v7956_v30 }
 0x289   :  { %v3598_v8 = vmul.f32 %v9818_v52, %v11966_v22  ;;  %v4655_v12 = vsel %vm4516_vm1, %v4434_v50, 0.0  ;;  %v4127_v19 = vadd.f32 %v3999_v25, %v3724_v24  ;;  %v3783_v48 = vadd.f32 %v3655_v36, %v3380_v33  ;;  %2858 = vmatprep.subr.bf16.mxu0 %v7964_v49 }
 0x28a   :  { %v4001_v43 = vmul.f32 %v9827_v46, %v11967_v60  ;;  %4656 = vadd.xlane.f32.xlu1 %v4655_v12  ;;  %v4832_v45 = vsel %vm4516_vm1, %v4493_v1, 0.0  ;;  %v4308_v13 = vadd.f32 %v12023_v2, %v4160_v58  ;;  %v9905_v40 = vrot.slane %v3144_v37, %v11980_v5  ;;  %v7962_v58 = vld [vmem:[#allocation6 + $0x870] ss:$24 sps:$4 sm:$0xff]  }
 0x28b   :  { %v3726_v41 = vadd.f32 %v3598_v8, %v3323_v63  ;;  %4833 = vadd.xlane.f32.xlu0 %v4832_v45  ;;  %v4275_v10 = vadd.f32 %v12000_v55, %v4127_v19  ;;  %v4186_v25 = vadd.f32 %v4058_v53, %v3783_v48  ;;  %v9909_v33 = vrot.slane %v3144_v37, %v11979_v35  ;;  %v7965_v12 = vld [vmem:[#allocation6 + $0x878] ss:$24 sps:$4 sm:$0xff]   ;;  %v7970_v19 = vld [vmem:[#allocation6 + $0x8a4] ss:$24 sps:$4 sm:$0xff]  }
 0x28c   :  { %v9912_v6 = vrot.slane %v3144_v37, %v11972_v59  ;;  %v4436_v50 = vmax.f32 %v4308_v13, 0.0  ;;  %v3382_v36 = vmul.f32 %v9905_v40, %v9116_v16  ;;  %v3353_v1 = vmul.f32 %v9583_v3, %v11973_v23  ;;  %2980 = vmatpush1.bf16.msra.mxu1 %v7959_v26  ;;  %2859 = vmatpush1.bf16.msra.mxu0 %v7962_v58 }
 0x28d   :  { %v4129_v24 = vadd.f32 %v4001_v43, %v3726_v41  ;;  %v4403_v63 = vmax.f32 %v4275_v10, 0.0  ;;  %v4334_v53 = vadd.f32 %v9309_v39, %v4186_v25  ;;  %v3657_v8 = vmul.f32 %v9909_v33, %v9131_v27  ;;  %2981 = vmatprep.subr.bf16.mxu1 %v7967_v14  ;;  %v7973_v43 = vld [vmem:[#allocation6 + $0x8ac] ss:$24 sps:$4 sm:$0xff]   ;;  %2860 = vmatprep.subr.bf16.mxu0 %v7970_v19 }
 0x28e   :  { %v4060_v37 = vmul.f32 %v9912_v6, %v9197_v28  ;;  %v4661_v48 = vsel %vm4516_vm1, %v4436_v50, 0.0  ;;  %v3628_v30 = vmul.f32 %v9586_v57, %v11974_v44  ;;  %v4031_v26 = vmul.f32 %v9590_v4, %v11975_v20  ;;  %v3152_v4 = vld [vmem:[%s11759_s4 + $0x6c] sm:$0x7] }
 0x28f   :  { %v4277_v3 = vadd.f32 %v11969_v62, %v4129_v24  ;;  %4662 = vadd.xlane.f32.xlu1 %v4661_v48  ;;  %v4562_v45 = vsel %vm4516_vm1, %v4403_v63, 0.0  ;;  %v4462_v13 = vmax.f32 %v4334_v53, 0.0  ;;  %v3785_v41 = vadd.f32 %v3657_v8, %v3382_v36  ;;  %v7968_v63 = vld [vmem:[#allocation6 + $0x8a0] ss:$24 sps:$4 sm:$0xff]  }
 0x290   :  { %v3412_v49 = vmul.f32 %v9771_v0, %v9167_v34  ;;  %4563 = vadd.xlane.f32.xlu0 %v4562_v45  ;;  %v3756_v10 = vadd.f32 %v3628_v30, %v3353_v1  ;;  %v3687_v25 = vmul.f32 %v9778_v51, %v9176_v7  ;;  %v4090_v57 = vmul.f32 %v9781_v56, %v9214_v11  ;;  %v7971_v53 = vld [vmem:[#allocation6 + $0x8a8] ss:$24 sps:$4 sm:$0xff]   ;;  %v7976_v30 = vld [vmem:[#allocation6 + $0x8d4] ss:$24 sps:$4 sm:$0xff]   ;;  %v9947_v45 = vpop.xlane.xlu1 %4521 }
 0x291   :  { %v4405_v14 = vmax.f32 %v4277_v3, 0.0  ;;  %v4739_v50 = vsel %vm4516_vm1, %v4462_v13, 0.0  ;;  %v4188_v24 = vadd.f32 %v4060_v37, %v3785_v41  ;;  %v3355_v36 = vmul.f32 %v9861_v61, %v11965_v17  ;;  %2982 = vmatpush1.bf16.msra.mxu1 %v7965_v12  ;;  %v7979_v37 = vld [vmem:[#allocation6 + $0x8dc] ss:$24 sps:$4 sm:$0xff]   ;;  %2861 = vmatpush1.bf16.msra.mxu0 %v7968_v63 }
 0x292   :  { %v3630_v1 = vmul.f32 %v9865_v47, %v11966_v22  ;;  %v4159_v58 = vadd.f32 %v4031_v26, %v3756_v10  ;;  %v3815_v48 = vadd.f32 %v3687_v25, %v3412_v49  ;;  %v4033_v3 = vmul.f32 %v9870_v21, %v11967_v60  ;;  %2983 = vmatprep.subr.bf16.mxu1 %v7973_v43 }
 0x293   :  { %v4568_v8 = vsel %vm4516_vm1, %v4405_v14, 0.0  ;;  %4740 = vadd.xlane.f32.xlu1 %v4739_v50  ;;  %v4336_v13 = vadd.f32 %v12023_v2, %v4188_v24  ;;  %v9951_v12 = vrot.slane %v3152_v4, %v11980_v5  ;;  %v9954_v19 = vrot.slane %v3152_v4, %v11979_v35  ;;  %2862 = vmatprep.subr.bf16.mxu0 %v7976_v30 }
 0x294   :  { %v3758_v41 = vadd.f32 %v3630_v1, %v3355_v36  ;;  %4569 = vadd.xlane.f32.xlu0 %v4568_v8  ;;  %v4307_v26 = vadd.f32 %v12000_v55, %v4159_v58  ;;  %v4218_v49 = vadd.f32 %v4090_v57, %v3815_v48  ;;  %v9958_v43 = vrot.slane %v3152_v4, %v11972_v59  ;;  %v7974_v36 = vld [vmem:[#allocation6 + $0x8d0] ss:$24 sps:$4 sm:$0xff]   ;;  %v7982_v58 = vld [vmem:[#allocation6 + $0x14] ss:$24 sps:$4 sm:$0xff]   ;;  %v9971_v48 = vpop.xlane.xlu0 %4518 }
 0x295   :  { %v3381_v14 = vmul.f32 %v9707_v31, %v11973_v23  ;;  %v4464_v10 = vmax.f32 %v4336_v13, 0.0  ;;  %v3414_v50 = vmul.f32 %v9951_v12, %v9116_v16  ;;  %v3689_v24 = vmul.f32 %v9954_v19, %v9131_v27  ;;  %2984 = vmatpush1.bf16.msra.mxu1 %v7971_v53  ;;  %v7977_v8 = vld [vmem:[#allocation6 + $0x8d8] ss:$24 sps:$4 sm:$0xff]   ;;  %12028 = vst [vmem:[#allocation57_spill] sm:$0xff] %v9971_v48 }
 0x296   :  { %v4161_v25 = vadd.f32 %v4033_v3, %v3758_v41  ;;  %v4435_v1 = vmax.f32 %v4307_v26, 0.0  ;;  %v4366_v57 = vadd.f32 %v9309_v39, %v4218_v49  ;;  %v4092_v4 = vmul.f32 %v9958_v43, %v9197_v28  ;;  %2985 = vmatprep.subr.bf16.mxu1 %v7979_v37  ;;  %v9973_v3 = vpop.xlane.xlu1 %4614  ;;  %2863 = vmatpush1.bf16.msra.mxu0 %v7974_v36 }
 0x297   :  { %v3656_v31 = vmul.f32 %v9711_v42, %v11974_v44  ;;  %12029 = vst [vmem:[#allocation64_spill] sm:$0xff] %v9973_v3  ;;  %v4745_v63 = vsel %vm4516_vm1, %v4464_v10, 0.0  ;;  %v3817_v13 = vadd.f32 %v3689_v24, %v3414_v50  ;;  %v4059_v41 = vmul.f32 %v9722_v9, %v11975_v20  ;;  %v3130_v9 = vld [vmem:[%s11759_s4 + $0x14] sm:$0x7]  ;;  %2996 = vmatprep.subr.bf16.mxu0 %v7982_v58 }
 0x298   :  { %v4309_v53 = vadd.f32 %v11969_v62, %v4161_v25  ;;  %4746 = vadd.xlane.f32.xlu1 %v4745_v63  ;;  %v4658_v26 = vsel %vm4516_vm1, %v4435_v1, 0.0  ;;  %v4494_v42 = vmax.f32 %v4366_v57, 0.0  ;;  %v3324_v37 = vmul.f32 %v9815_v29, %v9167_v34 }
 0x299   :  { %v3784_v30 = vadd.f32 %v3656_v31, %v3381_v14  ;;  %4659 = vadd.xlane.f32.xlu0 %v4658_v26  ;;  %v4220_v38 = vadd.f32 %v4092_v4, %v3817_v13  ;;  %v3599_v10 = vmul.f32 %v9818_v52, %v9176_v7  ;;  %v4002_v25 = vmul.f32 %v9827_v46, %v9214_v11 }
 0x29a   :  { %v4437_v49 = vmax.f32 %v4309_v53, 0.0  ;;  %v4835_v50 = vsel %vm4516_vm1, %v4494_v42, 0.0  ;;  %v3383_v24 = vmul.f32 %v9905_v40, %v11965_v17  ;;  %v3658_v1 = vmul.f32 %v9909_v33, %v11966_v22  ;;  %2986 = vmatpush1.bf16.msra.mxu1 %v7977_v8  ;;  %v10005_v8 = vpop.xlane.xlu0 %4530  ;;  %v10007_v58 = vpop.xlane.xlu1 %4626 }
 0x29b   :  { %v4187_v14 = vadd.f32 %v4059_v41, %v3784_v30  ;;  %v4368_v4 = vadd.f32 %v12023_v2, %v4220_v38  ;;  %v3727_v36 = vadd.f32 %v3599_v10, %v3324_v37  ;;  %v4061_v31 = vmul.f32 %v9912_v6, %v11967_v60  ;;  %12030 = vst [vmem:[#allocation43_spill] sm:$0xff] %v10005_v8 }
 0x29c   :  { %v4664_v57 = vsel %vm4516_vm1, %v4437_v49, 0.0  ;;  %4836 = vadd.xlane.f32.xlu1 %v4835_v50  ;;  %v3786_v53 = vadd.f32 %v3658_v1, %v3383_v24  ;;  %v10000_v13 = vrot.slane %v3130_v9, %v11980_v5  ;;  %v10003_v41 = vrot.slane %v3130_v9, %v11979_v35  ;;  %12031 = vst [vmem:[#allocation40_spill] sm:$0xff] %v10007_v58 }
 0x29d   :  { %v4335_v63 = vadd.f32 %v12000_v55, %v4187_v14  ;;  %4665 = vadd.xlane.f32.xlu0 %v4664_v57  ;;  %v4496_v38 = vmax.f32 %v4368_v4, 0.0  ;;  %v4130_v26 = vadd.f32 %v4002_v25, %v3727_v36  ;;  %v10010_v42 = vrot.slane %v3130_v9, %v11972_v59 }
 0x29e   :  { %v3413_v30 = vmul.f32 %v9771_v0, %v11973_v23  ;;  %v4189_v49 = vadd.f32 %v4061_v31, %v3786_v53  ;;  %v3326_v10 = vmul.f32 %v10000_v13, %v9116_v16  ;;  %v3601_v50 = vmul.f32 %v10003_v41, %v9131_v27 }
 0x29f   :  { %v4463_v37 = vmax.f32 %v4335_v63, 0.0  ;;  %v4841_v14 = vsel %vm4516_vm1, %v4496_v38, 0.0  ;;  %v4278_v24 = vadd.f32 %v9309_v39, %v4130_v26  ;;  %v4004_v25 = vmul.f32 %v10010_v42, %v9197_v28  ;;  %v12032_v63 = vld [vmem:[#allocation58_spill] sm:$0xff] }
 0x2a0   :  { %v3688_v9 = vmul.f32 %v9778_v51, %v11974_v44  ;;  %4842 = vadd.xlane.f32.xlu1 %v4841_v14  ;;  %v4337_v1 = vadd.f32 %v11969_v62, %v4189_v49  ;;  %v3729_v57 = vadd.f32 %v3601_v50, %v3326_v10  ;;  %v4091_v4 = vmul.f32 %v9781_v56, %v11975_v20  ;;  %v10034_v14 = vpop.xlane.xlu1 %4524  ;;  %v12036_v49 = vld [vmem:[#allocation65_spill] sm:$0xff]  ;;  %v12038_v56 = vld [vmem:[#allocation44_spill] sm:$0xff] }
 0x2a1   :  { %v4742_v0 = vsel %vm4516_vm1, %v4463_v37, 0.0  ;;  %v4406_v36 = vmax.f32 %v4278_v24, 0.0  ;;  %v12033_v53 = vrot.slane %v12032_v63, 1  ;;  %v12034_v26 = vrot.slane %v12027_v15, 1  ;;  %12035 = vst [vmem:[#allocation48_spill] sm:$0xff] %v10034_v14 }
 0x2a2   :  { %4743 = vadd.xlane.f32.xlu0 %v4742_v0  ;;  %v3816_v31 = vadd.f32 %v3688_v9, %v3413_v30  ;;  %v4465_v37 = vmax.f32 %v4337_v1, 0.0  ;;  %v4132_v58 = vadd.f32 %v4004_v25, %v3729_v57  ;;  %v12037_v10 = vrot.slane %v12036_v49, 2  ;;  %v10041_v30 = vpop.xlane.xlu0 %4533 }
 0x2a3   :  { %v594_v38 = vadd.f32 %v12033_v53, %v12032_v63  ;;  %v630_v51 = vadd.f32 %v12034_v26, %v12027_v15  ;;  %v699_v24 = vmul.f32 %v9120_v18, %v12038_v56  ;;  %12039 = vst [vmem:[#allocation53_spill] sm:$0xff] %v10041_v30  ;;  %v4571_v9 = vsel %vm4516_vm1, %v4406_v36, 0.0  ;;  %v12040_v63 = vld [vmem:[#allocation41_spill] sm:$0xff]  ;;  %v12041_v53 = vld [vmem:[#allocation71_spill] sm:$0xff]  ;;  %v12042_v15 = vld [vmem:[#allocation50_spill] sm:$0xff] }
 0x2a4   :  { %v664_v50 = vadd.f32 %v12037_v10, %v12036_v49  ;;  %v4219_v0 = vadd.f32 %v4091_v4, %v3816_v31  ;;  %v711_v3 = vmul.f32 %v12041_v53, %v12040_v63  ;;  %v717_v26 = vmul.f32 %v9144_v32, %v12042_v15  ;;  %4572 = vadd.xlane.f32.xlu1 %v4571_v9  ;;  %v12043_v49 = vld [vmem:[#allocation54_spill] sm:$0xff]  ;;  %v12044_v10 = vld [vmem:[#allocation72_spill] sm:$0xff]  ;;  %v12045_v36 = vld [vmem:[#allocation75_spill] sm:$0xff]  ;;  %v10055_v15 = vpop.xlane.xlu1 %4536 }
 0x2a5   :  { %v4748_v25 = vsel %vm4516_vm1, %v4465_v37, 0.0  ;;  %v4280_v1 = vadd.f32 %v12023_v2, %v4132_v58  ;;  %v723_v18 = vmul.f32 %v12044_v10, %v12043_v49  ;;  %v729_v4 = vmul.f32 %v9151_v54, %v594_v38 }
 0x2a6   :  { %v665_v57 = vrot.slane %v664_v50, 1  ;;  %4749 = vadd.xlane.f32.xlu0 %v4748_v25  ;;  %v4367_v56 = vadd.f32 %v12000_v55, %v4219_v0  ;;  %v735_v31 = vmul.f32 %v12045_v36, %v630_v51  ;;  %v747_v63 = vpack.c.bf16 %v699_v24, %v699_v24  ;;  %v12046_v25 = vld [vmem:[#allocation76_spill] sm:$0xff]  ;;  %v10059_v54 = vpop.xlane.xlu0 %4617 }
 0x2a7   :  { %v4408_v53 = vmax.f32 %v4280_v1, 0.0  ;;  %v759_v32 = vpack.c.bf16 %v711_v3, %v711_v3  ;;  %v765_v9 = vpack.c.bf16 %v717_v26, %v717_v26  ;;  %v771_v58 = vpack.c.bf16 %v723_v18, %v723_v18  ;;  %v12047_v1 = vld [vmem:[#allocation74_spill] sm:$0xff] }
 0x2a8   :  { %v666_v14 = vadd.f32 %v665_v57, %v664_v50  ;;  %v4495_v37 = vmax.f32 %v4367_v56, 0.0  ;;  %v777_v8 = vpack.c.bf16 %v729_v4, %v729_v4  ;;  %v783_v30 = vpack.c.bf16 %v735_v31, %v735_v31 }
 0x2a9   :  { %v4577_v49 = vsel %vm4516_vm1, %v4408_v53, 0.0  ;;  %v1163_v0 = vunpack.c.l.b16 %v747_v63  ;;  %v1175_v48 = vunpack.c.l.b16 %v759_v32  ;;  %v1181_v51 = vunpack.c.l.b16 %v765_v9  ;;  %v10073_v9 = vpop.xlane.xlu1 %4542 }
 0x2aa   :  { %v741_v10 = vmul.f32 %v12046_v25, %v666_v14  ;;  %4578 = vadd.xlane.f32.xlu1 %v4577_v49  ;;  %v4838_v38 = vsel %vm4516_vm1, %v4495_v37, 0.0  ;;  %v1187_v3 = vunpack.c.l.b16 %v771_v58  ;;  %v1193_v50 = vunpack.c.l.b16 %v777_v8  ;;  %12049 = vst [vmem:[#allocation46_spill] sm:$0xff] %v10073_v9 }
 0x2ab   :  { %4839 = vadd.xlane.f32.xlu0 %v4838_v38  ;;  %v1199_v26 = vunpack.c.l.b16 %v783_v30  ;;  %v12048_v57 = vrot.slane %v12047_v1, 7  ;;  %v1272_v56 = vrot.slane %v1175_v48, 6  ;;  %v1274_v4 = vrot.slane %v1181_v51, 5  ;;  %v3138_v30 = vld [vmem:[%s11759_s4 + $0x34] sm:$0x7]  ;;  %v10085_v51 = vpop.xlane.xlu0 %4629 }
 0x2ac   :  { %v789_v24 = vpack.c.bf16 %v741_v10, %v741_v10  ;;  %v1276_v14 = vrot.slane %v1187_v3, 4  ;;  %v1278_v36 = vrot.slane %v1193_v50, 3  ;;  %v3356_v31 = vmul.f32 %v9861_v61, %v9167_v34 }
 0x2ad   :  { %v1271_v18 = vsel %vm1208_vm2, %v12048_v57, %v1163_v0  ;;  %v1280_v32 = vrot.slane %v1199_v26, 2  ;;  %v3631_v8 = vmul.f32 %v9865_v47, %v9176_v7  ;;  %v4034_v37 = vmul.f32 %v9870_v21, %v9214_v11 }
 0x2ae   :  { %v1205_v63 = vunpack.c.l.b16 %v789_v24  ;;  %v1273_v53 = vsel %vm1211_vm3, %v1272_v56, %v1271_v18  ;;  %v3415_v58 = vmul.f32 %v9951_v12, %v11965_v17  ;;  %v3690_v49 = vmul.f32 %v9954_v19, %v11966_v22 }
 0x2af   :  { %v1275_v48 = vsel %vm1214_vm4, %v1274_v4, %v1273_v53  ;;  %v3759_v0 = vadd.f32 %v3631_v8, %v3356_v31  ;;  %v4093_v38 = vmul.f32 %v9958_v43, %v11967_v60  ;;  %v10089_v24 = vrot.slane %v3138_v30, %v11980_v5  ;;  %v7985_v8 = vld [vmem:[#allocation6 + $0x44] ss:$24 sps:$4 sm:$0xff]  }
 0x2b0   :  { %v1277_v25 = vsel %vm1217_vm5, %v1276_v14, %v1275_v48  ;;  %v1282_v10 = vrot.slane %v1205_v63, 1  ;;  %v3818_v50 = vadd.f32 %v3690_v49, %v3415_v58  ;;  %v10092_v26 = vrot.slane %v3138_v30, %v11979_v35  ;;  %v7980_v14 = vld [vmem:[#allocation6 + $0x10] ss:$24 sps:$4 sm:$0xff]   ;;  %v10112_v48 = vpop.xlane.xlu1 %4620 }
 0x2b1   :  { %v1279_v3 = vsel %vm1220_vm6, %v1278_v36, %v1277_v25  ;;  %v4162_v57 = vadd.f32 %v4034_v37, %v3759_v0  ;;  %v10096_v18 = vrot.slane %v3138_v30, %v11972_v59  ;;  %v3325_v56 = vmul.f32 %v9815_v29, %v11973_v23  ;;  %12051 = vst [vmem:[#allocation47_spill] sm:$0xff] %v10112_v48  ;;  %v7994_v48 = vld [vmem:[#allocation6 + $0xd4] ss:$24 sps:$4 sm:$0xff]  }
 0x2b2   :  { %v1281_v1 = vsel %vm1223_vm7, %v1280_v32, %v1279_v3  ;;  %v4221_v36 = vadd.f32 %v4093_v38, %v3818_v50  ;;  %v3358_v31 = vmul.f32 %v10089_v24, %v9116_v16  ;;  %v3633_v63 = vmul.f32 %v10092_v26, %v9131_v27  ;;  %v3145_v38 = vld [vmem:[%s11759_s4 + $0x50] sm:$0x7]  ;;  %v10126_v3 = vpop.xlane.xlu0 %4527 }
 0x2b3   :  { %v1283_v4 = vsel %vm1226_vm8, %v1282_v10, %v1281_v1  ;;  %v4310_v32 = vadd.f32 %v9309_v39, %v4162_v57  ;;  %v4036_v30 = vmul.f32 %v10096_v18, %v9197_v28  ;;  %v3600_v29 = vmul.f32 %v9818_v52, %v11974_v44  ;;  %v7983_v1 = vld [vmem:[#allocation6 + $0x40] ss:$24 sps:$4 sm:$0xff]  }
 0x2b4   :  { %v10105_v53 = vpack.c.b16 %v1283_v4, %v1283_v4  ;;  %v4369_v37 = vadd.f32 %v11969_v62, %v4221_v36  ;;  %v3761_v58 = vadd.f32 %v3633_v63, %v3358_v31  ;;  %v4003_v49 = vmul.f32 %v9827_v46, %v11975_v20  ;;  %v12052_v46 = vld [vmem:[#allocation78_spill] sm:$0xff]  ;;  %v7988_v63 = vld [vmem:[#allocation6 + $0x74] ss:$24 sps:$4 sm:$0xff]  }
 0x2b5   :  { %v4438_v25 = vmax.f32 %v4310_v32, 0.0  ;;  %v3728_v10 = vadd.f32 %v3600_v29, %v3325_v56  ;;  %v3384_v0 = vmul.f32 %v9905_v40, %v9167_v34  ;;  %v3659_v52 = vmul.f32 %v9909_v33, %v9176_v7 }
 0x2b6   :  { %12050 = vst [vmem:[#allocation73_spill] sm:$0xff] %v10105_v53  ;;  %2865 = vmatmul.mubr.bf16.vlgmr.msra.gmra.mrb[0].mxu0 %v10105_v53  ;;  %2988 = vmatmul.mubr.bf16.vlgmr.msra.gmra.mrb[0].mxu1 %v10105_v53  ;;  %v4497_v50 = vmax.f32 %v4369_v37, 0.0  ;;  %v4164_v57 = vadd.f32 %v4036_v30, %v3761_v58  ;;  %v4062_v56 = vmul.f32 %v9912_v6, %v9214_v11 }
 0x2b7   :  { %2997 = vmatpush1.bf16.msra.mxu0 %v7980_v14  ;;  %3028 = vmatprep.mubr.bf16.mxu0 %v12052_v46  ;;  %v3327_v4 = vmul.f32 %v10000_v13, %v11965_v17  ;;  %v4667_v36 = vsel %vm4516_vm1, %v4438_v25, 0.0  ;;  %v4131_v31 = vadd.f32 %v4003_v49, %v3728_v10  ;;  %v3787_v32 = vadd.f32 %v3659_v52, %v3384_v0  ;;  %v10147_v0 = vpop.xlane.xlu1 %4632  ;;  %v7986_v46 = vld [vmem:[#allocation6 + $0x70] ss:$24 sps:$4 sm:$0xff]  }
 0x2b8   :  { %2998 = vmatprep.subr.bf16.mxu0 %v7985_v8  ;;  %v3602_v14 = vmul.f32 %v10003_v41, %v11966_v22  ;;  %4668 = vadd.xlane.f32.xlu1 %v4667_v36  ;;  %v4844_v29 = vsel %vm4516_vm1, %v4497_v50, 0.0  ;;  %v4312_v30 = vadd.f32 %v12023_v2, %v4164_v57  ;;  %v4005_v37 = vmul.f32 %v10010_v42, %v11967_v60 }
 0x2b9   :  { %v10141_v58 = vrot.slane %v3145_v38, %v11980_v5  ;;  %4845 = vadd.xlane.f32.xlu0 %v4844_v29  ;;  %v4279_v8 = vadd.f32 %v12000_v55, %v4131_v31  ;;  %v4190_v49 = vadd.f32 %v4062_v56, %v3787_v32  ;;  %v10145_v10 = vrot.slane %v3145_v38, %v11979_v35  ;;  %v7991_v32 = vld [vmem:[#allocation6 + $0xa4] ss:$24 sps:$4 sm:$0xff]  }
 0x2ba   :  { %v3730_v25 = vadd.f32 %v3602_v14, %v3327_v4  ;;  %12054 = vst [vmem:[#allocation55_spill] sm:$0xff] %v10147_v0  ;;  %v4440_v52 = vmax.f32 %v4312_v30, 0.0  ;;  %v10152_v57 = vrot.slane %v3145_v38, %v11972_v59  ;;  %v3357_v36 = vmul.f32 %v9861_v61, %v11973_v23  ;;  %v10159_v14 = vpop.xlane.xlu0 %4539 }
 0x2bb   :  { %12053 = vst [vmem:[#allocation52_spill] sm:$0xff] %v10141_v58  ;;  %2999 = vmatpush1.bf16.msra.mxu0 %v7983_v1  ;;  %v3386_v50 = vmul.f32 %v10141_v58, %v9116_v16  ;;  %v4407_v31 = vmax.f32 %v4279_v8, 0.0  ;;  %v4338_v56 = vadd.f32 %v9309_v39, %v4190_v49  ;;  %v3661_v1 = vmul.f32 %v10145_v10, %v9131_v27  ;;  %v10170_v9 = vpop.xlane.xlu1 %4638 }
 0x2bc   :  { %12055 = vst [vmem:[#allocation59_spill] sm:$0xff] %v10152_v57  ;;  %3000 = vmatprep.subr.bf16.mxu0 %v7988_v63  ;;  %v4133_v4 = vadd.f32 %v4005_v37, %v3730_v25  ;;  %12056 = vst [vmem:[#allocation61_spill] sm:$0xff] %v10159_v14  ;;  %v4673_v29 = vsel %vm4516_vm1, %v4440_v52, 0.0  ;;  %v4064_v38 = vmul.f32 %v10152_v57, %v9197_v28  ;;  %v7989_v25 = vld [vmem:[#allocation6 + $0xa0] ss:$24 sps:$4 sm:$0xff]  }
 0x2bd   :  { %v3632_v30 = vmul.f32 %v9865_v47, %v11974_v44  ;;  %v4035_v61 = vmul.f32 %v9870_v21, %v11975_v20  ;;  %4674 = vadd.xlane.f32.xlu1 %v4673_v29  ;;  %v4574_v63 = vsel %vm4516_vm1, %v4407_v31, 0.0  ;;  %v4466_v37 = vmax.f32 %v4338_v56, 0.0  ;;  %12057 = vst [vmem:[#allocation45_spill] sm:$0xff] %v10170_v9 }
 0x2be   :  { %v4281_v8 = vadd.f32 %v11969_v62, %v4133_v4  ;;  %v3789_v49 = vadd.f32 %v3661_v1, %v3386_v50  ;;  %4575 = vadd.xlane.f32.xlu0 %v4574_v63  ;;  %v3416_v50 = vmul.f32 %v9951_v12, %v9167_v34  ;;  %v3153_v63 = vld [vmem:[%s11759_s4 + $0x70] sm:$0x7] }
 0x2bf   :  { %3001 = vmatpush1.bf16.msra.mxu0 %v7986_v46  ;;  %v3760_v52 = vadd.f32 %v3632_v30, %v3357_v36  ;;  %v4751_v47 = vsel %vm4516_vm1, %v4466_v37, 0.0  ;;  %v3691_v46 = vmul.f32 %v9954_v19, %v9176_v7  ;;  %v10179_v36 = vpop.xlane.xlu0 %4545 }
 0x2c0   :  { %v4409_v53 = vmax.f32 %v4281_v8, 0.0  ;;  %3002 = vmatprep.subr.bf16.mxu0 %v7991_v32  ;;  %v4192_v0 = vadd.f32 %v4064_v38, %v3789_v49  ;;  %12058 = vst [vmem:[#allocation42_spill] sm:$0xff] %v10179_v36  ;;  %v7992_v32 = vld [vmem:[#allocation6 + $0xd0] ss:$24 sps:$4 sm:$0xff]   ;;  %v7997_v38 = vld [vmem:[#allocation6 + $0x104] ss:$24 sps:$4 sm:$0xff]   ;;  %v10194_v49 = vpop.xlane.xlu1 %4710 }
 0x2c1   :  { %v4163_v21 = vadd.f32 %v4035_v61, %v3760_v52  ;;  %4752 = vadd.xlane.f32.xlu1 %v4751_v47  ;;  %v3819_v29 = vadd.f32 %v3691_v46, %v3416_v50  ;;  %v3634_v61 = vmul.f32 %v10092_v26, %v11966_v22  ;;  %12059 = vst [vmem:[#allocation69_spill] sm:$0xff] %v10194_v49  ;;  %v12060_v47 = vlaneseq  ;;  %v12062_v50 = vld [vmem:[#allocation57_spill] sm:$0xff]  ;;  %v8003_v36 = vld [vmem:[#allocation6 + $0x164] ss:$24 sps:$4 sm:$0xff]  }
 0x2c2   :  { %v4580_v31 = vsel %vm4516_vm1, %v4409_v53, 0.0  ;;  %v4340_v56 = vadd.f32 %v12023_v2, %v4192_v0  ;;  %v4094_v53 = vmul.f32 %v9958_v43, %v9214_v11  ;;  %v3359_v0 = vmul.f32 %v10089_v24, %v11965_v17 }
 0x2c3   :  { %4581 = vadd.xlane.f32.xlu0 %v4580_v31  ;;  %3003 = vmatpush1.bf16.msra.mxu0 %v7989_v25  ;;  %v4311_v4 = vadd.f32 %v12000_v55, %v4163_v21  ;;  %v4903_v25 = vmul.f32 0.015625, %v9947_v45  ;;  %v10199_v21 = vand.u32 127, %v12060_v47  ;;  %v4902_v46 = vmul.f32 0.015625, %v12062_v50 }
 0x2c4   :  { %v4468_v1 = vmax.f32 %v4340_v56, 0.0  ;;  %3004 = vmatprep.subr.bf16.mxu0 %v7994_v48  ;;  %v4222_v8 = vadd.f32 %v4094_v53, %v3819_v29  ;;  %v4037_v48 = vmul.f32 %v10096_v18, %v11967_v60  ;;  %v3762_v31 = vadd.f32 %v3634_v61, %v3359_v0  ;;  %v7995_v56 = vld [vmem:[#allocation6 + $0x100] ss:$24 sps:$4 sm:$0xff]   ;;  %v8000_v29 = vld [vmem:[#allocation6 + $0x134] ss:$24 sps:$4 sm:$0xff]   ;;  %v10209_v53 = vpop.xlane.xlu0 %4623  ;;  %v10233_v9 = vpop.xlane.xlu1 %4722 }
 0x2c5   :  { %v4439_v30 = vmax.f32 %v4311_v4, 0.0  ;;  %12061 = vst [vmem:[#allocation49_spill] sm:$0xff] %v10199_v21  ;;  %v10207_v45 = vrot.slane %v3153_v63, %v11979_v35  ;;  %12064 = vst [vmem:[#allocation67_spill] sm:$0xff] %v10209_v53  ;;  %v3385_v0 = vmul.f32 %v9905_v40, %v11973_v23  ;;  %v3660_v61 = vmul.f32 %v9909_v33, %v11974_v44  ;;  %v7998_v33 = vld [vmem:[#allocation6 + $0x130] ss:$24 sps:$4 sm:$0xff]  }
 0x2c6   :  { %v4757_v37 = vsel %vm4516_vm1, %v4468_v1, 0.0  ;;  %v4370_v4 = vadd.f32 %v9309_v39, %v4222_v8  ;;  %v10204_v1 = vrot.slane %v3153_v63, %v11980_v5  ;;  %12067 = vst [vmem:[#allocation38_spill] sm:$0xff] %v10233_v9 }
 0x2c7   :  { %4758 = vadd.xlane.f32.xlu1 %v4757_v37  ;;  %v4670_v52 = vsel %vm4516_vm1, %v4439_v30, 0.0  ;;  %3005 = vmatpush1.bf16.msra.mxu0 %v7992_v32  ;;  %12063 = vst [vmem:[#allocation60_spill] sm:$0xff] %v10207_v45  ;;  %v4165_v30 = vadd.f32 %v4037_v48, %v3762_v31  ;;  %v10212_v32 = vrot.slane %v3153_v63, %v11972_v59  ;;  %v5303_v48 = vadd.s32 4294967288, %v10199_v21  ;;  %v12066_v31 = vld [vmem:[#allocation32_spill] sm:$0xff] }
 0x2c8   :  { %4671 = vadd.xlane.f32.xlu0 %v4670_v52  ;;  %3006 = vmatprep.subr.bf16.mxu0 %v7997_v38  ;;  %v4498_v38 = vmax.f32 %v4370_v4, 0.0  ;;  %v3418_v37 = vmul.f32 %v10204_v1, %v9116_v16  ;;  %v3693_v8 = vmul.f32 %v10207_v45, %v9131_v27  ;;  %v4063_v52 = vmul.f32 %v9912_v6, %v11975_v20 }
 0x2c9   :  { %12065 = vst [vmem:[#allocation36_spill] sm:$0xff] %v10212_v32  ;;  %v4313_v63 = vadd.f32 %v11969_v62, %v4165_v30  ;;  %v4096_v40 = vmul.f32 %v10212_v32, %v9197_v28  ;;  %v3788_v47 = vadd.f32 %v3660_v61, %v3385_v0  ;;  %v10230_v50 = vsub.s32 %v10199_v21, %v12066_v31 }
 0x2ca   :  { %v4847_v4 = vsel %vm4516_vm1, %v4498_v38, 0.0  ;;  %v3821_v49 = vadd.f32 %v3693_v8, %v3418_v37  ;;  %v5030_v6 = vpack.c.bf16 %v4903_v25, %v4902_v46  ;;  %v3603_v61 = vmul.f32 %v10003_v41, %v9176_v7  ;;  %v10243_v38 = vpop.xlane.xlu0 %4635  ;;  %v12069_v8 = vld [vmem:[#allocation53_spill] sm:$0xff] }
 0x2cb   :  { %3007 = vmatpush1.bf16.msra.mxu0 %v7995_v56  ;;  %4848 = vadd.xlane.f32.xlu1 %v4847_v4  ;;  %v4441_v53 = vmax.f32 %v4313_v63, 0.0  ;;  %v4191_v30 = vadd.f32 %v4063_v52, %v3788_v47  ;;  %v3328_v56 = vmul.f32 %v10000_v13, %v9167_v34  ;;  %v4006_v21 = vmul.f32 %v10010_v42, %v9214_v11  ;;  %v8001_v52 = vld [vmem:[#allocation6 + $0x160] ss:$24 sps:$4 sm:$0xff]   ;;  %v3131_v63 = vld [vmem:[%s11759_s4 + $0x18] sm:$0x7] }
 0x2cc   :  { %3008 = vmatprep.subr.bf16.mxu0 %v8000_v29  ;;  %v4224_v0 = vadd.f32 %v4096_v40, %v3821_v49  ;;  %v3387_v29 = vmul.f32 %v10141_v58, %v11965_v17  ;;  %12068 = vst [vmem:[#allocation51_spill] sm:$0xff] %v10243_v38  ;;  %v10246_v25 = vsub.s32 %v5303_v48, %v12066_v31  ;;  %v4907_v49 = vmul.f32 0.015625, %v12069_v8  ;;  %v8006_v4 = vld [vmem:[#allocation6 + $0x194] ss:$24 sps:$4 sm:$0xff]   ;;  %v12070_v8 = vld [vmem:[#allocation43_spill] sm:$0xff] }
 0x2cd   :  { %v4676_v46 = vsel %vm4516_vm1, %v4441_v53, 0.0  ;;  %v4339_v37 = vadd.f32 %v12000_v55, %v4191_v30  ;;  %v3731_v47 = vadd.f32 %v3603_v61, %v3328_v56  ;;  %v3662_v48 = vmul.f32 %v10145_v10, %v11966_v22  ;;  %v10263_v56 = vpop.xlane.xlu1 %4806 }
 0x2ce   :  { %4677 = vadd.xlane.f32.xlu0 %v4676_v46  ;;  %v4372_v40 = vadd.f32 %v12023_v2, %v4224_v0  ;;  %v4065_v53 = vmul.f32 %v10152_v57, %v11967_v60  ;;  %v5169_v30 = vunpack.c.l.b16 %v5030_v6  ;;  %v5170_v9 = vunpack.c.h.b16 %v5030_v6  ;;  %12072 = vst [vmem:[#allocation66_spill] sm:$0xff] %v10263_v56 }
 0x2cf   :  { %3009 = vmatpush1.bf16.msra.mxu0 %v7998_v33  ;;  %v4906_v33 = vmul.f32 0.015625, %v12070_v8  ;;  %v4467_v38 = vmax.f32 %v4339_v37, 0.0  ;;  %v4134_v58 = vadd.f32 %v4006_v21, %v3731_v47  ;;  %v3790_v14 = vadd.f32 %v3662_v48, %v3387_v29  ;;  %v8004_v37 = vld [vmem:[#allocation6 + $0x190] ss:$24 sps:$4 sm:$0xff]   ;;  %v8009_v48 = vld [vmem:[#allocation6 + $0x1c4] ss:$24 sps:$4 sm:$0xff]  }
 0x2d0   :  { %3010 = vmatprep.subr.bf16.mxu0 %v8003_v36  ;;  %v4500_v31 = vmax.f32 %v4372_v40, 0.0  ;;  %v10261_v46 = vrot.slane %v3131_v63, %v11980_v5  ;;  %v10267_v57 = vrot.slane %v3131_v63, %v11979_v35  ;;  %v10270_v6 = vrot.slane %v3131_v63, %v11972_v59  ;;  %v12075_v36 = vld [vmem:[#allocation64_spill] sm:$0xff] }
 0x2d1   :  { %v4754_v0 = vsel %vm4516_vm1, %v4467_v38, 0.0  ;;  %v5032_v61 = vpack.c.bf16 %v4907_v49, %v4906_v33  ;;  %v4934_v40 = vmul.f32 0.015625, %v12075_v36  ;;  %v4282_v29 = vadd.f32 %v9309_v39, %v4134_v58  ;;  %v10275_v38 = vpop.xlane.xlu0 %4641 }
 0x2d2   :  { %12071 = vst [vmem:[#allocation56_spill] sm:$0xff] %v10261_v46  ;;  %12073 = vst [vmem:[#allocation63_spill] sm:$0xff] %v10267_v57  ;;  %v4853_v21 = vsel %vm4516_vm1, %v4500_v31, 0.0  ;;  %4755 = vadd.xlane.f32.xlu0 %v4754_v0  ;;  %v4193_v47 = vadd.f32 %v4065_v53, %v3790_v14  ;;  %v5302_v49 = vrot.slane %v5169_v30, %v10230_v50 }
 0x2d3   :  { %3011 = vmatpush1.bf16.msra.mxu0 %v8001_v52  ;;  %12074 = vst [vmem:[#allocation58_spill] sm:$0xff] %v10270_v6  ;;  %12076 = vst [vmem:[#allocation65_spill] sm:$0xff] %v10275_v38  ;;  %4854 = vadd.xlane.f32.xlu1 %v4853_v21  ;;  %v3330_v52 = vmul.f32 %v10261_v46, %v9116_v16  ;;  %v3605_v63 = vmul.f32 %v10267_v57, %v9131_v27  ;;  %v4410_v8 = vmax.f32 %v4282_v29, 0.0  ;;  %v10293_v38 = vpop.xlane.xlu1 %4818 }
 0x2d4   :  { %3012 = vmatprep.subr.bf16.mxu0 %v8006_v4  ;;  %v4008_v31 = vmul.f32 %v10270_v6, %v9197_v28  ;;  %v4341_v58 = vadd.f32 %v11969_v62, %v4193_v47  ;;  %v3417_v14 = vmul.f32 %v9951_v12, %v11973_v23  ;;  %v3692_v53 = vmul.f32 %v9954_v19, %v11974_v44  ;;  %v8007_v47 = vld [vmem:[#allocation6 + $0x1c0] ss:$24 sps:$4 sm:$0xff]   ;;  %v12078_v12 = vld [vmem:[#allocation40_spill] sm:$0xff] }
 0x2d5   :  { %v5307_v4 = vrot.slane %v5170_v9, %v10246_v25  ;;  %v5173_v30 = vunpack.c.l.b16 %v5032_v61  ;;  %v3733_v33 = vadd.f32 %v3605_v63, %v3330_v52  ;;  %v4095_v0 = vmul.f32 %v9958_v43, %v11975_v20  ;;  %12077 = vst [vmem:[#allocation44_spill] sm:$0xff] %v10293_v38  ;;  %v8012_v63 = vld [vmem:[#allocation6 + $0x1f4] ss:$24 sps:$4 sm:$0xff]  }
 0x2d6   :  { %v5174_v36 = vunpack.c.h.b16 %v5032_v61  ;;  %v4583_v21 = vsel %vm4516_vm1, %v4410_v8, 0.0  ;;  %v4469_v29 = vmax.f32 %v4341_v58, 0.0  ;;  %v3820_v56 = vadd.f32 %v3692_v53, %v3417_v14  ;;  %v10303_v8 = vpop.xlane.xlu0 %4713 }
 0x2d7   :  { %3013 = vmatpush1.bf16.msra.mxu0 %v8004_v37  ;;  %v4938_v6 = vmul.f32 0.015625, %v12078_v12  ;;  %4584 = vadd.xlane.f32.xlu1 %v4583_v21  ;;  %v4935_v19 = vmul.f32 0.015625, %v10059_v54  ;;  %v4136_v9 = vadd.f32 %v4008_v31, %v3733_v33  ;;  %v4939_v52 = vmul.f32 0.015625, %v10085_v51  ;;  %12079 = vst [vmem:[#allocation41_spill] sm:$0xff] %v10303_v8 }
 0x2d8   :  { %3014 = vmatprep.subr.bf16.mxu0 %v8009_v48  ;;  %v4760_v43 = vsel %vm4516_vm1, %v4469_v29, 0.0  ;;  %v4223_v61 = vadd.f32 %v4095_v0, %v3820_v56  ;;  %v3360_v37 = vmul.f32 %v10089_v24, %v9167_v34  ;;  %v3635_v48 = vmul.f32 %v10092_v26, %v9176_v7  ;;  %v8010_v0 = vld [vmem:[#allocation6 + $0x1f0] ss:$24 sps:$4 sm:$0xff]  }
 0x2d9   :  { %4761 = vadd.xlane.f32.xlu0 %v4760_v43  ;;  %v4284_v58 = vadd.f32 %v12023_v2, %v4136_v9  ;;  %v4038_v54 = vmul.f32 %v10096_v18, %v9214_v11  ;;  %v3419_v51 = vmul.f32 %v10204_v1, %v11965_v17  ;;  %v3694_v56 = vmul.f32 %v10207_v45, %v11966_v22  ;;  %v8015_v43 = vld [vmem:[#allocation6 + $0x224] ss:$24 sps:$4 sm:$0xff]  }
 0x2da   :  { %v5327_v31 = vrot.slane %v5173_v30, %v10230_v50  ;;  %v5331_v14 = vrot.slane %v5174_v36, %v10246_v25  ;;  %v4371_v53 = vadd.f32 %v12000_v55, %v4223_v61  ;;  %v3763_v33 = vadd.f32 %v3635_v48, %v3360_v37  ;;  %v10319_v30 = vpop.xlane.xlu1 %4548  ;;  %v10331_v48 = vpop.xlane.xlu0 %4725 }
 0x2db   :  { %3015 = vmatpush1.bf16.msra.mxu0 %v8007_v47  ;;  %v5046_v21 = vpack.c.bf16 %v4935_v19, %v4934_v40  ;;  %v4412_v29 = vmax.f32 %v4284_v58, 0.0  ;;  %v3822_v12 = vadd.f32 %v3694_v56, %v3419_v51  ;;  %v4097_v9 = vmul.f32 %v10212_v32, %v11967_v60  ;;  %12080 = vst [vmem:[#allocation71_spill] sm:$0xff] %v10319_v30  ;;  %v3139_v40 = vld [vmem:[%s11759_s4 + $0x38] sm:$0x7] }
 0x2dc   :  { %3016 = vmatprep.subr.bf16.mxu0 %v8012_v63  ;;  %v4499_v38 = vmax.f32 %v4371_v53, 0.0  ;;  %v10317_v8 = vpack.c.bf16 %v4939_v52, %v4938_v6  ;;  %v4166_v45 = vadd.f32 %v4038_v54, %v3763_v33  ;;  %v10326_v47 = vsel %vm5308_vm9, %v5307_v4, %v5302_v49  ;;  %v12081_v19 = vld [vmem:[#allocation48_spill] sm:$0xff]  ;;  %v8013_v52 = vld [vmem:[#allocation6 + $0x220] ss:$24 sps:$4 sm:$0xff]   ;;  %12082 = vst [vmem:[#allocation50_spill] sm:$0xff] %v10331_v48 }
 0x2dd   :  { %v4589_v36 = vsel %vm4516_vm1, %v4412_v29, 0.0  ;;  %v4225_v61 = vadd.f32 %v4097_v9, %v3822_v12  ;;  %v4904_v37 = vmul.f32 0.015625, %v12081_v19  ;;  %v10334_v58 = vsel %vm5308_vm9, %v5331_v14, %v5327_v31  ;;  %v8018_v4 = vld [vmem:[#allocation6 + $0x254] ss:$24 sps:$4 sm:$0xff]   ;;  %v8021_v19 = vld [vmem:[#allocation6 + $0x284] ss:$24 sps:$4 sm:$0xff]  }
 0x2de   :  { %4590 = vadd.xlane.f32.xlu1 %v4589_v36  ;;  %v4850_v63 = vsel %vm4516_vm1, %v4499_v38, 0.0  ;;  %v4314_v6 = vadd.f32 %v9309_v39, %v4166_v45  ;;  %v5201_v54 = vunpack.c.l.b16 %v5046_v21  ;;  %v5202_v51 = vunpack.c.h.b16 %v5046_v21 }
 0x2df   :  { %3017 = vmatpush1.bf16.msra.mxu0 %v8010_v0  ;;  %4851 = vadd.xlane.f32.xlu0 %v4850_v63  ;;  %v4373_v49 = vadd.f32 %v11969_v62, %v4225_v61  ;;  %v5205_v56 = vunpack.c.l.b16 %v10317_v8  ;;  %v10339_v38 = vrot.slane %v3139_v40, %v11980_v5  ;;  %v10342_v45 = vrot.slane %v3139_v40, %v11979_v35 }
 0x2e0   :  { %3018 = vmatprep.subr.bf16.mxu0 %v8015_v43  ;;  %v4442_v53 = vmax.f32 %v4314_v6, 0.0  ;;  %v4905_v31 = vmul.f32 0.015625, %v10126_v3  ;;  %v10346_v14 = vrot.slane %v3139_v40, %v11972_v59  ;;  %v3329_v0 = vmul.f32 %v10000_v13, %v11973_v23  ;;  %v8016_v43 = vld [vmem:[#allocation6 + $0x250] ss:$24 sps:$4 sm:$0xff]   ;;  %v10357_v3 = vpop.xlane.xlu1 %4554 }
 0x2e1   :  { %12083 = vst [vmem:[#allocation54_spill] sm:$0xff] %v10339_v38  ;;  %12084 = vst [vmem:[#allocation72_spill] sm:$0xff] %v10342_v45  ;;  %v4501_v33 = vmax.f32 %v4373_v49, 0.0  ;;  %v3362_v29 = vmul.f32 %v10339_v38, %v9116_v16  ;;  %v3637_v12 = vmul.f32 %v10342_v45, %v9131_v27  ;;  %v3604_v9 = vmul.f32 %v10003_v41, %v11974_v44 }
 0x2e2   :  { %v4679_v21 = vsel %vm4516_vm1, %v4442_v53, 0.0  ;;  %12085 = vst [vmem:[#allocation75_spill] sm:$0xff] %v10357_v3  ;;  %v4908_v36 = vmul.f32 0.015625, %v10055_v15  ;;  %v5206_v61 = vunpack.c.h.b16 %v10317_v8  ;;  %v4040_v40 = vmul.f32 %v10346_v14, %v9197_v28  ;;  %v10367_v53 = vpop.xlane.xlu0 %4809 }
 0x2e3   :  { %3019 = vmatpush1.bf16.msra.mxu0 %v8013_v52  ;;  %4680 = vadd.xlane.f32.xlu1 %v4679_v21  ;;  %v4856_v13 = vsel %vm4516_vm1, %v4501_v33, 0.0  ;;  %v3765_v63 = vadd.f32 %v3637_v12, %v3362_v29  ;;  %v3732_v6 = vadd.f32 %v3604_v9, %v3329_v0  ;;  %v4007_v41 = vmul.f32 %v10010_v42, %v11975_v20  ;;  %v12086_v52 = vld [vmem:[#allocation61_spill] sm:$0xff]  ;;  %v12089_v12 = vld [vmem:[#allocation52_spill] sm:$0xff] }
 0x2e4   :  { %3020 = vmatprep.subr.bf16.mxu0 %v8018_v4  ;;  %4857 = vadd.xlane.f32.xlu0 %v4856_v13  ;;  %v4909_v49 = vmul.f32 0.015625, %v12086_v52  ;;  %12087 = vst [vmem:[#allocation76_spill] sm:$0xff] %v10367_v53  ;;  %v5460_v15 = vrot.slane %v5201_v54, %v10230_v50  ;;  %v5464_v8 = vrot.slane %v5202_v51, %v10246_v25  ;;  %v12088_v21 = vld [vmem:[#allocation49_spill] sm:$0xff]  ;;  %v12090_v54 = vld [vmem:[#allocation59_spill] sm:$0xff] }
 0x2e5   :  { %v5479_v33 = vrot.slane %v5205_v56, %v10230_v50  ;;  %v5310_v3 = vadd.s32 4294967280, %v12088_v21  ;;  %v10373_v4 = vpack.c.bf16 %v4905_v31, %v4904_v37  ;;  %v4168_v13 = vadd.f32 %v4040_v40, %v3765_v63  ;;  %v8019_v42 = vld [vmem:[#allocation6 + $0x280] ss:$24 sps:$4 sm:$0xff]   ;;  %v8024_v56 = vld [vmem:[#allocation6 + $0x2b4] ss:$24 sps:$4 sm:$0xff]  }
 0x2e6   :  { %v4135_v29 = vadd.f32 %v4007_v41, %v3732_v6  ;;  %v3663_v0 = vmul.f32 %v10145_v10, %v9176_v7  ;;  %v3388_v9 = vmul.f32 %v12089_v12, %v9167_v34  ;;  %v4066_v52 = vmul.f32 %v12090_v54, %v9214_v11  ;;  %v10390_v6 = vpop.xlane.xlu1 %4644  ;;  %v12092_v41 = vld [vmem:[#allocation32_spill] sm:$0xff] }
 0x2e7   :  { %3021 = vmatpush1.bf16.msra.mxu0 %v8016_v43  ;;  %v3331_v51 = vmul.f32 %v10261_v46, %v11965_v17  ;;  %v3606_v37 = vmul.f32 %v10267_v57, %v11966_v22  ;;  %v5483_v31 = vrot.slane %v5206_v61, %v10246_v25  ;;  %v4316_v40 = vadd.f32 %v12023_v2, %v4168_v13  ;;  %v12094_v46 = vld [vmem:[#allocation58_spill] sm:$0xff] }
 0x2e8   :  { %3022 = vmatprep.subr.bf16.mxu0 %v8021_v19  ;;  %v4283_v43 = vadd.f32 %v12000_v55, %v4135_v29  ;;  %v10388_v63 = vpack.c.bf16 %v4909_v49, %v4908_v36  ;;  %12091 = vst [vmem:[#allocation74_spill] sm:$0xff] %v10390_v6  ;;  %v10393_v30 = vsub.s32 %v5310_v3, %v12092_v41  ;;  %v5317_v19 = vadd.s32 4294967272, %v12088_v21  ;;  %v8022_v29 = vld [vmem:[#allocation6 + $0x2b0] ss:$24 sps:$4 sm:$0xff]   ;;  %v10399_v36 = vpop.xlane.xlu0 %4821  ;;  %v12097_v3 = vld [vmem:[#allocation46_spill] sm:$0xff] }
 0x2e9   :  { %v3791_v53 = vadd.f32 %v3663_v0, %v3388_v9  ;;  %v3734_v48 = vadd.f32 %v3606_v37, %v3331_v51  ;;  %v4009_v57 = vmul.f32 %v12094_v46, %v11967_v60  ;;  %v5171_v61 = vunpack.c.l.b16 %v10373_v4  ;;  %12095 = vst [vmem:[#allocation57_spill] sm:$0xff] %v10399_v36  ;;  %v3146_v51 = vld [vmem:[%s11759_s4 + $0x54] sm:$0x7]  ;;  %v8027_v21 = vld [vmem:[#allocation6 + $0x2e4] ss:$24 sps:$4 sm:$0xff]  }
 0x2ea   :  { %12093 = vst [vmem:[#allocation78_spill] sm:$0xff] %v10393_v30  ;;  %v4444_v54 = vmax.f32 %v4316_v40, 0.0  ;;  %v4411_v13 = vmax.f32 %v4283_v43, 0.0  ;;  %v10402_v49 = vsel %vm5308_vm9, %v5464_v8, %v5460_v15  ;;  %v4910_v6 = vmul.f32 0.015625, %v12097_v3 }
 0x2eb   :  { %3023 = vmatpush1.bf16.msra.mxu0 %v8019_v42  ;;  %12096 = vst [vmem:[#allocation53_spill] sm:$0xff] %v10402_v49  ;;  %v4194_v0 = vadd.f32 %v4066_v52, %v3791_v53  ;;  %v4137_v9 = vadd.f32 %v4009_v57, %v3734_v48  ;;  %v5175_v40 = vunpack.c.l.b16 %v10388_v63  ;;  %v10412_v15 = vsel %vm5308_vm9, %v5483_v31, %v5479_v33  ;;  %v10424_v33 = vpop.xlane.xlu1 %4650  ;;  %v12105_v49 = vld [vmem:[#allocation80_spill] sm:$0xff] }
 0x2ec   :  { %3024 = vmatprep.subr.bf16.mxu0 %v8024_v56  ;;  %v4685_v37 = vsel %vm4516_vm1, %v4444_v54, 0.0  ;;  %v4586_v42 = vsel %vm4516_vm1, %v4411_v13, 0.0  ;;  %12098 = vst [vmem:[#allocation43_spill] sm:$0xff] %v10412_v15  ;;  %v10417_v53 = vsub.s32 %v5317_v19, %v12092_v41  ;;  %v5172_v8 = vunpack.c.h.b16 %v10373_v4  ;;  %12100 = vst [vmem:[#allocation40_spill] sm:$0xff] %v10424_v33  ;;  %v8025_v19 = vld [vmem:[#allocation6 + $0x2e0] ss:$24 sps:$4 sm:$0xff]  }
 0x2ed   :  { %4686 = vadd.xlane.f32.xlu1 %v4685_v37  ;;  %4587 = vadd.xlane.f32.xlu0 %v4586_v42  ;;  %v4342_v57 = vadd.f32 %v9309_v39, %v4194_v0  ;;  %v4285_v48 = vadd.f32 %v11969_v62, %v4137_v9  ;;  %v5314_v54 = vrot.slane %v5171_v61, %v10393_v30  ;;  %v5176_v4 = vunpack.c.h.b16 %v10388_v63  ;;  %v8030_v0 = vld [vmem:[#allocation6 + $0x314] ss:$24 sps:$4 sm:$0xff]   ;;  %v10438_v9 = vpop.xlane.xlu0 %4551 }
 0x2ee   :  { %12099 = vst [vmem:[#allocation64_spill] sm:$0xff] %v10417_v53  ;;  %v10422_v52 = vrot.slane %v3146_v51, %v11980_v5  ;;  %v10427_v43 = vrot.slane %v3146_v51, %v11979_v35  ;;  %v10430_v13 = vrot.slane %v3146_v51, %v11972_v59  ;;  %v5336_v61 = vrot.slane %v5175_v40, %v10393_v30  ;;  %v12102_v40 = vld [vmem:[#allocation42_spill] sm:$0xff]  ;;  %v12103_v33 = vld [vmem:[#allocation60_spill] sm:$0xff] }
 0x2ef   :  { %3025 = vmatpush1.bf16.msra.mxu0 %v8022_v29  ;;  %v4470_v56 = vmax.f32 %v4342_v57, 0.0  ;;  %v4413_v31 = vmax.f32 %v4285_v48, 0.0  ;;  %v3361_v29 = vmul.f32 %v10089_v24, %v11973_v23  ;;  %12101 = vst [vmem:[#allocation48_spill] sm:$0xff] %v10438_v9  ;;  %v5321_v42 = vrot.slane %v5172_v8, %v10417_v53 }
 0x2f0   :  { %3026 = vmatprep.subr.bf16.mxu0 %v8027_v21  ;;  %v3390_v3 = vmul.f32 %v10422_v52, %v9116_v16  ;;  %v3665_v21 = vmul.f32 %v10427_v43, %v9131_v27  ;;  %v4068_v63 = vmul.f32 %v10430_v13, %v9197_v28  ;;  %v4911_v57 = vmul.f32 0.015625, %v12102_v40 }
 0x2f1   :  { %v4763_v37 = vsel %vm4516_vm1, %v4470_v56, 0.0  ;;  %v4592_v51 = vsel %vm4516_vm1, %v4413_v31, 0.0  ;;  %v3636_v24 = vmul.f32 %v10092_v26, %v11974_v44  ;;  %v4039_v48 = vmul.f32 %v10096_v18, %v11975_v20 }
 0x2f2   :  { %4764 = vadd.xlane.f32.xlu1 %v4763_v37  ;;  %4593 = vadd.xlane.f32.xlu0 %v4592_v51  ;;  %v5316_v56 = vsel %vm5315_vm10, %v5314_v54, %v10326_v47  ;;  %v3793_v31 = vadd.f32 %v3665_v21, %v3390_v3  ;;  %v3420_v41 = vmul.f32 %v10204_v1, %v9167_v34  ;;  %v8028_v37 = vld [vmem:[#allocation6 + $0x310] ss:$24 sps:$4 sm:$0xff]   ;;  %v8033_v47 = vld [vmem:[#allocation6 + $0x344] ss:$24 sps:$4 sm:$0xff]  }
 0x2f3   :  { %v3695_v8 = vmul.f32 %v12103_v33, %v9176_v7  ;;  %3027 = vmatpush1.bf16.msra.mxu0 %v8025_v19  ;;  %v3764_v51 = vadd.f32 %v3636_v24, %v3361_v29  ;;  %v4098_v40 = vmul.f32 %v10212_v32, %v9214_v11  ;;  %v3363_v26 = vmul.f32 %v10339_v38, %v11965_v17  ;;  %v10464_v54 = vpop.xlane.xlu1 %4716 }
 0x2f4   :  { %v3638_v18 = vmul.f32 %v10342_v45, %v11966_v22  ;;  %3037 = vmatprep.subr.bf16.mxu0 %v8030_v0  ;;  %12104 = vst [vmem:[#allocation61_spill] sm:$0xff] %v10464_v54  ;;  %v5337_v3 = vsel %vm5315_vm10, %v5336_v61, %v10334_v58  ;;  %v5341_v19 = vrot.slane %v5176_v4, %v10417_v53  ;;  %v12107_v0 = vld [vmem:[#allocation47_spill] sm:$0xff] }
 0x2f5   :  { %v4196_v21 = vadd.f32 %v4068_v63, %v3793_v31  ;;  %v3823_v29 = vadd.f32 %v3695_v8, %v3420_v41  ;;  %v5034_v24 = vpack.c.bf16 %v4911_v57, %v4910_v6  ;;  %v4167_v9 = vadd.f32 %v4039_v48, %v3764_v51  ;;  %v12108_v54 = vld [vmem:[#allocation55_spill] sm:$0xff]  ;;  %v3154_v6 = vld [vmem:[%s11759_s4 + $0x74] sm:$0x7]  ;;  %v12110_v31 = vld [vmem:[#allocation37_spill] sm:$0xff] }
 0x2f6   :  { %v3766_v36 = vadd.f32 %v3638_v18, %v3363_v26  ;;  %v4041_v38 = vmul.f32 %v10346_v14, %v11967_v60  ;;  %3029 = vmatmul.mubr.bf16.vlgmr.msra.gmra.mrb[4].mxu0 %v12105_v49  ;;  %v10472_v45 = vpop.xlane.xlu0 %4557  ;;  %v4936_v32 = vmul.f32 0.015625, %v12107_v0  ;;  %v4940_v15 = vmul.f32 0.015625, %v12108_v54  ;;  %v8031_v41 = vld [vmem:[#allocation6 + $0x340] ss:$24 sps:$4 sm:$0xff]   ;;  %v8036_v8 = vld [vmem:[#allocation6 + $0x374] ss:$24 sps:$4 sm:$0xff]  }
 0x2f7   :  { %12106 = vst [vmem:[#allocation49_spill] sm:$0xff] %v10472_v45  ;;  %v4344_v58 = vadd.f32 %v12023_v2, %v4196_v21  ;;  %v4226_v61 = vadd.f32 %v4098_v40, %v3823_v29  ;;  %3038 = vmatpush1.bf16.msra.mxu0 %v8028_v37  ;;  %v5323_v4 = vsel %vm5322_vm11, %v5321_v42, %v5316_v56  ;;  %v12109_v49 = vld [vmem:[#allocation67_spill] sm:$0xff]  ;;  %v5177_v21 = vunpack.c.l.b16 %v5034_v24  ;;  %v12124_v45 = vld [vmem:[#allocation69_spill] sm:$0xff] }
 0x2f8   :  { %v4315_v63 = vadd.f32 %v12000_v55, %v4167_v9  ;;  %v4937_v57 = vmul.f32 0.015625, %v12109_v49  ;;  %v4169_v48 = vadd.f32 %v4041_v38, %v3766_v36  ;;  %3069 = vmatprep.mubr.bf16.mxu0 %v12110_v31  ;;  %3039 = vmatprep.subr.bf16.mxu0 %v8033_v47  ;;  %v5342_v51 = vsel %vm5322_vm11, %v5341_v19, %v5337_v3  ;;  %v12111_v18 = vld [vmem:[#allocation51_spill] sm:$0xff]  ;;  %v10487_v37 = vpop.xlane.xlu1 %4728  ;;  %v12114_v47 = vld [vmem:[#allocation45_spill] sm:$0xff] }
 0x2f9   :  { %v4472_v40 = vmax.f32 %v4344_v58, 0.0  ;;  %v4374_v26 = vadd.f32 %v9309_v39, %v4226_v61  ;;  %v4941_v54 = vmul.f32 0.015625, %v12111_v18  ;;  %12112 = vst [vmem:[#allocation52_spill] sm:$0xff] %v10487_v37  ;;  %v10491_v56 = vrot.slane %v3154_v6, %v11980_v5  ;;  %v8034_v0 = vld [vmem:[#allocation6 + $0x370] ss:$24 sps:$4 sm:$0xff]  }
 0x2fa   :  { %v4443_v42 = vmax.f32 %v4315_v63, 0.0  ;;  %v4317_v9 = vadd.f32 %v11969_v62, %v4169_v48  ;;  %v10493_v38 = vpop.xlane.xlu0 %4647  ;;  %v5178_v36 = vunpack.c.h.b16 %v5034_v24  ;;  %v10496_v29 = vmul.f32 0.015625, %v12114_v47  ;;  %v8039_v48 = vld [vmem:[#allocation6 + $0x3a4] ss:$24 sps:$4 sm:$0xff]  }
 0x2fb   :  { %12113 = vst [vmem:[#allocation58_spill] sm:$0xff] %v10493_v38  ;;  %v4769_v3 = vsel %vm4516_vm1, %v4472_v40, 0.0  ;;  %v4502_v19 = vmax.f32 %v4374_v26, 0.0  ;;  %3040 = vmatpush1.bf16.msra.mxu0 %v8031_v41  ;;  %v5047_v61 = vpack.c.bf16 %v4937_v57, %v4936_v32  ;;  %v10501_v49 = vrot.slane %v3154_v6, %v11979_v35  ;;  %v12121_v37 = vld [vmem:[#allocation63_spill] sm:$0xff] }
 0x2fc   :  { %4770 = vadd.xlane.f32.xlu1 %v4769_v3  ;;  %v4682_v58 = vsel %vm4516_vm1, %v4443_v42, 0.0  ;;  %v4445_v63 = vmax.f32 %v4317_v9, 0.0  ;;  %3041 = vmatprep.subr.bf16.mxu0 %v8036_v8  ;;  %v10504_v24 = vsel %vm1208_vm2, %v5342_v51, %v5323_v4  ;;  %v5049_v31 = vpack.c.bf16 %v4941_v54, %v4940_v15  ;;  %v12118_v51 = vld [vmem:[#allocation59_spill] sm:$0xff] }
 0x2fd   :  { %12115 = vst [vmem:[#allocation46_spill] sm:$0xff] %v10504_v24  ;;  %4683 = vadd.xlane.f32.xlu0 %v4682_v58  ;;  %v10507_v40 = vrot.slane %v3154_v6, %v11972_v59  ;;  %v3389_v41 = vmul.f32 %v12089_v12, %v11973_v23  ;;  %v5346_v26 = vrot.slane %v5177_v21, %v10230_v50  ;;  %v4859_v6 = vsel %vm4516_vm1, %v4502_v19, 0.0  ;;  %v8037_v54 = vld [vmem:[#allocation6 + $0x3a0] ss:$24 sps:$4 sm:$0xff]   ;;  %v12120_v19 = vld [vmem:[#allocation56_spill] sm:$0xff] }
 0x2fe   :  { %v3422_v32 = vmul.f32 %v10491_v56, %v9116_v16  ;;  %v3697_v57 = vmul.f32 %v10501_v49, %v9131_v27  ;;  %v3664_v4 = vmul.f32 %v10145_v10, %v11974_v44  ;;  %v5350_v15 = vrot.slane %v5178_v36, %v10246_v25  ;;  %v10526_v21 = vpop.xlane.xlu1 %4734  ;;  %v8042_v36 = vld [vmem:[#allocation6 + $0x3d4] ss:$24 sps:$4 sm:$0xff]  }
 0x2ff   :  { %12116 = vst [vmem:[#allocation42_spill] sm:$0xff] %v10507_v40  ;;  %v10518_v8 = vpop.xlane.xlu0 %4653  ;;  %v4100_v12 = vmul.f32 %v10507_v40, %v9197_v28  ;;  %v4067_v18 = vmul.f32 %v12118_v51, %v11975_v20  ;;  %3042 = vmatpush1.bf16.msra.mxu0 %v8034_v0  ;;  %12119 = vst [vmem:[#allocation80_spill] sm:$0xff] %v10526_v21  ;;  %v5203_v42 = vunpack.c.l.b16 %v5047_v61  ;;  %v4688_v10 = vsel %vm4516_vm1, %v4445_v63, 0.0 }
 0x300   :  { %12117 = vst [vmem:[#allocation60_spill] sm:$0xff] %v10518_v8  ;;  %4860 = vadd.xlane.f32.xlu1 %v4859_v6  ;;  %v3825_v9 = vadd.f32 %v3697_v57, %v3422_v32  ;;  %v3792_v47 = vadd.f32 %v3664_v4, %v3389_v41  ;;  %3043 = vmatprep.subr.bf16.mxu0 %v8039_v48  ;;  %v5207_v3 = vunpack.c.l.b16 %v5049_v31  ;;  %v5204_v57 = vunpack.c.h.b16 %v5047_v61  ;;  %v8045_v8 = vld [vmem:[#allocation6 + $0x404] ss:$24 sps:$4 sm:$0xff]  }
 0x301   :  { %4689 = vadd.xlane.f32.xlu0 %v4688_v10  ;;  %v3332_v58 = vmul.f32 %v12120_v19, %v9167_v34  ;;  %v3607_v51 = vmul.f32 %v12121_v37, %v9176_v7  ;;  %v4010_v0 = vmul.f32 %v12094_v46, %v9214_v11  ;;  %v3391_v63 = vmul.f32 %v10422_v52, %v11965_v17  ;;  %v8040_v10 = vld [vmem:[#allocation6 + $0x3d0] ss:$24 sps:$4 sm:$0xff]  }
 0x302   :  { %v4228_v21 = vadd.f32 %v4100_v12, %v3825_v9  ;;  %v4195_v24 = vadd.f32 %v4067_v18, %v3792_v47  ;;  %v3666_v48 = vmul.f32 %v10427_v43, %v11966_v22  ;;  %v10542_v32 = vsel %vm5308_vm9, %v5350_v15, %v5346_v26 }
 0x303   :  { %v10539_v41 = vpop.xlane.xlu0 %4719  ;;  %12123 = vst [vmem:[#allocation55_spill] sm:$0xff] %v10542_v32  ;;  %v3735_v4 = vadd.f32 %v3607_v51, %v3332_v58  ;;  %v4069_v6 = vmul.f32 %v10430_v13, %v11967_v60  ;;  %3044 = vmatpush1.bf16.msra.mxu0 %v8037_v54  ;;  %v5208_v12 = vunpack.c.h.b16 %v5049_v31  ;;  %v10550_v26 = vmul.f32 0.015625, %v12124_v45  ;;  %v10553_v58 = vpop.xlane.xlu1 %4812  ;;  %v12126_v31 = vld [vmem:[#allocation65_spill] sm:$0xff] }
 0x304   :  { %12122 = vst [vmem:[#allocation47_spill] sm:$0xff] %v10539_v41  ;;  %v4376_v18 = vadd.f32 %v12023_v2, %v4228_v21  ;;  %v4343_v9 = vadd.f32 %v12000_v55, %v4195_v24  ;;  %v3794_v47 = vadd.f32 %v3666_v48, %v3391_v63  ;;  %3045 = vmatprep.subr.bf16.mxu0 %v8042_v36  ;;  %12125 = vst [vmem:[#allocation67_spill] sm:$0xff] %v10553_v58 }
 0x305   :  { %v5469_v41 = vrot.slane %v5203_v42, %v10393_v30  ;;  %v5488_v61 = vrot.slane %v5207_v3, %v10393_v30  ;;  %v4138_v15 = vadd.f32 %v4010_v0, %v3735_v4  ;;  %v4943_v32 = vmul.f32 0.015625, %v12126_v31  ;;  %v3132_v3 = vld [vmem:[%s11759_s4 + $0x1c] sm:$0x7]  ;;  %v8043_v0 = vld [vmem:[#allocation6 + $0x400] ss:$24 sps:$4 sm:$0xff]  }
 0x306   :  { %v4504_v54 = vmax.f32 %v4376_v18, 0.0  ;;  %v4471_v51 = vmax.f32 %v4343_v9, 0.0  ;;  %v4197_v21 = vadd.f32 %v4069_v6, %v3794_v47  ;;  %v5474_v24 = vrot.slane %v5204_v57, %v10417_v53  ;;  %v8048_v6 = vld [vmem:[#allocation6 + $0x434] ss:$24 sps:$4 sm:$0xff]  }
 0x307   :  { %v10556_v38 = vpop.xlane.xlu0 %4731  ;;  %v4286_v36 = vadd.f32 %v9309_v39, %v4138_v15  ;;  %v3421_v45 = vmul.f32 %v10204_v1, %v11973_v23  ;;  %v3696_v42 = vmul.f32 %v12103_v33, %v11974_v44  ;;  %3046 = vmatpush1.bf16.msra.mxu0 %v8040_v10  ;;  %v5493_v63 = vrot.slane %v5208_v12, %v10417_v53  ;;  %v12128_v1 = vld [vmem:[#allocation43_spill] sm:$0xff]  ;;  %v12129_v10 = vld [vmem:[#allocation36_spill] sm:$0xff]  ;;  %v12132_v31 = vld [vmem:[#allocation41_spill] sm:$0xff] }
 0x308   :  { %12127 = vst [vmem:[#allocation37_spill] sm:$0xff] %v10556_v38  ;;  %v4865_v48 = vsel %vm4516_vm1, %v4504_v54, 0.0  ;;  %v4766_v57 = vsel %vm4516_vm1, %v4471_v51, 0.0  ;;  %v4345_v4 = vadd.f32 %v11969_v62, %v4197_v21  ;;  %3047 = vmatprep.subr.bf16.mxu0 %v8045_v8  ;;  %v5489_v18 = vsel %vm5315_vm10, %v5488_v61, %v12128_v1  ;;  %v12131_v51 = vld [vmem:[#allocation53_spill] sm:$0xff]  ;;  %v8051_v1 = vld [vmem:[#allocation6 + $0x464] ss:$24 sps:$4 sm:$0xff]  }
 0x309   :  { %4866 = vadd.xlane.f32.xlu1 %v4865_v48  ;;  %4767 = vadd.xlane.f32.xlu0 %v4766_v57  ;;  %v4414_v33 = vmax.f32 %v4286_v36, 0.0  ;;  %v3824_v9 = vadd.f32 %v3696_v42, %v3421_v45  ;;  %v4099_v47 = vmul.f32 %v12129_v10, %v11975_v20  ;;  %v10576_v12 = vpack.c.bf16 %v4943_v32, %v10496_v29  ;;  %v8046_v42 = vld [vmem:[#allocation6 + $0x430] ss:$24 sps:$4 sm:$0xff]   ;;  %v10590_v29 = vpop.xlane.xlu1 %4824 }
 0x30a   :  { %v4473_v15 = vmax.f32 %v4345_v4, 0.0  ;;  %v10579_v54 = vrot.slane %v3132_v3, %v11980_v5  ;;  %v10582_v8 = vrot.slane %v3132_v3, %v11979_v35  ;;  %v5470_v61 = vsel %vm5315_vm10, %v5469_v41, %v12131_v51  ;;  %12134 = vst [vmem:[#allocation59_spill] sm:$0xff] %v10590_v29 }
 0x30b   :  { %v4967_v21 = vmul.f32 0.015625, %v12132_v31  ;;  %v4227_v36 = vadd.f32 %v4099_v47, %v3824_v9  ;;  %v10588_v45 = vrot.slane %v3132_v3, %v11972_v59  ;;  %3048 = vmatpush1.bf16.msra.mxu0 %v8043_v0  ;;  %v4595_v48 = vsel %vm4516_vm1, %v4414_v33, 0.0  ;;  %v12136_v0 = vld [vmem:[#allocation38_spill] sm:$0xff] }
 0x30c   :  { %12130 = vst [vmem:[#allocation51_spill] sm:$0xff] %v10582_v8  ;;  %v10592_v32 = vpop.xlane.xlu0 %4737  ;;  %v4772_v57 = vsel %vm4516_vm1, %v4473_v15, 0.0  ;;  %v3334_v4 = vmul.f32 %v10579_v54, %v9116_v16  ;;  %v3609_v41 = vmul.f32 %v10582_v8, %v9131_v27  ;;  %3049 = vmatprep.subr.bf16.mxu0 %v8048_v6  ;;  %v5494_v3 = vsel %vm5322_vm11, %v5493_v63, %v5489_v18  ;;  %v12137_v18 = vld [vmem:[#allocation54_spill] sm:$0xff] }
 0x30d   :  { %12133 = vst [vmem:[#allocation45_spill] sm:$0xff] %v10588_v45  ;;  %12135 = vst [vmem:[#allocation56_spill] sm:$0xff] %v10592_v32  ;;  %v4970_v9 = vmul.f32 0.015625, %v12136_v0  ;;  %4596 = vadd.xlane.f32.xlu1 %v4595_v48  ;;  %4773 = vadd.xlane.f32.xlu0 %v4772_v57  ;;  %v4375_v10 = vadd.f32 %v12000_v55, %v4227_v36  ;;  %v4012_v33 = vmul.f32 %v10588_v45, %v9197_v28  ;;  %v12138_v36 = vld [vmem:[#allocation72_spill] sm:$0xff]  ;;  %v8049_v0 = vld [vmem:[#allocation6 + $0x460] ss:$24 sps:$4 sm:$0xff]  }
 0x30e   :  { %v5209_v47 = vunpack.c.l.b16 %v10576_v12  ;;  %v3737_v15 = vadd.f32 %v3609_v41, %v3334_v4  ;;  %v3423_v51 = vmul.f32 %v10491_v56, %v11965_v17  ;;  %v3698_v6 = vmul.f32 %v10501_v49, %v11966_v22 }
 0x30f   :  { %v4503_v31 = vmax.f32 %v4375_v10, 0.0  ;;  %v4101_v63 = vmul.f32 %v10507_v40, %v11967_v60  ;;  %v3364_v48 = vmul.f32 %v12137_v18, %v9167_v34  ;;  %v3639_v57 = vmul.f32 %v12138_v36, %v9176_v7  ;;  %3050 = vmatpush1.bf16.msra.mxu0 %v8046_v42  ;;  %v8054_v10 = vld [vmem:[#allocation6 + $0x494] ss:$24 sps:$4 sm:$0xff]   ;;  %v10626_v40 = vpop.xlane.xlu1 %4830 }
 0x310   :  { %v10616_v29 = vpop.xlane.xlu0 %4815  ;;  %v5475_v4 = vsel %vm5322_vm11, %v5474_v24, %v5470_v61  ;;  %v5062_v41 = vpack.c.bf16 %v4967_v21, %v10550_v26  ;;  %v4140_v32 = vadd.f32 %v4012_v33, %v3737_v15  ;;  %v3826_v58 = vadd.f32 %v3698_v6, %v3423_v51  ;;  %3051 = vmatprep.subr.bf16.mxu0 %v8051_v1  ;;  %v12142_v24 = vld [vmem:[#allocation66_spill] sm:$0xff]  ;;  %v3140_v6 = vld [vmem:[%s11759_s4 + $0x3c] sm:$0x7] }
 0x311   :  { %12139 = vst [vmem:[#allocation63_spill] sm:$0xff] %v10616_v29  ;;  %v10621_v38 = vsel %vm1208_vm2, %v5494_v3, %v5475_v4  ;;  %v4862_v53 = vsel %vm4516_vm1, %v4503_v31, 0.0  ;;  %v3767_v30 = vadd.f32 %v3639_v57, %v3364_v48  ;;  %v4042_v42 = vmul.f32 %v10346_v14, %v9214_v11  ;;  %12141 = vst [vmem:[#allocation65_spill] sm:$0xff] %v10626_v40  ;;  %v12143_v3 = vld [vmem:[#allocation50_spill] sm:$0xff]  ;;  %v12145_v48 = vld [vmem:[#allocation76_spill] sm:$0xff] }
 0x312   :  { %12140 = vst [vmem:[#allocation69_spill] sm:$0xff] %v10621_v38  ;;  %v5210_v29 = vunpack.c.h.b16 %v10576_v12  ;;  %v4998_v61 = vmul.f32 0.015625, %v12142_v24  ;;  %4863 = vadd.xlane.f32.xlu0 %v4862_v53  ;;  %v4288_v26 = vadd.f32 %v12023_v2, %v4140_v32  ;;  %v4229_v21 = vadd.f32 %v4101_v63, %v3826_v58  ;;  %v8052_v12 = vld [vmem:[#allocation6 + $0x490] ss:$24 sps:$4 sm:$0xff]  }
 0x313   :  { %v10632_v1 = vrot.slane %v5209_v47, %v10230_v50  ;;  %v4971_v33 = vmul.f32 0.015625, %v12143_v3  ;;  %v4170_v15 = vadd.f32 %v4042_v42, %v3767_v30  ;;  %v3333_v51 = vmul.f32 %v12120_v19, %v11973_v23  ;;  %3052 = vmatpush1.bf16.msra.mxu0 %v8049_v0  ;;  %v8057_v47 = vld [vmem:[#allocation6 + $0x4c4] ss:$24 sps:$4 sm:$0xff]   ;;  %v10657_v3 = vpop.xlane.xlu1 %4560 }
 0x314   :  { %v5233_v31 = vunpack.c.l.b16 %v5062_v41  ;;  %v4416_v53 = vmax.f32 %v4288_v26, 0.0  ;;  %v4377_v32 = vadd.f32 %v11969_v62, %v4229_v21  ;;  %v3608_v58 = vmul.f32 %v12121_v37, %v11974_v44  ;;  %3053 = vmatprep.subr.bf16.mxu0 %v8054_v10  ;;  %v10643_v63 = vpop.xlane.xlu0 %4827  ;;  %12146 = vst [vmem:[#allocation36_spill] sm:$0xff] %v10657_v3 }
 0x315   :  { %12144 = vst [vmem:[#allocation43_spill] sm:$0xff] %v10643_v63  ;;  %v5234_v30 = vunpack.c.h.b16 %v5062_v41  ;;  %v4318_v19 = vadd.f32 %v9309_v39, %v4170_v15  ;;  %v4999_v57 = vmul.f32 0.015625, %v12145_v48  ;;  %v4011_v0 = vmul.f32 %v12094_v46, %v11975_v20 }
 0x316   :  { %v4601_v4 = vsel %vm4516_vm1, %v4416_v53, 0.0  ;;  %v4505_v42 = vmax.f32 %v4377_v32, 0.0  ;;  %v3736_v24 = vadd.f32 %v3608_v58, %v3333_v51  ;;  %v10651_v26 = vrot.slane %v3140_v6, %v11980_v5  ;;  %v8055_v32 = vld [vmem:[#allocation6 + $0x4c0] ss:$24 sps:$4 sm:$0xff]   ;;  %v8060_v58 = vld [vmem:[#allocation6 + $0x4f4] ss:$24 sps:$4 sm:$0xff]  }
 0x317   :  { %v5502_v37 = vrot.slane %v5210_v29, %v10246_v25  ;;  %4602 = vadd.xlane.f32.xlu1 %v4601_v4  ;;  %v5064_v10 = vpack.c.bf16 %v4971_v33, %v4970_v9  ;;  %v4446_v21 = vmax.f32 %v4318_v19, 0.0  ;;  %v10655_v41 = vrot.slane %v3140_v6, %v11979_v35  ;;  %3054 = vmatpush1.bf16.msra.mxu0 %v8052_v12  ;;  %v10688_v3 = vpop.xlane.xlu1 %4566 }
 0x318   :  { %v5612_v46 = vrot.slane %v5233_v31, %v10230_v50  ;;  %v4868_v15 = vsel %vm4516_vm1, %v4505_v42, 0.0  ;;  %v4139_v53 = vadd.f32 %v4011_v0, %v3736_v24  ;;  %v10662_v51 = vrot.slane %v3140_v6, %v11972_v59  ;;  %3055 = vmatprep.subr.bf16.mxu0 %v8057_v47  ;;  %v10664_v29 = vpop.xlane.xlu0 %4833  ;;  %12149 = vst [vmem:[#allocation41_spill] sm:$0xff] %v10688_v3 }
 0x319   :  { %12147 = vst [vmem:[#allocation53_spill] sm:$0xff] %v10664_v29  ;;  %v5616_v9 = vrot.slane %v5234_v30, %v10246_v25  ;;  %4869 = vadd.xlane.f32.xlu0 %v4868_v15  ;;  %v5078_v33 = vpack.c.bf16 %v4999_v57, %v4998_v61  ;;  %v3366_v12 = vmul.f32 %v10651_v26, %v9116_v16  ;;  %v4691_v19 = vsel %vm4516_vm1, %v4446_v21, 0.0  ;;  %v8058_v15 = vld [vmem:[#allocation6 + $0x4f0] ss:$24 sps:$4 sm:$0xff]  }
 0x31a   :  { %v3641_v31 = vmul.f32 %v10655_v41, %v9131_v27  ;;  %v4287_v6 = vadd.f32 %v12000_v55, %v4139_v53  ;;  %v4044_v47 = vmul.f32 %v10662_v51, %v9197_v28  ;;  %v3335_v48 = vmul.f32 %v10579_v54, %v11965_v17  ;;  %v12148_v53 = vld [vmem:[#allocation44_spill] sm:$0xff] }
 0x31b   :  { %v5237_v30 = vunpack.c.l.b16 %v5064_v10  ;;  %4692 = vadd.xlane.f32.xlu1 %v4691_v19  ;;  %v3610_v57 = vmul.f32 %v10582_v8, %v11966_v22  ;;  %v4013_v0 = vmul.f32 %v10588_v45, %v11967_v60  ;;  %v3392_v42 = vmul.f32 %v10422_v52, %v9167_v34  ;;  %3056 = vmatpush1.bf16.msra.mxu0 %v8055_v32 }
 0x31c   :  { %v3769_v61 = vadd.f32 %v3641_v31, %v3366_v12  ;;  %v4415_v4 = vmax.f32 %v4287_v6, 0.0  ;;  %v3667_v24 = vmul.f32 %v10427_v43, %v9176_v7  ;;  %v4070_v21 = vmul.f32 %v10430_v13, %v9214_v11  ;;  %3057 = vmatprep.subr.bf16.mxu0 %v8060_v58  ;;  %v8063_v6 = vld [vmem:[#allocation6 + $0x524] ss:$24 sps:$4 sm:$0xff]  }
 0x31d   :  { %v5002_v12 = vmul.f32 0.015625, %v12148_v53  ;;  %v5238_v31 = vunpack.c.h.b16 %v5064_v10  ;;  %v3738_v29 = vadd.f32 %v3610_v57, %v3335_v48  ;;  %v10692_v40 = vsel %vm5308_vm9, %v5502_v37, %v10632_v1  ;;  %v10695_v8 = vpop.xlane.xlu0 %4563  ;;  %v3147_v57 = vld [vmem:[%s11759_s4 + $0x58] sm:$0x7]  ;;  %v10723_v53 = vpop.xlane.xlu1 %4656 }
 0x31e   :  { %v4172_v19 = vadd.f32 %v4044_v47, %v3769_v61  ;;  %v5265_v63 = vunpack.c.l.b16 %v5078_v33  ;;  %v4598_v38 = vsel %vm4516_vm1, %v4415_v4, 0.0  ;;  %v3795_v45 = vadd.f32 %v3667_v24, %v3392_v42  ;;  %12150 = vst [vmem:[#allocation38_spill] sm:$0xff] %v10695_v8  ;;  %12153 = vst [vmem:[#allocation72_spill] sm:$0xff] %v10723_v53  ;;  %v12165_v53 = vld [vmem:[#allocation40_spill] sm:$0xff] }
 0x31f   :  { %v10698_v32 = vsel %vm5308_vm9, %v5616_v9, %v5612_v46  ;;  %v5631_v10 = vrot.slane %v5237_v30, %v10230_v50  ;;  %4599 = vadd.xlane.f32.xlu0 %v4598_v38  ;;  %v4141_v47 = vadd.f32 %v4013_v0, %v3738_v29  ;;  %v5266_v48 = vunpack.c.h.b16 %v5078_v33  ;;  %3058 = vmatpush1.bf16.msra.mxu0 %v8058_v15  ;;  %v8061_v46 = vld [vmem:[#allocation6 + $0x520] ss:$24 sps:$4 sm:$0xff]   ;;  %v8066_v29 = vld [vmem:[#allocation6 + $0x554] ss:$24 sps:$4 sm:$0xff]  }
 0x320   :  { %12151 = vst [vmem:[#allocation54_spill] sm:$0xff] %v10698_v32  ;;  %v4320_v58 = vadd.f32 %v12023_v2, %v4172_v19  ;;  %v4198_v61 = vadd.f32 %v4070_v21, %v3795_v45  ;;  %v3365_v1 = vmul.f32 %v12137_v18, %v11973_v23  ;;  %v3640_v37 = vmul.f32 %v12138_v36, %v11974_v44  ;;  %v12152_v33 = vld [vmem:[#allocation57_spill] sm:$0xff] }
 0x321   :  { %v5635_v9 = vrot.slane %v5238_v31, %v10246_v25  ;;  %v4289_v30 = vadd.f32 %v11969_v62, %v4141_v47  ;;  %v4043_v45 = vmul.f32 %v10346_v14, %v11975_v20  ;;  %3059 = vmatprep.subr.bf16.mxu0 %v8063_v6  ;;  %v5764_v18 = vrot.slane %v5265_v63, %v10230_v50  ;;  %v12154_v31 = vld [vmem:[#allocation48_spill] sm:$0xff]  ;;  %v10727_v47 = vpop.xlane.xlu0 %4569 }
 0x322   :  { %v4448_v38 = vmax.f32 %v4320_v58, 0.0  ;;  %v5003_v36 = vmul.f32 0.015625, %v12152_v33  ;;  %v4346_v0 = vadd.f32 %v9309_v39, %v4198_v61  ;;  %v3768_v4 = vadd.f32 %v3640_v37, %v3365_v1  ;;  %v8064_v58 = vld [vmem:[#allocation6 + $0x550] ss:$24 sps:$4 sm:$0xff]   ;;  %12155 = vst [vmem:[#allocation66_spill] sm:$0xff] %v10727_v47 }
 0x323   :  { %v4417_v24 = vmax.f32 %v4289_v30, 0.0  ;;  %v10718_v21 = vrot.slane %v3147_v57, %v11980_v5  ;;  %v10721_v15 = vrot.slane %v3147_v57, %v11979_v35  ;;  %v5768_v14 = vrot.slane %v5266_v48, %v10246_v25  ;;  %3060 = vmatpush1.bf16.msra.mxu0 %v8061_v46  ;;  %v8069_v48 = vld [vmem:[#allocation6 + $0x584] ss:$24 sps:$4 sm:$0xff]   ;;  %v8076_v32 = vld [vmem:[#allocation6 + $0x610] ss:$24 sps:$4 sm:$0xff]  }
 0x324   :  { %v4697_v42 = vsel %vm4516_vm1, %v4448_v38, 0.0  ;;  %v4474_v63 = vmax.f32 %v4346_v0, 0.0  ;;  %v4913_v19 = vmul.f32 0.015625, %v12154_v31  ;;  %v4171_v6 = vadd.f32 %v4043_v45, %v3768_v4  ;;  %3061 = vmatprep.subr.bf16.mxu0 %v8066_v29  ;;  %v12156_v30 = vld [vmem:[#allocation71_spill] sm:$0xff] }
 0x325   :  { %4698 = vadd.xlane.f32.xlu1 %v4697_v42  ;;  %v4604_v61 = vsel %vm4516_vm1, %v4417_v24, 0.0  ;;  %v3394_v1 = vmul.f32 %v10718_v21, %v9116_v16  ;;  %v3669_v37 = vmul.f32 %v10721_v15, %v9131_v27  ;;  %v10735_v38 = vrot.slane %v3147_v57, %v11972_v59  ;;  %v12157_v45 = vld [vmem:[#allocation75_spill] sm:$0xff] }
 0x326   :  { %v4912_v33 = vmul.f32 0.015625, %v12156_v30  ;;  %v4914_v46 = vmul.f32 0.015625, %v12157_v45  ;;  %v10739_v0 = vpack.c.bf16 %v5003_v36, %v5002_v12  ;;  %4605 = vadd.xlane.f32.xlu0 %v4604_v61  ;;  %v4319_v4 = vadd.f32 %v12000_v55, %v4171_v6  ;;  %v8067_v6 = vld [vmem:[#allocation6 + $0x580] ss:$24 sps:$4 sm:$0xff]   ;;  %v10768_v45 = vpop.xlane.xlu0 %4659 }
 0x327   :  { %v10743_v42 = vsel %vm5308_vm9, %v5635_v9, %v5631_v10  ;;  %v4775_v24 = vsel %vm4516_vm1, %v4474_v63, 0.0  ;;  %v3797_v31 = vadd.f32 %v3669_v37, %v3394_v1  ;;  %v4072_v57 = vmul.f32 %v10735_v38, %v9197_v28  ;;  %3062 = vmatpush1.bf16.msra.mxu0 %v8064_v58  ;;  %v12160_v10 = vld [vmem:[#allocation74_spill] sm:$0xff]  ;;  %12162 = vst [vmem:[#allocation57_spill] sm:$0xff] %v10768_v45  ;;  %v12166_v45 = vld [vmem:[#allocation49_spill] sm:$0xff] }
 0x328   :  { %12158 = vst [vmem:[#allocation50_spill] sm:$0xff] %v10743_v42  ;;  %v10749_v29 = vsel %vm5308_vm9, %v5768_v14, %v5764_v18  ;;  %v10751_v30 = vpack.c.bf16 %v4913_v19, %v4912_v33  ;;  %v4447_v12 = vmax.f32 %v4319_v4, 0.0  ;;  %v3367_v36 = vmul.f32 %v10651_v26, %v11965_v17  ;;  %v10760_v18 = vpop.xlane.xlu1 %4662  ;;  %3063 = vmatprep.subr.bf16.mxu0 %v8069_v48  ;;  %v8072_v14 = vld [vmem:[#allocation6 + $0x5b4] ss:$24 sps:$4 sm:$0xff]  }
 0x329   :  { %12159 = vst [vmem:[#allocation76_spill] sm:$0xff] %v10749_v29  ;;  %4776 = vadd.xlane.f32.xlu1 %v4775_v24  ;;  %v4944_v9 = vmul.f32 0.015625, %v12160_v10  ;;  %v4200_v61 = vadd.f32 %v4072_v57, %v3797_v31  ;;  %v3642_v63 = vmul.f32 %v10655_v41, %v11966_v22  ;;  %v4045_v1 = vmul.f32 %v10662_v51, %v11967_v60  ;;  %v12163_v31 = vld [vmem:[#allocation42_spill] sm:$0xff] }
 0x32a   :  { %12161 = vst [vmem:[#allocation44_spill] sm:$0xff] %v10760_v18  ;;  %v5269_v19 = vunpack.c.l.b16 %v10739_v0  ;;  %v4694_v37 = vsel %vm4516_vm1, %v4447_v12, 0.0  ;;  %v3424_v58 = vmul.f32 %v10491_v56, %v9167_v34  ;;  %v3699_v33 = vmul.f32 %v10501_v49, %v9176_v7  ;;  %v12164_v57 = vld [vmem:[#allocation58_spill] sm:$0xff] }
 0x32b   :  { %4695 = vadd.xlane.f32.xlu0 %v4694_v37  ;;  %v4348_v4 = vadd.f32 %v12023_v2, %v4200_v61  ;;  %v3770_v24 = vadd.f32 %v3642_v63, %v3367_v36  ;;  %v4102_v48 = vmul.f32 %v12163_v31, %v9214_v11  ;;  %v4945_v10 = vmul.f32 0.015625, %v12164_v57  ;;  %3064 = vmatpush1.bf16.msra.mxu0 %v8067_v6  ;;  %v3155_v61 = vld [vmem:[%s11759_s4 + $0x78] sm:$0x7] }
 0x32c   :  { %v5270_v18 = vunpack.c.h.b16 %v10739_v0  ;;  %v5179_v12 = vunpack.c.l.b16 %v10751_v30  ;;  %v10777_v47 = vmul.f32 0.015625, %v12165_v53  ;;  %v3827_v29 = vadd.f32 %v3699_v33, %v3424_v58  ;;  %v8070_v63 = vld [vmem:[#allocation6 + $0x5b0] ss:$24 sps:$4 sm:$0xff]   ;;  %3065 = vmatprep.subr.bf16.mxu0 %v8072_v14  ;;  %v8075_v58 = vld [vmem:[#allocation6 + $0x5e4] ss:$24 sps:$4 sm:$0xff]  }
 0x32d   :  { %v4476_v3 = vmax.f32 %v4348_v4, 0.0  ;;  %v4915_v37 = vmul.f32 0.015625, %v12166_v45  ;;  %v4173_v8 = vadd.f32 %v4045_v1, %v3770_v24  ;;  %v3393_v36 = vmul.f32 %v10422_v52, %v11973_v23  ;;  %v10795_v4 = vpop.xlane.xlu1 %4740 }
 0x32e   :  { %v5783_v0 = vrot.slane %v5269_v19, %v10230_v50  ;;  %v4230_v57 = vadd.f32 %v4102_v48, %v3827_v29  ;;  %v3668_v53 = vmul.f32 %v10427_v43, %v11974_v44  ;;  %v4071_v6 = vmul.f32 %v10430_v13, %v11975_v20  ;;  %12167 = vst [vmem:[#allocation48_spill] sm:$0xff] %v10795_v4  ;;  %v10804_v19 = vpop.xlane.xlu0 %4665  ;;  %v8073_v48 = vld [vmem:[#allocation6 + $0x5e0] ss:$24 sps:$4 sm:$0xff]  }
 0x32f   :  { %v5180_v1 = vunpack.c.h.b16 %v10751_v30  ;;  %v4781_v52 = vsel %vm4516_vm1, %v4476_v3, 0.0  ;;  %v4321_v33 = vadd.f32 %v11969_v62, %v4173_v8  ;;  %v10793_v45 = vpack.c.bf16 %v4945_v10, %v4944_v9  ;;  %12168 = vst [vmem:[#allocation71_spill] sm:$0xff] %v10804_v19  ;;  %v12169_v30 = vld [vmem:[#allocation78_spill] sm:$0xff]  ;;  %3066 = vmatpush1.bf16.msra.mxu0 %v8070_v63 }
 0x330   :  { %4782 = vadd.xlane.f32.xlu1 %v4781_v52  ;;  %v4378_v29 = vadd.f32 %v9309_v39, %v4230_v57  ;;  %v3796_v14 = vadd.f32 %v3668_v53, %v3393_v36  ;;  %v10799_v43 = vrot.slane %v3155_v61, %v11980_v5  ;;  %v10802_v13 = vrot.slane %v3155_v61, %v11979_v35  ;;  %v8078_v52 = vld [vmem:[#allocation6 + $0x614] ss:$24 sps:$4 sm:$0xff]  }
 0x331   :  { %v5355_v3 = vrot.slane %v5179_v12, %v12169_v30  ;;  %v5036_v24 = vpack.c.bf16 %v4915_v37, %v4914_v46  ;;  %v4449_v8 = vmax.f32 %v4321_v33, 0.0  ;;  %v10808_v9 = vrot.slane %v3155_v61, %v11972_v59  ;;  %3067 = vmatprep.subr.bf16.mxu0 %v8075_v58  ;;  %v12170_v61 = vld [vmem:[#allocation64_spill] sm:$0xff]  ;;  %v10826_v42 = vpop.xlane.xlu1 %4746  ;;  %v8079_v59 = vld [vmem:[#allocation6 + $0x640] ss:$24 sps:$4 sm:$0xff]  }
 0x332   :  { %v4506_v10 = vmax.f32 %v4378_v29, 0.0  ;;  %v4199_v57 = vadd.f32 %v4071_v6, %v3796_v14  ;;  %v3426_v36 = vmul.f32 %v10799_v43, %v9116_v16  ;;  %v3701_v53 = vmul.f32 %v10802_v13, %v9131_v27  ;;  %v12171_v14 = vld [vmem:[#allocation55_spill] sm:$0xff]  ;;  %12172 = vst [vmem:[#allocation75_spill] sm:$0xff] %v10826_v42 }
 0x333   :  { %v5787_v19 = vrot.slane %v5270_v18, %v10246_v25  ;;  %v4700_v46 = vsel %vm4516_vm1, %v4449_v8, 0.0  ;;  %v5211_v12 = vunpack.c.l.b16 %v10793_v45  ;;  %v4104_v37 = vmul.f32 %v10808_v9, %v9197_v28  ;;  %3068 = vmatpush1.bf16.msra.mxu0 %v8073_v48  ;;  %v12177_v28 = vld [vmem:[#allocation60_spill] sm:$0xff] }
 0x334   :  { %v5360_v63 = vrot.slane %v5180_v1, %v12170_v61  ;;  %4701 = vadd.xlane.f32.xlu0 %v4700_v46  ;;  %v4871_v6 = vsel %vm4516_vm1, %v4506_v10, 0.0  ;;  %v4347_v33 = vadd.f32 %v12000_v55, %v4199_v57  ;;  %v3829_v29 = vadd.f32 %v3701_v53, %v3426_v36  ;;  %3078 = vmatprep.subr.bf16.mxu0 %v8078_v52  ;;  %v12175_v52 = vld [vmem:[#allocation45_spill] sm:$0xff] }
 0x335   :  { %v5356_v58 = vsel %vm5315_vm10, %v5355_v3, %v12171_v14  ;;  %v5181_v4 = vunpack.c.l.b16 %v5036_v24  ;;  %v5182_v18 = vunpack.c.h.b16 %v5036_v24  ;;  %4872 = vadd.xlane.f32.xlu1 %v4871_v6  ;;  %v3395_v8 = vmul.f32 %v10718_v21, %v11965_v17  ;;  %v10832_v3 = vpop.xlane.xlu0 %4743  ;;  %v8081_v24 = vld [vmem:[#allocation6 + $0x644] ss:$24 sps:$4 sm:$0xff]  }
 0x336   :  { %v4475_v1 = vmax.f32 %v4347_v33, 0.0  ;;  %v4232_v46 = vadd.f32 %v4104_v37, %v3829_v29  ;;  %v3670_v10 = vmul.f32 %v10721_v15, %v11966_v22  ;;  %v4073_v57 = vmul.f32 %v10735_v38, %v11967_v60  ;;  %12173 = vst [vmem:[#allocation74_spill] sm:$0xff] %v10832_v3  ;;  %v12174_v6 = vld [vmem:[#allocation51_spill] sm:$0xff]  ;;  %v12176_v3 = vld [vmem:[#allocation62_spill] sm:$0xff] }
 0x337   :  { %v5212_v36 = vunpack.c.h.b16 %v10793_v45  ;;  %v5507_v53 = vrot.slane %v5211_v12, %v12169_v30  ;;  %v3336_v48 = vmul.f32 %v10579_v54, %v9167_v34  ;;  %v3611_v37 = vmul.f32 %v12174_v6, %v9176_v7  ;;  %3070 = vmatmul.mubr.bf16.vlgmr.msra.gmra.mrb[4].mxu0 %v12176_v3 }
 0x338   :  { %v4778_v33 = vsel %vm4516_vm1, %v4475_v1, 0.0  ;;  %v4380_v29 = vadd.f32 %v12023_v2, %v4232_v46  ;;  %v3798_v14 = vadd.f32 %v3670_v10, %v3395_v8  ;;  %v4014_v42 = vmul.f32 %v12175_v52, %v9214_v11  ;;  %3079 = vmatpush1.bf16.msra.mxu0 %v8076_v32  ;;  %v12178_v2 = vld [vmem:[#allocation39_spill] sm:$0xff]  ;;  %v10858_v32 = vpop.xlane.xlu1 %4836 }
 0x339   :  { %v10846_v45 = vsel %vm5308_vm9, %v5787_v19, %v5783_v0  ;;  %v5361_v12 = vsel %vm5322_vm11, %v5360_v63, %v5356_v58  ;;  %4779 = vadd.xlane.f32.xlu0 %v4778_v33  ;;  %v4947_v27 = vmul.f32 0.015625, %v12177_v28  ;;  %v3739_v16 = vadd.f32 %v3611_v37, %v3336_v48  ;;  %3110 = vmatprep.mubr.bf16.mxu0 %v12178_v2  ;;  %v8084_v0 = vld [vmem:[#allocation6 + $0x674] ss:$24 sps:$4 sm:$0xff]   ;;  %v10866_v3 = vpop.xlane.xlu0 %4749  ;;  %v8087_v37 = vld [vmem:[#allocation6 + $0x6a4] ss:$24 sps:$4 sm:$0xff]  }
 0x33a   :  { %v5365_v1 = vrot.slane %v5181_v4, %v10230_v50  ;;  %v4508_v46 = vmax.f32 %v4380_v29, 0.0  ;;  %v4201_v8 = vadd.f32 %v4073_v57, %v3798_v14  ;;  %v3425_v10 = vmul.f32 %v10491_v56, %v11973_v23  ;;  %3080 = vmatprep.subr.bf16.mxu0 %v8081_v24  ;;  %12179 = vst [vmem:[#allocation42_spill] sm:$0xff] %v10866_v3  ;;  %v12181_v33 = vld [vmem:[#allocation47_spill] sm:$0xff] }
 0x33b   :  { %v5369_v19 = vrot.slane %v5182_v18, %v10246_v25  ;;  %v5512_v63 = vrot.slane %v5212_v36, %v12170_v61  ;;  %v4142_v58 = vadd.f32 %v4014_v42, %v3739_v16  ;;  %v3700_v28 = vmul.f32 %v10501_v49, %v11974_v44  ;;  %v12180_v18 = vld [vmem:[#allocation61_spill] sm:$0xff] }
 0x33c   :  { %v5508_v4 = vsel %vm5315_vm10, %v5507_v53, %v10692_v40  ;;  %v4877_v57 = vsel %vm4516_vm1, %v4508_v46, 0.0  ;;  %v4349_v56 = vadd.f32 %v11969_v62, %v4201_v8  ;;  %v4103_v2 = vmul.f32 %v12163_v31, %v11975_v20  ;;  %3081 = vmatpush1.bf16.msra.mxu0 %v8079_v59  ;;  %v8082_v40 = vld [vmem:[#allocation6 + $0x670] ss:$24 sps:$4 sm:$0xff]   ;;  %v12182_v59 = vld [vmem:[#allocation46_spill] sm:$0xff] }
 0x33d   :  { %v4968_v24 = vmul.f32 0.015625, %v12180_v18  ;;  %4878 = vadd.xlane.f32.xlu1 %v4877_v57  ;;  %v10870_v16 = vpack.c.bf16 %v4947_v27, %v10777_v47  ;;  %v4290_v49 = vadd.f32 %v9309_v39, %v4142_v58  ;;  %v3828_v42 = vadd.f32 %v3700_v28, %v3425_v10  ;;  %3082 = vmatprep.subr.bf16.mxu0 %v8084_v0  ;;  %v12184_v8 = vld [vmem:[#allocation52_spill] sm:$0xff] }
 0x33e   :  { %v4477_v36 = vmax.f32 %v4349_v56, 0.0  ;;  %v3368_v53 = vmul.f32 %v10651_v26, %v9167_v34  ;;  %v3643_v31 = vmul.f32 %v10655_v41, %v9176_v7  ;;  %v4046_v48 = vmul.f32 %v10662_v51, %v9214_v11  ;;  %v12185_v56 = vld [vmem:[#allocation37_spill] sm:$0xff] }
 0x33f   :  { %v5513_v27 = vsel %vm5322_vm11, %v5512_v63, %v5508_v4  ;;  %v4418_v47 = vmax.f32 %v4290_v49, 0.0  ;;  %v4969_v29 = vmul.f32 0.015625, %v12181_v33  ;;  %v4231_v14 = vadd.f32 %v4103_v2, %v3828_v42  ;;  %v10892_v2 = vpop.xlane.xlu1 %4842  ;;  %v12187_v49 = vld [vmem:[#allocation69_spill] sm:$0xff] }
 0x340   :  { %v10883_v46 = vsel %vm1211_vm3, %v5361_v12, %v12182_v59  ;;  %v4972_v10 = vmul.f32 0.015625, %v12184_v8  ;;  %v4784_v58 = vsel %vm4516_vm1, %v4477_v36, 0.0  ;;  %v3771_v28 = vadd.f32 %v3643_v31, %v3368_v53  ;;  %12186 = vst [vmem:[#allocation40_spill] sm:$0xff] %v10892_v2  ;;  %3083 = vmatpush1.bf16.msra.mxu0 %v8082_v40  ;;  %v8085_v12 = vld [vmem:[#allocation6 + $0x6a0] ss:$24 sps:$4 sm:$0xff]   ;;  %v10902_v31 = vpop.xlane.xlu0 %4839 }
 0x341   :  { %12183 = vst [vmem:[#allocation58_spill] sm:$0xff] %v10883_v46  ;;  %4785 = vadd.xlane.f32.xlu0 %v4784_v58  ;;  %v4607_v57 = vsel %vm4516_vm1, %v4418_v47, 0.0  ;;  %v4379_v0 = vadd.f32 %v12000_v55, %v4231_v14  ;;  %v4973_v63 = vmul.f32 0.015625, %v12185_v56  ;;  %v3427_v4 = vmul.f32 %v10799_v43, %v11965_v17  ;;  %12189 = vst [vmem:[#allocation78_spill] sm:$0xff] %v10902_v31  ;;  %v8090_v47 = vld [vmem:[#allocation6 + $0x6d4] ss:$24 sps:$4 sm:$0xff]  }
 0x342   :  { %v10895_v18 = vsel %vm5308_vm9, %v5369_v19, %v5365_v1  ;;  %v10899_v42 = vsel %vm1211_vm3, %v5513_v27, %v12187_v49  ;;  %v5213_v36 = vunpack.c.l.b16 %v10870_v16  ;;  %4608 = vadd.xlane.f32.xlu1 %v4607_v57  ;;  %v4174_v53 = vadd.f32 %v4046_v48, %v3771_v28  ;;  %3084 = vmatprep.subr.bf16.mxu0 %v8087_v37  ;;  %v8088_v58 = vld [vmem:[#allocation6 + $0x6d0] ss:$24 sps:$4 sm:$0xff]   ;;  %v8093_v49 = vld [vmem:[#allocation6 + $0x704] ss:$24 sps:$4 sm:$0xff]  }
 0x343   :  { %12188 = vst [vmem:[#allocation49_spill] sm:$0xff] %v10899_v42  ;;  %v5063_v33 = vpack.c.bf16 %v4969_v29, %v4968_v24  ;;  %v4507_v14 = vmax.f32 %v4379_v0, 0.0  ;;  %v3702_v40 = vmul.f32 %v10802_v13, %v11966_v22  ;;  %v4105_v1 = vmul.f32 %v10808_v9, %v11967_v60  ;;  %v12190_v28 = vld [vmem:[#allocation80_spill] sm:$0xff] }
 0x344   :  { %v5214_v19 = vunpack.c.h.b16 %v10870_v16  ;;  %v4322_v27 = vadd.f32 %v9309_v39, %v4174_v53  ;;  %v3396_v59 = vmul.f32 %v10718_v21, %v9167_v34  ;;  %v3671_v48 = vmul.f32 %v10721_v15, %v9176_v7  ;;  %3085 = vmatpush1.bf16.msra.mxu0 %v8085_v12  ;;  %v3148_v12 = vld [vmem:[%s11759_s4 + $0x5c] sm:$0x7] }
 0x345   :  { %v4874_v37 = vsel %vm4516_vm1, %v4507_v14, 0.0  ;;  %v10915_v24 = vpack.c.bf16 %v4973_v63, %v4972_v10  ;;  %v3830_v29 = vadd.f32 %v3702_v40, %v3427_v4  ;;  %v4074_v8 = vmul.f32 %v10735_v38, %v9214_v11  ;;  %3086 = vmatprep.subr.bf16.mxu0 %v8090_v47 }
 0x346   :  { %v10920_v16 = vrot.slane %v5213_v36, %v10230_v50  ;;  %v10923_v57 = vmul.f32 0.015625, %v12190_v28  ;;  %4875 = vadd.xlane.f32.xlu0 %v4874_v37  ;;  %v4450_v0 = vmax.f32 %v4322_v27, 0.0  ;;  %v3799_v56 = vadd.f32 %v3671_v48, %v3396_v59  ;;  %v10930_v36 = vpop.xlane.xlu1 %4572  ;;  %v8091_v37 = vld [vmem:[#allocation6 + $0x700] ss:$24 sps:$4 sm:$0xff]  }
 0x347   :  { %v5235_v53 = vunpack.c.l.b16 %v5063_v33  ;;  %v5236_v10 = vunpack.c.h.b16 %v5063_v33  ;;  %v4233_v63 = vadd.f32 %v4105_v1, %v3830_v29  ;;  %v3337_v4 = vmul.f32 %v10579_v54, %v11973_v23  ;;  %12191 = vst [vmem:[#allocation64_spill] sm:$0xff] %v10930_v36  ;;  %v10938_v33 = vpop.xlane.xlu0 %4845  ;;  %v12193_v1 = vld [vmem:[#allocation67_spill] sm:$0xff]  ;;  %v12197_v36 = vld [vmem:[#allocation77_spill] sm:$0xff] }
 0x348   :  { %v10933_v14 = vrot.slane %v5214_v19, %v10246_v25  ;;  %v4703_v40 = vsel %vm4516_vm1, %v4450_v0, 0.0  ;;  %v4202_v27 = vadd.f32 %v4074_v8, %v3799_v56  ;;  %v3612_v47 = vmul.f32 %v12174_v6, %v11974_v44  ;;  %12192 = vst [vmem:[#allocation55_spill] sm:$0xff] %v10938_v33  ;;  %3087 = vmatpush1.bf16.msra.mxu0 %v8088_v58  ;;  %v8096_v0 = vld [vmem:[#allocation6 + $0x734] ss:$24 sps:$4 sm:$0xff]  }
 0x349   :  { %v10941_v59 = vmul.f32 0.015625, %v12193_v1  ;;  %4704 = vadd.xlane.f32.xlu1 %v4703_v40  ;;  %v5239_v54 = vunpack.c.l.b16 %v10915_v24  ;;  %v4381_v48 = vadd.f32 %v11969_v62, %v4233_v63  ;;  %v4015_v19 = vmul.f32 %v12175_v52, %v11975_v20  ;;  %3088 = vmatprep.subr.bf16.mxu0 %v8093_v49  ;;  %v12194_v1 = vld [vmem:[#allocation33_spill] sm:$0xff] }
 0x34a   :  { %v4350_v29 = vadd.f32 %v9309_v39, %v4202_v27  ;;  %v3740_v8 = vadd.f32 %v3612_v47, %v3337_v4  ;;  %v10949_v6 = vrot.slane %v3148_v12, %v11980_v5  ;;  %v10952_v28 = vrot.slane %v3148_v12, %v11979_v35  ;;  %v12195_v27 = vld [vmem:[#allocation68_spill] sm:$0xff]  ;;  %v12196_v47 = vld [vmem:[#allocation70_spill] sm:$0xff] }
 0x34b   :  { %v5621_v56 = vrot.slane %v5235_v53, %v12169_v30  ;;  %v5626_v63 = vrot.slane %v5236_v10, %v12170_v61  ;;  %v4509_v40 = vmax.f32 %v4381_v48, 0.0  ;;  %v10957_v52 = vrot.slane %v3148_v12, %v12194_v1  ;;  %v10968_v48 = vpop.xlane.xlu1 %4578  ;;  %v8094_v12 = vld [vmem:[#allocation6 + $0x730] ss:$24 sps:$4 sm:$0xff]  }
 0x34c   :  { %v4478_v58 = vmax.f32 %v4350_v29, 0.0  ;;  %v4143_v2 = vadd.f32 %v4015_v19, %v3740_v8  ;;  %v3398_v4 = vmul.f32 %v10949_v6, %v12195_v27  ;;  %v3673_v33 = vmul.f32 %v10952_v28, %v12196_v47  ;;  %12198 = vst [vmem:[#allocation51_spill] sm:$0xff] %v10968_v48  ;;  %3089 = vmatpush1.bf16.msra.mxu0 %v8091_v37  ;;  %v12199_v29 = vld [vmem:[#allocation56_spill] sm:$0xff] }
 0x34d   :  { %v5240_v42 = vunpack.c.h.b16 %v10915_v24  ;;  %v5640_v49 = vrot.slane %v5239_v54, %v12169_v30  ;;  %v4880_v53 = vsel %vm4516_vm1, %v4509_v40, 0.0  ;;  %v4076_v10 = vmul.f32 %v10957_v52, %v12197_v36  ;;  %v10973_v24 = vpop.xlane.xlu0 %4575  ;;  %3090 = vmatprep.subr.bf16.mxu0 %v8096_v0  ;;  %v8099_v54 = vld [vmem:[#allocation6 + $0x764] ss:$24 sps:$4 sm:$0xff]  }
 0x34e   :  { %4881 = vadd.xlane.f32.xlu0 %v4880_v53  ;;  %v4787_v19 = vsel %vm4516_vm1, %v4478_v58, 0.0  ;;  %v4975_v8 = vmul.f32 0.015625, %v12199_v29  ;;  %v4291_v3 = vadd.f32 %v12000_v55, %v4143_v2  ;;  %v3801_v46 = vadd.f32 %v3673_v33, %v3398_v4  ;;  %12200 = vst [vmem:[#allocation45_spill] sm:$0xff] %v10973_v24  ;;  %v12201_v40 = vld [vmem:[#allocation54_spill] sm:$0xff]  ;;  %v8102_v24 = vld [vmem:[#allocation6 + $0x794] ss:$24 sps:$4 sm:$0xff]  }
 0x34f   :  { %v5622_v31 = vsel %vm5315_vm10, %v5621_v56, %v12201_v40  ;;  %4788 = vadd.xlane.f32.xlu1 %v4787_v19  ;;  %v3369_v37 = vmul.f32 %v10651_v26, %v11973_v23  ;;  %v3644_v53 = vmul.f32 %v10655_v41, %v11974_v44  ;;  %v4047_v58 = vmul.f32 %v10662_v51, %v11975_v20  ;;  %v12202_v4 = vld [vmem:[#allocation50_spill] sm:$0xff] }
 0x350   :  { %v4419_v29 = vmax.f32 %v4291_v3, 0.0  ;;  %v4204_v2 = vadd.f32 %v4076_v10, %v3801_v46  ;;  %v3428_v33 = vmul.f32 %v10799_v43, %v9167_v34  ;;  %v3703_v0 = vmul.f32 %v10802_v13, %v9176_v7  ;;  %3091 = vmatpush1.bf16.msra.mxu0 %v8094_v12  ;;  %v8097_v40 = vld [vmem:[#allocation6 + $0x760] ss:$24 sps:$4 sm:$0xff]  }
 0x351   :  { %v5641_v56 = vsel %vm5315_vm10, %v5640_v49, %v12202_v4  ;;  %v5645_v19 = vrot.slane %v5240_v42, %v12170_v61  ;;  %v3772_v26 = vadd.f32 %v3644_v53, %v3369_v37  ;;  %v4106_v41 = vmul.f32 %v10808_v9, %v9214_v11  ;;  %v12203_v46 = vld [vmem:[#allocation79_spill] sm:$0xff]  ;;  %3092 = vmatprep.subr.bf16.mxu0 %v8099_v54  ;;  %v11002_v4 = vpop.xlane.xlu1 %4668 }
 0x352   :  { %v5066_v51 = vpack.c.bf16 %v4975_v8, %v10923_v57  ;;  %v4610_v3 = vsel %vm4516_vm1, %v4419_v29, 0.0  ;;  %v4352_v10 = vadd.f32 %v12203_v46, %v4204_v2  ;;  %v3831_v48 = vadd.f32 %v3703_v0, %v3428_v33  ;;  %v12204_v37 = vld [vmem:[#allocation59_spill] sm:$0xff] }
 0x353   :  { %v10998_v49 = vsel %vm5308_vm9, %v10933_v14, %v10920_v16  ;;  %v5627_v42 = vsel %vm5322_vm11, %v5626_v63, %v5622_v31  ;;  %v5004_v53 = vmul.f32 0.015625, %v12204_v37  ;;  %4611 = vadd.xlane.f32.xlu0 %v4610_v3  ;;  %v4175_v12 = vadd.f32 %v4047_v58, %v3772_v26  ;;  %v12205_v8 = vld [vmem:[#allocation63_spill] sm:$0xff]  ;;  %v3156_v16 = vld [vmem:[%s11759_s4 + $0x7c] sm:$0x7]  ;;  %v11010_v14 = vpop.xlane.xlu0 %4581  ;;  %s8578_s4 = smov 96  }
 0x354   :  { %v4480_v57 = vmax.f32 %v4352_v10, 0.0  ;;  %v5001_v29 = vmul.f32 0.015625, %v12205_v8  ;;  %v4234_v2 = vadd.f32 %v4106_v41, %v3831_v48  ;;  %v3397_v54 = vmul.f32 %v10718_v21, %v11973_v23  ;;  %3093 = vmatpush1.bf16.msra.mxu0 %v8097_v40  ;;  %v8100_v48 = vld [vmem:[#allocation6 + $0x790] ss:$24 sps:$4 sm:$0xff]   ;;  %v8105_v3 = vld [vmem:[#allocation6 + $0x7c4] ss:$24 sps:$4 sm:$0xff]  }
 0x355   :  { %v5646_v31 = vsel %vm5322_vm11, %v5645_v19, %v5641_v56  ;;  %v4323_v63 = vadd.f32 %v12000_v55, %v4175_v12  ;;  %v3672_v58 = vmul.f32 %v10721_v15, %v11974_v44  ;;  %v4075_v33 = vmul.f32 %v10735_v38, %v11975_v20  ;;  %3094 = vmatprep.subr.bf16.mxu0 %v8102_v24  ;;  %v12206_v19 = vld [vmem:[#allocation43_spill] sm:$0xff] }
 0x356   :  { %v5241_v0 = vunpack.c.l.b16 %v5066_v51  ;;  %v5242_v21 = vunpack.c.h.b16 %v5066_v51  ;;  %v4793_v26 = vsel %vm4516_vm1, %v4480_v57, 0.0  ;;  %v4382_v41 = vadd.f32 %v9309_v39, %v4234_v2  ;;  %v12207_v57 = vld [vmem:[#allocation65_spill] sm:$0xff] }
 0x357   :  { %4794 = vadd.xlane.f32.xlu1 %v4793_v26  ;;  %v4451_v56 = vmax.f32 %v4323_v63, 0.0  ;;  %v5005_v10 = vmul.f32 0.015625, %v12206_v19  ;;  %v3800_v37 = vadd.f32 %v3672_v58, %v3397_v54  ;;  %v11022_v15 = vrot.slane %v3156_v16, %v11980_v5  ;;  %v11038_v63 = vpop.xlane.xlu1 %4674  ;;  %v11047_v58 = vpop.xlane.xlu0 %4671  ;;  %v12210_v5 = vld [vmem:[#allocation41_spill] sm:$0xff] }
 0x358   :  { %v5079_v38 = vpack.c.bf16 %v5001_v29, %v10941_v59  ;;  %v4510_v40 = vmax.f32 %v4382_v41, 0.0  ;;  %v11026_v12 = vrot.slane %v3156_v16, %v11979_v35  ;;  %v11029_v51 = vrot.slane %v3156_v16, %v12194_v1  ;;  %3095 = vmatpush1.bf16.msra.mxu0 %v8100_v48  ;;  %v8103_v59 = vld [vmem:[#allocation6 + $0x7c0] ss:$24 sps:$4 sm:$0xff]  }
 0x359   :  { %v11032_v24 = vsel %vm1208_vm2, %v5646_v31, %v5627_v42  ;;  %v11035_v8 = vmul.f32 0.015625, %v12207_v57  ;;  %v4706_v2 = vsel %vm4516_vm1, %v4451_v56, 0.0  ;;  %v4203_v54 = vadd.f32 %v4075_v33, %v3800_v37  ;;  %3096 = vmatprep.subr.bf16.mxu0 %v8105_v3  ;;  %v8108_v33 = vld [vmem:[#allocation6 + $0x7f4] ss:$24 sps:$4 sm:$0xff]  }
 0x35a   :  { %4707 = vadd.xlane.f32.xlu0 %v4706_v2  ;;  %v4883_v29 = vsel %vm4516_vm1, %v4510_v40, 0.0  ;;  %v3430_v16 = vmul.f32 %v11022_v15, %v12195_v27  ;;  %v3705_v42 = vmul.f32 %v11026_v12, %v12196_v47  ;;  %v4108_v31 = vmul.f32 %v11029_v51, %v12197_v36 }
 0x35b   :  { %v5650_v26 = vrot.slane %v5241_v0, %v10230_v50  ;;  %v5654_v48 = vrot.slane %v5242_v21, %v10246_v25  ;;  %4884 = vadd.xlane.f32.xlu1 %v4883_v29  ;;  %v11051_v41 = vpack.c.bf16 %v5005_v10, %v5004_v53  ;;  %v4351_v56 = vadd.f32 %v12000_v55, %v4203_v54  ;;  %v8106_v53 = vld [vmem:[#allocation6 + $0x7f0] ss:$24 sps:$4 sm:$0xff]   ;;  %v8111_v54 = vld [vmem:[#allocation6 + $0x824] ss:$24 sps:$4 sm:$0xff]  }
 0x35c   :  { %v5267_v27 = vunpack.c.l.b16 %v5079_v38  ;;  %v3833_v19 = vadd.f32 %v3705_v42, %v3430_v16  ;;  %v3399_v47 = vmul.f32 %v10949_v6, %v11965_v17  ;;  %v3674_v36 = vmul.f32 %v10952_v28, %v11966_v22  ;;  %3097 = vmatpush1.bf16.msra.mxu0 %v8103_v59  ;;  %v12208_v42 = vld [vmem:[#allocation38_spill] sm:$0xff] }
 0x35d   :  { %v5268_v37 = vunpack.c.h.b16 %v5079_v38  ;;  %v4479_v3 = vmax.f32 %v4351_v56, 0.0  ;;  %v4077_v0 = vmul.f32 %v10957_v52, %v11967_v60  ;;  %v3400_v21 = vmul.f32 %v10949_v6, %v9167_v34  ;;  %3098 = vmatprep.subr.bf16.mxu0 %v8108_v33  ;;  %v11072_v56 = vpop.xlane.xlu1 %4752  ;;  %v11076_v33 = vpop.xlane.xlu0 %4677 }
 0x35e   :  { %v4236_v10 = vadd.f32 %v4108_v31, %v3833_v19  ;;  %v3802_v40 = vadd.f32 %v3674_v36, %v3399_v47  ;;  %v3675_v57 = vmul.f32 %v10952_v28, %v9176_v7  ;;  %v4078_v2 = vmul.f32 %v10957_v52, %v9214_v11  ;;  %v12209_v31 = vld [vmem:[#allocation36_spill] sm:$0xff] }
 0x35f   :  { %v11067_v38 = vsel %vm5308_vm9, %v5654_v48, %v5650_v26  ;;  %v5271_v29 = vunpack.c.l.b16 %v11051_v41  ;;  %v4790_v16 = vsel %vm4516_vm1, %v4479_v3, 0.0  ;;  %v4917_v59 = vmul.f32 0.015625, %v12208_v42 }
 0x360   :  { %v4916_v19 = vmul.f32 0.015625, %v12209_v31  ;;  %4791 = vadd.xlane.f32.xlu0 %v4790_v16  ;;  %v4384_v47 = vadd.f32 %v12203_v46, %v4236_v10  ;;  %v4205_v36 = vadd.f32 %v4077_v0, %v3802_v40  ;;  %v3803_v1 = vadd.f32 %v3675_v57, %v3400_v21  ;;  %3099 = vmatpush1.bf16.msra.mxu0 %v8106_v53  ;;  %v8109_v0 = vld [vmem:[#allocation6 + $0x820] ss:$24 sps:$4 sm:$0xff]   ;;  %v8114_v10 = vld [vmem:[#allocation6 + $0x854] ss:$24 sps:$4 sm:$0xff]  }
 0x361   :  { %v5773_v26 = vrot.slane %v5267_v27, %v12169_v30  ;;  %v11080_v48 = vrot.slane %v5268_v37, %v12170_v61  ;;  %v4918_v3 = vmul.f32 0.015625, %v12210_v5  ;;  %v3429_v42 = vmul.f32 %v10799_v43, %v11973_v23  ;;  %3100 = vmatprep.subr.bf16.mxu0 %v8111_v54  ;;  %v12211_v57 = vld [vmem:[#allocation76_spill] sm:$0xff] }
 0x362   :  { %v4512_v35 = vmax.f32 %v4384_v47, 0.0  ;;  %v4353_v16 = vadd.f32 %v11969_v62, %v4205_v36  ;;  %v4206_v31 = vadd.f32 %v4078_v2, %v3803_v1  ;;  %v3704_v46 = vmul.f32 %v10802_v13, %v11974_v44  ;;  %v12212_v2 = vld [vmem:[#allocation53_spill] sm:$0xff]  ;;  %v11108_v36 = vpop.xlane.xlu0 %4755 }
 0x363   :  { %v5272_v27 = vunpack.c.h.b16 %v11051_v41  ;;  %v5792_v37 = vrot.slane %v5271_v29, %v12169_v30  ;;  %v5037_v21 = vpack.c.bf16 %v4917_v59, %v4916_v19  ;;  %v4107_v5 = vmul.f32 %v10808_v9, %v11975_v20  ;;  %v11103_v29 = vpop.xlane.xlu1 %4758 }
 0x364   :  { %v4889_v43 = vsel %vm4516_vm1, %v4512_v35, 0.0  ;;  %v4481_v53 = vmax.f32 %v4353_v16, 0.0  ;;  %v4354_v40 = vadd.f32 %v9309_v39, %v4206_v31  ;;  %v3832_v1 = vadd.f32 %v3704_v46, %v3429_v42  ;;  %3101 = vmatpush1.bf16.msra.mxu0 %v8109_v0  ;;  %v8117_v46 = vld [vmem:[#allocation6 + $0x884] ss:$24 sps:$4 sm:$0xff]  }
 0x365   :  { %v11096_v13 = vsel %vm5315_vm10, %v5773_v26, %v12211_v57  ;;  %4890 = vadd.xlane.f32.xlu1 %v4889_v43  ;;  %v5007_v41 = vmul.f32 0.015625, %v12212_v2  ;;  %v3432_v54 = vmul.f32 %v11022_v15, %v9167_v34  ;;  %v3707_v9 = vmul.f32 %v11026_v12, %v9176_v7  ;;  %v8112_v26 = vld [vmem:[#allocation6 + $0x850] ss:$24 sps:$4 sm:$0xff]   ;;  %v12213_v7 = vld [vmem:[#allocation66_spill] sm:$0xff]  ;;  %3102 = vmatprep.subr.bf16.mxu0 %v8114_v10 }
 0x366   :  { %v4796_v35 = vsel %vm4516_vm1, %v4481_v53, 0.0  ;;  %v4482_v59 = vmax.f32 %v4354_v40, 0.0  ;;  %v4235_v19 = vadd.f32 %v4107_v5, %v3832_v1  ;;  %v4110_v47 = vmul.f32 %v11029_v51, %v9214_v11  ;;  %v12214_v53 = vld [vmem:[#allocation72_spill] sm:$0xff]  ;;  %v12215_v2 = vld [vmem:[#allocation57_spill] sm:$0xff] }
 0x367   :  { %v11111_v42 = vrot.slane %v5272_v27, %v12170_v61  ;;  %4797 = vadd.xlane.f32.xlu0 %v4796_v35  ;;  %v5183_v34 = vunpack.c.l.b16 %v5037_v21  ;;  %v3835_v16 = vadd.f32 %v3707_v9, %v3432_v54  ;;  %v4919_v31 = vmul.f32 0.015625, %v12213_v7  ;;  %v8115_v9 = vld [vmem:[#allocation6 + $0x880] ss:$24 sps:$4 sm:$0xff]  }
 0x368   :  { %v11116_v5 = vsel %vm5315_vm10, %v5792_v37, %v10846_v45  ;;  %v4799_v11 = vsel %vm4516_vm1, %v4482_v59, 0.0  ;;  %v4383_v43 = vadd.f32 %v12000_v55, %v4235_v19  ;;  %v3431_v0 = vmul.f32 %v11022_v15, %v11965_v17  ;;  %3103 = vmatpush1.bf16.msra.mxu0 %v8112_v26  ;;  %v11133_v59 = vpop.xlane.xlu1 %4848  ;;  %v8120_v19 = vld [vmem:[#allocation6 + $0x8b4] ss:$24 sps:$4 sm:$0xff]   ;;  %v11140_v26 = vpop.xlane.xlu0 %4761 }
 0x369   :  { %v11123_v27 = vpack.c.bf16 %v5007_v41, %v11035_v8  ;;  %v4948_v40 = vmul.f32 0.015625, %v12214_v53  ;;  %4800 = vadd.xlane.f32.xlu1 %v4799_v11  ;;  %v4238_v1 = vadd.f32 %v4110_v47, %v3835_v16  ;;  %v3706_v10 = vmul.f32 %v11026_v12, %v11966_v22  ;;  %3104 = vmatprep.subr.bf16.mxu0 %v8117_v46 }
 0x36a   :  { %v5184_v57 = vunpack.c.h.b16 %v5037_v21  ;;  %v4511_v45 = vmax.f32 %v4383_v43, 0.0  ;;  %v4109_v37 = vmul.f32 %v11029_v51, %v11967_v60  ;;  %v4949_v54 = vmul.f32 0.015625, %v12215_v2 }
 0x36b   :  { %v5374_v17 = vrot.slane %v5183_v34, %v12169_v30  ;;  %v4386_v8 = vadd.f32 %v9309_v39, %v4238_v1  ;;  %v5038_v41 = vpack.c.bf16 %v4919_v31, %v4918_v3  ;;  %v3834_v35 = vadd.f32 %v3706_v10, %v3431_v0  ;;  %v12216_v0 = vld [vmem:[#allocation48_spill] sm:$0xff] }
 0x36c   :  { %v4886_v22 = vsel %vm4516_vm1, %v4511_v45, 0.0  ;;  %v5053_v21 = vpack.c.bf16 %v4949_v54, %v4948_v40  ;;  %v3401_v60 = vmul.f32 %v10949_v6, %v11973_v23  ;;  %v3676_v47 = vmul.f32 %v10952_v28, %v11974_v44  ;;  %3105 = vmatpush1.bf16.msra.mxu0 %v8115_v9  ;;  %v8118_v6 = vld [vmem:[#allocation6 + $0x8b0] ss:$24 sps:$4 sm:$0xff]   ;;  %v8123_v40 = vld [vmem:[#allocation6 + $0x8e4] ss:$24 sps:$4 sm:$0xff]   ;;  %v11157_v9 = vpop.xlane.xlu1 %4854 }
 0x36d   :  { %v5273_v34 = vunpack.c.l.b16 %v11123_v27  ;;  %v5274_v39 = vunpack.c.h.b16 %v11123_v27  ;;  %4887 = vadd.xlane.f32.xlu0 %v4886_v22  ;;  %v4514_v3 = vmax.f32 %v4386_v8, 0.0  ;;  %v4237_v16 = vadd.f32 %v4109_v37, %v3834_v35  ;;  %3106 = vmatprep.subr.bf16.mxu0 %v8120_v19  ;;  %v11164_v19 = vpop.xlane.xlu0 %4851  ;;  %v8121_v22 = vld [vmem:[#allocation6 + $0x8e0] ss:$24 sps:$4 sm:$0xff]  }
 0x36e   :  { %v5379_v7 = vrot.slane %v5184_v57, %v12170_v61  ;;  %v5215_v31 = vunpack.c.l.b16 %v5053_v21  ;;  %v3804_v46 = vadd.f32 %v3676_v47, %v3401_v60  ;;  %v4079_v11 = vmul.f32 %v10957_v52, %v11975_v20  ;;  %v12217_v52 = vld [vmem:[#allocation71_spill] sm:$0xff] }
 0x36f   :  { %v5375_v28 = vsel %vm5315_vm10, %v5374_v17, %v10895_v18  ;;  %v4895_v43 = vsel %vm4516_vm1, %v4514_v3, 0.0  ;;  %v4976_v53 = vmul.f32 0.015625, %v12216_v0  ;;  %v4385_v27 = vadd.f32 %v11969_v62, %v4237_v16  ;;  %v12221_v0 = vld [vmem:[#allocation58_spill] sm:$0xff] }
 0x370   :  { %4896 = vadd.xlane.f32.xlu1 %v4895_v43  ;;  %v5185_v1 = vunpack.c.l.b16 %v5038_v41  ;;  %v5186_v10 = vunpack.c.h.b16 %v5038_v41  ;;  %v5216_v57 = vunpack.c.h.b16 %v5053_v21  ;;  %v4207_v45 = vadd.f32 %v4079_v11, %v3804_v46  ;;  %v12218_v41 = vld [vmem:[#allocation74_spill] sm:$0xff]  ;;  %3107 = vmatpush1.bf16.msra.mxu0 %v8118_v6 }
 0x371   :  { %v4513_v37 = vmax.f32 %v4385_v27, 0.0  ;;  %v4951_v2 = vmul.f32 0.015625, %v12217_v52  ;;  %v3433_v54 = vmul.f32 %v11022_v15, %v11973_v23  ;;  %v3708_v18 = vmul.f32 %v11026_v12, %v11974_v44  ;;  %v12219_v15 = vld [vmem:[#allocation44_spill] sm:$0xff]  ;;  %3108 = vmatprep.subr.bf16.mxu0 %v8123_v40 }
 0x372   :  { %v5526_v62 = vrot.slane %v5215_v31, %v12169_v30  ;;  %v4355_v17 = vadd.f32 %v12000_v55, %v4207_v45  ;;  %v4111_v8 = vmul.f32 %v11029_v51, %v11975_v20  ;;  %v4977_v35 = vmul.f32 0.015625, %v12218_v41  ;;  %v12226_v41 = vld [vmem:[#allocation64_spill] sm:$0xff] }
 0x373   :  { %v11169_v23 = vsel %vm5322_vm11, %v11080_v48, %v11096_v13  ;;  %v5802_v44 = vrot.slane %v5273_v34, %v10230_v50  ;;  %v4950_v12 = vmul.f32 0.015625, %v12219_v15  ;;  %v4892_v21 = vsel %vm4516_vm1, %v4513_v37, 0.0  ;;  %v12223_v37 = vld [vmem:[#allocation73_spill] sm:$0xff] }
 0x374   :  { %v5806_v20 = vrot.slane %v5274_v39, %v10246_v25  ;;  %4893 = vadd.xlane.f32.xlu0 %v4892_v21  ;;  %v4483_v51 = vmax.f32 %v4355_v17, 0.0  ;;  %v3836_v60 = vadd.f32 %v3708_v18, %v3433_v54  ;;  %v5067_v47 = vpack.c.bf16 %v4977_v35, %v4976_v53  ;;  %3109 = vmatpush1.bf16.msra.mxu0 %v8121_v22 }
 0x375   :  { %v11178_v3 = vsel %vm5322_vm11, %v11111_v42, %v11116_v5  ;;  %v5380_v48 = vsel %vm5322_vm11, %v5379_v7, %v5375_v28  ;;  %v5531_v13 = vrot.slane %v5216_v57, %v12170_v61  ;;  %v5054_v34 = vpack.c.bf16 %v4951_v2, %v4950_v12  ;;  %v12220_v5 = vld [vmem:[#allocation78_spill] sm:$0xff]  ;;  %v11189_v7 = vpop.xlane.xlu1 %4584  ;;  %v12224_v2 = vld [vmem:[#allocation75_spill] sm:$0xff] }
 0x376   :  { %v5384_v16 = vrot.slane %v5185_v1, %v10230_v50  ;;  %v5388_v31 = vrot.slane %v5186_v10, %v10246_v25  ;;  %v5527_v39 = vsel %vm5315_vm10, %v5526_v62, %v10998_v49  ;;  %v4239_v46 = vadd.f32 %v4111_v8, %v3836_v60  ;;  %v12222_v49 = vld [vmem:[#allocation42_spill] sm:$0xff]  ;;  %v11196_v1 = vpop.xlane.xlu0 %4857  ;;  %v12225_v62 = vld [vmem:[#allocation45_spill] sm:$0xff] }
 0x377   :  { %v4802_v11 = vsel %vm4516_vm1, %v4483_v51, 0.0  ;;  %v5008_v6 = vmul.f32 0.015625, %v10858_v32  ;;  %v5243_v42 = vunpack.c.l.b16 %v5067_v47  ;;  %v5009_v43 = vmul.f32 0.015625, %v12220_v5  ;;  %3111 = vmatmul.mubr.bf16.vlgmr.msra.gmra.mrb[4].mxu0 %v12223_v37 }
 0x378   :  { %v5807_v28 = vsel %vm5308_vm9, %v5806_v20, %v5802_v44  ;;  %v5915_v53 = vsel %vm1214_vm4, %v5380_v48, %v12221_v0  ;;  %4803 = vadd.xlane.f32.xlu0 %v4802_v11  ;;  %v4387_v27 = vadd.f32 %v12000_v55, %v4239_v46  ;;  %v4979_v40 = vmul.f32 0.015625, %v12222_v49  ;;  %v12227_v44 = vld [vmem:[#allocation49_spill] sm:$0xff] }
 0x379   :  { %v5532_v10 = vsel %vm5322_vm11, %v5531_v13, %v5527_v39  ;;  %v5217_v32 = vunpack.c.l.b16 %v5054_v34  ;;  %v5244_v57 = vunpack.c.h.b16 %v5067_v47  ;;  %v5083_v45 = vpack.c.bf16 %v5009_v43, %v5008_v6  ;;  %v11213_v13 = vpop.xlane.xlu1 %4590  ;;  %v12229_v39 = vld [vmem:[#allocation55_spill] sm:$0xff] }
 0x37a   :  { %v5389_v52 = vsel %vm5308_vm9, %v5388_v31, %v5384_v16  ;;  %v4978_v54 = vmul.f32 0.015625, %v12224_v2  ;;  %v4515_v18 = vmax.f32 %v4387_v27, 0.0  ;;  %v4921_v17 = vmul.f32 0.015625, %v12225_v62  ;;  %v12228_v16 = vld [vmem:[#allocation51_spill] sm:$0xff]  ;;  %v11219_v6 = vpop.xlane.xlu0 %4587  ;;  %v12230_v27 = vld [vmem:[#allocation40_spill] sm:$0xff] }
 0x37b   :  { %v5218_v8 = vunpack.c.h.b16 %v5054_v34  ;;  %v5659_v55 = vrot.slane %v5243_v42, %v12169_v30  ;;  %v4920_v35 = vmul.f32 0.015625, %v12226_v41  ;;  %v5275_v22 = vunpack.c.l.b16 %v5083_v45 }
 0x37c   :  { %v11207_v15 = vsel %vm1214_vm4, %v5532_v10, %v12227_v44  ;;  %v4898_v12 = vsel %vm4516_vm1, %v4515_v18, 0.0  ;;  %v5068_v21 = vpack.c.bf16 %v4979_v40, %v4978_v54  ;;  %v5276_v20 = vunpack.c.h.b16 %v5083_v45 }
 0x37d   :  { %v5536_v51 = vrot.slane %v5217_v32, %v10230_v50  ;;  %4899 = vadd.xlane.f32.xlu0 %v4898_v12  ;;  %v5664_v60 = vrot.slane %v5244_v57, %v12170_v61  ;;  %v5811_v47 = vrot.slane %v5275_v22, %v12169_v30  ;;  %v5039_v48 = vpack.c.bf16 %v4921_v17, %v4920_v35 }
 0x37e   :  { %v5816_v34 = vrot.slane %v5276_v20, %v12170_v61  ;;  %v4922_v31 = vmul.f32 0.015625, %v12228_v16  ;;  %v5011_v46 = vmul.f32 0.015625, %v12229_v39  ;;  %v4923_v11 = vmul.f32 0.015625, %v11010_v14 }
 0x37f   :  { %v5660_v42 = vsel %vm5315_vm10, %v5659_v55, %v11067_v38  ;;  %v5812_v5 = vsel %vm5315_vm10, %v5811_v47, %v5807_v28  ;;  %v5187_v43 = vunpack.c.l.b16 %v5039_v48  ;;  %v5188_v0 = vunpack.c.h.b16 %v5039_v48  ;;  %v11245_v22 = vpop.xlane.xlu0 %4593 }
 0x380   :  { %v5010_v49 = vmul.f32 0.015625, %v12230_v27  ;;  %v5245_v40 = vunpack.c.l.b16 %v5068_v21  ;;  %v11226_v10 = vsel %vm5322_vm11, %v5816_v34, %v5812_v5  ;;  %v11228_v32 = vpack.c.bf16 %v4923_v11, %v4922_v31 }
 0x381   :  { %v4952_v57 = vmul.f32 0.015625, %v11002_v4  ;;  %v5393_v14 = vrot.slane %v5187_v43, %v12169_v30  ;;  %v5398_v45 = vrot.slane %v5188_v0, %v12170_v61  ;;  %v4953_v38 = vmul.f32 0.015625, %v11047_v58  ;;  %v11239_v4 = vpop.xlane.xlu1 %4680 }
 0x382   :  { %v5540_v28 = vrot.slane %v5218_v8, %v10246_v25  ;;  %v5665_v37 = vsel %vm5322_vm11, %v5664_v60, %v5660_v42  ;;  %v5246_v2 = vunpack.c.h.b16 %v5068_v21  ;;  %v5084_v54 = vpack.c.bf16 %v5011_v46, %v5010_v49 }
 0x383   :  { %v5394_v18 = vsel %vm5315_vm10, %v5393_v14, %v5389_v52  ;;  %v4954_v62 = vmul.f32 0.015625, %v11038_v63  ;;  %v5055_v17 = vpack.c.bf16 %v4953_v38, %v4952_v57  ;;  %v4955_v55 = vmul.f32 0.015625, %v11076_v33 }
 0x384   :  { %v5669_v41 = vrot.slane %v5245_v40, %v10230_v50  ;;  %v5399_v35 = vsel %vm5322_vm11, %v5398_v45, %v5394_v18  ;;  %v4980_v58 = vmul.f32 0.015625, %v11072_v56  ;;  %v4981_v8 = vmul.f32 0.015625, %v11108_v36 }
 0x385   :  { %v11248_v44 = vsel %vm1217_vm5, %v5399_v35, %v5915_v53  ;;  %v5219_v52 = vunpack.c.l.b16 %v5055_v17  ;;  %v5220_v63 = vunpack.c.h.b16 %v5055_v17  ;;  %v11250_v12 = vpack.c.bf16 %v4955_v55, %v4954_v62  ;;  %v11273_v0 = vpop.xlane.xlu1 %4686 }
 0x386   :  { %v5673_v33 = vrot.slane %v5246_v2, %v10246_v25  ;;  %v4982_v21 = vmul.f32 0.015625, %v11103_v29  ;;  %v5069_v20 = vpack.c.bf16 %v4981_v8, %v4980_v58  ;;  %v4983_v60 = vmul.f32 0.015625, %v11140_v26 }
 0x387   :  { %v5277_v47 = vunpack.c.l.b16 %v5084_v54  ;;  %v5278_v56 = vunpack.c.h.b16 %v5084_v54  ;;  %v5545_v36 = vrot.slane %v5219_v52, %v12169_v30  ;;  %v5550_v48 = vrot.slane %v5220_v63, %v12170_v61 }
 0x388   :  { %v5541_v16 = vsel %vm5308_vm9, %v5540_v28, %v5536_v51  ;;  %v5247_v31 = vunpack.c.l.b16 %v5069_v20  ;;  %v5248_v39 = vunpack.c.h.b16 %v5069_v20  ;;  %v11262_v46 = vpack.c.bf16 %v4983_v60, %v4982_v21 }
 0x389   :  { %v11257_v34 = vpop.f32.mrb[0].mxu0  ;;  %v11259_v53 = vpop.f32.mrb[0].mxu1  ;;  %v5928_v26 = vsel %vm1211_vm3, %v5665_v37, %v11032_v24  ;;  %v5546_v42 = vsel %vm5315_vm10, %v5545_v36, %v5541_v16  ;;  %v5012_v5 = vmul.f32 0.015625, %v11133_v59  ;;  %v5013_v43 = vmul.f32 0.015625, %v11164_v19 }
 0x38a   :  { %v11264_v29 = vpop.f32.mrb[1].mxu0  ;;  %v11266_v11 = vpop.f32.mrb[1].mxu1  ;;  %v5674_v27 = vsel %vm5308_vm9, %v5673_v33, %v5669_v41  ;;  %v5551_v49 = vsel %vm5322_vm11, %v5550_v48, %v5546_v42  ;;  %v5678_v40 = vrot.slane %v5247_v31, %v12169_v30  ;;  %v5683_v57 = vrot.slane %v5248_v39, %v12170_v61 }
 0x38b   :  { %v2870_v51 = vpop.f32.mrb[2].mxu0  ;;  %v4684_v14 = vpop.xlane.xlu0 %4683  ;;  %v5821_v24 = vrot.slane %v5277_v47, %v10230_v50  ;;  %v5825_v38 = vrot.slane %v5278_v56, %v10246_v25  ;;  %v11283_v59 = vsel %vm1217_vm5, %v5551_v49, %v11207_v15  ;;  %v5085_v19 = vpack.c.bf16 %v5013_v43, %v5012_v5  ;;  %v8125_v43 = vld [vmem:[#allocation12 + $0x8] sm:$0xff]  }
 0x38c   :  { %v2993_v45 = vpop.f32.mrb[2].mxu1  ;;  %v2871_v28 = vpop.f32.mrb[3].mxu0  ;;  %v5189_v2 = vunpack.c.l.b16 %v11228_v32  ;;  %v5679_v54 = vsel %vm5315_vm10, %v5678_v40, %v5674_v27  ;;  %v5014_v18 = vmul.f32 0.015625, %v11157_v9  ;;  %v5015_v62 = vmul.f32 0.015625, %v11196_v1 }
 0x38d   :  { %v2994_v37 = vpop.f32.mrb[3].mxu1  ;;  %v5190_v17 = vunpack.c.h.b16 %v11228_v32  ;;  %v5684_v55 = vsel %vm5322_vm11, %v5683_v57, %v5679_v54  ;;  %v5279_v41 = vunpack.c.l.b16 %v5085_v19  ;;  %v5280_v35 = vunpack.c.h.b16 %v5085_v19 }
 0x38e   :  { %v11292_v15 = vsel %vm1214_vm4, %v5684_v55, %v5928_v26  ;;  %v4924_v58 = vmul.f32 0.015625, %v11189_v7  ;;  %v11295_v8 = vpack.c.bf16 %v5015_v62, %v5014_v18  ;;  %v4925_v52 = vmul.f32 0.015625, %v11219_v6 }
 0x38f   :  { %v5934_v9 = vsel %vm1208_vm2, %v11178_v3, %v11169_v23  ;;  %v5826_v1 = vsel %vm5308_vm9, %v5825_v38, %v5821_v24  ;;  %v5830_v32 = vrot.slane %v5279_v41, %v12169_v30  ;;  %v5835_v63 = vrot.slane %v5280_v35, %v12170_v61  ;;  %v11307_v60 = vpop.xlane.xlu0 %4689  ;;  %v4765_v3 = vpop.xlane.xlu1 %4764 }
 0x390   :  { %v5403_v33 = vrot.slane %v5189_v2, %v10230_v50  ;;  %v5221_v21 = vunpack.c.l.b16 %v11250_v12  ;;  %v5222_v7 = vunpack.c.h.b16 %v11250_v12  ;;  %v5041_v20 = vpack.c.bf16 %v4925_v52, %v4924_v58 }
 0x391   :  { %v5407_v6 = vrot.slane %v5190_v17, %v10246_v25  ;;  %v5831_v47 = vsel %vm5315_vm10, %v5830_v32, %v5826_v1  ;;  %v4956_v23 = vmul.f32 0.015625, %v11239_v4  ;;  %v4957_v56 = vmul.f32 0.015625, %v4684_v14  ;;  %v8124_v4 = vld [vmem:[#allocation12] sm:$0xff]  }
 0x392   :  { %v5935_v36 = vsel %vm1211_vm3, %v11226_v10, %v5934_v9  ;;  %v5836_v48 = vsel %vm5322_vm11, %v5835_v63, %v5831_v47  ;;  %v5191_v16 = vunpack.c.l.b16 %v5041_v20  ;;  %v5192_v12 = vunpack.c.h.b16 %v5041_v20  ;;  %7564 = vmatprep.subr.bf16.mxu1 %v8124_v4 }
 0x393   :  { %v11316_v31 = vsel %vm1214_vm4, %v5836_v48, %v5935_v36  ;;  %v5057_v39 = vpack.c.bf16 %v4957_v56, %v4956_v23  ;;  %v5555_v26 = vrot.slane %v5221_v21, %v10230_v50  ;;  %v5559_v42 = vrot.slane %v5222_v7, %v10246_v25  ;;  %v4771_v19 = vpop.xlane.xlu1 %4770  ;;  %7565 = vmatpush3.bf16.msra.mxu1 %v8124_v4 }
 0x394   :  { %v5412_v5 = vrot.slane %v5191_v16, %v12169_v30  ;;  %v5408_v51 = vsel %vm5308_vm9, %v5407_v6, %v5403_v33  ;;  %v5417_v10 = vrot.slane %v5192_v12, %v12170_v61  ;;  %v5249_v49 = vunpack.c.l.b16 %v11262_v46  ;;  %7566 = vmatprep.subr.bf16.mxu1 %v8125_v43 }
 0x395   :  { %v5223_v27 = vunpack.c.l.b16 %v5057_v39  ;;  %v5224_v57 = vunpack.c.h.b16 %v5057_v39  ;;  %v5250_v45 = vunpack.c.h.b16 %v11262_v46  ;;  %v5560_v28 = vsel %vm5308_vm9, %v5559_v42, %v5555_v26 }
 0x396   :  { %v5413_v40 = vsel %vm5315_vm10, %v5412_v5, %v5408_v51  ;;  %v4768_v14 = vpop.xlane.xlu0 %4767  ;;  %v4984_v37 = vmul.f32 0.015625, %v4765_v3  ;;  %v5688_v62 = vrot.slane %v5249_v49, %v10230_v50  ;;  %v4986_v35 = vmul.f32 0.015625, %v4771_v19 }
 0x397   :  { %v5418_v24 = vsel %vm5322_vm11, %v5417_v10, %v5413_v40  ;;  %v5564_v38 = vrot.slane %v5223_v27, %v12169_v30  ;;  %v5569_v2 = vrot.slane %v5224_v57, %v12170_v61  ;;  %v4985_v54 = vmul.f32 0.015625, %v4768_v14  ;;  %7567 = vmatpush3.bf16.msra.mxu1 %v8125_v43  ;;  %v4861_v1 = vpop.xlane.xlu1 %4860 }
 0x398   :  { %v5692_v46 = vrot.slane %v5250_v45, %v10246_v25  ;;  %v11336_v63 = vsel %vm1220_vm6, %v5418_v24, %v11248_v44  ;;  %v5281_v6 = vunpack.c.l.b16 %v11295_v8  ;;  %v5282_v47 = vunpack.c.h.b16 %v11295_v8 }
 0x399   :  { %v5565_v18 = vsel %vm5315_vm10, %v5564_v38, %v5560_v28  ;;  %v5071_v17 = vpack.c.bf16 %v4985_v54, %v4984_v37  ;;  %v5016_v3 = vmul.f32 0.015625, %v4861_v1  ;;  %v8575_v39 = vmov 0.0  }
 0x39a   :  { %v4774_v55 = vpop.xlane.xlu0 %4773  ;;  %v5570_v41 = vsel %vm5322_vm11, %v5569_v2, %v5565_v18  ;;  %v5693_v20 = vsel %vm5308_vm9, %v5692_v46, %v5688_v62  ;;  %v5844_v12 = vrot.slane %v5282_v47, %v10246_v25  ;;  %7572 = vmatprep.subr.bf16.mxu1 %v8575_v39 }
 0x39b   :  { %v4987_v58 = vmul.f32 0.015625, %v4774_v55  ;;  %v5251_v52 = vunpack.c.l.b16 %v5071_v17  ;;  %v5252_v9 = vunpack.c.h.b16 %v5071_v17  ;;  %v11342_v7 = vsel %vm1220_vm6, %v5570_v41, %v11283_v59  ;;  %v4867_v26 = vpop.xlane.xlu1 %4866 }
 0x39c   :  { %v5840_v59 = vrot.slane %v5281_v6, %v10230_v50  ;;  %v5018_v10 = vmul.f32 0.015625, %v4867_v26 }
 0x39d   :  { %v5072_v32 = vpack.c.bf16 %v4987_v58, %v4986_v35  ;;  %v5697_v33 = vrot.slane %v5251_v52, %v12169_v30  ;;  %v5702_v21 = vrot.slane %v5252_v9, %v12170_v61 }
 0x39e   :  { %v5845_v51 = vsel %vm5308_vm9, %v5844_v12, %v5840_v59  ;;  %v4927_v12 = vmul.f32 0.015625, %v11245_v22 }
 0x39f   :  { %v4864_v23 = vpop.xlane.xlu0 %4863  ;;  %v5698_v56 = vsel %vm5315_vm10, %v5697_v33, %v5693_v20  ;;  %v4597_v14 = vpop.xlane.xlu1 %4596  ;;  %v5253_v18 = vunpack.c.l.b16 %v5072_v32  ;;  %v5254_v62 = vunpack.c.h.b16 %v5072_v32 }
 0x3a0   :  { %v5017_v44 = vmul.f32 0.015625, %v4864_v23  ;;  %v5703_v36 = vsel %vm5322_vm11, %v5702_v21, %v5698_v56 }
 0x3a1   :  { %v5930_v48 = vsel %vm1217_vm5, %v5703_v36, %v11292_v15  ;;  %v5707_v35 = vrot.slane %v5253_v18, %v10230_v50  ;;  %v5711_v58 = vrot.slane %v5254_v62, %v10246_v25  ;;  %v4928_v62 = vmul.f32 0.015625, %v4597_v14 }
 0x3a2   :  { %v5087_v16 = vpack.c.bf16 %v5017_v44, %v5016_v3 }
 0x3a3   :  { %v5712_v21 = vsel %vm5308_vm9, %v5711_v58, %v5707_v35 }
 0x3a4   :  { %v5283_v8 = vunpack.c.l.b16 %v5087_v16  ;;  %v5284_v42 = vunpack.c.h.b16 %v5087_v16  ;;  %v4603_v24 = vpop.xlane.xlu1 %4602 }
 0x3a6   :  { %v5849_v5 = vrot.slane %v5283_v8, %v12169_v30  ;;  %v5854_v4 = vrot.slane %v5284_v42, %v12170_v61  ;;  %v4870_v43 = vpop.xlane.xlu0 %4869  ;;  %v4959_v42 = vmul.f32 0.015625, %v11307_v60 }
 0x3a7   :  { %v5019_v15 = vmul.f32 0.015625, %v4870_v43 }
 0x3a8   :  { %v5850_v27 = vsel %vm5315_vm10, %v5849_v5, %v5845_v51  ;;  %v4693_v19 = vpop.xlane.xlu1 %4692  ;;  %v4958_v51 = vmul.f32 0.015625, %v11273_v0 }
 0x3a9   :  { %v5855_v49 = vsel %vm5322_vm11, %v5854_v4, %v5850_v27  ;;  %v5088_v40 = vpack.c.bf16 %v5019_v15, %v5018_v10 }
 0x3aa   :  { %v5937_v57 = vsel %vm1217_vm5, %v5855_v49, %v11316_v31  ;;  %v5058_v60 = vpack.c.bf16 %v4959_v42, %v4958_v51 }
 0x3ab   :  { %v5285_v3 = vunpack.c.l.b16 %v5088_v40  ;;  %v5286_v56 = vunpack.c.h.b16 %v5088_v40 }
 0x3ac   :  { %v4600_v45 = vpop.xlane.xlu0 %4599 }
 0x3ad   :  { %v5859_v26 = vrot.slane %v5285_v3, %v10230_v50  ;;  %v5863_v8 = vrot.slane %v5286_v56, %v10246_v25  ;;  %v4929_v10 = vmul.f32 0.015625, %v4600_v45 }
 0x3af   :  { %v5864_v40 = vsel %vm5308_vm9, %v5863_v8, %v5859_v26  ;;  %v5043_v45 = vpack.c.bf16 %v4929_v10, %v4928_v62 }
 0x3b2   :  { %v4699_v37 = vpop.xlane.xlu1 %4698 }
 0x3b3   :  { %v4606_v38 = vpop.xlane.xlu0 %4605  ;;  %v4962_v14 = vmul.f32 0.015625, %v4699_v37 }
 0x3b4   :  { %v4931_v15 = vmul.f32 0.015625, %v4606_v38 }
 0x3b6   :  { %v4777_v54 = vpop.xlane.xlu1 %4776 }
 0x3b7   :  { %v4988_v55 = vmul.f32 0.015625, %v4777_v54 }
 0x3b8   :  { %v4696_v28 = vpop.xlane.xlu0 %4695 }
 0x3b9   :  { %v4961_v54 = vmul.f32 0.015625, %v4696_v28 }
 0x3bd   :  { %v11363_v31 = vpop.xlane.xlu1 %4782 }
 0x3c1   :  { %v4702_v2 = vpop.xlane.xlu0 %4701 }
 0x3c2   :  { %v4873_v47 = vpop.xlane.xlu1 %4872  ;;  %v4963_v58 = vmul.f32 0.015625, %v4702_v2 }
 0x3c3   :  { %v5020_v36 = vmul.f32 0.015625, %v4873_v47 }
 0x3c4   :  { %v5060_v3 = vpack.c.bf16 %v4963_v58, %v4962_v14 }
 0x3c6   :  { %v4780_v17 = vpop.xlane.xlu0 %4779 }
 0x3c7   :  { %v4989_v46 = vmul.f32 0.015625, %v4780_v17  ;;  %v4930_v17 = vmul.f32 0.015625, %v4603_v24 }
 0x3c9   :  { %v5073_v41 = vpack.c.bf16 %v4989_v46, %v4988_v55  ;;  %v5044_v38 = vpack.c.bf16 %v4931_v15, %v4930_v17 }
 0x3ca   :  { %v11379_v5 = vpop.xlane.xlu1 %4878 }
 0x3cb   :  { %v5255_v52 = vunpack.c.l.b16 %v5073_v41  ;;  %v5256_v9 = vunpack.c.h.b16 %v5073_v41 }
 0x3cd   :  { %v5716_v1 = vrot.slane %v5255_v52, %v12169_v30  ;;  %v5721_v33 = vrot.slane %v5256_v9, %v12170_v61  ;;  %v5225_v9 = vunpack.c.l.b16 %v5058_v60 }
 0x3ce   :  { %v11368_v20 = vpop.xlane.xlu0 %4785 }
 0x3cf   :  { %v5717_v32 = vsel %vm5315_vm10, %v5716_v1, %v5712_v21  ;;  %v4609_v46 = vpop.xlane.xlu1 %4608  ;;  %v5574_v2 = vrot.slane %v5225_v9, %v10230_v50 }
 0x3d0   :  { %v5722_v6 = vsel %vm5322_vm11, %v5721_v33, %v5717_v32  ;;  %v5226_v33 = vunpack.c.h.b16 %v5058_v60  ;;  %v4932_v24 = vmul.f32 0.015625, %v4609_v46  ;;  %v5195_v32 = vunpack.c.l.b16 %v5043_v45 }
 0x3d1   :  { %v11373_v23 = vsel %vm1220_vm6, %v5722_v6, %v5930_v48  ;;  %v4926_v48 = vmul.f32 0.015625, %v11213_v13  ;;  %v4960_v13 = vmul.f32 0.015625, %v4693_v19  ;;  %v5197_v19 = vunpack.c.l.b16 %v5044_v38 }
 0x3d2   :  { %v5198_v6 = vunpack.c.h.b16 %v5044_v38  ;;  %v5431_v37 = vrot.slane %v5195_v32, %v12169_v30 }
 0x3d3   :  { %v4876_v44 = vpop.xlane.xlu0 %4875  ;;  %v5042_v49 = vpack.c.bf16 %v4927_v12, %v4926_v48  ;;  %v5059_v35 = vpack.c.bf16 %v4961_v54, %v4960_v13  ;;  %v5441_v26 = vrot.slane %v5197_v19, %v10230_v50  ;;  %v5230_v48 = vunpack.c.h.b16 %v5060_v3 }
 0x3d4   :  { %v5021_v16 = vmul.f32 0.015625, %v4876_v44  ;;  %v5445_v8 = vrot.slane %v5198_v6, %v10246_v25 }
 0x3d5   :  { %v5193_v52 = vunpack.c.l.b16 %v5042_v49  ;;  %v5194_v28 = vunpack.c.h.b16 %v5042_v49  ;;  %v5227_v47 = vunpack.c.l.b16 %v5059_v35  ;;  %v5228_v42 = vunpack.c.h.b16 %v5059_v35 }
 0x3d6   :  { %v5089_v59 = vpack.c.bf16 %v5021_v16, %v5020_v36  ;;  %v4705_v36 = vpop.xlane.xlu1 %4704  ;;  %v5578_v16 = vrot.slane %v5226_v33, %v10246_v25  ;;  %v5446_v62 = vsel %vm5308_vm9, %v5445_v8, %v5441_v26  ;;  %v5597_v38 = vrot.slane %v5230_v48, %v10246_v25 }
 0x3d7   :  { %v5422_v44 = vrot.slane %v5193_v52, %v10230_v50  ;;  %v4964_v15 = vmul.f32 0.015625, %v4705_v36  ;;  %v5588_v17 = vrot.slane %v5228_v42, %v12170_v61  ;;  %v4990_v26 = vmul.f32 0.015625, %v11363_v31 }
 0x3d8   :  { %v5287_v4 = vunpack.c.l.b16 %v5089_v59  ;;  %v5288_v43 = vunpack.c.h.b16 %v5089_v59  ;;  %v5196_v59 = vunpack.c.h.b16 %v5043_v45 }
 0x3da   :  { %v5868_v27 = vrot.slane %v5287_v4, %v12169_v30  ;;  %v5873_v22 = vrot.slane %v5288_v43, %v12170_v61  ;;  %v5583_v4 = vrot.slane %v5227_v47, %v12169_v30  ;;  %v5229_v43 = vunpack.c.l.b16 %v5060_v3 }
 0x3db   :  { %v11386_v18 = vpop.xlane.xlu0 %4881  ;;  %v5436_v54 = vrot.slane %v5196_v59, %v12170_v61  ;;  %v4991_v59 = vmul.f32 0.015625, %v11368_v20 }
 0x3dc   :  { %v5869_v55 = vsel %vm5315_vm10, %v5868_v27, %v5864_v40  ;;  %v5579_v40 = vsel %vm5308_vm9, %v5578_v16, %v5574_v2  ;;  %v5593_v45 = vrot.slane %v5229_v43, %v10230_v50 }
 0x3dd   :  { %v5874_v0 = vsel %vm5322_vm11, %v5873_v22, %v5869_v55  ;;  %v4789_v55 = vpop.xlane.xlu1 %4788  ;;  %v5074_v43 = vpack.c.bf16 %v4991_v59, %v4990_v26 }
 0x3de   :  { %v11391_v41 = vsel %vm1220_vm6, %v5874_v0, %v5937_v57  ;;  %v5426_v57 = vrot.slane %v5194_v28, %v10246_v25  ;;  %v5584_v0 = vsel %vm5315_vm10, %v5583_v4, %v5579_v40  ;;  %v4992_v4 = vmul.f32 0.015625, %v4789_v55 }
 0x3df   :  { %v5589_v9 = vsel %vm5322_vm11, %v5588_v17, %v5584_v0 }
 0x3e0   :  { %v4612_v1 = vpop.xlane.xlu0 %4611  ;;  %v5427_v49 = vsel %vm5308_vm9, %v5426_v57, %v5422_v44  ;;  %v5925_v3 = vsel %vm1223_vm7, %v5589_v9, %v11342_v7  ;;  %v5022_v7 = vmul.f32 0.015625, %v11379_v5 }
 0x3e1   :  { %v4933_v21 = vmul.f32 0.015625, %v4612_v1  ;;  %v5432_v60 = vsel %vm5315_vm10, %v5431_v37, %v5427_v49 }
 0x3e2   :  { %v5437_v28 = vsel %vm5322_vm11, %v5436_v54, %v5432_v60  ;;  %v5258_v54 = vunpack.c.h.b16 %v5074_v43 }
 0x3e3   :  { %v5045_v56 = vpack.c.bf16 %v4933_v21, %v4932_v24  ;;  %v5598_v24 = vsel %vm5308_vm9, %v5597_v38, %v5593_v45  ;;  %v5918_v47 = vsel %vm1223_vm7, %v5437_v28, %v11336_v63 }
 0x3e4   :  { %v4795_v32 = vpop.xlane.xlu1 %4794 }
 0x3e5   :  { %v5199_v12 = vunpack.c.l.b16 %v5045_v56  ;;  %v5200_v51 = vunpack.c.h.b16 %v5045_v56 }
 0x3e7   :  { %v4708_v10 = vpop.xlane.xlu0 %4707  ;;  %v5450_v27 = vrot.slane %v5199_v12, %v12169_v30  ;;  %v5455_v46 = vrot.slane %v5200_v51, %v12170_v61  ;;  %v5023_v12 = vmul.f32 0.015625, %v11386_v18  ;;  %v4994_v51 = vmul.f32 0.015625, %v4795_v32 }
 0x3e8   :  { %v4965_v22 = vmul.f32 0.015625, %v4708_v10  ;;  %v4885_v2 = vpop.xlane.xlu1 %4884  ;;  %v5257_v18 = vunpack.c.l.b16 %v5074_v43 }
 0x3e9   :  { %v5451_v35 = vsel %vm5315_vm10, %v5450_v27, %v5446_v62  ;;  %v5090_v48 = vpack.c.bf16 %v5023_v12, %v5022_v7  ;;  %v5024_v10 = vmul.f32 0.015625, %v4885_v2 }
 0x3ea   :  { %v5061_v13 = vpack.c.bf16 %v4965_v22, %v4964_v15  ;;  %v5456_v21 = vsel %vm5322_vm11, %v5455_v46, %v5451_v35  ;;  %v5726_v35 = vrot.slane %v5257_v18, %v10230_v50 }
 0x3eb   :  { %v5919_v56 = vsel %vm1226_vm8, %v5456_v21, %v5918_v47  ;;  %v5289_v60 = vunpack.c.l.b16 %v5090_v48  ;;  %v5290_v62 = vunpack.c.h.b16 %v5090_v48 }
 0x3ec   :  { %v5231_v58 = vunpack.c.l.b16 %v5061_v13  ;;  %v5232_v52 = vunpack.c.h.b16 %v5061_v13 }
 0x3ed   :  { %v4792_v14 = vpop.xlane.xlu0 %4791  ;;  %v5882_v28 = vrot.slane %v5290_v62, %v10246_v25  ;;  %v11466_v62 = vld [vmem:[#allocation13] sm:$0xff]  }
 0x3ee   :  { %v5602_v1 = vrot.slane %v5231_v58, %v12169_v30  ;;  %v5607_v33 = vrot.slane %v5232_v52, %v12170_v61  ;;  %v4993_v37 = vmul.f32 0.015625, %v4792_v14  ;;  %v5730_v58 = vrot.slane %v5258_v54, %v10246_v25 }
 0x3ef   :  { %v5878_v52 = vrot.slane %v5289_v60, %v10230_v50 }
 0x3f0   :  { %v5603_v19 = vsel %vm5315_vm10, %v5602_v1, %v5598_v24  ;;  %v5075_v15 = vpack.c.bf16 %v4993_v37, %v4992_v4  ;;  %v5731_v2 = vsel %vm5308_vm9, %v5730_v58, %v5726_v35 }
 0x3f1   :  { %v5608_v6 = vsel %vm5322_vm11, %v5607_v33, %v5603_v19 }
 0x3f2   :  { %v5926_v44 = vsel %vm1226_vm8, %v5608_v6, %v5925_v3  ;;  %v4891_v63 = vpop.xlane.xlu1 %4890  ;;  %v5259_v31 = vunpack.c.l.b16 %v5075_v15  ;;  %v5260_v9 = vunpack.c.h.b16 %v5075_v15 }
 0x3f3   :  { %v5941_v57 = vpack.c.b16 %v5926_v44, %v5919_v56  ;;  %v5026_v17 = vmul.f32 0.015625, %v4891_v63 }
 0x3f4   :  { %v4798_v36 = vpop.xlane.xlu0 %4797  ;;  %v5735_v1 = vrot.slane %v5259_v31, %v12169_v30  ;;  %v5740_v59 = vrot.slane %v5260_v9, %v12170_v61  ;;  %v11470_v31 = vld [vmem:[#allocation13 + $0x8] sm:$0xff]  }
 0x3f5   :  { %7568 = vmatprep.mubr.msk.bf16.mxu1 %vm5955_vm12, %v5941_v57  ;;  %v4995_v8 = vmul.f32 0.015625, %v4798_v36 }
 0x3f6   :  { %v4801_v20 = vpop.xlane.xlu1 %4800  ;;  %v5736_v37 = vsel %vm5315_vm10, %v5735_v1, %v5731_v2 }
 0x3f7   :  { %v5076_v27 = vpack.c.bf16 %v4995_v8, %v4994_v51  ;;  %v4996_v45 = vmul.f32 0.015625, %v4801_v20  ;;  %v5741_v15 = vsel %vm5322_vm11, %v5740_v59, %v5736_v37 }
 0x3f9   :  { %v5261_v5 = vunpack.c.l.b16 %v5076_v27  ;;  %v5262_v13 = vunpack.c.h.b16 %v5076_v27 }
 0x3fa   :  { %v4888_v16 = vpop.xlane.xlu0 %4887 }
 0x3fb   :  { %v5025_v42 = vmul.f32 0.015625, %v4888_v16  ;;  %v5745_v24 = vrot.slane %v5261_v5, %v10230_v50  ;;  %v5749_v21 = vrot.slane %v5262_v13, %v10246_v25  ;;  %v5883_v16 = vsel %vm5308_vm9, %v5882_v28, %v5878_v52  ;;  %v11492_v28 = vld [vmem:[#allocation16] ss:$0 sm:$0xff] }
 0x3fd   :  { %v5091_v22 = vpack.c.bf16 %v5025_v42, %v5024_v10  ;;  %v4897_v33 = vpop.xlane.xlu1 %4896  ;;  %v5750_v63 = vsel %vm5308_vm9, %v5749_v21, %v5745_v24 }
 0x3fe   :  { %v5028_v57 = vmul.f32 0.015625, %v4897_v33 }
 0x3ff   :  { %v5291_v0 = vunpack.c.l.b16 %v5091_v22  ;;  %v5292_v32 = vunpack.c.h.b16 %v5091_v22 }
 0x401   :  { %v4894_v49 = vpop.xlane.xlu0 %4893  ;;  %v5887_v19 = vrot.slane %v5291_v0, %v12169_v30  ;;  %v5892_v26 = vrot.slane %v5292_v32, %v12170_v61  ;;  %v7389_v0 = vld [vmem:[#allocation15] ss:$0 sm:$0xff] }
 0x402   :  { %v5027_v40 = vmul.f32 0.015625, %v4894_v49 }
 0x403   :  { %v5888_v8 = vsel %vm5315_vm10, %v5887_v19, %v5883_v16 }
 0x404   :  { %v5092_v38 = vpack.c.bf16 %v5027_v40, %v5026_v17  ;;  %v5893_v27 = vsel %vm5322_vm11, %v5892_v26, %v5888_v8  ;;  %v5932_v40 = vsel %vm1223_vm7, %v5741_v15, %v11373_v23  ;;  %v8577_v23 = vmov 0  }
 0x405   :  { %v4804_v55 = vpop.xlane.xlu0 %4803  ;;  %v5939_v18 = vsel %vm1223_vm7, %v5893_v27, %v11391_v41 }
 0x406   :  { %v4997_v46 = vmul.f32 0.015625, %v4804_v55  ;;  %v5293_v6 = vunpack.c.l.b16 %v5092_v38  ;;  %v5294_v47 = vunpack.c.h.b16 %v5092_v38 }
 0x408   :  { %v5077_v14 = vpack.c.bf16 %v4997_v46, %v4996_v45  ;;  %v5897_v42 = vrot.slane %v5293_v6, %v10230_v50  ;;  %v5901_v4 = vrot.slane %v5294_v47, %v10246_v25 }
 0x40a   :  { %v5263_v3 = vunpack.c.l.b16 %v5077_v14  ;;  %v5264_v56 = vunpack.c.h.b16 %v5077_v14  ;;  %v4900_v44 = vpop.xlane.xlu0 %4899  ;;  %v5902_v20 = vsel %vm5308_vm9, %v5901_v4, %v5897_v42 }
 0x40b   :  { %v5029_v36 = vmul.f32 0.015625, %v4900_v44 }
 0x40c   :  { %v5754_v12 = vrot.slane %v5263_v3, %v12169_v30  ;;  %v5759_v43 = vrot.slane %v5264_v56, %v12170_v61 }
 0x40d   :  { %v5093_v7 = vpack.c.bf16 %v5029_v36, %v5028_v57 }
 0x40e   :  { %v5755_v48 = vsel %vm5315_vm10, %v5754_v12, %v5750_v63 }
 0x40f   :  { %v5295_v51 = vunpack.c.l.b16 %v5093_v7  ;;  %v5296_v10 = vunpack.c.h.b16 %v5093_v7  ;;  %v5760_v50 = vsel %vm5322_vm11, %v5759_v43, %v5755_v48 }
 0x410   :  { %v5933_v60 = vsel %vm1226_vm8, %v5760_v50, %v5932_v40 }
 0x411   :  { %v5906_v22 = vrot.slane %v5295_v51, %v12169_v30  ;;  %v5911_v49 = vrot.slane %v5296_v10, %v12170_v61 }
 0x413   :  { %v5907_v25 = vsel %vm5315_vm10, %v5906_v22, %v5902_v20 }
 0x414   :  { %v5912_v54 = vsel %vm5322_vm11, %v5911_v49, %v5907_v25 }
 0x415   :  { %v5940_v30 = vsel %vm1226_vm8, %v5912_v54, %v5939_v18 }
 0x416   :  { %v5942_v61 = vpack.c.b16 %v5940_v30, %v5933_v60 }
 0x418   :  { %7569 = vmatmul.mubr.msk.bf16.vlgmr.msra.gmra.mrb[4].mxu1 %vm5955_vm12, %v5942_v61 }
 0x419   :  { %7573 = vmatpush3.bf16.msra.mxu1 %v11466_v62  ;;  %7576 = vmatprep.mubr.msk.bf16.mxu1 %vm8576_vm13, %v8575_v39 }
 0x41a   :  { %7574 = vmatprep.subr.bf16.mxu1 %v8575_v39 }
 0x41d   :  { %7575 = vmatpush3.bf16.msra.mxu1 %v11470_v31 }
 0x41e   :  { %7580 = vmatprep.subr.bf16.mxu1 %v8575_v39 }
 0x420   :  { %7577 = vmatmul.mubr.bf16.vlgmr.msra.gmra.mrb[8].mxu1 %v8577_v23 }
 0x421   :  { %7581 = vmatpush3.bf16.msra.mxu1 %v11466_v62  ;;  %7584 = vmatprep.mubr.msk.bf16.mxu1 %vm8576_vm13, %v8575_v39 }
 0x422   :  { %7582 = vmatprep.subr.bf16.mxu1 %v8575_v39 }
 0x425   :  { %7583 = vmatpush3.bf16.msra.mxu1 %v11470_v31 }
 0x426   :  { %7588 = vmatprep.subr.bf16.mxu1 %v8575_v39 }
 0x44a   :  { %v11484_v41 = vpop.f32.mrb[4].mxu0 }
 0x44b   :  { %v11486_v17 = vpop.f32.mrb[5].mxu0 }
 0x44c   :  { %v3116_v5 = vpop.f32.mrb[6].mxu0 }
 0x44d   :  { %v3117_v13 = vpop.f32.mrb[7].mxu0 }
 0x4eb   :  { %v7570_v55 = vpop.f32.mrb[4].mxu1 }
 0x4ec   :  { %v11488_v45 = vadd.f32 %v7570_v55, %v7389_v0  ;;  %v5996_v38 = vpop.f32.mrb[5].mxu1 }
 0x4ed   :  { %v7571_v46 = vpop.f32.mrb[6].mxu1  ;;  %v5997_v21 = vadd.f32 %v7389_v0, %v5996_v38 }
 0x4ee   :  { %v11490_v35 = vadd.f32 %v7571_v46, %v7389_v0  ;;  %v5999_v58 = vpop.f32.mrb[7].mxu1 }
 0x4ef   :  { %v6000_v52 = vadd.f32 %v7389_v0, %v5999_v58 }
 0x4f3   :  { %v6071_v9 = vpop.f32.mrb[8].mxu1 }
 0x4f4   :  { %v6072_v1 = vadd.f32 %v11492_v28, %v6071_v9  ;;  %v7578_v33 = vpop.f32.mrb[9].mxu1 }
 0x4f5   :  { %v6074_v14 = vpop.f32.mrb[10].mxu1 }
 0x4f6   :  { %6085 = vrot.lane.b32.xlu1 %v6072_v1, %s8560_s24  ;;  %v7579_v24 = vpop.f32.mrb[11].mxu1  ;;  %v6077_v32 = vadd.f32 %v6072_v1, %v5997_v21 }
 0x4f8   :  { %v7397_v19 = vmul.f32 -1.442695, %v6077_v32 }
 0x4fa   :  { %8189 = vpow2.f32 %v7397_v19 }
 0x504   :  { %v8190_v6 = vpop.eup %8189 }
 0x505   :  { %v6081_v47 = vadd.f32 1.0, %v8190_v6 }
 0x507   :  { %8191 = vrcp.f32 %v6081_v47 }
 0x511   :  { %v8192_v3 = vpop.eup %8191 }
 0x512   :  { %v6095_v16 = vsub.f32 1.0, %v8192_v3  ;;  %v6101_v12 = vmul.f32 0.0, %v8192_v3 }
 0x568   :  { %v6086_v56 = vpop.permute.xlu1 %6085 }
 0x569   :  { %v6088_v44 = vmul.f32 %v8192_v3, %v6086_v56 }
 0x56b   :  { %6090 = vrot.lane.b32.xlu0 %v6088_v44, %s8560_s24 }
 0x5dd   :  { %v6091_v57 = vpop.permute.xlu0 %6090 }
 0x5de   :  { %v6093_v36 = vadd.f32 %v6091_v57, %v5997_v21 }
 0x5e0   :  { %8193 = vtanh.f32 %v6093_v36 }
 0x5ea   :  { %v8194_v2 = vpop.eup %8193 }
 0x5eb   :  { %6097 = vrot.lane.b32.xlu1 %v8194_v2, %s8578_s4 }
 0x65d   :  { %v6098_v59 = vpop.permute.xlu1 %6097 }
 0x65e   :  { %v6100_v37 = vmul.f32 %v6098_v59, %v6095_v16 }
 0x660   :  { %v6102_v63 = vadd.f32 %v6101_v12, %v6100_v37 }
 0x662   :  { %v6103_v26 = vpack.c.bf16 %v6102_v63, %v6102_v63 }
 0x664   :  { %6105 = vrot.lane.b32.xlu1 %v6103_v26, %s8578_s4 }
 0x6d6   :  { %v6106_v7 = vpop.permute.xlu1 %6105 }
 0x6d7   :  { %7585 = vmatmul.mubr.msk.bf16.vlgmr.msra.gmra.mrb[12].mxu1 %vm5955_vm12, %v6106_v7 }
 0x6d8   :  { %7589 = vmatpush3.bf16.msra.mxu1 %v11466_v62  ;;  %7592 = vmatprep.mubr.msk.bf16.mxu1 %vm8576_vm13, %v8575_v39 }
 0x6d9   :  { %7590 = vmatprep.subr.bf16.mxu1 %v8575_v39 }
 0x6dc   :  { %7591 = vmatpush3.bf16.msra.mxu1 %v11470_v31 }
 0x6dd   :  { %7596 = vmatprep.subr.bf16.mxu1 %v8575_v39 }
 0x7aa   :  { %v6144_v8 = vpop.f32.mrb[12].mxu1 }
 0x7ab   :  { %v6145_v42 = vadd.f32 %v11492_v28, %v6144_v8  ;;  %v7586_v4 = vpop.f32.mrb[13].mxu1 }
 0x7ac   :  { %v6147_v43 = vpop.f32.mrb[14].mxu1 }
 0x7ad   :  { %6158 = vrot.lane.b32.xlu0 %v6145_v42, %s8560_s24  ;;  %v7587_v48 = vpop.f32.mrb[15].mxu1  ;;  %v6150_v51 = vadd.f32 %v6145_v42, %v6000_v52  ;;  %v8129_v43 = vld [vmem:[%s11768_s13] sm:$0xff]  }
 0x7ae   :  { %v8130_v48 = vld [vmem:[%s11768_s13 + $0x8] sm:$0xff]  }
 0x7af   :  { %v7399_v10 = vmul.f32 -1.442695, %v6150_v51 }
 0x7b1   :  { %8195 = vpow2.f32 %v7399_v10  ;;  %v8131_v10 = vld [vmem:[%s11768_s13 + $0x10] sm:$0xff]  }
 0x7bb   :  { %v8196_v15 = vpop.eup %8195 }
 0x7bc   :  { %v6154_v27 = vadd.f32 1.0, %v8196_v15  ;;  %v8132_v15 = vld [vmem:[%s11768_s13 + $0x18] sm:$0xff]  }
 0x7be   :  { %8197 = vrcp.f32 %v6154_v27  ;;  %v6371_v27 = vsel %vm6369_vm14, 65535, %v8577_v23  ;;  %v8135_v23 = vld [vmem:[%s11769_s14 + $0x40] sm:$0xff]  }
 0x7c8   :  { %v8198_v22 = vpop.eup %8197 }
 0x7c9   :  { %v6168_v18 = vsub.f32 1.0, %v8198_v22  ;;  %v6174_v60 = vmul.f32 %v8198_v22, %v6102_v63 }
 0x81f   :  { %v6159_v49 = vpop.permute.xlu0 %6158 }
 0x820   :  { %v6161_v20 = vmul.f32 %v8198_v22, %v6159_v49  ;;  %v6327_v49 = vld [vmem:[#allocation18] sm:$0xff] }
 0x822   :  { %6163 = vrot.lane.b32.xlu1 %v6161_v20, %s8560_s24  ;;  %v6328_v20 = vpack.c.bf16 %v6327_v49, %v6327_v49  ;;  %v8159_v49 = vld [vmem:[%s11769_s14 + $0xe0] sm:$0xff]  }
 0x894   :  { %v6164_v50 = vpop.permute.xlu1 %6163 }
 0x895   :  { %v6166_v25 = vadd.f32 %v6164_v50, %v6000_v52  ;;  %v8133_v50 = vld [vmem:[#allocation19] sm:$0xff]  }
 0x897   :  { %8199 = vtanh.f32 %v6166_v25  ;;  %v8134_v25 = vld [vmem:[#allocation19 + $0x8] sm:$0xff]  }
 0x8a1   :  { %v8200_v40 = vpop.eup %8199 }
 0x8a2   :  { %6170 = vrot.lane.b32.xlu0 %v8200_v40, %s8578_s4 }
 0x914   :  { %v6171_v54 = vpop.permute.xlu0 %6170 }
 0x915   :  { %v6173_v30 = vmul.f32 %v6171_v54, %v6168_v18 }
 0x917   :  { %v6175_v61 = vadd.f32 %v6174_v60, %v6173_v30 }
 0x919   :  { %v6176_v5 = vpack.c.bf16 %v6175_v61, %v6175_v61 }
 0x91b   :  { %6178 = vrot.lane.b32.xlu1 %v6176_v5, %s8578_s4  ;;  %v11562_v5 = vld [vmem:[#allocation7] sm:$0x3f] }
 0x98d   :  { %v6179_v13 = vpop.permute.xlu1 %6178 }
 0x98e   :  { %7593 = vmatmul.mubr.msk.bf16.vlgmr.msra.gmra.mrb[16].mxu1 %vm5955_vm12, %v6179_v13  ;;  %v12231_v13 = vld [vmem:[#allocation35_spill] sm:$0xff] }
 0x98f   :  { %7597 = vmatpush3.bf16.msra.mxu1 %v11466_v62  ;;  %7600 = vmatprep.mubr.msk.bf16.mxu1 %vm8576_vm13, %v8575_v39 }
 0x990   :  { %7598 = vmatprep.subr.bf16.mxu1 %v8575_v39 }
 0x993   :  { %7599 = vmatpush3.bf16.msra.mxu1 %v11470_v31 }
 0x994   :  { %7604 = vmatprep.subr.bf16.mxu1 %v8575_v39 }
 0xa61   :  { %v6217_v0 = vpop.f32.mrb[16].mxu1 }
 0xa62   :  { %v6218_v55 = vadd.f32 %v11492_v28, %v6217_v0  ;;  %v7594_v38 = vpop.f32.mrb[17].mxu1  ;;  %v1088_v0 = vrot.slane %v11562_v5, %v12231_v13  ;;  %v8168_v13 = vld [vmem:[%s11769_s14 + $0x100] sm:$0xff]  }
 0xa63   :  { %v6220_v46 = vpop.f32.mrb[18].mxu1 }
 0xa64   :  { %6231 = vrot.lane.b32.xlu0 %v6218_v55, %s8560_s24  ;;  %v7595_v58 = vpop.f32.mrb[19].mxu1  ;;  %v6223_v52 = vadd.f32 %v6218_v55, %v11488_v45  ;;  %v7639_v55 = vadd.f32 %v11264_v29, %v1088_v0  ;;  %v8138_v29 = vld [vmem:[%s11769_s14 + $0x8] sm:$0xff]  }
 0xa66   :  { %v7401_v62 = vmul.f32 -1.442695, %v6223_v52 }
 0xa68   :  { %8201 = vpow2.f32 %v7401_v62 }
 0xa72   :  { %v8202_v9 = vpop.eup %8201 }
 0xa73   :  { %v6227_v1 = vadd.f32 1.0, %v8202_v9  ;;  %v8136_v9 = vld [vmem:[%s11769_s14] sm:$0xff]  }
 0xa75   :  { %8203 = vrcp.f32 %v6227_v1  ;;  %v8137_v1 = vld [vmem:[%s11769_s14 + $0x48] sm:$0xff]  }
 0xa7f   :  { %v8204_v33 = vpop.eup %8203 }
 0xa80   :  { %v6241_v19 = vsub.f32 1.0, %v8204_v33  ;;  %v6247_v47 = vmul.f32 %v8204_v33, %v6175_v61 }
 0xad6   :  { %v6232_v14 = vpop.permute.xlu0 %6231 }
 0xad7   :  { %v6234_v31 = vmul.f32 %v8204_v33, %v6232_v14 }
 0xad9   :  { %6236 = vrot.lane.b32.xlu1 %v6234_v31, %s8560_s24  ;;  %v8139_v31 = vld [vmem:[%s11769_s14 + $0x50] sm:$0xff]  }
 0xb4b   :  { %v6237_v24 = vpop.permute.xlu1 %6236 }
 0xb4c   :  { %v6239_v21 = vadd.f32 %v6237_v24, %v11488_v45  ;;  %v8140_v24 = vld [vmem:[%s11769_s14 + $0x10] sm:$0xff]  }
 0xb4e   :  { %8205 = vtanh.f32 %v6239_v21  ;;  %v8141_v21 = vld [vmem:[%s11769_s14 + $0x58] sm:$0xff]  }
 0xb58   :  { %v8206_v32 = vpop.eup %8205 }
 0xb59   :  { %6243 = vrot.lane.b32.xlu0 %v8206_v32, %s8578_s4  ;;  %v12232_v32 = vld [vmem:[#allocation34_spill] sm:$0xff] }
 0xbcb   :  { %v6244_v6 = vpop.permute.xlu0 %6243 }
 0xbcc   :  { %v6246_v3 = vmul.f32 %v6244_v6, %v6241_v19  ;;  %v1084_v19 = vrot.slane %v11562_v5, %v12232_v32  ;;  %v8142_v6 = vld [vmem:[%s11769_s14 + $0x18] sm:$0xff]   ;;  %v8180_v32 = vld [vmem:[%s11769_s14 + $0x130] sm:$0xff]  }
 0xbce   :  { %v6248_v56 = vadd.f32 %v6247_v47, %v6246_v3  ;;  %v12233_v47 = vld [vmem:[#allocation32_spill] sm:$0xff] }
 0xbcf   :  { %v12234_v3 = vsub.s32 3, %v12233_v47 }
 0xbd0   :  { %v6249_v44 = vpack.c.bf16 %v6248_v56, %v6248_v56 }
 0xbd2   :  { %6251 = vrot.lane.b32.xlu1 %v6249_v44, %s8578_s4  ;;  %v8143_v44 = vld [vmem:[%s11769_s14 + $0x60] sm:$0xff]  }
 0xc44   :  { %v6252_v57 = vpop.permute.xlu1 %6251 }
 0xc45   :  { %7601 = vmatmul.mubr.msk.bf16.vlgmr.msra.gmra.mrb[20].mxu1 %vm5955_vm12, %v6252_v57  ;;  %v7638_v57 = vadd.f32 %v11257_v34, %v1084_v19  ;;  %v8147_v34 = vld [vmem:[%s11769_s14 + $0x70] sm:$0xff]   ;;  %v8181_v19 = vld [vmem:[%s11769_s14 + $0x178] sm:$0xff]  }
 0xc46   :  { %7614 = vmatprep.mubr.msk.bf16.mxu1 %vm8576_vm13, %v8575_v39  ;;  %7605 = vmatpush3.bf16.msra.mxu1 %v8129_v43  ;;  %v8155_v43 = vld [vmem:[%s11769_s14 + $0xd0] sm:$0xff]  }
 0xc47   :  { %7606 = vmatprep.subr.bf16.mxu1 %v8575_v39 }
 0xc4a   :  { %7607 = vmatpush3.bf16.msra.mxu1 %v8130_v48  ;;  %v8156_v48 = vld [vmem:[%s11769_s14 + $0x90] sm:$0xff]  }
 0xc4b   :  { %7608 = vmatprep.subr.bf16.mxu1 %v8575_v39 }
 0xc4e   :  { %7609 = vmatpush3.bf16.msra.mxu1 %v8131_v10  ;;  %v12235_v10 = vld [vmem:[#allocation33_spill] sm:$0xff] }
 0xc4f   :  { %7610 = vmatprep.subr.bf16.mxu1 %v8575_v39 }
 0xc52   :  { %7611 = vmatpush3.bf16.msra.mxu1 %v8132_v15  ;;  %v8158_v15 = vld [vmem:[%s11769_s14 + $0x98] sm:$0xff]  }
 0xc53   :  { %7612 = vmatprep.subr.bf16.mxu1 %v8575_v39 }
 0xd18   :  { %v6290_v36 = vpop.f32.mrb[20].mxu1 }
 0xd19   :  { %v6291_v45 = vadd.f32 %v11492_v28, %v6290_v36  ;;  %v7602_v2 = vpop.f32.mrb[21].mxu1  ;;  %v8144_v36 = vld [vmem:[%s11769_s14 + $0x20] sm:$0xff]  }
 0xd1a   :  { %v6293_v16 = vpop.f32.mrb[22].mxu1  ;;  %v8145_v2 = vld [vmem:[%s11769_s14 + $0x68] sm:$0xff]  }
 0xd1b   :  { %6304 = vrot.lane.b32.xlu0 %v6291_v45, %s8560_s24  ;;  %v7603_v59 = vpop.f32.mrb[23].mxu1  ;;  %v6296_v12 = vadd.f32 %v6291_v45, %v11490_v35  ;;  %v8146_v16 = vld [vmem:[%s11769_s14 + $0x28] sm:$0xff]  }
 0xd1c   :  { %v8149_v59 = vld [vmem:[%s11769_s14 + $0x78] sm:$0xff]  }
 0xd1d   :  { %v7403_v37 = vmul.f32 -1.442695, %v6296_v12  ;;  %v8150_v12 = vld [vmem:[%s11769_s14 + $0x38] sm:$0xff]  }
 0xd1f   :  { %8207 = vpow2.f32 %v7403_v37  ;;  %v8151_v37 = vld [vmem:[%s11769_s14 + $0xc0] sm:$0xff]  }
 0xd29   :  { %v8208_v63 = vpop.eup %8207 }
 0xd2a   :  { %v6300_v26 = vadd.f32 1.0, %v8208_v63 }
 0xd2c   :  { %8209 = vrcp.f32 %v6300_v26 }
 0xd36   :  { %v8210_v7 = vpop.eup %8209 }
 0xd37   :  { %v6314_v40 = vsub.f32 1.0, %v8210_v7  ;;  %v6320_v54 = vmul.f32 %v8210_v7, %v6248_v56  ;;  %v1096_v56 = vrot.slane %v11562_v5, %v12234_v3 }
 0xd39   :  { %v7641_v45 = vadd.f32 %v11266_v11, %v1096_v56  ;;  %v8148_v11 = vld [vmem:[%s11769_s14 + $0x30] sm:$0xff]   ;;  %v8183_v56 = vld [vmem:[%s11771_s16] sm:$0xff]  }
 0xd8d   :  { %v6305_v8 = vpop.permute.xlu0 %6304 }
 0xd8e   :  { %v6307_v42 = vmul.f32 %v8210_v7, %v6305_v8  ;;  %v8152_v7 = vld [vmem:[%s11769_s14 + $0x80] sm:$0xff]  }
 0xd90   :  { %6309 = vrot.lane.b32.xlu1 %v6307_v42, %s8560_s24  ;;  %v8153_v42 = vld [vmem:[%s11769_s14 + $0xc8] sm:$0xff]  }
 0xe02   :  { %v6310_v4 = vpop.permute.xlu1 %6309 }
 0xe03   :  { %v6312_v28 = vadd.f32 %v6310_v4, %v11490_v35  ;;  %v8128_v35 = vld [vmem:[%s11768_s13 + $0x20] ss:$0 sps:$4 sm:$0x11]  }
 0xe04   :  { %v6373_v22 = vand.u32 %v8128_v35, %v6371_v27  ;;  %v1092_v35 = vrot.slane %v11562_v5, %v12235_v10  ;;  %v12236_v27 = vsub.s32 5, %v12233_v47 }
 0xe05   :  { %8211 = vtanh.f32 %v6312_v28  ;;  %v8154_v28 = vld [vmem:[%s11769_s14 + $0x88] sm:$0xff]  }
 0xe06   :  { %7613 = vmatpush3.bf16.msra.mxu1 %v6373_v22  ;;  %8213 = vtanh.f32 %v7639_v55  ;;  %v1104_v22 = vrot.slane %v11562_v5, %v12236_v27  ;;  %v8169_v55 = vld [vmem:[%s11769_s14 + $0x148] sm:$0xff]  }
 0xe07   :  { %7618 = vmatprep.subr.bf16.mxu1 %v8575_v39  ;;  %8215 = vtanh.f32 %v7638_v57  ;;  %v8185_v57 = vld [vmem:[%s11771_s16 + $0x10] sm:$0xff]  }
 0xe08   :  { %8217 = vtanh.f32 %v7641_v45 }
 0xe09   :  { %7615 = vmatmul.mubr.msk.bf16.vlgmr.msra.gmra.mrb[24].mxu1 %vm6365_vm15, %v6328_v20  ;;  %v7640_v20 = vadd.f32 %v11259_v53, %v1092_v35  ;;  %v8163_v53 = vld [vmem:[%s11769_s14 + $0xf0] sm:$0xff]  }
 0xe0a   :  { %7619 = vmatpush3.bf16.msra.mxu1 %v8133_v50  ;;  %7622 = vmatprep.mubr.msk.bf16.mxu1 %vm8576_vm13, %v8575_v39  ;;  %v8160_v50 = vld [vmem:[%s11769_s14 + $0xa0] sm:$0xff]  }
 0xe0b   :  { %7620 = vmatprep.subr.bf16.mxu1 %v8575_v39  ;;  %8219 = vtanh.f32 %v7640_v20  ;;  %v7462_v20 = vld [vmem:[#allocation22] ss:$0 sm:$0xff] }
 0xe0e   :  { %7621 = vmatpush3.bf16.msra.mxu1 %v8134_v25  ;;  %v7643_v25 = vadd.f32 %v11486_v17, %v1104_v22  ;;  %v8164_v17 = vld [vmem:[%s11769_s14 + $0xb0] sm:$0xff]  }
 0xe0f   :  { %v8212_v51 = vpop.eup %8211  ;;  %7493 = vmatprep.subr.bf16.mxu1 %v8135_v23  ;;  %v8161_v23 = vld [vmem:[%s11769_s14 + $0xe8] sm:$0xff]  }
 0xe10   :  { %6316 = vrot.lane.b32.xlu0 %v8212_v51, %s8578_s4  ;;  %v8214_v62 = vpop.eup %8213  ;;  %v8157_v51 = vld [vmem:[%s11769_s14 + $0xd8] sm:$0xff]   ;;  %8221 = vtanh.f32 %v7643_v25 }
 0xe11   :  { %v6474_v33 = vpack.c.bf16 %v8214_v62, %v8214_v62  ;;  %v8216_v63 = vpop.eup %8215  ;;  %v8172_v62 = vld [vmem:[%s11769_s14 + $0x110] sm:$0xff]  }
 0xe12   :  { %v8218_v26 = vpop.eup %8217  ;;  %v6473_v8 = vpack.c.bf16 %v8216_v63, %v8216_v63 }
 0xe13   :  { %v6476_v4 = vpack.c.bf16 %v8218_v26, %v8218_v26 }
 0xe82   :  { %v6317_v18 = vpop.permute.xlu0 %6316 }
 0xe83   :  { %v6319_v60 = vmul.f32 %v6317_v18, %v6314_v40  ;;  %v8162_v40 = vld [vmem:[%s11769_s14 + $0xa8] sm:$0xff]   ;;  %v8165_v18 = vld [vmem:[%s11769_s14 + $0xf8] sm:$0xff]  }
 0xe85   :  { %v6321_v30 = vadd.f32 %v6320_v54, %v6319_v60  ;;  %v8166_v54 = vld [vmem:[%s11769_s14 + $0xb8] sm:$0xff]   ;;  %v8167_v60 = vld [vmem:[%s11769_s14 + $0x140] sm:$0xff]  }
 0xe87   :  { %v6322_v61 = vpack.c.bf16 %v6321_v30, %v6321_v30  ;;  %v8220_v30 = vpop.eup %8219 }
 0xe88   :  { %v6475_v0 = vpack.c.bf16 %v8220_v30, %v8220_v30 }
 0xe89   :  { %6416 = vrot.lane.b32.xlu1 %v6322_v61, %s8578_s4  ;;  %v8222_v61 = vpop.eup %8221 }
 0xedc   :  { %v11567_v38 = vpop.f32.mrb[24].mxu1 }
 0xedd   :  { %v7616_v46 = vpop.f32.mrb[25].mxu1 }
 0xede   :  { %v6412_v58 = vpop.f32.mrb[26].mxu1  ;;  %v6478_v46 = vpack.c.bf16 %v8222_v61, %v8222_v61 }
 0xedf   :  { %v7617_v52 = vpop.f32.mrb[27].mxu1  ;;  %v8170_v58 = vld [vmem:[%s11769_s14 + $0x108] sm:$0xff]  }
 0xee0   :  { %v8171_v52 = vld [vmem:[%s11769_s14 + $0x150] sm:$0xff]  }
 0xefb   :  { %v6417_v14 = vpop.permute.xlu1 %6416 }
 0xefc   :  { %7623 = vmatmul.mubr.msk.bf16.vlgmr.msra.gmra.mrb[28].mxu1 %vm5955_vm12, %v6417_v14  ;;  %v8174_v14 = vld [vmem:[%s11769_s14 + $0x118] sm:$0xff]  }
 0xefd   :  { %7494 = vmatpush3.bf16.msra.mxu1 %v8136_v9  ;;  %6895 = vmatprep.mubr.bf16.mxu1 %v6474_v33  ;;  %v8173_v9 = vld [vmem:[%s11769_s14 + $0x158] sm:$0xff]  }
 0xefe   :  { %7495 = vmatprep.subr.bf16.mxu1 %v8137_v1  ;;  %v12237_v1 = vsub.s32 4, %v12233_v47 }
 0xf00   :  { %v1100_v33 = vrot.slane %v11562_v5, %v12237_v1  ;;  %v8177_v5 = vld [vmem:[%s11769_s14 + $0x168] sm:$0xff]  }
 0xf01   :  { %7496 = vmatpush3.bf16.msra.mxu1 %v8138_v29  ;;  %v8175_v29 = vld [vmem:[%s11769_s14 + $0x160] sm:$0xff]  }
 0xf02   :  { %7497 = vmatprep.subr.bf16.mxu1 %v8139_v31  ;;  %v7642_v31 = vadd.f32 %v11484_v41, %v1100_v33  ;;  %v8179_v41 = vld [vmem:[%s11769_s14 + $0x170] sm:$0xff]  }
 0xf04   :  { %8223 = vtanh.f32 %v7642_v31 }
 0xf05   :  { %7498 = vmatpush3.bf16.msra.mxu1 %v8140_v24  ;;  %v8176_v24 = vld [vmem:[%s11769_s14 + $0x120] sm:$0xff]  }
 0xf06   :  { %7499 = vmatprep.subr.bf16.mxu1 %v8141_v21  ;;  %v8178_v21 = vld [vmem:[%s11769_s14 + $0x128] sm:$0xff]  }
 0xf09   :  { %7500 = vmatpush3.bf16.msra.mxu1 %v8142_v6  ;;  %v8182_v6 = vld [vmem:[%s11769_s14 + $0x138] sm:$0xff]  }
 0xf0a   :  { %7501 = vmatprep.subr.bf16.mxu1 %v8143_v44  ;;  %v8184_v44 = vld [vmem:[%s11771_s16 + $0x8] sm:$0xff]  }
 0xf0d   :  { %7502 = vmatpush3.bf16.msra.mxu1 %v8144_v36  ;;  %v8186_v36 = vld [vmem:[%s11771_s16 + $0x18] sm:$0xff]  }
 0xf0e   :  { %7503 = vmatprep.subr.bf16.mxu1 %v8145_v2  ;;  %v8224_v47 = vpop.eup %8223 }
 0xf0f   :  { %v6477_v3 = vpack.c.bf16 %v8224_v47, %v8224_v47 }
 0xf11   :  { %7504 = vmatpush3.bf16.msra.mxu1 %v8146_v16 }
 0xf12   :  { %7505 = vmatprep.subr.bf16.mxu1 %v8147_v34 }
 0xf15   :  { %7506 = vmatpush3.bf16.msra.mxu1 %v8148_v11 }
 0xf16   :  { %7507 = vmatprep.subr.bf16.mxu1 %v8149_v59 }
 0xf19   :  { %7508 = vmatpush3.bf16.msra.mxu1 %v8150_v12 }
 0xf1a   :  { %7515 = vmatprep.subr.bf16.mxu1 %v8151_v37 }
 0xf1c   :  { %6896 = vmatmul.mubr.bf16.vlgmr.msra.gmra.mrb[32].mxu1 %v6473_v8 }
 0xf1d   :  { %7516 = vmatpush3.bf16.msra.mxu1 %v8152_v7  ;;  %6935 = vmatprep.mubr.bf16.mxu1 %v6476_v4 }
 0xf1e   :  { %7517 = vmatprep.subr.bf16.mxu1 %v8153_v42 }
 0xf21   :  { %7518 = vmatpush3.bf16.msra.mxu1 %v8154_v28 }
 0xf22   :  { %7519 = vmatprep.subr.bf16.mxu1 %v8155_v43 }
 0xf25   :  { %7520 = vmatpush3.bf16.msra.mxu1 %v8156_v48 }
 0xf26   :  { %7521 = vmatprep.subr.bf16.mxu1 %v8157_v51 }
 0xf29   :  { %7522 = vmatpush3.bf16.msra.mxu1 %v8158_v15  ;;  %v7461_v15 = vld [vmem:[#allocation21] ss:$0 sm:$0xff] }
 0xf2a   :  { %7523 = vmatprep.subr.bf16.mxu1 %v8159_v49 }
 0xf2d   :  { %7524 = vmatpush3.bf16.msra.mxu1 %v8160_v50 }
 0xf2e   :  { %7525 = vmatprep.subr.bf16.mxu1 %v8161_v23 }
 0xf31   :  { %7526 = vmatpush3.bf16.msra.mxu1 %v8162_v40 }
 0xf32   :  { %7527 = vmatprep.subr.bf16.mxu1 %v8163_v53 }
 0xf35   :  { %7528 = vmatpush3.bf16.msra.mxu1 %v8164_v17 }
 0xf36   :  { %7529 = vmatprep.subr.bf16.mxu1 %v8165_v18 }
 0xf39   :  { %7530 = vmatpush3.bf16.msra.mxu1 %v8166_v54 }
 0xf3a   :  { %7537 = vmatprep.subr.bf16.mxu1 %v8167_v60 }
 0xf3c   :  { %6936 = vmatmul.mubr.bf16.vlgmr.msra.gmra.mrb[36].mxu1 %v6475_v0 }
 0xf3d   :  { %7538 = vmatpush3.bf16.msra.mxu1 %v8168_v13  ;;  %6975 = vmatprep.mubr.bf16.mxu1 %v6478_v46 }
 0xf3e   :  { %7539 = vmatprep.subr.bf16.mxu1 %v8169_v55 }
 0xf41   :  { %7540 = vmatpush3.bf16.msra.mxu1 %v8170_v58 }
 0xf42   :  { %7541 = vmatprep.subr.bf16.mxu1 %v8171_v52 }
 0xf45   :  { %7542 = vmatpush3.bf16.msra.mxu1 %v8172_v62 }
 0xf46   :  { %7543 = vmatprep.subr.bf16.mxu1 %v8173_v9 }
 0xf49   :  { %7544 = vmatpush3.bf16.msra.mxu1 %v8174_v14 }
 0xf4a   :  { %7545 = vmatprep.subr.bf16.mxu1 %v8175_v29 }
 0xf4d   :  { %7546 = vmatpush3.bf16.msra.mxu1 %v8176_v24 }
 0xf4e   :  { %7547 = vmatprep.subr.bf16.mxu1 %v8177_v5 }
 0xf51   :  { %7548 = vmatpush3.bf16.msra.mxu1 %v8178_v21 }
 0xf52   :  { %7549 = vmatprep.subr.bf16.mxu1 %v8179_v41 }
 0xf55   :  { %7550 = vmatpush3.bf16.msra.mxu1 %v8180_v32 }
 0xf56   :  { %7551 = vmatprep.subr.bf16.mxu1 %v8181_v19 }
 0xf59   :  { %7552 = vmatpush3.bf16.msra.mxu1 %v8182_v6 }
 0xf5a   :  { %7626 = vmatprep.subr.bf16.mxu1 %v8575_v39 }
 0xf5c   :  { %6976 = vmatmul.mubr.bf16.vlgmr.msra.gmra.mrb[40].mxu1 %v6477_v3 }
 0xf5d   :  { %7634 = vmatprep.mubr.msk.bf16.mxu1 %vm8576_vm13, %v8575_v39  ;;  %7627 = vmatpush3.bf16.msra.mxu1 %v8183_v56 }
 0xf5e   :  { %7628 = vmatprep.subr.bf16.mxu1 %v8575_v39 }
 0xf61   :  { %7629 = vmatpush3.bf16.msra.mxu1 %v8184_v44 }
 0xf62   :  { %7630 = vmatprep.subr.bf16.mxu1 %v8575_v39 }
 0xf65   :  { %7631 = vmatpush3.bf16.msra.mxu1 %v8185_v57 }
 0xf66   :  { %7632 = vmatprep.subr.bf16.mxu1 %v8575_v39 }
 0xf69   :  { %7633 = vmatpush3.bf16.msra.mxu1 %v8186_v36 }
 0xfcf   :  { %v6467_v45 = vpop.f32.mrb[28].mxu1 }
 0xfd0   :  { %v6468_v2 = vadd.f32 %v6467_v45, %v11567_v38  ;;  %v7624_v16 = vpop.f32.mrb[29].mxu1 }
 0xfd1   :  { %v6470_v34 = vpop.f32.mrb[30].mxu1 }
 0xfd2   :  { %v7625_v11 = vpop.f32.mrb[31].mxu1 }
 0xfef   :  { %v7509_v59 = vpop.f32.mrb[32].mxu1 }
 0xff0   :  { %v7510_v12 = vpop.f32.mrb[33].mxu1 }
 0xff1   :  { %v7511_v37 = vadd.f32 %v7510_v12, %v7509_v59  ;;  %v7512_v63 = vpop.f32.mrb[34].mxu1 }
 0xff2   :  { %v7513_v26 = vpop.f32.mrb[35].mxu1 }
0x100f   :  { %v7531_v7 = vpop.f32.mrb[36].mxu1 }
0x1010   :  { %v7532_v8 = vpop.f32.mrb[37].mxu1 }
0x1011   :  { %v7533_v42 = vadd.f32 %v7532_v8, %v7531_v7  ;;  %v7534_v4 = vpop.f32.mrb[38].mxu1 }
0x1012   :  { %v7535_v28 = vpop.f32.mrb[39].mxu1 }
0x1013   :  { %v6938_v43 = vadd.f32 %v7533_v42, %v7511_v37 }
0x102f   :  { %v7553_v48 = vpop.f32.mrb[40].mxu1 }
0x1030   :  { %v7554_v39 = vpop.f32.mrb[41].mxu1 }
0x1031   :  { %v7555_v51 = vadd.f32 %v7554_v39, %v7553_v48  ;;  %v7556_v10 = vpop.f32.mrb[42].mxu1 }
0x1032   :  { %v7557_v35 = vpop.f32.mrb[43].mxu1 }
0x1033   :  { %v6978_v38 = vadd.f32 %v7555_v51, %v6938_v43 }
0x1035   :  { %v6983_v27 = vadd.f32 %v6978_v38, %v6468_v2 }
0x1037   :  { %v6991_v22 = vadd.f32 %v7461_v15, %v6983_v27 }
0x1039   :  { %v6992_v49 = vpack.c.bf16 %v6991_v22, %v6991_v22 }
0x103b   :  { %7635 = vmatmul.mubr.msk.bf16.vlgmr.msra.gmra.mrb[44].mxu1 %vm4516_vm1, %v6992_v49 }
0x110e   :  { %v7069_v50 = vpop.f32.mrb[44].mxu1 }
0x110f   :  { %v7070_v25 = vadd.f32 %v7462_v20, %v7069_v50  ;;  %v7636_v23 = vpop.f32.mrb[45].mxu1 }
0x1110   :  { %v7072_v40 = vpop.f32.mrb[46].mxu1 }
0x1111   :  { %v7637_v53 = vpop.f32.mrb[47].mxu1  ;;  %v7076_v17 = vsel %vm7075_vm0, %v7070_v25, -inf }
0x1112   :  { %7077 = vmax.xlane.f32.xlu0 %v7076_v17 }
0x119f   :  { %v7078_v18 = vpop.xlane.xlu0 %7077 }
0x11a0   :  { %v7079_v54 = vsub.f32 %v7070_v25, %v7078_v18 }
0x11a2   :  { %v7080_v60 = vmul.f32 1.442695, %v7079_v54 }
0x11a4   :  { %8225 = vpow2.f32 %v7080_v60 }
0x11ae   :  { %v8226_v30 = vpop.eup %8225 }
0x11af   :  { %v7082_v61 = vsel %vm7075_vm0, %v8226_v30, 0.0 }
0x11b0   :  { %7083 = vadd.xlane.f32.xlu1 %v7082_v61 }
0x123d   :  { %v7084_v13 = vpop.xlane.xlu1 %7083 }
0x123e   :  { %8227 = vrcp.f32 %v7084_v13 }
0x1248   :  { %v8228_v0 = vpop.eup %8227 }
0x1249   :  { %v7086_v55 = vmul.f32 %v8228_v0, %v8226_v30 }
0x124b   :  { %7087 = vst.msk [vmem:[%s11773_s18] sm:$0xff] %vm7075_vm0, %v7086_v55 }
0x124c   :  { %7092 = vsyncpa [#allocation3], 1 }
0x124d   :  { %7093 = vsyncpa [#allocation5], 1 }
0x124e   :  { %7094 = vsyncpa [#allocation8], 1 }
0x124f   :  { %7095 = vsyncpa [#allocation11], 1 }
0x1250   :  { %7096 = vsyncpa [#allocation14], 1 }
0x1251   :  { %7097 = vsyncpa [#allocation17], 1 }
0x1252   :  { %7098 = vsyncpa [#allocation20], 1 }
0x1253   :  { %7099 = vsyncpa [#allocation23], 1 }

</bundles_post_ra>
